<compile_context>
chip_gen: v7x
topology: tpu7x:2x2x1
jax: 0.10.0
libtpu: 0.0.40
codegen_flags: <defaults>
</compile_context>

<pallas_src>
import jax
import jax.numpy as jnp
from jax.experimental import pallas as pl
from jax.experimental.pallas import tpu as pltpu

EPS = 1e-5
LANES = 128  # channel padding target (TPU lane width)


def _resblock_kernel(xpad_ref, w1_ref, w2_ref,
                     g1_ref, b1_ref, g2_ref, b2_ref,
                     out_ref, y1pad_ref):
    B, Hp, Wp, C = xpad_ref.shape          # C == LANES (padded channels)
    H, W = Hp - 2, Wp - 2
    rows = B * H * W
    inv_n = 1.0 / rows

    def conv3x3(src_ref, w_ref, want_center=False):
        # 3x3, stride 1; `src_ref` is already spatially zero-padded by 1.
        acc = None
        center = None
        for dy in range(3):
            for dx in range(3):
                patch = src_ref[:, dy:dy + H, dx:dx + W, :].reshape(rows, C)
                if want_center and dy == 1 and dx == 1:
                    center = patch          # == unpadded input, reuse as residual
                d = jnp.dot(patch, w_ref[dy, dx],
                            preferred_element_type=jnp.float32)
                acc = d if acc is None else acc + d
        if want_center:
            return acc, center
        return acc                          # (rows, C) f32

    def bn_relu(y, g, b):
        # Training-mode BN, single-pass stats (sum / sum-of-squares), fused ReLU.
        s1 = jnp.sum(y, axis=0, keepdims=True)
        s2 = jnp.sum(y * y, axis=0, keepdims=True)
        mean = s1 * inv_n
        var = s2 * inv_n - mean * mean
        scale = jax.lax.rsqrt(var + EPS) * g
        return jnp.maximum((y - mean) * scale + b, 0.0)

    # ---- conv1 -> BN1 -> ReLU --------------------------------------------
    y1_pre, res = conv3x3(xpad_ref, w1_ref, want_center=True)
    y1 = bn_relu(y1_pre, g1_ref[...], b1_ref[...])

    # Spatially pad y1 into the VMEM scratch: zero only the 1-pixel border,
    # then write the interior (kept in (rows, C) layout until here).
    zrow = jnp.zeros((B, 1, Wp, C), jnp.float32)
    zcol = jnp.zeros((B, H, 1, C), jnp.float32)
    y1pad_ref[:, 0:1, :, :] = zrow
    y1pad_ref[:, Hp - 1:Hp, :, :] = zrow
    y1pad_ref[:, 1:H + 1, 0:1, :] = zcol
    y1pad_ref[:, 1:H + 1, Wp - 1:Wp, :] = zcol
    y1pad_ref[:, 1:H + 1, 1:W + 1, :] = y1.reshape(B, H, W, C)

    # ---- conv2 -> BN2 -> ReLU -> + residual --------------------------------
    y2 = bn_relu(conv3x3(y1pad_ref, w2_ref), g2_ref[...], b2_ref[...])

    out_ref[...] = y2 + res                 # lane-dense (rows, 128) store


def residual_block(x_nchw, w1_hwio, w2_hwio, g1, b1, g2, b2):
    """x_nchw: (B, C, H, W) float32. Returns (B, C, H, W) float32."""
    x = jnp.transpose(x_nchw, (0, 2, 3, 1)).astype(jnp.float32)   # NHWC
    B, H, W, C = x.shape
    pc = LANES - C
    rows = B * H * W

    # Single padded input: spatial pad 1 (conv padding) + channel pad to 128
    # lanes.  Padded channels stay exactly 0 through conv/BN/ReLU/residual
    # (gamma padded with 1, beta with 0, weights with 0 -> y=0 -> relu(0)=0).
    x_pad = jnp.pad(x, ((0, 0), (1, 1), (1, 1), (0, pc)))

    def pad_w(w):  # HWIO (3,3,C,C) -> (3,3,128,128), zero-padded
        return jnp.pad(w.astype(jnp.float32),
                       ((0, 0), (0, 0), (0, pc), (0, pc)))

    def pad_v(v, fill):  # (C,) -> (1,128)
        return jnp.pad(v.astype(jnp.float32), (0, pc),
                       constant_values=fill).reshape(1, LANES)

    operands = (x_pad, pad_w(w1_hwio), pad_w(w2_hwio),
                pad_v(g1, 1.0), pad_v(b1, 0.0),
                pad_v(g2, 1.0), pad_v(b2, 0.0))

    def full_spec(shape):
        nd = len(shape)
        return pl.BlockSpec(shape, lambda i, _nd=nd: (0,) * _nd)

    out2d = pl.pallas_call(
        _resblock_kernel,
        out_shape=jax.ShapeDtypeStruct((rows, LANES), jnp.float32),
        grid=(1,),
        in_specs=[full_spec(op.shape) for op in operands],
        out_specs=full_spec((rows, LANES)),
        scratch_shapes=[pltpu.VMEM((B, H + 2, W + 2, LANES), jnp.float32)],
        compiler_params=pltpu.CompilerParams(
            dimension_semantics=("arbitrary",),
            vmem_limit_bytes=64 * 1024 * 1024),
    )(*operands)

    out_nhwc = out2d.reshape(B, H, W, LANES)[..., :C]
    return jnp.transpose(out_nhwc, (0, 3, 1, 2))                   # NCHW


def reference(x_nchw, w1_hwio, w2_hwio, g1, b1, g2, b2):
    """Pure-JAX reference with identical semantics."""
    def conv(x, w):
        return jax.lax.conv_general_dilated(
            x, w, window_strides=(1, 1), padding=((1, 1), (1, 1)),
            dimension_numbers=("NCHW", "HWIO", "NCHW"))

    def bn(y, g, b):
        mean = jnp.mean(y, axis=(0, 2, 3), keepdims=True)
        var = jnp.mean((y - mean) ** 2, axis=(0, 2, 3), keepdims=True)
        return ((y - mean) * jax.lax.rsqrt(var + EPS)
                * g.reshape(1, -1, 1, 1) + b.reshape(1, -1, 1, 1))

    y = jax.nn.relu(bn(conv(x_nchw, w1_hwio), g1, b1))
    y = jax.nn.relu(bn(conv(y, w2_hwio), g2, b2))
    return y + x_nchw


if __name__ == "__main__":
    B, C, H, W = 2, 4, 16, 16          # in_channels == out_channels, stride=1
    KH = KW = 3

    key = jax.random.PRNGKey(0)
    kx, kw1, kw2 = jax.random.split(key, 3)

    x = jax.random.normal(kx, (B, C, H, W), dtype=jnp.float32)
    # conv weights (HWIO layout); bias=False as in the module
    w1 = 0.1 * jax.random.normal(kw1, (KH, KW, C, C), dtype=jnp.float32)
    w2 = 0.1 * jax.random.normal(kw2, (KH, KW, C, C), dtype=jnp.float32)
    # BatchNorm2d default params: weight=1, bias=0
    g1 = jnp.ones((C,), jnp.float32)
    b1 = jnp.zeros((C,), jnp.float32)
    g2 = jnp.ones((C,), jnp.float32)
    b2 = jnp.zeros((C,), jnp.float32)

    out = jax.block_until_ready(residual_block(x, w1, w2, g1, b1, g2, b2))
    ref = jax.block_until_ready(reference(x, w1, w2, g1, b1, g2, b2))

    assert out.shape == (B, C, H, W)
    assert jnp.allclose(out, ref, atol=1e-2, rtol=1e-2), (
        f"max abs diff {jnp.max(jnp.abs(out - ref))}")

    print("KERNEL_OK")
</pallas_src>

<mosaic_0001>
module attributes {stable_mosaic.version = 11 : i64} {
  func.func @_resblock_kernel(%arg0: i32, %arg1: memref<2x18x18x128xf32, #tpu.memory_space<vmem>>, %arg2: memref<3x3x128x128xf32, #tpu.memory_space<vmem>>, %arg3: memref<3x3x128x128xf32, #tpu.memory_space<vmem>>, %arg4: memref<1x128xf32, #tpu.memory_space<vmem>>, %arg5: memref<1x128xf32, #tpu.memory_space<vmem>>, %arg6: memref<1x128xf32, #tpu.memory_space<vmem>>, %arg7: memref<1x128xf32, #tpu.memory_space<vmem>>, %arg8: memref<512x128xf32, #tpu.memory_space<vmem>>, %arg9: memref<2x18x18x128xf32, #tpu.memory_space<vmem>>) attributes {dimension_semantics = [#tpu.dimension_semantics<arbitrary>], iteration_bounds = array<i64: 1>, scalar_prefetch = 0 : i64, scratch_operands = 1 : i64, tpu.core_type = #tpu.core_type<tc>, window_params = [{pipeline_mode = #tpu.pipeline_mode<synchronous>, transform_indices = @transform_0, window_bounds = array<i64: 2, 18, 18, 128>}, {pipeline_mode = #tpu.pipeline_mode<synchronous>, transform_indices = @transform_1, window_bounds = array<i64: 3, 3, 128, 128>}, {pipeline_mode = #tpu.pipeline_mode<synchronous>, transform_indices = @transform_2, window_bounds = array<i64: 3, 3, 128, 128>}, {pipeline_mode = #tpu.pipeline_mode<synchronous>, transform_indices = @transform_3, window_bounds = array<i64: 1, 128>}, {pipeline_mode = #tpu.pipeline_mode<synchronous>, transform_indices = @transform_4, window_bounds = array<i64: 1, 128>}, {pipeline_mode = #tpu.pipeline_mode<synchronous>, transform_indices = @transform_5, window_bounds = array<i64: 1, 128>}, {pipeline_mode = #tpu.pipeline_mode<synchronous>, transform_indices = @transform_6, window_bounds = array<i64: 1, 128>}, {pipeline_mode = #tpu.pipeline_mode<synchronous>, transform_indices = @transform_7, window_bounds = array<i64: 512, 128>}]} {
    %c0 = arith.constant 0 : index
    %c0_0 = arith.constant 0 : index
    %c0_1 = arith.constant 0 : index
    %c0_2 = arith.constant 0 : index
    %0 = vector.load %arg1[%c0, %c0_0, %c0_1, %c0_2] : memref<2x18x18x128xf32, #tpu.memory_space<vmem>>, vector<2x16x16x128xf32>
    %1 = vector.shape_cast %0 : vector<2x16x16x128xf32> to vector<512x128xf32>
    %c0_3 = arith.constant 0 : index
    %c0_4 = arith.constant 0 : index
    %c0_5 = arith.constant 0 : index
    %c0_6 = arith.constant 0 : index
    %2 = vector.load %arg2[%c0_3, %c0_4, %c0_5, %c0_6] : memref<3x3x128x128xf32, #tpu.memory_space<vmem>>, vector<1x1x128x128xf32>
    %3 = vector.shape_cast %2 : vector<1x1x128x128xf32> to vector<128x128xf32>
    %cst = arith.constant dense<0.000000e+00> : vector<512x128xf32>
    %4 = tpu.matmul %1, %3, %cst {dimension_numbers = #tpu.dot_dimension_numbers<[1], [0], [0], [1], [0, 0, 1, 1], [], []>} : vector<512x128xf32>, vector<128x128xf32>, vector<512x128xf32> -> vector<512x128xf32>
    %c0_7 = arith.constant 0 : index
    %c0_8 = arith.constant 0 : index
    %c1 = arith.constant 1 : index
    %c0_9 = arith.constant 0 : index
    %5 = vector.load %arg1[%c0_7, %c0_8, %c1, %c0_9] : memref<2x18x18x128xf32, #tpu.memory_space<vmem>>, vector<2x16x16x128xf32>
    %6 = vector.shape_cast %5 : vector<2x16x16x128xf32> to vector<512x128xf32>
    %c0_10 = arith.constant 0 : index
    %c1_11 = arith.constant 1 : index
    %c0_12 = arith.constant 0 : index
    %c0_13 = arith.constant 0 : index
    %7 = vector.load %arg2[%c0_10, %c1_11, %c0_12, %c0_13] : memref<3x3x128x128xf32, #tpu.memory_space<vmem>>, vector<1x1x128x128xf32>
    %8 = vector.shape_cast %7 : vector<1x1x128x128xf32> to vector<128x128xf32>
    %cst_14 = arith.constant dense<0.000000e+00> : vector<512x128xf32>
    %9 = tpu.matmul %6, %8, %cst_14 {dimension_numbers = #tpu.dot_dimension_numbers<[1], [0], [0], [1], [0, 0, 1, 1], [], []>} : vector<512x128xf32>, vector<128x128xf32>, vector<512x128xf32> -> vector<512x128xf32>
    %10 = arith.addf %4, %9 : vector<512x128xf32>
    %c0_15 = arith.constant 0 : index
    %c0_16 = arith.constant 0 : index
    %c2 = arith.constant 2 : index
    %c0_17 = arith.constant 0 : index
    %11 = vector.load %arg1[%c0_15, %c0_16, %c2, %c0_17] : memref<2x18x18x128xf32, #tpu.memory_space<vmem>>, vector<2x16x16x128xf32>
    %12 = vector.shape_cast %11 : vector<2x16x16x128xf32> to vector<512x128xf32>
    %c0_18 = arith.constant 0 : index
    %c2_19 = arith.constant 2 : index
    %c0_20 = arith.constant 0 : index
    %c0_21 = arith.constant 0 : index
    %13 = vector.load %arg2[%c0_18, %c2_19, %c0_20, %c0_21] : memref<3x3x128x128xf32, #tpu.memory_space<vmem>>, vector<1x1x128x128xf32>
    %14 = vector.shape_cast %13 : vector<1x1x128x128xf32> to vector<128x128xf32>
    %cst_22 = arith.constant dense<0.000000e+00> : vector<512x128xf32>
    %15 = tpu.matmul %12, %14, %cst_22 {dimension_numbers = #tpu.dot_dimension_numbers<[1], [0], [0], [1], [0, 0, 1, 1], [], []>} : vector<512x128xf32>, vector<128x128xf32>, vector<512x128xf32> -> vector<512x128xf32>
    %16 = arith.addf %10, %15 : vector<512x128xf32>
    %c0_23 = arith.constant 0 : index
    %c1_24 = arith.constant 1 : index
    %c0_25 = arith.constant 0 : index
    %c0_26 = arith.constant 0 : index
    %17 = vector.load %arg1[%c0_23, %c1_24, %c0_25, %c0_26] : memref<2x18x18x128xf32, #tpu.memory_space<vmem>>, vector<2x16x16x128xf32>
    %18 = vector.shape_cast %17 : vector<2x16x16x128xf32> to vector<512x128xf32>
    %c1_27 = arith.constant 1 : index
    %c0_28 = arith.constant 0 : index
    %c0_29 = arith.constant 0 : index
    %c0_30 = arith.constant 0 : index
    %19 = vector.load %arg2[%c1_27, %c0_28, %c0_29, %c0_30] : memref<3x3x128x128xf32, #tpu.memory_space<vmem>>, vector<1x1x128x128xf32>
    %20 = vector.shape_cast %19 : vector<1x1x128x128xf32> to vector<128x128xf32>
    %cst_31 = arith.constant dense<0.000000e+00> : vector<512x128xf32>
    %21 = tpu.matmul %18, %20, %cst_31 {dimension_numbers = #tpu.dot_dimension_numbers<[1], [0], [0], [1], [0, 0, 1, 1], [], []>} : vector<512x128xf32>, vector<128x128xf32>, vector<512x128xf32> -> vector<512x128xf32>
    %22 = arith.addf %16, %21 : vector<512x128xf32>
    %c0_32 = arith.constant 0 : index
    %c1_33 = arith.constant 1 : index
    %c1_34 = arith.constant 1 : index
    %c0_35 = arith.constant 0 : index
    %23 = vector.load %arg1[%c0_32, %c1_33, %c1_34, %c0_35] : memref<2x18x18x128xf32, #tpu.memory_space<vmem>>, vector<2x16x16x128xf32>
    %24 = vector.shape_cast %23 : vector<2x16x16x128xf32> to vector<512x128xf32>
    %c1_36 = arith.constant 1 : index
    %c1_37 = arith.constant 1 : index
    %c0_38 = arith.constant 0 : index
    %c0_39 = arith.constant 0 : index
    %25 = vector.load %arg2[%c1_36, %c1_37, %c0_38, %c0_39] : memref<3x3x128x128xf32, #tpu.memory_space<vmem>>, vector<1x1x128x128xf32>
    %26 = vector.shape_cast %25 : vector<1x1x128x128xf32> to vector<128x128xf32>
    %cst_40 = arith.constant dense<0.000000e+00> : vector<512x128xf32>
    %27 = tpu.matmul %24, %26, %cst_40 {dimension_numbers = #tpu.dot_dimension_numbers<[1], [0], [0], [1], [0, 0, 1, 1], [], []>} : vector<512x128xf32>, vector<128x128xf32>, vector<512x128xf32> -> vector<512x128xf32>
    %28 = arith.addf %22, %27 : vector<512x128xf32>
    %c0_41 = arith.constant 0 : index
    %c1_42 = arith.constant 1 : index
    %c2_43 = arith.constant 2 : index
    %c0_44 = arith.constant 0 : index
    %29 = vector.load %arg1[%c0_41, %c1_42, %c2_43, %c0_44] : memref<2x18x18x128xf32, #tpu.memory_space<vmem>>, vector<2x16x16x128xf32>
    %30 = vector.shape_cast %29 : vector<2x16x16x128xf32> to vector<512x128xf32>
    %c1_45 = arith.constant 1 : index
    %c2_46 = arith.constant 2 : index
    %c0_47 = arith.constant 0 : index
    %c0_48 = arith.constant 0 : index
    %31 = vector.load %arg2[%c1_45, %c2_46, %c0_47, %c0_48] : memref<3x3x128x128xf32, #tpu.memory_space<vmem>>, vector<1x1x128x128xf32>
    %32 = vector.shape_cast %31 : vector<1x1x128x128xf32> to vector<128x128xf32>
    %cst_49 = arith.constant dense<0.000000e+00> : vector<512x128xf32>
    %33 = tpu.matmul %30, %32, %cst_49 {dimension_numbers = #tpu.dot_dimension_numbers<[1], [0], [0], [1], [0, 0, 1, 1], [], []>} : vector<512x128xf32>, vector<128x128xf32>, vector<512x128xf32> -> vector<512x128xf32>
    %34 = arith.addf %28, %33 : vector<512x128xf32>
    %c0_50 = arith.constant 0 : index
    %c2_51 = arith.constant 2 : index
    %c0_52 = arith.constant 0 : index
    %c0_53 = arith.constant 0 : index
    %35 = vector.load %arg1[%c0_50, %c2_51, %c0_52, %c0_53] : memref<2x18x18x128xf32, #tpu.memory_space<vmem>>, vector<2x16x16x128xf32>
    %36 = vector.shape_cast %35 : vector<2x16x16x128xf32> to vector<512x128xf32>
    %c2_54 = arith.constant 2 : index
    %c0_55 = arith.constant 0 : index
    %c0_56 = arith.constant 0 : index
    %c0_57 = arith.constant 0 : index
    %37 = vector.load %arg2[%c2_54, %c0_55, %c0_56, %c0_57] : memref<3x3x128x128xf32, #tpu.memory_space<vmem>>, vector<1x1x128x128xf32>
    %38 = vector.shape_cast %37 : vector<1x1x128x128xf32> to vector<128x128xf32>
    %cst_58 = arith.constant dense<0.000000e+00> : vector<512x128xf32>
    %39 = tpu.matmul %36, %38, %cst_58 {dimension_numbers = #tpu.dot_dimension_numbers<[1], [0], [0], [1], [0, 0, 1, 1], [], []>} : vector<512x128xf32>, vector<128x128xf32>, vector<512x128xf32> -> vector<512x128xf32>
    %40 = arith.addf %34, %39 : vector<512x128xf32>
    %c0_59 = arith.constant 0 : index
    %c2_60 = arith.constant 2 : index
    %c1_61 = arith.constant 1 : index
    %c0_62 = arith.constant 0 : index
    %41 = vector.load %arg1[%c0_59, %c2_60, %c1_61, %c0_62] : memref<2x18x18x128xf32, #tpu.memory_space<vmem>>, vector<2x16x16x128xf32>
    %42 = vector.shape_cast %41 : vector<2x16x16x128xf32> to vector<512x128xf32>
    %c2_63 = arith.constant 2 : index
    %c1_64 = arith.constant 1 : index
    %c0_65 = arith.constant 0 : index
    %c0_66 = arith.constant 0 : index
    %43 = vector.load %arg2[%c2_63, %c1_64, %c0_65, %c0_66] : memref<3x3x128x128xf32, #tpu.memory_space<vmem>>, vector<1x1x128x128xf32>
    %44 = vector.shape_cast %43 : vector<1x1x128x128xf32> to vector<128x128xf32>
    %cst_67 = arith.constant dense<0.000000e+00> : vector<512x128xf32>
    %45 = tpu.matmul %42, %44, %cst_67 {dimension_numbers = #tpu.dot_dimension_numbers<[1], [0], [0], [1], [0, 0, 1, 1], [], []>} : vector<512x128xf32>, vector<128x128xf32>, vector<512x128xf32> -> vector<512x128xf32>
    %46 = arith.addf %40, %45 : vector<512x128xf32>
    %c0_68 = arith.constant 0 : index
    %c2_69 = arith.constant 2 : index
    %c2_70 = arith.constant 2 : index
    %c0_71 = arith.constant 0 : index
    %47 = vector.load %arg1[%c0_68, %c2_69, %c2_70, %c0_71] : memref<2x18x18x128xf32, #tpu.memory_space<vmem>>, vector<2x16x16x128xf32>
    %48 = vector.shape_cast %47 : vector<2x16x16x128xf32> to vector<512x128xf32>
    %c2_72 = arith.constant 2 : index
    %c2_73 = arith.constant 2 : index
    %c0_74 = arith.constant 0 : index
    %c0_75 = arith.constant 0 : index
    %49 = vector.load %arg2[%c2_72, %c2_73, %c0_74, %c0_75] : memref<3x3x128x128xf32, #tpu.memory_space<vmem>>, vector<1x1x128x128xf32>
    %50 = vector.shape_cast %49 : vector<1x1x128x128xf32> to vector<128x128xf32>
    %cst_76 = arith.constant dense<0.000000e+00> : vector<512x128xf32>
    %51 = tpu.matmul %48, %50, %cst_76 {dimension_numbers = #tpu.dot_dimension_numbers<[1], [0], [0], [1], [0, 0, 1, 1], [], []>} : vector<512x128xf32>, vector<128x128xf32>, vector<512x128xf32> -> vector<512x128xf32>
    %52 = arith.addf %46, %51 : vector<512x128xf32>
    %c0_77 = arith.constant 0 : index
    %c0_78 = arith.constant 0 : index
    %53 = vector.load %arg4[%c0_77, %c0_78] : memref<1x128xf32, #tpu.memory_space<vmem>>, vector<1x128xf32>
    %c0_79 = arith.constant 0 : index
    %c0_80 = arith.constant 0 : index
    %54 = vector.load %arg5[%c0_79, %c0_80] : memref<1x128xf32, #tpu.memory_space<vmem>>, vector<1x128xf32>
    %cst_81 = arith.constant dense<0.000000e+00> : vector<128xf32>
    %55 = vector.multi_reduction <add>, %52, %cst_81 [0] : vector<512x128xf32> to vector<128xf32>
    %56 = vector.shape_cast %55 : vector<128xf32> to vector<1x128xf32>
    %57 = arith.mulf %52, %52 : vector<512x128xf32>
    %cst_82 = arith.constant dense<0.000000e+00> : vector<128xf32>
    %58 = vector.multi_reduction <add>, %57, %cst_82 [0] : vector<512x128xf32> to vector<128xf32>
    %59 = vector.shape_cast %58 : vector<128xf32> to vector<1x128xf32>
    %cst_83 = arith.constant 0.001953125 : f32
    %60 = vector.broadcast %cst_83 : f32 to vector<1x128xf32>
    %61 = arith.mulf %56, %60 : vector<1x128xf32>
    %cst_84 = arith.constant 0.001953125 : f32
    %62 = vector.broadcast %cst_84 : f32 to vector<1x128xf32>
    %63 = arith.mulf %59, %62 : vector<1x128xf32>
    %64 = arith.mulf %61, %61 : vector<1x128xf32>
    %65 = arith.subf %63, %64 : vector<1x128xf32>
    %cst_85 = arith.constant 9.99999974E-6 : f32
    %66 = vector.broadcast %cst_85 : f32 to vector<1x128xf32>
    %67 = arith.addf %65, %66 : vector<1x128xf32>
    %68 = math.rsqrt %67 : vector<1x128xf32>
    %69 = arith.mulf %68, %53 : vector<1x128xf32>
    %70 = vector.broadcast %61 : vector<1x128xf32> to vector<512x128xf32>
    %71 = arith.subf %52, %70 : vector<512x128xf32>
    %72 = vector.broadcast %69 : vector<1x128xf32> to vector<512x128xf32>
    %73 = arith.mulf %71, %72 : vector<512x128xf32>
    %74 = vector.broadcast %54 : vector<1x128xf32> to vector<512x128xf32>
    %75 = arith.addf %73, %74 : vector<512x128xf32>
    %cst_86 = arith.constant 0.000000e+00 : f32
    %76 = vector.broadcast %cst_86 : f32 to vector<512x128xf32>
    %77 = arith.maximumf %75, %76 : vector<512x128xf32>
    %cst_87 = arith.constant 0.000000e+00 : f32
    %78 = vector.broadcast %cst_87 : f32 to vector<2x1x18x128xf32>
    %cst_88 = arith.constant 0.000000e+00 : f32
    %79 = vector.broadcast %cst_88 : f32 to vector<2x16x1x128xf32>
    %c0_89 = arith.constant 0 : index
    %c0_90 = arith.constant 0 : index
    %c0_91 = arith.constant 0 : index
    %c0_92 = arith.constant 0 : index
    %80 = vector.load %arg9[%c0_89, %c0_90, %c0_91, %c0_92] : memref<2x18x18x128xf32, #tpu.memory_space<vmem>>, vector<2x1x18x128xf32>
    tpu.vector_store %arg9[%c0_89, %c0_90, %c0_91, %c0_92], %78 {strides = array<i32>} : memref<2x18x18x128xf32, #tpu.memory_space<vmem>>, vector<2x1x18x128xf32>,
    %c0_93 = arith.constant 0 : index
    %c17 = arith.constant 17 : index
    %c0_94 = arith.constant 0 : index
    %c0_95 = arith.constant 0 : index
    %81 = vector.load %arg9[%c0_93, %c17, %c0_94, %c0_95] : memref<2x18x18x128xf32, #tpu.memory_space<vmem>>, vector<2x1x18x128xf32>
    tpu.vector_store %arg9[%c0_93, %c17, %c0_94, %c0_95], %78 {strides = array<i32>} : memref<2x18x18x128xf32, #tpu.memory_space<vmem>>, vector<2x1x18x128xf32>,
    %c0_96 = arith.constant 0 : index
    %c1_97 = arith.constant 1 : index
    %c0_98 = arith.constant 0 : index
    %c0_99 = arith.constant 0 : index
    %82 = vector.load %arg9[%c0_96, %c1_97, %c0_98, %c0_99] : memref<2x18x18x128xf32, #tpu.memory_space<vmem>>, vector<2x16x1x128xf32>
    tpu.vector_store %arg9[%c0_96, %c1_97, %c0_98, %c0_99], %79 {strides = array<i32>} : memref<2x18x18x128xf32, #tpu.memory_space<vmem>>, vector<2x16x1x128xf32>,
    %c0_100 = arith.constant 0 : index
    %c1_101 = arith.constant 1 : index
    %c17_102 = arith.constant 17 : index
    %c0_103 = arith.constant 0 : index
    %83 = vector.load %arg9[%c0_100, %c1_101, %c17_102, %c0_103] : memref<2x18x18x128xf32, #tpu.memory_space<vmem>>, vector<2x16x1x128xf32>
    tpu.vector_store %arg9[%c0_100, %c1_101, %c17_102, %c0_103], %79 {strides = array<i32>} : memref<2x18x18x128xf32, #tpu.memory_space<vmem>>, vector<2x16x1x128xf32>,
    %84 = vector.shape_cast %77 : vector<512x128xf32> to vector<2x16x16x128xf32>
    %c0_104 = arith.constant 0 : index
    %c1_105 = arith.constant 1 : index
    %c1_106 = arith.constant 1 : index
    %c0_107 = arith.constant 0 : index
    %85 = vector.load %arg9[%c0_104, %c1_105, %c1_106, %c0_107] : memref<2x18x18x128xf32, #tpu.memory_space<vmem>>, vector<2x16x16x128xf32>
    tpu.vector_store %arg9[%c0_104, %c1_105, %c1_106, %c0_107], %84 {strides = array<i32>} : memref<2x18x18x128xf32, #tpu.memory_space<vmem>>, vector<2x16x16x128xf32>,
    %c0_108 = arith.constant 0 : index
    %c0_109 = arith.constant 0 : index
    %c0_110 = arith.constant 0 : index
    %c0_111 = arith.constant 0 : index
    %86 = vector.load %arg9[%c0_108, %c0_109, %c0_110, %c0_111] : memref<2x18x18x128xf32, #tpu.memory_space<vmem>>, vector<2x16x16x128xf32>
    %87 = vector.shape_cast %86 : vector<2x16x16x128xf32> to vector<512x128xf32>
    %c0_112 = arith.constant 0 : index
    %c0_113 = arith.constant 0 : index
    %c0_114 = arith.constant 0 : index
    %c0_115 = arith.constant 0 : index
    %88 = vector.load %arg3[%c0_112, %c0_113, %c0_114, %c0_115] : memref<3x3x128x128xf32, #tpu.memory_space<vmem>>, vector<1x1x128x128xf32>
    %89 = vector.shape_cast %88 : vector<1x1x128x128xf32> to vector<128x128xf32>
    %cst_116 = arith.constant dense<0.000000e+00> : vector<512x128xf32>
    %90 = tpu.matmul %87, %89, %cst_116 {dimension_numbers = #tpu.dot_dimension_numbers<[1], [0], [0], [1], [0, 0, 1, 1], [], []>} : vector<512x128xf32>, vector<128x128xf32>, vector<512x128xf32> -> vector<512x128xf32>
    %c0_117 = arith.constant 0 : index
    %c0_118 = arith.constant 0 : index
    %c1_119 = arith.constant 1 : index
    %c0_120 = arith.constant 0 : index
    %91 = vector.load %arg9[%c0_117, %c0_118, %c1_119, %c0_120] : memref<2x18x18x128xf32, #tpu.memory_space<vmem>>, vector<2x16x16x128xf32>
    %92 = vector.shape_cast %91 : vector<2x16x16x128xf32> to vector<512x128xf32>
    %c0_121 = arith.constant 0 : index
    %c1_122 = arith.constant 1 : index
    %c0_123 = arith.constant 0 : index
    %c0_124 = arith.constant 0 : index
    %93 = vector.load %arg3[%c0_121, %c1_122, %c0_123, %c0_124] : memref<3x3x128x128xf32, #tpu.memory_space<vmem>>, vector<1x1x128x128xf32>
    %94 = vector.shape_cast %93 : vector<1x1x128x128xf32> to vector<128x128xf32>
    %cst_125 = arith.constant dense<0.000000e+00> : vector<512x128xf32>
    %95 = tpu.matmul %92, %94, %cst_125 {dimension_numbers = #tpu.dot_dimension_numbers<[1], [0], [0], [1], [0, 0, 1, 1], [], []>} : vector<512x128xf32>, vector<128x128xf32>, vector<512x128xf32> -> vector<512x128xf32>
    %96 = arith.addf %90, %95 : vector<512x128xf32>
    %c0_126 = arith.constant 0 : index
    %c0_127 = arith.constant 0 : index
    %c2_128 = arith.constant 2 : index
    %c0_129 = arith.constant 0 : index
    %97 = vector.load %arg9[%c0_126, %c0_127, %c2_128, %c0_129] : memref<2x18x18x128xf32, #tpu.memory_space<vmem>>, vector<2x16x16x128xf32>
    %98 = vector.shape_cast %97 : vector<2x16x16x128xf32> to vector<512x128xf32>
    %c0_130 = arith.constant 0 : index
    %c2_131 = arith.constant 2 : index
    %c0_132 = arith.constant 0 : index
    %c0_133 = arith.constant 0 : index
    %99 = vector.load %arg3[%c0_130, %c2_131, %c0_132, %c0_133] : memref<3x3x128x128xf32, #tpu.memory_space<vmem>>, vector<1x1x128x128xf32>
    %100 = vector.shape_cast %99 : vector<1x1x128x128xf32> to vector<128x128xf32>
    %cst_134 = arith.constant dense<0.000000e+00> : vector<512x128xf32>
    %101 = tpu.matmul %98, %100, %cst_134 {dimension_numbers = #tpu.dot_dimension_numbers<[1], [0], [0], [1], [0, 0, 1, 1], [], []>} : vector<512x128xf32>, vector<128x128xf32>, vector<512x128xf32> -> vector<512x128xf32>
    %102 = arith.addf %96, %101 : vector<512x128xf32>
    %c0_135 = arith.constant 0 : index
    %c1_136 = arith.constant 1 : index
    %c0_137 = arith.constant 0 : index
    %c0_138 = arith.constant 0 : index
    %103 = vector.load %arg9[%c0_135, %c1_136, %c0_137, %c0_138] : memref<2x18x18x128xf32, #tpu.memory_space<vmem>>, vector<2x16x16x128xf32>
    %104 = vector.shape_cast %103 : vector<2x16x16x128xf32> to vector<512x128xf32>
    %c1_139 = arith.constant 1 : index
    %c0_140 = arith.constant 0 : index
    %c0_141 = arith.constant 0 : index
    %c0_142 = arith.constant 0 : index
    %105 = vector.load %arg3[%c1_139, %c0_140, %c0_141, %c0_142] : memref<3x3x128x128xf32, #tpu.memory_space<vmem>>, vector<1x1x128x128xf32>
    %106 = vector.shape_cast %105 : vector<1x1x128x128xf32> to vector<128x128xf32>
    %cst_143 = arith.constant dense<0.000000e+00> : vector<512x128xf32>
    %107 = tpu.matmul %104, %106, %cst_143 {dimension_numbers = #tpu.dot_dimension_numbers<[1], [0], [0], [1], [0, 0, 1, 1], [], []>} : vector<512x128xf32>, vector<128x128xf32>, vector<512x128xf32> -> vector<512x128xf32>
    %108 = arith.addf %102, %107 : vector<512x128xf32>
    %c0_144 = arith.constant 0 : index
    %c1_145 = arith.constant 1 : index
    %c1_146 = arith.constant 1 : index
    %c0_147 = arith.constant 0 : index
    %109 = vector.load %arg9[%c0_144, %c1_145, %c1_146, %c0_147] : memref<2x18x18x128xf32, #tpu.memory_space<vmem>>, vector<2x16x16x128xf32>
    %110 = vector.shape_cast %109 : vector<2x16x16x128xf32> to vector<512x128xf32>
    %c1_148 = arith.constant 1 : index
    %c1_149 = arith.constant 1 : index
    %c0_150 = arith.constant 0 : index
    %c0_151 = arith.constant 0 : index
    %111 = vector.load %arg3[%c1_148, %c1_149, %c0_150, %c0_151] : memref<3x3x128x128xf32, #tpu.memory_space<vmem>>, vector<1x1x128x128xf32>
    %112 = vector.shape_cast %111 : vector<1x1x128x128xf32> to vector<128x128xf32>
    %cst_152 = arith.constant dense<0.000000e+00> : vector<512x128xf32>
    %113 = tpu.matmul %110, %112, %cst_152 {dimension_numbers = #tpu.dot_dimension_numbers<[1], [0], [0], [1], [0, 0, 1, 1], [], []>} : vector<512x128xf32>, vector<128x128xf32>, vector<512x128xf32> -> vector<512x128xf32>
    %114 = arith.addf %108, %113 : vector<512x128xf32>
    %c0_153 = arith.constant 0 : index
    %c1_154 = arith.constant 1 : index
    %c2_155 = arith.constant 2 : index
    %c0_156 = arith.constant 0 : index
    %115 = vector.load %arg9[%c0_153, %c1_154, %c2_155, %c0_156] : memref<2x18x18x128xf32, #tpu.memory_space<vmem>>, vector<2x16x16x128xf32>
    %116 = vector.shape_cast %115 : vector<2x16x16x128xf32> to vector<512x128xf32>
    %c1_157 = arith.constant 1 : index
    %c2_158 = arith.constant 2 : index
    %c0_159 = arith.constant 0 : index
    %c0_160 = arith.constant 0 : index
    %117 = vector.load %arg3[%c1_157, %c2_158, %c0_159, %c0_160] : memref<3x3x128x128xf32, #tpu.memory_space<vmem>>, vector<1x1x128x128xf32>
    %118 = vector.shape_cast %117 : vector<1x1x128x128xf32> to vector<128x128xf32>
    %cst_161 = arith.constant dense<0.000000e+00> : vector<512x128xf32>
    %119 = tpu.matmul %116, %118, %cst_161 {dimension_numbers = #tpu.dot_dimension_numbers<[1], [0], [0], [1], [0, 0, 1, 1], [], []>} : vector<512x128xf32>, vector<128x128xf32>, vector<512x128xf32> -> vector<512x128xf32>
    %120 = arith.addf %114, %119 : vector<512x128xf32>
    %c0_162 = arith.constant 0 : index
    %c2_163 = arith.constant 2 : index
    %c0_164 = arith.constant 0 : index
    %c0_165 = arith.constant 0 : index
    %121 = vector.load %arg9[%c0_162, %c2_163, %c0_164, %c0_165] : memref<2x18x18x128xf32, #tpu.memory_space<vmem>>, vector<2x16x16x128xf32>
    %122 = vector.shape_cast %121 : vector<2x16x16x128xf32> to vector<512x128xf32>
    %c2_166 = arith.constant 2 : index
    %c0_167 = arith.constant 0 : index
    %c0_168 = arith.constant 0 : index
    %c0_169 = arith.constant 0 : index
    %123 = vector.load %arg3[%c2_166, %c0_167, %c0_168, %c0_169] : memref<3x3x128x128xf32, #tpu.memory_space<vmem>>, vector<1x1x128x128xf32>
    %124 = vector.shape_cast %123 : vector<1x1x128x128xf32> to vector<128x128xf32>
    %cst_170 = arith.constant dense<0.000000e+00> : vector<512x128xf32>
    %125 = tpu.matmul %122, %124, %cst_170 {dimension_numbers = #tpu.dot_dimension_numbers<[1], [0], [0], [1], [0, 0, 1, 1], [], []>} : vector<512x128xf32>, vector<128x128xf32>, vector<512x128xf32> -> vector<512x128xf32>
    %126 = arith.addf %120, %125 : vector<512x128xf32>
    %c0_171 = arith.constant 0 : index
    %c2_172 = arith.constant 2 : index
    %c1_173 = arith.constant 1 : index
    %c0_174 = arith.constant 0 : index
    %127 = vector.load %arg9[%c0_171, %c2_172, %c1_173, %c0_174] : memref<2x18x18x128xf32, #tpu.memory_space<vmem>>, vector<2x16x16x128xf32>
    %128 = vector.shape_cast %127 : vector<2x16x16x128xf32> to vector<512x128xf32>
    %c2_175 = arith.constant 2 : index
    %c1_176 = arith.constant 1 : index
    %c0_177 = arith.constant 0 : index
    %c0_178 = arith.constant 0 : index
    %129 = vector.load %arg3[%c2_175, %c1_176, %c0_177, %c0_178] : memref<3x3x128x128xf32, #tpu.memory_space<vmem>>, vector<1x1x128x128xf32>
    %130 = vector.shape_cast %129 : vector<1x1x128x128xf32> to vector<128x128xf32>
    %cst_179 = arith.constant dense<0.000000e+00> : vector<512x128xf32>
    %131 = tpu.matmul %128, %130, %cst_179 {dimension_numbers = #tpu.dot_dimension_numbers<[1], [0], [0], [1], [0, 0, 1, 1], [], []>} : vector<512x128xf32>, vector<128x128xf32>, vector<512x128xf32> -> vector<512x128xf32>
    %132 = arith.addf %126, %131 : vector<512x128xf32>
    %c0_180 = arith.constant 0 : index
    %c2_181 = arith.constant 2 : index
    %c2_182 = arith.constant 2 : index
    %c0_183 = arith.constant 0 : index
    %133 = vector.load %arg9[%c0_180, %c2_181, %c2_182, %c0_183] : memref<2x18x18x128xf32, #tpu.memory_space<vmem>>, vector<2x16x16x128xf32>
    %134 = vector.shape_cast %133 : vector<2x16x16x128xf32> to vector<512x128xf32>
    %c2_184 = arith.constant 2 : index
    %c2_185 = arith.constant 2 : index
    %c0_186 = arith.constant 0 : index
    %c0_187 = arith.constant 0 : index
    %135 = vector.load %arg3[%c2_184, %c2_185, %c0_186, %c0_187] : memref<3x3x128x128xf32, #tpu.memory_space<vmem>>, vector<1x1x128x128xf32>
    %136 = vector.shape_cast %135 : vector<1x1x128x128xf32> to vector<128x128xf32>
    %cst_188 = arith.constant dense<0.000000e+00> : vector<512x128xf32>
    %137 = tpu.matmul %134, %136, %cst_188 {dimension_numbers = #tpu.dot_dimension_numbers<[1], [0], [0], [1], [0, 0, 1, 1], [], []>} : vector<512x128xf32>, vector<128x128xf32>, vector<512x128xf32> -> vector<512x128xf32>
    %138 = arith.addf %132, %137 : vector<512x128xf32>
    %c0_189 = arith.constant 0 : index
    %c0_190 = arith.constant 0 : index
    %139 = vector.load %arg6[%c0_189, %c0_190] : memref<1x128xf32, #tpu.memory_space<vmem>>, vector<1x128xf32>
    %c0_191 = arith.constant 0 : index
    %c0_192 = arith.constant 0 : index
    %140 = vector.load %arg7[%c0_191, %c0_192] : memref<1x128xf32, #tpu.memory_space<vmem>>, vector<1x128xf32>
    %cst_193 = arith.constant dense<0.000000e+00> : vector<128xf32>
    %141 = vector.multi_reduction <add>, %138, %cst_193 [0] : vector<512x128xf32> to vector<128xf32>
    %142 = vector.shape_cast %141 : vector<128xf32> to vector<1x128xf32>
    %143 = arith.mulf %138, %138 : vector<512x128xf32>
    %cst_194 = arith.constant dense<0.000000e+00> : vector<128xf32>
    %144 = vector.multi_reduction <add>, %143, %cst_194 [0] : vector<512x128xf32> to vector<128xf32>
    %145 = vector.shape_cast %144 : vector<128xf32> to vector<1x128xf32>
    %cst_195 = arith.constant 0.001953125 : f32
    %146 = vector.broadcast %cst_195 : f32 to vector<1x128xf32>
    %147 = arith.mulf %142, %146 : vector<1x128xf32>
    %cst_196 = arith.constant 0.001953125 : f32
    %148 = vector.broadcast %cst_196 : f32 to vector<1x128xf32>
    %149 = arith.mulf %145, %148 : vector<1x128xf32>
    %150 = arith.mulf %147, %147 : vector<1x128xf32>
    %151 = arith.subf %149, %150 : vector<1x128xf32>
    %cst_197 = arith.constant 9.99999974E-6 : f32
    %152 = vector.broadcast %cst_197 : f32 to vector<1x128xf32>
    %153 = arith.addf %151, %152 : vector<1x128xf32>
    %154 = math.rsqrt %153 : vector<1x128xf32>
    %155 = arith.mulf %154, %139 : vector<1x128xf32>
    %156 = vector.broadcast %147 : vector<1x128xf32> to vector<512x128xf32>
    %157 = arith.subf %138, %156 : vector<512x128xf32>
    %158 = vector.broadcast %155 : vector<1x128xf32> to vector<512x128xf32>
    %159 = arith.mulf %157, %158 : vector<512x128xf32>
    %160 = vector.broadcast %140 : vector<1x128xf32> to vector<512x128xf32>
    %161 = arith.addf %159, %160 : vector<512x128xf32>
    %cst_198 = arith.constant 0.000000e+00 : f32
    %162 = vector.broadcast %cst_198 : f32 to vector<512x128xf32>
    %163 = arith.maximumf %161, %162 : vector<512x128xf32>
    %164 = arith.addf %163, %24 : vector<512x128xf32>
    %c0_199 = arith.constant 0 : index
    %c0_200 = arith.constant 0 : index
    %165 = vector.load %arg8[%c0_199, %c0_200] : memref<512x128xf32, #tpu.memory_space<vmem>>, vector<512x128xf32>
    tpu.vector_store %arg8[%c0_199, %c0_200], %164 {strides = array<i32>} : memref<512x128xf32, #tpu.memory_space<vmem>>, vector<512x128xf32>,
    return
  }
  func.func @transform_0(%arg0: i32) -> (i32, i32, i32, i32) {
    %c0_i32 = arith.constant 0 : i32
    %c0_i32_0 = arith.constant 0 : i32
    %c0_i32_1 = arith.constant 0 : i32
    %c0_i32_2 = arith.constant 0 : i32
    %c0_i32_3 = arith.constant 0 : i32
    return %c0_i32, %c0_i32_0, %c0_i32_1, %c0_i32_2 : i32, i32, i32, i32
  }
  func.func @transform_1(%arg0: i32) -> (i32, i32, i32, i32) {
    %c0_i32 = arith.constant 0 : i32
    %c0_i32_0 = arith.constant 0 : i32
    %c0_i32_1 = arith.constant 0 : i32
    %c0_i32_2 = arith.constant 0 : i32
    %c0_i32_3 = arith.constant 0 : i32
    return %c0_i32, %c0_i32_0, %c0_i32_1, %c0_i32_2 : i32, i32, i32, i32
  }
  func.func @transform_2(%arg0: i32) -> (i32, i32, i32, i32) {
    %c0_i32 = arith.constant 0 : i32
    %c0_i32_0 = arith.constant 0 : i32
    %c0_i32_1 = arith.constant 0 : i32
    %c0_i32_2 = arith.constant 0 : i32
    %c0_i32_3 = arith.constant 0 : i32
    return %c0_i32, %c0_i32_0, %c0_i32_1, %c0_i32_2 : i32, i32, i32, i32
  }
  func.func @transform_3(%arg0: i32) -> (i32, i32) {
    %c0_i32 = arith.constant 0 : i32
    %c0_i32_0 = arith.constant 0 : i32
    %c0_i32_1 = arith.constant 0 : i32
    return %c0_i32, %c0_i32_0 : i32, i32
  }
  func.func @transform_4(%arg0: i32) -> (i32, i32) {
    %c0_i32 = arith.constant 0 : i32
    %c0_i32_0 = arith.constant 0 : i32
    %c0_i32_1 = arith.constant 0 : i32
    return %c0_i32, %c0_i32_0 : i32, i32
  }
  func.func @transform_5(%arg0: i32) -> (i32, i32) {
    %c0_i32 = arith.constant 0 : i32
    %c0_i32_0 = arith.constant 0 : i32
    %c0_i32_1 = arith.constant 0 : i32
    return %c0_i32, %c0_i32_0 : i32, i32
  }
  func.func @transform_6(%arg0: i32) -> (i32, i32) {
    %c0_i32 = arith.constant 0 : i32
    %c0_i32_0 = arith.constant 0 : i32
    %c0_i32_1 = arith.constant 0 : i32
    return %c0_i32, %c0_i32_0 : i32, i32
  }
  func.func @transform_7(%arg0: i32) -> (i32, i32) {
    %c0_i32 = arith.constant 0 : i32
    %c0_i32_0 = arith.constant 0 : i32
    %c0_i32_1 = arith.constant 0 : i32
    return %c0_i32, %c0_i32_0 : i32, i32
  }
}

</mosaic_0001>

<bundles_post_ra>
// kernel: tpu_custom_call.1
= control target key start
LH: loop header
LB: loop body
LE: loop exit
PB: predicated region body
PF: predicated region fallthrough
CT: control target
= control target key end

     0   :  { %12 = vsyncpa [#allocation4], 0  ;;  %s20755_s0 = inlined_call_operand.hbm [shape: f32[2,18,18,128], index: 0, kind: input, shape index: {}]   ;;  %s20756_s1 = inlined_call_operand.hbm [shape: f32[3,3,128,128], index: 1, kind: input, shape index: {}]   ;;  %s20757_s2 = inlined_call_operand.hbm [shape: f32[3,3,128,128], index: 2, kind: input, shape index: {}]   ;;  %s20758_s3 = inlined_call_operand.hbm [shape: f32[1,128], index: 3, kind: input, shape index: {}]   ;;  %s20759_s4 = inlined_call_operand.hbm [shape: f32[1,128], index: 4, kind: input, shape index: {}]   ;;  %s20760_s5 = inlined_call_operand.hbm [shape: f32[1,128], index: 5, kind: input, shape index: {}]   ;;  %s20761_s6 = inlined_call_operand.hbm [shape: f32[1,128], index: 6, kind: input, shape index: {}]   ;;  %s20762_s7 = inlined_call_operand.hbm [shape: f32[512,128], index: 7, kind: output, shape index: {}]  }
   0x1   :  { %13 = vsyncpa [#allocation7], 0 }
   0x2   :  { %14 = vsyncpa [#allocation10], 0 }
   0x3   :  { %15 = vsyncpa [#allocation13], 0 }
   0x4   :  { %16 = vsyncpa [#allocation5], 0  ;;  %s16256_s24 = smov [#allocation6]   ;;  %s16257_s26 = smov [#allocation9]  }
   0x5   :  { %s34_s25 = sshll.u32 %s16256_s24, 4  ;;  %s59_s27 = sshll.u32 %s16257_s26, 4  ;;  %s35_s25 = int_to_ptr.vmem [resolvable:$true] %s34_s25  ;;  %s16307_s27 = int_to_ptr.vmem [resolvable:$true] %s59_s27 }
   0x6   :  { %s16070_s30 = scalar_lea.hbm %s20756_s1, 18432 }
   0x7   :  { %p16071_p0 = scmp.ne.s32.totalorder %s20756_s1, %s16070_s30  ;;  %p16074_p1 = scmp.lt.u32.totalorder %s16070_s30, %s20756_s1 }
   0x9   :  { %p16076_p2 = pnand %p16074_p1, %p16071_p0 }
   0xb   :  { %16079 = shalt.err (!%p16076_p2)
}
   0xc   :  { %s16080_s12 = scalar_lea.vmem %s35_s25, 18432  ;;  %p16085_p4 = scmp.lt.s32.totalorder %s35_s25, %s35_s25 }
   0xd   :  { %p16081_p3 = scmp.ne.s32.totalorder %s35_s25, %s16080_s12  ;;  %p16086_p5 = scmp.lt.s32.totalorder %s16080_s12, %s16080_s12 }
   0xf   :  { %p16087_p6 = por %p16086_p5, %p16085_p4 }
  0x11   :  { %p16088_p7 = pnand %p16087_p6, %p16081_p3 }
  0x13   :  { %16091 = shalt.err (!%p16088_p7)
}
  0x14   :  { %s16258_s13 = smov 128   ;;  %s16259_s14 = smov 8  }
  0x15   :  { %40 = dma.hbm_to_vmem [thread:$0]  %s20756_s1, 18432, %s35_s25, [#allocation7], %s16258_s13, %s16258_s13, %s16259_s14  }
  0x16   :  { %s16092_s19 = scalar_lea.hbm %s20758_s3, 16 }
  0x17   :  { %p16093_p8 = scmp.ne.s32.totalorder %s20758_s3, %s16092_s19  ;;  %p16096_p9 = scmp.lt.u32.totalorder %s16092_s19, %s20758_s3 }
  0x19   :  { %p16098_p10 = pnand %p16096_p9, %p16093_p8 }
  0x1b   :  { %16101 = shalt.err (!%p16098_p10)
}
  0x1c   :  { %s16102_s24 = scalar_lea.vmem %s16307_s27, 16  ;;  %s16106_s1 = scalar_lea.vmem %s16307_s27, 32 }
  0x1d   :  { %p16103_p11 = scmp.ne.s32.totalorder %s16307_s27, %s16102_s24  ;;  %p16107_p12 = scmp.lt.s32.totalorder %s16307_s27, %s16307_s27 }
  0x1e   :  { %p16108_p13 = scmp.lt.s32.totalorder %s16106_s1, %s16102_s24 }
  0x20   :  { %p16109_p0 = por %p16108_p13, %p16107_p12 }
  0x22   :  { %p16110_p1 = pnand %p16109_p0, %p16103_p11 }
  0x24   :  { %16113 = shalt.err (!%p16110_p1)
}
  0x25   :  { %62 = dma.hbm_to_vmem [thread:$0]  %s20758_s3, 16, %s16307_s27, [#allocation10]  }
  0x26   :  { %s16260_s28 = smov [#allocation12]   ;;  %s16261_s30 = smov [#allocation3]  }
  0x27   :  { %s79_s29 = sshll.u32 %s16260_s28, 4  ;;  %s22_s8 = sshll.u32 %s16261_s30, 4  ;;  %s80_s29 = int_to_ptr.vmem [resolvable:$true] %s79_s29  ;;  %s16342_s8 = int_to_ptr.vmem [resolvable:$true] %s22_s8 }
  0x28   :  { %s16114_s11 = scalar_lea.hbm %s20760_s5, 16 }
  0x29   :  { %p16115_p2 = scmp.ne.s32.totalorder %s20760_s5, %s16114_s11  ;;  %p16118_p3 = scmp.lt.u32.totalorder %s16114_s11, %s20760_s5 }
  0x2b   :  { %p16120_p4 = pnand %p16118_p3, %p16115_p2 }
  0x2d   :  { %16123 = shalt.err (!%p16120_p4)
}
  0x2e   :  { %s16124_s3 = scalar_lea.vmem %s80_s29, 16  ;;  %s16128_s27 = scalar_lea.vmem %s80_s29, 32 }
  0x2f   :  { %p16125_p5 = scmp.ne.s32.totalorder %s80_s29, %s16124_s3  ;;  %p16129_p6 = scmp.lt.s32.totalorder %s80_s29, %s80_s29 }
  0x30   :  { %p16130_p7 = scmp.lt.s32.totalorder %s16128_s27, %s16124_s3 }
  0x32   :  { %p16131_p8 = por %p16130_p7, %p16129_p6 }
  0x34   :  { %p16132_p9 = pnand %p16131_p8, %p16125_p5 }
  0x36   :  { %16135 = shalt.err (!%p16132_p9)
}
  0x37   :  { %82 = dma.hbm_to_vmem [thread:$0]  %s20760_s5, 16, %s80_s29, [#allocation13]  }
  0x38   :  { %s16136_s22 = scalar_lea.hbm %s20755_s0, 13824 }
  0x39   :  { %p16137_p10 = scmp.ne.s32.totalorder %s20755_s0, %s16136_s22  ;;  %p16140_p11 = scmp.lt.u32.totalorder %s16136_s22, %s20755_s0 }
  0x3b   :  { %p16142_p12 = pnand %p16140_p11, %p16137_p10 }
  0x3d   :  { %16145 = shalt.err (!%p16142_p12)
}
  0x3e   :  { %s16146_s26 = scalar_lea.vmem %s16342_s8, 13824  ;;  %p16151_p0 = scmp.lt.s32.totalorder %s16342_s8, %s16342_s8 }
  0x3f   :  { %p16147_p13 = scmp.ne.s32.totalorder %s16342_s8, %s16146_s26  ;;  %p16152_p1 = scmp.lt.s32.totalorder %s16146_s26, %s16146_s26 }
  0x41   :  { %p16153_p2 = por %p16152_p1, %p16151_p0 }
  0x43   :  { %p16154_p3 = pnand %p16153_p2, %p16147_p13 }
  0x45   :  { %16157 = shalt.err (!%p16154_p3)
}
  0x46   :  { %28 = dma.hbm_to_vmem [thread:$0]  %s20755_s0, 13824, %s16342_s8, [#allocation4], %s16258_s13, %s16258_s13, %s16259_s14  }
  0x47   :  { %s16262_s29 = smov [#allocation8]   ;;  %s16263_s9 = smov [#allocation11]  }
  0x48   :  { %s46_s30 = sshll.u32 %s16262_s29, 4  ;;  %s69_s10 = sshll.u32 %s16263_s9, 4  ;;  %s47_s30 = int_to_ptr.vmem [resolvable:$true] %s46_s30  ;;  %s70_s10 = int_to_ptr.vmem [resolvable:$true] %s69_s10 }
  0x49   :  { %s16158_s15 = scalar_lea.hbm %s20757_s2, 18432 }
  0x4a   :  { %p16159_p4 = scmp.ne.s32.totalorder %s20757_s2, %s16158_s15  ;;  %p16162_p5 = scmp.lt.u32.totalorder %s16158_s15, %s20757_s2 }
  0x4c   :  { %p16164_p6 = pnand %p16162_p5, %p16159_p4 }
  0x4e   :  { %16167 = shalt.err (!%p16164_p6)
}
  0x4f   :  { %s16168_s0 = scalar_lea.vmem %s47_s30, 18432  ;;  %p16173_p8 = scmp.lt.s32.totalorder %s47_s30, %s47_s30 }
  0x50   :  { %p16169_p7 = scmp.ne.s32.totalorder %s47_s30, %s16168_s0  ;;  %p16174_p9 = scmp.lt.s32.totalorder %s16168_s0, %s16168_s0 }
  0x52   :  { %p16175_p10 = por %p16174_p9, %p16173_p8 }
  0x54   :  { %p16176_p11 = pnand %p16175_p10, %p16169_p7 }
  0x56   :  { %16179 = shalt.err (!%p16176_p11)
}
  0x57   :  { %52 = dma.hbm_to_vmem [thread:$0]  %s20757_s2, 18432, %s47_s30, [#allocation7], %s16258_s13, %s16258_s13, %s16259_s14  }
  0x58   :  { %s16180_s21 = scalar_lea.hbm %s20759_s4, 16 }
  0x59   :  { %p16181_p12 = scmp.ne.s32.totalorder %s20759_s4, %s16180_s21  ;;  %p16184_p13 = scmp.lt.u32.totalorder %s16180_s21, %s20759_s4 }
  0x5b   :  { %p16186_p0 = pnand %p16184_p13, %p16181_p12 }
  0x5d   :  { %16189 = shalt.err (!%p16186_p0)
}
  0x5e   :  { %s16190_s25 = scalar_lea.vmem %s70_s10, 16  ;;  %s16194_s26 = scalar_lea.vmem %s70_s10, 32 }
  0x5f   :  { %p16191_p1 = scmp.ne.s32.totalorder %s70_s10, %s16190_s25  ;;  %p16195_p2 = scmp.lt.s32.totalorder %s70_s10, %s70_s10 }
  0x60   :  { %p16196_p3 = scmp.lt.s32.totalorder %s16194_s26, %s16190_s25 }
  0x62   :  { %p16197_p4 = por %p16196_p3, %p16195_p2 }
  0x64   :  { %p16198_p5 = pnand %p16197_p4, %p16191_p1 }
  0x66   :  { %16201 = shalt.err (!%p16198_p5)
}
  0x67   :  { %72 = dma.hbm_to_vmem [thread:$0]  %s20759_s4, 16, %s70_s10, [#allocation10]  }
  0x68   :  { %s16264_s28 = smov [#allocation14]   ;;  %s16202_s11 = scalar_lea.hbm %s20761_s6, 16 }
  0x69   :  { %s89_s29 = sshll.u32 %s16264_s28, 4  ;;  %p16203_p6 = scmp.ne.s32.totalorder %s20761_s6, %s16202_s11  ;;  %s90_s29 = int_to_ptr.vmem [resolvable:$true] %s89_s29 }
  0x6a   :  { %p16206_p7 = scmp.lt.u32.totalorder %s16202_s11, %s20761_s6 }
  0x6c   :  { %p16208_p8 = pnand %p16206_p7, %p16203_p6 }
  0x6e   :  { %16211 = shalt.err (!%p16208_p8)
}
  0x6f   :  { %s16212_s3 = scalar_lea.vmem %s90_s29, 16  ;;  %s16216_s4 = scalar_lea.vmem %s90_s29, 32 }
  0x70   :  { %p16213_p9 = scmp.ne.s32.totalorder %s90_s29, %s16212_s3  ;;  %p16217_p10 = scmp.lt.s32.totalorder %s90_s29, %s90_s29 }
  0x71   :  { %p16218_p11 = scmp.lt.s32.totalorder %s16216_s4, %s16212_s3 }
  0x73   :  { %p16219_p12 = por %p16218_p11, %p16217_p10 }
  0x75   :  { %p16220_p13 = pnand %p16219_p12, %p16213_p9 }
  0x77   :  { %16223 = shalt.err (!%p16220_p13)
}
  0x78   :  { %92 = dma.hbm_to_vmem [thread:$0]  %s20761_s6, 16, %s90_s29, [#allocation13]  }
  0x79   :  { %16246 = dma.done.wait [#allocation4], 13824  }
  0x7a   :  { %16247 = vsyncadd [#allocation4], 4294953472 }
  0x7b   :  { %16248 = dma.done.wait [#allocation7], 36864  }
  0x7c   :  { %16249 = vsyncadd [#allocation7], 4294930432 }
  0x7d   :  { %16250 = dma.done.wait [#allocation10], 32  }
  0x7e   :  { %16251 = vsyncadd [#allocation10], 4294967264 }
  0x7f   :  { %16252 = dma.done.wait [#allocation13], 32  }
  0x80   :  { %16253 = vsyncadd [#allocation13], 4294967264  ;;  %v259_v0 = vld [vmem:[#allocation6 + $0x80] sm:$0xff]  ;;  %v260_v1 = vld [vmem:[#allocation6 + $0x88] sm:$0xff]  ;;  %s16266_s6 = smov [#allocation15]  }
  0x81   :  { %v261_v2 = vld [vmem:[#allocation6 + $0x90] sm:$0xff]  ;;  %v14389_v3 = vpack.c.bf16 %v260_v1, %v259_v0  ;;  %v262_v4 = vld [vmem:[#allocation6 + $0x98] sm:$0xff]  ;;  %v263_v6 = vld [vmem:[#allocation6 + $0xa0] sm:$0xff]  ;;  %s20713_s0 = sshll.u32 %s16266_s6, 4  ;;  %s10629_s0 = int_to_ptr.vmem [resolvable:$true] %s20713_s0 }
  0x82   :  { %v14393_v5 = vpack.c.bf16 %v262_v4, %v261_v2  ;;  %v264_v7 = vld [vmem:[#allocation6 + $0xa8] sm:$0xff]  ;;  %v265_v10 = vld [vmem:[#allocation6 + $0xb0] sm:$0xff]  ;;  %v266_v11 = vld [vmem:[#allocation6 + $0xb8] sm:$0xff]  ;;  %s16224_s8 = scalar_lea.vmem %s10629_s0, 8192  ;;  %p16229_p1 = scmp.lt.s32.totalorder %s10629_s0, %s10629_s0 }
  0x83   :  { %14390 = vmatprep.subr.bf16.mxu0 %v14389_v3  ;;  %v14397_v8 = vpack.c.bf16 %v264_v7, %v263_v6  ;;  %v194_v9 = vld [vmem:[#allocation3 + $0x1] sm:$0xff]  ;;  %v14401_v12 = vpack.c.bf16 %v266_v11, %v265_v10  ;;  %v269_v16 = vld [vmem:[#allocation6 + $0xd0] sm:$0xff]  ;;  %v270_v17 = vld [vmem:[#allocation6 + $0xd8] sm:$0xff]  ;;  %p16225_p0 = scmp.ne.s32.totalorder %s10629_s0, %s16224_s8  ;;  %p16230_p2 = scmp.lt.s32.totalorder %s16224_s8, %s16224_s8 }
  0x84   :  { %14392 = vmatpush3.bf16.msra.mxu0 %v14389_v3  ;;  %12117 = vmatprep.mubr.f32.mxu0 %v194_v9  ;;  %v267_v13 = vld [vmem:[#allocation6 + $0xc0] sm:$0xff]  ;;  %v268_v14 = vld [vmem:[#allocation6 + $0xc8] sm:$0xff]  ;;  %v14409_v18 = vpack.c.bf16 %v270_v17, %v269_v16  ;;  %v273_v22 = vld [vmem:[#allocation6 + $0xf0] sm:$0xff] }
  0x85   :  { %14394 = vmatprep.subr.bf16.mxu0 %v14393_v5  ;;  %v14405_v15 = vpack.c.bf16 %v268_v14, %v267_v13  ;;  %v271_v19 = vld [vmem:[#allocation6 + $0xe0] sm:$0xff]  ;;  %v272_v20 = vld [vmem:[#allocation6 + $0xe8] sm:$0xff]  ;;  %v274_v23 = vld [vmem:[#allocation6 + $0xf8] sm:$0xff]  ;;  %p16231_p3 = por %p16230_p2, %p16229_p1 }
  0x86   :  { %v14413_v21 = vpack.c.bf16 %v272_v20, %v271_v19  ;;  %v14417_v24 = vpack.c.bf16 %v274_v23, %v273_v22  ;;  %v178_v25 = vld [vmem:[#allocation6] sm:$0xff]  ;;  %v179_v26 = vld [vmem:[#allocation6 + $0x8] sm:$0xff]  ;;  %v180_v28 = vld [vmem:[#allocation6 + $0x10] sm:$0xff] }
  0x87   :  { %v14421_v27 = vpack.c.bf16 %v179_v26, %v178_v25  ;;  %v181_v29 = vld [vmem:[#allocation6 + $0x18] sm:$0xff]  ;;  %v195_v30 = vld [vmem:[#allocation3 + $0x9] sm:$0xff]  ;;  %v182_v33 = vld [vmem:[#allocation6 + $0x20] sm:$0xff]  ;;  %p16232_p4 = pnand %p16231_p3, %p16225_p0 }
  0x88   :  { %14396 = vmatpush3.bf16.msra.mxu0 %v14393_v5  ;;  %v196_v31 = vld [vmem:[#allocation3 + $0x19] sm:$0xff]  ;;  %v14425_v32 = vpack.c.bf16 %v181_v29, %v180_v28  ;;  %v183_v34 = vld [vmem:[#allocation6 + $0x28] sm:$0xff]  ;;  %v198_v36 = vld [vmem:[#allocation3 + $0x31] sm:$0xff] }
  0x89   :  { %14398 = vmatprep.subr.bf16.mxu0 %v14397_v8  ;;  %v197_v35 = vld [vmem:[#allocation3 + $0x21] sm:$0xff]  ;;  %v14429_v37 = vpack.c.bf16 %v183_v34, %v182_v33  ;;  %v184_v38 = vld [vmem:[#allocation6 + $0x30] sm:$0xff]  ;;  %v185_v39 = vld [vmem:[#allocation6 + $0x38] sm:$0xff] }
  0x8a   :  { %v199_v40 = vld [vmem:[#allocation3 + $0x39] sm:$0xff]  ;;  %v200_v41 = vld [vmem:[#allocation3 + $0x49] sm:$0xff]  ;;  %v14433_v42 = vpack.c.bf16 %v185_v39, %v184_v38  ;;  %v201_v45 = vld [vmem:[#allocation3 + $0x51] sm:$0xff] }
  0x8b   :  { %v186_v43 = vld [vmem:[#allocation6 + $0x40] sm:$0xff]  ;;  %v187_v44 = vld [vmem:[#allocation6 + $0x48] sm:$0xff]  ;;  %v188_v48 = vld [vmem:[#allocation6 + $0x50] sm:$0xff] }
  0x8c   :  { %14400 = vmatpush3.bf16.msra.mxu0 %v14397_v8  ;;  %v202_v46 = vld [vmem:[#allocation3 + $0x61] sm:$0xff]  ;;  %v14437_v47 = vpack.c.bf16 %v187_v44, %v186_v43  ;;  %v189_v49 = vld [vmem:[#allocation6 + $0x58] sm:$0xff]  ;;  %v203_v50 = vld [vmem:[#allocation3 + $0x69] sm:$0xff] }
  0x8d   :  { %14402 = vmatprep.subr.bf16.mxu0 %v14401_v12  ;;  %v204_v51 = vld [vmem:[#allocation3 + $0x79] sm:$0xff]  ;;  %v14441_v52 = vpack.c.bf16 %v189_v49, %v188_v48  ;;  %v191_v54 = vld [vmem:[#allocation6 + $0x68] sm:$0xff]  ;;  %v206_v56 = vld [vmem:[#allocation3 + $0x91] sm:$0xff] }
  0x8e   :  { %v190_v53 = vld [vmem:[#allocation6 + $0x60] sm:$0xff]  ;;  %v192_v58 = vld [vmem:[#allocation6 + $0x70] sm:$0xff]  ;;  %v193_v59 = vld [vmem:[#allocation6 + $0x78] sm:$0xff] }
  0x8f   :  { %v205_v55 = vld [vmem:[#allocation3 + $0x81] sm:$0xff]  ;;  %v14445_v57 = vpack.c.bf16 %v191_v54, %v190_v53  ;;  %v207_v60 = vld [vmem:[#allocation3 + $0x99] sm:$0xff]  ;;  %v208_v61 = vld [vmem:[#allocation3 + $0xa9] sm:$0xff]  ;;  %v14449_v62 = vpack.c.bf16 %v193_v59, %v192_v58 }
  0x90   :  { %14404 = vmatpush3.bf16.msra.mxu0 %v14401_v12  ;;  %v1110_v63 = vld [vmem:[#allocation6 + $0x100] sm:$0xff]  ;;  %v1111_v0 = vld [vmem:[#allocation6 + $0x108] sm:$0xff]  ;;  %v209_v1 = vld [vmem:[#allocation3 + $0xb1] sm:$0xff] }
  0x91   :  { %14406 = vmatprep.subr.bf16.mxu0 %v14405_v15  ;;  %v210_v2 = vld [vmem:[#allocation3 + $0xc1] sm:$0xff]  ;;  %v16415_v3 = vpack.c.bf16 %v1111_v0, %v1110_v63  ;;  %v211_v4 = vld [vmem:[#allocation3 + $0xc9] sm:$0xff]  ;;  %v212_v5 = vld [vmem:[#allocation3 + $0xd9] sm:$0xff] }
  0x92   :  { %v213_v6 = vld [vmem:[#allocation3 + $0xe1] sm:$0xff]  ;;  %v214_v7 = vld [vmem:[#allocation3 + $0xf1] sm:$0xff]  ;;  %v215_v8 = vld [vmem:[#allocation3 + $0xf9] sm:$0xff] }
  0x93   :  { %v216_v9 = vld [vmem:[#allocation3 + $0x109] sm:$0xff]  ;;  %v217_v10 = vld [vmem:[#allocation3 + $0x111] sm:$0xff]  ;;  %v218_v11 = vld [vmem:[#allocation3 + $0x121] sm:$0xff] }
  0x94   :  { %14408 = vmatpush3.bf16.msra.mxu0 %v14405_v15  ;;  %v219_v12 = vld [vmem:[#allocation3 + $0x129] sm:$0xff]  ;;  %v220_v13 = vld [vmem:[#allocation3 + $0x139] sm:$0xff]  ;;  %v221_v14 = vld [vmem:[#allocation3 + $0x141] sm:$0xff] }
  0x95   :  { %14410 = vmatprep.subr.bf16.mxu0 %v14409_v18  ;;  %v222_v15 = vld [vmem:[#allocation3 + $0x151] sm:$0xff]  ;;  %v223_v16 = vld [vmem:[#allocation3 + $0x159] sm:$0xff]  ;;  %v224_v17 = vld [vmem:[#allocation3 + $0x169] sm:$0xff] }
  0x96   :  { %v226_v19 = vld [vmem:[#allocation3 + $0x1b1] sm:$0xff]  ;;  %v227_v20 = vld [vmem:[#allocation3 + $0x1b9] sm:$0xff]  ;;  %v230_v23 = vld [vmem:[#allocation3 + $0x1e1] sm:$0xff] }
  0x97   :  { %v229_v22 = vld [vmem:[#allocation3 + $0x1d1] sm:$0xff]  ;;  %v232_v25 = vld [vmem:[#allocation3 + $0x1f9] sm:$0xff]  ;;  %v233_v26 = vld [vmem:[#allocation3 + $0x201] sm:$0xff] }
  0x98   :  { %14412 = vmatpush3.bf16.msra.mxu0 %v14409_v18  ;;  %v225_v18 = vld [vmem:[#allocation3 + $0x171] sm:$0xff]  ;;  %v235_v28 = vld [vmem:[#allocation3 + $0x219] sm:$0xff]  ;;  %v236_v29 = vld [vmem:[#allocation3 + $0x229] sm:$0xff] }
  0x99   :  { %14414 = vmatprep.subr.bf16.mxu0 %v14413_v21  ;;  %v240_v33 = vld [vmem:[#allocation3 + $0x259] sm:$0xff]  ;;  %v241_v34 = vld [vmem:[#allocation3 + $0x261] sm:$0xff]  ;;  %v245_v38 = vld [vmem:[#allocation3 + $0x291] sm:$0xff] }
  0x9a   :  { %v246_v39 = vld [vmem:[#allocation3 + $0x2a1] sm:$0xff]  ;;  %v250_v43 = vld [vmem:[#allocation3 + $0x2d1] sm:$0xff]  ;;  %v251_v44 = vld [vmem:[#allocation3 + $0x2d9] sm:$0xff] }
  0x9b   :  { %v255_v48 = vld [vmem:[#allocation3 + $0x309] sm:$0xff]  ;;  %v256_v49 = vld [vmem:[#allocation3 + $0x319] sm:$0xff] }
  0x9c   :  { %14416 = vmatpush3.bf16.msra.mxu0 %v14413_v21  ;;  %v228_v21 = vld [vmem:[#allocation3 + $0x1c9] sm:$0xff]  ;;  %v1113_v53 = vld [vmem:[#allocation6 + $0x118] sm:$0xff]  ;;  %v16422_v59 = vld [vmem:[#allocation3 + $0x20] sm:$0xff] }
  0x9d   :  { %14418 = vmatprep.subr.bf16.mxu0 %v14417_v24  ;;  %v115_v54 = vld [vmem:[#allocation3 + $0x8] sm:$0xff]  ;;  %v1117_v63 = vld [vmem:[#allocation6 + $0x138] sm:$0xff] }
  0x9e   :  { %v1115_v58 = vld [vmem:[#allocation6 + $0x128] sm:$0xff]  ;;  %v16428_v0 = vld [vmem:[#allocation3 + $0x38] sm:$0xff] }
  0xa0   :  { %14420 = vmatpush3.bf16.msra.mxu0 %v14417_v24  ;;  %v231_v24 = vld [vmem:[#allocation3 + $0x1e9] sm:$0xff] }
  0xa1   :  { %14422 = vmatprep.subr.bf16.mxu0 %v14421_v27 }
  0xa3   :  { %12118 = vmatmul.mubr.f32.vlgmr.msra.gmra.mrb[0].mxu0 %v195_v30  ;;  %v237_v30 = vld [vmem:[#allocation3 + $0x231] sm:$0xff] }
  0xa4   :  { %14424 = vmatpush3.bf16.msra.mxu0 %v14421_v27  ;;  %12120 = vmatprep.mubr.f32.mxu0 %v196_v31  ;;  %v234_v27 = vld [vmem:[#allocation3 + $0x211] sm:$0xff]  ;;  %v238_v31 = vld [vmem:[#allocation3 + $0x241] sm:$0xff] }
  0xa5   :  { %14426 = vmatprep.subr.bf16.mxu0 %v14425_v32 }
  0xa7   :  { %12121 = vmatmul.mubr.f32.gmra.mrb[2].mxu0 %v197_v35  ;;  %v242_v35 = vld [vmem:[#allocation3 + $0x271] sm:$0xff] }
  0xa8   :  { %12123 = vmatprep.mubr.f32.mxu0 %v198_v36  ;;  %14428 = vmatpush3.bf16.msra.mxu0 %v14425_v32  ;;  %v239_v32 = vld [vmem:[#allocation3 + $0x249] sm:$0xff]  ;;  %v243_v36 = vld [vmem:[#allocation3 + $0x279] sm:$0xff] }
  0xa9   :  { %14430 = vmatprep.subr.bf16.mxu0 %v14429_v37 }
  0xab   :  { %12124 = vmatmul.mubr.f32.gmra.mrb[4].mxu0 %v199_v40  ;;  %v247_v40 = vld [vmem:[#allocation3 + $0x2a9] sm:$0xff] }
  0xac   :  { %12126 = vmatprep.mubr.f32.mxu0 %v200_v41  ;;  %14432 = vmatpush3.bf16.msra.mxu0 %v14429_v37  ;;  %v244_v37 = vld [vmem:[#allocation3 + $0x289] sm:$0xff]  ;;  %v248_v41 = vld [vmem:[#allocation3 + $0x2b9] sm:$0xff] }
  0xad   :  { %14434 = vmatprep.subr.bf16.mxu0 %v14433_v42 }
  0xaf   :  { %12127 = vmatmul.mubr.f32.gmra.mrb[6].mxu0 %v201_v45  ;;  %v252_v45 = vld [vmem:[#allocation3 + $0x2e9] sm:$0xff] }
  0xb0   :  { %12129 = vmatprep.mubr.f32.mxu0 %v202_v46  ;;  %14436 = vmatpush3.bf16.msra.mxu0 %v14433_v42  ;;  %v249_v42 = vld [vmem:[#allocation3 + $0x2c1] sm:$0xff]  ;;  %v253_v46 = vld [vmem:[#allocation3 + $0x2f1] sm:$0xff] }
  0xb1   :  { %14438 = vmatprep.subr.bf16.mxu0 %v14437_v47 }
  0xb3   :  { %12130 = vmatmul.mubr.f32.gmra.mrb[8].mxu0 %v203_v50  ;;  %v257_v50 = vld [vmem:[#allocation3 + $0x321] sm:$0xff] }
  0xb4   :  { %12132 = vmatprep.mubr.f32.mxu0 %v204_v51  ;;  %14440 = vmatpush3.bf16.msra.mxu0 %v14437_v47  ;;  %v254_v47 = vld [vmem:[#allocation3 + $0x301] sm:$0xff] }
  0xb5   :  { %14442 = vmatprep.subr.bf16.mxu0 %v14441_v52  ;;  %v114_v51 = vld [vmem:[#allocation3] sm:$0xff] }
  0xb7   :  { %12133 = vmatmul.mubr.f32.gmra.mrb[10].mxu0 %v205_v55  ;;  %v16418_v55 = vld [vmem:[#allocation3 + $0x18] sm:$0xff] }
  0xb8   :  { %12135 = vmatprep.mubr.f32.mxu0 %v206_v56  ;;  %14444 = vmatpush3.bf16.msra.mxu0 %v14441_v52  ;;  %v1112_v52 = vld [vmem:[#allocation6 + $0x110] sm:$0xff] }
  0xb9   :  { %14446 = vmatprep.subr.bf16.mxu0 %v14445_v57  ;;  %v14457_v56 = vpack.c.bf16 %v1113_v53, %v1112_v52  ;;  %v16533_v52 = vld [vmem:[#allocation3 + $0x218] sm:$0xff]  ;;  %v16535_v53 = vld [vmem:[#allocation3 + $0x228] sm:$0xff] }
  0xbb   :  { %12136 = vmatmul.mubr.f32.gmra.mrb[12].mxu0 %v207_v60  ;;  %v16424_v60 = vld [vmem:[#allocation3 + $0x30] sm:$0xff] }
  0xbc   :  { %12138 = vmatprep.mubr.f32.mxu0 %v208_v61  ;;  %14448 = vmatpush3.bf16.msra.mxu0 %v14445_v57  ;;  %v1114_v57 = vld [vmem:[#allocation6 + $0x120] sm:$0xff] }
  0xbd   :  { %14450 = vmatprep.subr.bf16.mxu0 %v14449_v62  ;;  %v14461_v61 = vpack.c.bf16 %v1115_v58, %v1114_v57  ;;  %v16545_v57 = vld [vmem:[#allocation3 + $0x248] sm:$0xff]  ;;  %v16547_v58 = vld [vmem:[#allocation3 + $0x258] sm:$0xff] }
  0xbf   :  { %12139 = vmatmul.mubr.f32.gmra.mrb[14].mxu0 %v209_v1  ;;  %v16430_v1 = vld [vmem:[#allocation3 + $0x48] sm:$0xff] }
  0xc0   :  { %12141 = vmatprep.mubr.f32.mxu0 %v210_v2  ;;  %14452 = vmatpush3.bf16.msra.mxu0 %v14449_v62  ;;  %v1116_v62 = vld [vmem:[#allocation6 + $0x130] sm:$0xff] }
  0xc1   :  { %14454 = vmatprep.subr.bf16.mxu0 %v16415_v3  ;;  %v14465_v2 = vpack.c.bf16 %v1117_v63, %v1116_v62  ;;  %v16553_v62 = vld [vmem:[#allocation3 + $0x270] sm:$0xff]  ;;  %v16557_v63 = vld [vmem:[#allocation3 + $0x278] sm:$0xff] }
  0xc3   :  { %12142 = vmatmul.mubr.f32.gmra.mrb[16].mxu0 %v211_v4  ;;  %v1119_v4 = vld [vmem:[#allocation6 + $0x148] sm:$0xff] }
  0xc4   :  { %12144 = vmatprep.mubr.f32.mxu0 %v212_v5  ;;  %v16434_v5 = vld [vmem:[#allocation3 + $0x50] sm:$0xff] }
  0xc7   :  { %12145 = vmatmul.mubr.f32.gmra.mrb[18].mxu0 %v213_v6  ;;  %v16436_v6 = vld [vmem:[#allocation3 + $0x60] sm:$0xff] }
  0xc8   :  { %12147 = vmatprep.mubr.f32.mxu0 %v214_v7 }
  0xcb   :  { %12148 = vmatmul.mubr.f32.gmra.mrb[20].mxu0 %v215_v8  ;;  %v1120_v8 = vld [vmem:[#allocation6 + $0x150] sm:$0xff] }
  0xcc   :  { %12150 = vmatprep.mubr.f32.mxu0 %v216_v9  ;;  %v1121_v9 = vld [vmem:[#allocation6 + $0x158] sm:$0xff] }
  0xcf   :  { %12151 = vmatmul.mubr.f32.gmra.mrb[22].mxu0 %v217_v10  ;;  %v16440_v10 = vld [vmem:[#allocation3 + $0x68] sm:$0xff] }
  0xd0   :  { %12153 = vmatprep.mubr.f32.mxu0 %v218_v11  ;;  %v16442_v11 = vld [vmem:[#allocation3 + $0x78] sm:$0xff] }
  0xd3   :  { %12154 = vmatmul.mubr.f32.gmra.mrb[24].mxu0 %v219_v12  ;;  %v14473_v12 = vpack.c.bf16 %v1121_v9, %v1120_v8  ;;  %v16571_v8 = vld [vmem:[#allocation3 + $0x2b8] sm:$0xff]  ;;  %v16575_v9 = vld [vmem:[#allocation3 + $0x2c0] sm:$0xff] }
  0xd4   :  { %12156 = vmatprep.mubr.f32.mxu0 %v220_v13  ;;  %v1122_v13 = vld [vmem:[#allocation6 + $0x160] sm:$0xff]  ;;  %21087 = vst [vmem:[#allocation21_spill] sm:$0xff] %v16571_v8  ;;  %21088 = vst [vmem:[#allocation22_spill] sm:$0xff] %v16575_v9 }
  0xd7   :  { %12157 = vmatmul.mubr.f32.gmra.mrb[26].mxu0 %v221_v14  ;;  %v1123_v14 = vld [vmem:[#allocation6 + $0x168] sm:$0xff] }
  0xd8   :  { %12159 = vmatprep.mubr.f32.mxu0 %v222_v15  ;;  %v16446_v15 = vld [vmem:[#allocation3 + $0x80] sm:$0xff] }
  0xdb   :  { %12160 = vmatmul.mubr.f32.gmra.mrb[28].mxu0 %v223_v16  ;;  %v16448_v16 = vld [vmem:[#allocation3 + $0x90] sm:$0xff] }
  0xdc   :  { %12162 = vmatprep.mubr.f32.mxu0 %v224_v17  ;;  %v14477_v17 = vpack.c.bf16 %v1123_v14, %v1122_v13  ;;  %v16581_v13 = vld [vmem:[#allocation3 + $0x2d8] sm:$0xff]  ;;  %v16583_v14 = vld [vmem:[#allocation3 + $0x2e8] sm:$0xff] }
  0xdd   :  { %21090 = vst [vmem:[#allocation24_spill] sm:$0xff] %v16581_v13  ;;  %21091 = vst [vmem:[#allocation25_spill] sm:$0xff] %v16583_v14 }
  0xdf   :  { %12163 = vmatmul.mubr.f32.gmra.mrb[30].mxu0 %v225_v18  ;;  %v1124_v18 = vld [vmem:[#allocation6 + $0x170] sm:$0xff] }
  0xe0   :  { %12165 = vmatprep.mubr.f32.mxu0 %v226_v19  ;;  %v1125_v19 = vld [vmem:[#allocation6 + $0x178] sm:$0xff] }
  0xe3   :  { %12166 = vmatmul.mubr.f32.gmra.mrb[32].mxu0 %v227_v20  ;;  %v16452_v20 = vld [vmem:[#allocation3 + $0x98] sm:$0xff] }
  0xe4   :  { %12168 = vmatprep.mubr.f32.mxu0 %v228_v21  ;;  %v16454_v21 = vld [vmem:[#allocation3 + $0xa8] sm:$0xff] }
  0xe7   :  { %12169 = vmatmul.mubr.f32.gmra.mrb[34].mxu0 %v229_v22  ;;  %v14481_v22 = vpack.c.bf16 %v1125_v19, %v1124_v18  ;;  %v16589_v18 = vld [vmem:[#allocation3 + $0x300] sm:$0xff]  ;;  %v16593_v19 = vld [vmem:[#allocation3 + $0x308] sm:$0xff] }
  0xe8   :  { %12171 = vmatprep.mubr.f32.mxu0 %v230_v23  ;;  %v1641_v23 = vld [vmem:[#allocation6 + $0x180] sm:$0xff]  ;;  %21093 = vst [vmem:[#allocation27_spill] sm:$0xff] %v16589_v18  ;;  %21094 = vst [vmem:[#allocation28_spill] sm:$0xff] %v16593_v19 }
  0xeb   :  { %12172 = vmatmul.mubr.f32.gmra.mrb[36].mxu0 %v231_v24  ;;  %v1642_v24 = vld [vmem:[#allocation6 + $0x188] sm:$0xff] }
  0xec   :  { %12174 = vmatprep.mubr.f32.mxu0 %v232_v25  ;;  %v16458_v25 = vld [vmem:[#allocation3 + $0xb0] sm:$0xff] }
  0xef   :  { %12175 = vmatmul.mubr.f32.gmra.mrb[38].mxu0 %v233_v26  ;;  %v16460_v26 = vld [vmem:[#allocation3 + $0xc0] sm:$0xff] }
  0xf0   :  { %12177 = vmatprep.mubr.f32.mxu0 %v234_v27  ;;  %v16462_v27 = vpack.c.bf16 %v1642_v24, %v1641_v23  ;;  %v16599_v23 = vld [vmem:[#allocation3 + $0x320] sm:$0xff] }
  0xf1   :  { %21096 = vst [vmem:[#allocation30_spill] sm:$0xff] %v16599_v23  ;;  %v1045_v24 = vld [vmem:[#allocation3 + $0x2] sm:$0xff] }
  0xf3   :  { %12178 = vmatmul.mubr.f32.gmra.mrb[40].mxu0 %v235_v28  ;;  %v16466_v28 = vld [vmem:[#allocation3 + $0xc8] sm:$0xff] }
  0xf4   :  { %12180 = vmatprep.mubr.f32.mxu0 %v236_v29  ;;  %v16468_v29 = vld [vmem:[#allocation3 + $0xd8] sm:$0xff] }
  0xf7   :  { %12181 = vmatmul.mubr.f32.gmra.mrb[42].mxu0 %v237_v30  ;;  %v16473_v30 = vld [vmem:[#allocation3 + $0xe0] sm:$0xff] }
  0xf8   :  { %12183 = vmatprep.mubr.f32.mxu0 %v238_v31  ;;  %v16475_v31 = vld [vmem:[#allocation3 + $0xf0] sm:$0xff] }
  0xfb   :  { %12184 = vmatmul.mubr.f32.gmra.mrb[44].mxu0 %v239_v32  ;;  %v16479_v32 = vld [vmem:[#allocation3 + $0xf8] sm:$0xff] }
  0xfc   :  { %12186 = vmatprep.mubr.f32.mxu0 %v240_v33  ;;  %v16481_v33 = vld [vmem:[#allocation3 + $0x108] sm:$0xff] }
  0xff   :  { %12187 = vmatmul.mubr.f32.gmra.mrb[46].mxu0 %v241_v34  ;;  %v16485_v34 = vld [vmem:[#allocation3 + $0x110] sm:$0xff] }
 0x100   :  { %12189 = vmatprep.mubr.f32.mxu0 %v242_v35  ;;  %v16487_v35 = vld [vmem:[#allocation3 + $0x120] sm:$0xff] }
 0x103   :  { %12190 = vmatmul.mubr.f32.gmra.mrb[48].mxu0 %v243_v36  ;;  %v16491_v36 = vld [vmem:[#allocation3 + $0x128] sm:$0xff] }
 0x104   :  { %12192 = vmatprep.mubr.f32.mxu0 %v244_v37  ;;  %v16493_v37 = vld [vmem:[#allocation3 + $0x138] sm:$0xff] }
 0x107   :  { %12193 = vmatmul.mubr.f32.gmra.mrb[50].mxu0 %v245_v38  ;;  %v16497_v38 = vld [vmem:[#allocation3 + $0x140] sm:$0xff] }
 0x108   :  { %12195 = vmatprep.mubr.f32.mxu0 %v246_v39  ;;  %v16499_v39 = vld [vmem:[#allocation3 + $0x150] sm:$0xff] }
 0x10b   :  { %12196 = vmatmul.mubr.f32.gmra.mrb[52].mxu0 %v247_v40  ;;  %v16503_v40 = vld [vmem:[#allocation3 + $0x158] sm:$0xff] }
 0x10c   :  { %12198 = vmatprep.mubr.f32.mxu0 %v248_v41  ;;  %v16505_v41 = vld [vmem:[#allocation3 + $0x168] sm:$0xff] }
 0x10f   :  { %12199 = vmatmul.mubr.f32.gmra.mrb[54].mxu0 %v249_v42  ;;  %v16509_v42 = vld [vmem:[#allocation3 + $0x170] sm:$0xff] }
 0x110   :  { %12201 = vmatprep.mubr.f32.mxu0 %v250_v43  ;;  %v146_v43 = vld [vmem:[#allocation3 + $0x1b0] sm:$0xff] }
 0x113   :  { %12202 = vmatmul.mubr.f32.gmra.mrb[56].mxu0 %v251_v44  ;;  %v147_v44 = vld [vmem:[#allocation3 + $0x1b8] sm:$0xff] }
 0x114   :  { %12204 = vmatprep.mubr.f32.mxu0 %v252_v45  ;;  %v16512_v45 = vld [vmem:[#allocation3 + $0x1c8] sm:$0xff] }
 0x117   :  { %12205 = vmatmul.mubr.f32.gmra.mrb[58].mxu0 %v253_v46  ;;  %v16515_v46 = vld [vmem:[#allocation3 + $0x1d0] sm:$0xff] }
 0x118   :  { %12207 = vmatprep.mubr.f32.mxu0 %v254_v47  ;;  %v16517_v47 = vld [vmem:[#allocation3 + $0x1e0] sm:$0xff] }
 0x11b   :  { %12208 = vmatmul.mubr.f32.gmra.mrb[60].mxu0 %v255_v48  ;;  %v16521_v48 = vld [vmem:[#allocation3 + $0x1e8] sm:$0xff] }
 0x11c   :  { %12210 = vmatprep.mubr.f32.mxu0 %v256_v49  ;;  %v16523_v49 = vld [vmem:[#allocation3 + $0x1f8] sm:$0xff] }
 0x11f   :  { %12211 = vmatmul.mubr.f32.gmra.mrb[62].mxu0 %v257_v50  ;;  %v16527_v50 = vld [vmem:[#allocation3 + $0x200] sm:$0xff] }
 0x120   :  { %12245 = vmatprep.mubr.f32.mxu0 %v114_v51  ;;  %v16529_v51 = vld [vmem:[#allocation3 + $0x210] sm:$0xff] }
 0x123   :  { %12246 = vmatmul.mubr.f32.vlgmr.msra.gmra.mrb[0].mxu0 %v115_v54  ;;  %v16539_v54 = vld [vmem:[#allocation3 + $0x230] sm:$0xff] }
 0x124   :  { %14456 = vmatpush3.bf16.msra.mxu0 %v16415_v3  ;;  %12248 = vmatprep.mubr.f32.mxu0 %v16418_v55  ;;  %v1118_v3 = vld [vmem:[#allocation6 + $0x140] sm:$0xff] }
 0x125   :  { %14458 = vmatprep.subr.bf16.mxu0 %v14457_v56  ;;  %v14469_v7 = vpack.c.bf16 %v1119_v4, %v1118_v3  ;;  %v16563_v3 = vld [vmem:[#allocation3 + $0x290] sm:$0xff]  ;;  %v16565_v4 = vld [vmem:[#allocation3 + $0x2a0] sm:$0xff] }
 0x127   :  { %12249 = vmatmul.mubr.f32.gmra.mrb[2].mxu0 %v16422_v59 }
 0x128   :  { %12251 = vmatprep.mubr.f32.mxu0 %v16424_v60  ;;  %14460 = vmatpush3.bf16.msra.mxu0 %v14457_v56  ;;  %v16541_v56 = vld [vmem:[#allocation3 + $0x240] sm:$0xff] }
 0x129   :  { %14462 = vmatprep.subr.bf16.mxu0 %v14461_v61 }
 0x12b   :  { %12252 = vmatmul.mubr.f32.gmra.mrb[4].mxu0 %v16428_v0 }
 0x12c   :  { %12254 = vmatprep.mubr.f32.mxu0 %v16430_v1  ;;  %14464 = vmatpush3.bf16.msra.mxu0 %v14461_v61  ;;  %v16551_v61 = vld [vmem:[#allocation3 + $0x260] sm:$0xff] }
 0x12d   :  { %14466 = vmatprep.subr.bf16.mxu0 %v14465_v2 }
 0x12f   :  { %12255 = vmatmul.mubr.f32.gmra.mrb[6].mxu0 %v16434_v5 }
 0x130   :  { %12257 = vmatprep.mubr.f32.mxu0 %v16436_v6  ;;  %14468 = vmatpush3.bf16.msra.mxu0 %v14465_v2  ;;  %v16559_v2 = vld [vmem:[#allocation3 + $0x288] sm:$0xff] }
 0x131   :  { %14470 = vmatprep.subr.bf16.mxu0 %v14469_v7 }
 0x133   :  { %12258 = vmatmul.mubr.f32.gmra.mrb[8].mxu0 %v16440_v10 }
 0x134   :  { %12260 = vmatprep.mubr.f32.mxu0 %v16442_v11  ;;  %14472 = vmatpush3.bf16.msra.mxu0 %v14469_v7  ;;  %v16569_v7 = vld [vmem:[#allocation3 + $0x2a8] sm:$0xff] }
 0x135   :  { %14474 = vmatprep.subr.bf16.mxu0 %v14473_v12 }
 0x137   :  { %12261 = vmatmul.mubr.f32.gmra.mrb[10].mxu0 %v16446_v15 }
 0x138   :  { %12263 = vmatprep.mubr.f32.mxu0 %v16448_v16  ;;  %14476 = vmatpush3.bf16.msra.mxu0 %v14473_v12  ;;  %v16577_v12 = vld [vmem:[#allocation3 + $0x2d0] sm:$0xff] }
 0x139   :  { %14478 = vmatprep.subr.bf16.mxu0 %v14477_v17  ;;  %21089 = vst [vmem:[#allocation23_spill] sm:$0xff] %v16577_v12 }
 0x13b   :  { %12264 = vmatmul.mubr.f32.gmra.mrb[12].mxu0 %v16452_v20 }
 0x13c   :  { %12266 = vmatprep.mubr.f32.mxu0 %v16454_v21  ;;  %14480 = vmatpush3.bf16.msra.mxu0 %v14477_v17  ;;  %v16587_v17 = vld [vmem:[#allocation3 + $0x2f0] sm:$0xff] }
 0x13d   :  { %14482 = vmatprep.subr.bf16.mxu0 %v14481_v22  ;;  %21092 = vst [vmem:[#allocation26_spill] sm:$0xff] %v16587_v17 }
 0x13f   :  { %12267 = vmatmul.mubr.f32.gmra.mrb[14].mxu0 %v16458_v25 }
 0x140   :  { %12269 = vmatprep.mubr.f32.mxu0 %v16460_v26  ;;  %14484 = vmatpush3.bf16.msra.mxu0 %v14481_v22  ;;  %v16595_v22 = vld [vmem:[#allocation3 + $0x318] sm:$0xff] }
 0x141   :  { %14486 = vmatprep.subr.bf16.mxu0 %v16462_v27  ;;  %21095 = vst [vmem:[#allocation29_spill] sm:$0xff] %v16595_v22 }
 0x143   :  { %12270 = vmatmul.mubr.f32.gmra.mrb[16].mxu0 %v16466_v28 }
 0x144   :  { %12272 = vmatprep.mubr.f32.mxu0 %v16468_v29 }
 0x147   :  { %12273 = vmatmul.mubr.f32.gmra.mrb[18].mxu0 %v16473_v30 }
 0x148   :  { %12275 = vmatprep.mubr.f32.mxu0 %v16475_v31 }
 0x14b   :  { %12276 = vmatmul.mubr.f32.gmra.mrb[20].mxu0 %v16479_v32 }
 0x14c   :  { %12278 = vmatprep.mubr.f32.mxu0 %v16481_v33 }
 0x14f   :  { %12279 = vmatmul.mubr.f32.gmra.mrb[22].mxu0 %v16485_v34 }
 0x150   :  { %12281 = vmatprep.mubr.f32.mxu0 %v16487_v35 }
 0x153   :  { %12282 = vmatmul.mubr.f32.gmra.mrb[24].mxu0 %v16491_v36 }
 0x154   :  { %12284 = vmatprep.mubr.f32.mxu0 %v16493_v37 }
 0x157   :  { %12285 = vmatmul.mubr.f32.gmra.mrb[26].mxu0 %v16497_v38 }
 0x158   :  { %12287 = vmatprep.mubr.f32.mxu0 %v16499_v39 }
 0x15b   :  { %12288 = vmatmul.mubr.f32.gmra.mrb[28].mxu0 %v16503_v40 }
 0x15c   :  { %12290 = vmatprep.mubr.f32.mxu0 %v16505_v41 }
 0x15f   :  { %12291 = vmatmul.mubr.f32.gmra.mrb[30].mxu0 %v16509_v42 }
 0x160   :  { %12293 = vmatprep.mubr.f32.mxu0 %v146_v43  ;;  %v1643_v43 = vld [vmem:[#allocation6 + $0x190] sm:$0xff] }
 0x163   :  { %12294 = vmatmul.mubr.f32.gmra.mrb[32].mxu0 %v147_v44  ;;  %v1644_v44 = vld [vmem:[#allocation6 + $0x198] sm:$0xff] }
 0x164   :  { %12296 = vmatprep.mubr.f32.mxu0 %v16512_v45 }
 0x167   :  { %12297 = vmatmul.mubr.f32.gmra.mrb[34].mxu0 %v16515_v46 }
 0x168   :  { %12299 = vmatprep.mubr.f32.mxu0 %v16517_v47 }
 0x16b   :  { %12300 = vmatmul.mubr.f32.gmra.mrb[36].mxu0 %v16521_v48 }
 0x16c   :  { %12302 = vmatprep.mubr.f32.mxu0 %v16523_v49 }
 0x16f   :  { %12303 = vmatmul.mubr.f32.gmra.mrb[38].mxu0 %v16527_v50 }
 0x170   :  { %12305 = vmatprep.mubr.f32.mxu0 %v16529_v51 }
 0x173   :  { %12306 = vmatmul.mubr.f32.gmra.mrb[40].mxu0 %v16533_v52 }
 0x174   :  { %12308 = vmatprep.mubr.f32.mxu0 %v16535_v53 }
 0x177   :  { %12309 = vmatmul.mubr.f32.gmra.mrb[42].mxu0 %v16539_v54 }
 0x178   :  { %12311 = vmatprep.mubr.f32.mxu0 %v16541_v56 }
 0x17b   :  { %12312 = vmatmul.mubr.f32.gmra.mrb[44].mxu0 %v16545_v57 }
 0x17c   :  { %12314 = vmatprep.mubr.f32.mxu0 %v16547_v58 }
 0x17f   :  { %12315 = vmatmul.mubr.f32.gmra.mrb[46].mxu0 %v16551_v61 }
 0x180   :  { %12317 = vmatprep.mubr.f32.mxu0 %v16553_v62 }
 0x183   :  { %12318 = vmatmul.mubr.f32.gmra.mrb[48].mxu0 %v16557_v63 }
 0x184   :  { %12320 = vmatprep.mubr.f32.mxu0 %v16559_v2 }
 0x187   :  { %12321 = vmatmul.mubr.f32.gmra.mrb[50].mxu0 %v16563_v3 }
 0x188   :  { %12323 = vmatprep.mubr.f32.mxu0 %v16565_v4 }
 0x18b   :  { %12324 = vmatmul.mubr.f32.gmra.mrb[52].mxu0 %v16569_v7 }
 0x18c   :  { %12326 = vmatprep.mubr.f32.mxu0 %v16571_v8  ;;  %v1647_v8 = vld [vmem:[#allocation6 + $0x1b0] sm:$0xff] }
 0x18f   :  { %12327 = vmatmul.mubr.f32.gmra.mrb[54].mxu0 %v16575_v9 }
 0x190   :  { %12329 = vmatprep.mubr.f32.mxu0 %v16577_v12  ;;  %v1646_v12 = vld [vmem:[#allocation6 + $0x1a8] sm:$0xff] }
 0x193   :  { %12330 = vmatmul.mubr.f32.gmra.mrb[56].mxu0 %v16581_v13  ;;  %v1645_v13 = vld [vmem:[#allocation6 + $0x1a0] sm:$0xff] }
 0x194   :  { %12332 = vmatprep.mubr.f32.mxu0 %v16583_v14  ;;  %v1046_v14 = vld [vmem:[#allocation3 + $0xa] sm:$0xff]  ;;  %v14493_v9 = vpack.c.bf16 %v1646_v12, %v1645_v13  ;;  %v16618_v12 = vld [vmem:[#allocation3 + $0x52] sm:$0xff]  ;;  %v16620_v13 = vld [vmem:[#allocation3 + $0x62] sm:$0xff] }
 0x195   :  { %21102 = vst [vmem:[#allocation36_spill] sm:$0xff] %v16618_v12  ;;  %21103 = vst [vmem:[#allocation37_spill] sm:$0xff] %v16620_v13 }
 0x197   :  { %12333 = vmatmul.mubr.f32.gmra.mrb[58].mxu0 %v16587_v17  ;;  %v16602_v17 = vld [vmem:[#allocation3 + $0x1a] sm:$0xff] }
 0x198   :  { %12335 = vmatprep.mubr.f32.mxu0 %v16589_v18  ;;  %21097 = vst [vmem:[#allocation31_spill] sm:$0xff] %v16602_v17  ;;  %v14489_v18 = vpack.c.bf16 %v1644_v44, %v1643_v43  ;;  %v1649_v43 = vld [vmem:[#allocation6 + $0x1c0] sm:$0xff]  ;;  %v1650_v44 = vld [vmem:[#allocation6 + $0x1c8] sm:$0xff] }
 0x19b   :  { %12336 = vmatmul.mubr.f32.gmra.mrb[60].mxu0 %v16593_v19  ;;  %v16608_v19 = vld [vmem:[#allocation3 + $0x32] sm:$0xff] }
 0x19c   :  { %12338 = vmatprep.mubr.f32.mxu0 %v16595_v22  ;;  %v16606_v22 = vld [vmem:[#allocation3 + $0x22] sm:$0xff]  ;;  %21099 = vst [vmem:[#allocation33_spill] sm:$0xff] %v16608_v19 }
 0x19d   :  { %21098 = vst [vmem:[#allocation32_spill] sm:$0xff] %v16606_v22 }
 0x19f   :  { %12339 = vmatmul.mubr.f32.gmra.mrb[62].mxu0 %v16599_v23  ;;  %v1648_v23 = vld [vmem:[#allocation6 + $0x1b8] sm:$0xff] }
 0x1a0   :  { %12373 = vmatprep.mubr.f32.mxu0 %v1045_v24  ;;  %v16612_v24 = vld [vmem:[#allocation3 + $0x3a] sm:$0xff] }
 0x1a1   :  { %21100 = vst [vmem:[#allocation34_spill] sm:$0xff] %v16612_v24 }
 0x1a3   :  { %12374 = vmatmul.mubr.f32.vlgmr.msra.gmra.mrb[0].mxu0 %v1046_v14  ;;  %v16614_v14 = vld [vmem:[#allocation3 + $0x4a] sm:$0xff] }
 0x1a4   :  { %14488 = vmatpush3.bf16.msra.mxu0 %v16462_v27  ;;  %12376 = vmatprep.mubr.f32.mxu0 %v16602_v17  ;;  %21101 = vst [vmem:[#allocation35_spill] sm:$0xff] %v16614_v14  ;;  %v14497_v27 = vpack.c.bf16 %v1648_v23, %v1647_v8  ;;  %v1652_v17 = vld [vmem:[#allocation6 + $0x1d8] sm:$0xff]  ;;  %v16624_v8 = vld [vmem:[#allocation3 + $0x6a] sm:$0xff] }
 0x1a5   :  { %14490 = vmatprep.subr.bf16.mxu0 %v14489_v18  ;;  %21104 = vst [vmem:[#allocation38_spill] sm:$0xff] %v16624_v8 }
 0x1a7   :  { %12377 = vmatmul.mubr.f32.gmra.mrb[2].mxu0 %v16606_v22  ;;  %v1651_v22 = vld [vmem:[#allocation6 + $0x1d0] sm:$0xff] }
 0x1a8   :  { %12379 = vmatprep.mubr.f32.mxu0 %v16608_v19  ;;  %14492 = vmatpush3.bf16.msra.mxu0 %v14489_v18  ;;  %v14501_v19 = vpack.c.bf16 %v1650_v44, %v1649_v43  ;;  %v16626_v18 = vld [vmem:[#allocation3 + $0x7a] sm:$0xff]  ;;  %v14505_v23 = vpack.c.bf16 %v1652_v17, %v1651_v22  ;;  %v16632_v43 = vld [vmem:[#allocation3 + $0x92] sm:$0xff]  ;;  %v16638_v22 = vld [vmem:[#allocation3 + $0xaa] sm:$0xff] }
 0x1a9   :  { %14494 = vmatprep.subr.bf16.mxu0 %v14493_v9  ;;  %21105 = vst [vmem:[#allocation39_spill] sm:$0xff] %v16626_v18  ;;  %v16636_v17 = vld [vmem:[#allocation3 + $0x9a] sm:$0xff] }
 0x1ab   :  { %12380 = vmatmul.mubr.f32.gmra.mrb[4].mxu0 %v16612_v24  ;;  %v1654_v24 = vld [vmem:[#allocation6 + $0x1e8] sm:$0xff] }
 0x1ac   :  { %12382 = vmatprep.mubr.f32.mxu0 %v16614_v14  ;;  %14496 = vmatpush3.bf16.msra.mxu0 %v14493_v9  ;;  %v1653_v14 = vld [vmem:[#allocation6 + $0x1e0] sm:$0xff] }
 0x1ad   :  { %14498 = vmatprep.subr.bf16.mxu0 %v14497_v27  ;;  %v16630_v9 = vld [vmem:[#allocation3 + $0x82] sm:$0xff]  ;;  %v14509_v44 = vpack.c.bf16 %v1654_v24, %v1653_v14 }
 0x1ae   :  { %v16644_v24 = vld [vmem:[#allocation3 + $0xc2] sm:$0xff] }
 0x1af   :  { %12383 = vmatmul.mubr.f32.gmra.mrb[6].mxu0 %v16618_v12  ;;  %v1656_v12 = vld [vmem:[#allocation6 + $0x1f8] sm:$0xff]  ;;  %21107 = vst [vmem:[#allocation41_spill] sm:$0xff] %v16644_v24 }
 0x1b0   :  { %12385 = vmatprep.mubr.f32.mxu0 %v16620_v13  ;;  %14500 = vmatpush3.bf16.msra.mxu0 %v14497_v27  ;;  %v1655_v13 = vld [vmem:[#allocation6 + $0x1f0] sm:$0xff] }
 0x1b1   :  { %14502 = vmatprep.subr.bf16.mxu0 %v14501_v19  ;;  %v14513_v27 = vpack.c.bf16 %v1656_v12, %v1655_v13  ;;  %v16652_v12 = vld [vmem:[#allocation3 + $0xda] sm:$0xff]  ;;  %v16657_v13 = vld [vmem:[#allocation3 + $0xe2] sm:$0xff] }
 0x1b2   :  { %21109 = vst [vmem:[#allocation43_spill] sm:$0xff] %v16652_v12  ;;  %21110 = vst [vmem:[#allocation44_spill] sm:$0xff] %v16657_v13 }
 0x1b3   :  { %12386 = vmatmul.mubr.f32.gmra.mrb[8].mxu0 %v16624_v8  ;;  %v2172_v8 = vld [vmem:[#allocation6 + $0x208] sm:$0xff] }
 0x1b4   :  { %12388 = vmatprep.mubr.f32.mxu0 %v16626_v18  ;;  %14504 = vmatpush3.bf16.msra.mxu0 %v14501_v19  ;;  %v2171_v18 = vld [vmem:[#allocation6 + $0x200] sm:$0xff]  ;;  %v16642_v19 = vld [vmem:[#allocation3 + $0xb2] sm:$0xff] }
 0x1b5   :  { %14506 = vmatprep.subr.bf16.mxu0 %v14505_v23  ;;  %21106 = vst [vmem:[#allocation40_spill] sm:$0xff] %v16642_v19  ;;  %v16646_v14 = vpack.c.bf16 %v2172_v8, %v2171_v18  ;;  %v16663_v8 = vld [vmem:[#allocation3 + $0xfa] sm:$0xff]  ;;  %v16665_v18 = vld [vmem:[#allocation3 + $0x10a] sm:$0xff] }
 0x1b6   :  { %21112 = vst [vmem:[#allocation46_spill] sm:$0xff] %v16663_v8  ;;  %21113 = vst [vmem:[#allocation47_spill] sm:$0xff] %v16665_v18 }
 0x1b7   :  { %12389 = vmatmul.mubr.f32.gmra.mrb[10].mxu0 %v16630_v9 }
 0x1b8   :  { %12391 = vmatprep.mubr.f32.mxu0 %v16632_v43  ;;  %14508 = vmatpush3.bf16.msra.mxu0 %v14505_v23  ;;  %v16650_v23 = vld [vmem:[#allocation3 + $0xca] sm:$0xff] }
 0x1b9   :  { %14510 = vmatprep.subr.bf16.mxu0 %v14509_v44  ;;  %21108 = vst [vmem:[#allocation42_spill] sm:$0xff] %v16650_v23 }
 0x1bb   :  { %12392 = vmatmul.mubr.f32.gmra.mrb[12].mxu0 %v16636_v17 }
 0x1bc   :  { %12394 = vmatprep.mubr.f32.mxu0 %v16638_v22  ;;  %14512 = vmatpush3.bf16.msra.mxu0 %v14509_v44  ;;  %v16659_v44 = vld [vmem:[#allocation3 + $0xf2] sm:$0xff] }
 0x1bd   :  { %14514 = vmatprep.subr.bf16.mxu0 %v14513_v27  ;;  %21111 = vst [vmem:[#allocation45_spill] sm:$0xff] %v16659_v44 }
 0x1bf   :  { %12395 = vmatmul.mubr.f32.gmra.mrb[14].mxu0 %v16642_v19  ;;  %v2176_v19 = vld [vmem:[#allocation6 + $0x228] sm:$0xff] }
 0x1c0   :  { %12397 = vmatprep.mubr.f32.mxu0 %v16644_v24  ;;  %14516 = vmatpush3.bf16.msra.mxu0 %v14513_v27  ;;  %v16669_v27 = vld [vmem:[#allocation3 + $0x112] sm:$0xff]  ;;  %v16696_v24 = vld [vmem:[#allocation3 + $0x1ca] sm:$0xff] }
 0x1c1   :  { %14518 = vmatprep.subr.bf16.mxu0 %v16646_v14  ;;  %21114 = vst [vmem:[#allocation48_spill] sm:$0xff] %v16669_v27  ;;  %21123 = vst [vmem:[#allocation57_spill] sm:$0xff] %v16696_v24 }
 0x1c3   :  { %12398 = vmatmul.mubr.f32.gmra.mrb[16].mxu0 %v16650_v23  ;;  %v16671_v23 = vld [vmem:[#allocation3 + $0x122] sm:$0xff] }
 0x1c4   :  { %12400 = vmatprep.mubr.f32.mxu0 %v16652_v12  ;;  %21115 = vst [vmem:[#allocation49_spill] sm:$0xff] %v16671_v23  ;;  %v16675_v12 = vld [vmem:[#allocation3 + $0x12a] sm:$0xff] }
 0x1c5   :  { %21116 = vst [vmem:[#allocation50_spill] sm:$0xff] %v16675_v12 }
 0x1c7   :  { %12401 = vmatmul.mubr.f32.gmra.mrb[18].mxu0 %v16657_v13  ;;  %v16677_v13 = vld [vmem:[#allocation3 + $0x13a] sm:$0xff] }
 0x1c8   :  { %12403 = vmatprep.mubr.f32.mxu0 %v16659_v44  ;;  %21117 = vst [vmem:[#allocation51_spill] sm:$0xff] %v16677_v13  ;;  %v16681_v44 = vld [vmem:[#allocation3 + $0x142] sm:$0xff] }
 0x1c9   :  { %21118 = vst [vmem:[#allocation52_spill] sm:$0xff] %v16681_v44 }
 0x1cb   :  { %12404 = vmatmul.mubr.f32.gmra.mrb[20].mxu0 %v16663_v8  ;;  %v16683_v8 = vld [vmem:[#allocation3 + $0x152] sm:$0xff] }
 0x1cc   :  { %12406 = vmatprep.mubr.f32.mxu0 %v16665_v18  ;;  %21119 = vst [vmem:[#allocation53_spill] sm:$0xff] %v16683_v8  ;;  %v16687_v18 = vld [vmem:[#allocation3 + $0x15a] sm:$0xff] }
 0x1cd   :  { %21120 = vst [vmem:[#allocation54_spill] sm:$0xff] %v16687_v18 }
 0x1cf   :  { %12407 = vmatmul.mubr.f32.gmra.mrb[22].mxu0 %v16669_v27  ;;  %v16689_v27 = vld [vmem:[#allocation3 + $0x16a] sm:$0xff] }
 0x1d0   :  { %12409 = vmatprep.mubr.f32.mxu0 %v16671_v23  ;;  %21121 = vst [vmem:[#allocation55_spill] sm:$0xff] %v16689_v27  ;;  %v16693_v23 = vld [vmem:[#allocation3 + $0x172] sm:$0xff] }
 0x1d1   :  { %21122 = vst [vmem:[#allocation56_spill] sm:$0xff] %v16693_v23 }
 0x1d3   :  { %12410 = vmatmul.mubr.f32.gmra.mrb[24].mxu0 %v16675_v12  ;;  %v1077_v12 = vld [vmem:[#allocation3 + $0x1b2] sm:$0xff] }
 0x1d4   :  { %12412 = vmatprep.mubr.f32.mxu0 %v16677_v13  ;;  %v1078_v13 = vld [vmem:[#allocation3 + $0x1ba] sm:$0xff] }
 0x1d7   :  { %12413 = vmatmul.mubr.f32.gmra.mrb[26].mxu0 %v16681_v44  ;;  %v16701_v44 = vld [vmem:[#allocation3 + $0x1e2] sm:$0xff] }
 0x1d8   :  { %12415 = vmatprep.mubr.f32.mxu0 %v16683_v8  ;;  %v16699_v8 = vld [vmem:[#allocation3 + $0x1d2] sm:$0xff]  ;;  %21125 = vst [vmem:[#allocation59_spill] sm:$0xff] %v16701_v44 }
 0x1d9   :  { %21124 = vst [vmem:[#allocation58_spill] sm:$0xff] %v16699_v8 }
 0x1db   :  { %12416 = vmatmul.mubr.f32.gmra.mrb[28].mxu0 %v16687_v18  ;;  %v16707_v18 = vld [vmem:[#allocation3 + $0x1fa] sm:$0xff] }
 0x1dc   :  { %12418 = vmatprep.mubr.f32.mxu0 %v16689_v27  ;;  %v16705_v27 = vld [vmem:[#allocation3 + $0x1ea] sm:$0xff]  ;;  %21127 = vst [vmem:[#allocation61_spill] sm:$0xff] %v16707_v18 }
 0x1dd   :  { %21126 = vst [vmem:[#allocation60_spill] sm:$0xff] %v16705_v27 }
 0x1df   :  { %12419 = vmatmul.mubr.f32.gmra.mrb[30].mxu0 %v16693_v23 }
 0x1e0   :  { %12421 = vmatprep.mubr.f32.mxu0 %v1077_v12  ;;  %v16711_v12 = vld [vmem:[#allocation3 + $0x202] sm:$0xff] }
 0x1e1   :  { %21128 = vst [vmem:[#allocation62_spill] sm:$0xff] %v16711_v12 }
 0x1e3   :  { %12422 = vmatmul.mubr.f32.gmra.mrb[32].mxu0 %v1078_v13  ;;  %v16713_v13 = vld [vmem:[#allocation3 + $0x212] sm:$0xff] }
 0x1e4   :  { %12424 = vmatprep.mubr.f32.mxu0 %v16696_v24  ;;  %21129 = vst [vmem:[#allocation63_spill] sm:$0xff] %v16713_v13  ;;  %v16717_v24 = vld [vmem:[#allocation3 + $0x21a] sm:$0xff] }
 0x1e5   :  { %21130 = vst [vmem:[#allocation64_spill] sm:$0xff] %v16717_v24 }
 0x1e7   :  { %12425 = vmatmul.mubr.f32.gmra.mrb[34].mxu0 %v16699_v8  ;;  %v16719_v8 = vld [vmem:[#allocation3 + $0x22a] sm:$0xff] }
 0x1e8   :  { %12427 = vmatprep.mubr.f32.mxu0 %v16701_v44  ;;  %21131 = vst [vmem:[#allocation65_spill] sm:$0xff] %v16719_v8  ;;  %v16723_v44 = vld [vmem:[#allocation3 + $0x232] sm:$0xff] }
 0x1e9   :  { %21132 = vst [vmem:[#allocation66_spill] sm:$0xff] %v16723_v44 }
 0x1eb   :  { %12428 = vmatmul.mubr.f32.gmra.mrb[36].mxu0 %v16705_v27  ;;  %v16725_v27 = vld [vmem:[#allocation3 + $0x242] sm:$0xff] }
 0x1ec   :  { %12430 = vmatprep.mubr.f32.mxu0 %v16707_v18  ;;  %21133 = vst [vmem:[#allocation67_spill] sm:$0xff] %v16725_v27  ;;  %v16729_v18 = vld [vmem:[#allocation3 + $0x24a] sm:$0xff] }
 0x1ed   :  { %21134 = vst [vmem:[#allocation68_spill] sm:$0xff] %v16729_v18 }
 0x1ef   :  { %12431 = vmatmul.mubr.f32.gmra.mrb[38].mxu0 %v16711_v12  ;;  %v16731_v12 = vld [vmem:[#allocation3 + $0x25a] sm:$0xff] }
 0x1f0   :  { %12433 = vmatprep.mubr.f32.mxu0 %v16713_v13  ;;  %21135 = vst [vmem:[#allocation69_spill] sm:$0xff] %v16731_v12  ;;  %v16735_v13 = vld [vmem:[#allocation3 + $0x262] sm:$0xff] }
 0x1f1   :  { %21136 = vst [vmem:[#allocation70_spill] sm:$0xff] %v16735_v13 }
 0x1f3   :  { %12434 = vmatmul.mubr.f32.gmra.mrb[40].mxu0 %v16717_v24  ;;  %v16737_v24 = vld [vmem:[#allocation3 + $0x272] sm:$0xff] }
 0x1f4   :  { %12436 = vmatprep.mubr.f32.mxu0 %v16719_v8  ;;  %21137 = vst [vmem:[#allocation71_spill] sm:$0xff] %v16737_v24  ;;  %v16741_v8 = vld [vmem:[#allocation3 + $0x27a] sm:$0xff] }
 0x1f5   :  { %21138 = vst [vmem:[#allocation72_spill] sm:$0xff] %v16741_v8 }
 0x1f7   :  { %12437 = vmatmul.mubr.f32.gmra.mrb[42].mxu0 %v16723_v44  ;;  %v16743_v44 = vld [vmem:[#allocation3 + $0x28a] sm:$0xff] }
 0x1f8   :  { %12439 = vmatprep.mubr.f32.mxu0 %v16725_v27  ;;  %21139 = vst [vmem:[#allocation73_spill] sm:$0xff] %v16743_v44  ;;  %v16747_v27 = vld [vmem:[#allocation3 + $0x292] sm:$0xff] }
 0x1f9   :  { %21140 = vst [vmem:[#allocation74_spill] sm:$0xff] %v16747_v27 }
 0x1fb   :  { %12440 = vmatmul.mubr.f32.gmra.mrb[44].mxu0 %v16729_v18  ;;  %v16749_v18 = vld [vmem:[#allocation3 + $0x2a2] sm:$0xff] }
 0x1fc   :  { %12442 = vmatprep.mubr.f32.mxu0 %v16731_v12  ;;  %21141 = vst [vmem:[#allocation75_spill] sm:$0xff] %v16749_v18  ;;  %v16753_v12 = vld [vmem:[#allocation3 + $0x2aa] sm:$0xff] }
 0x1fd   :  { %21142 = vst [vmem:[#allocation76_spill] sm:$0xff] %v16753_v12 }
 0x1ff   :  { %12443 = vmatmul.mubr.f32.gmra.mrb[46].mxu0 %v16735_v13  ;;  %v16755_v13 = vld [vmem:[#allocation3 + $0x2ba] sm:$0xff] }
 0x200   :  { %12445 = vmatprep.mubr.f32.mxu0 %v16737_v24  ;;  %21143 = vst [vmem:[#allocation77_spill] sm:$0xff] %v16755_v13  ;;  %v16759_v24 = vld [vmem:[#allocation3 + $0x2c2] sm:$0xff] }
 0x201   :  { %21144 = vst [vmem:[#allocation78_spill] sm:$0xff] %v16759_v24 }
 0x203   :  { %12446 = vmatmul.mubr.f32.gmra.mrb[48].mxu0 %v16741_v8  ;;  %v16761_v8 = vld [vmem:[#allocation3 + $0x2d2] sm:$0xff] }
 0x204   :  { %12448 = vmatprep.mubr.f32.mxu0 %v16743_v44  ;;  %21145 = vst [vmem:[#allocation79_spill] sm:$0xff] %v16761_v8  ;;  %v16765_v44 = vld [vmem:[#allocation3 + $0x2da] sm:$0xff] }
 0x205   :  { %21146 = vst [vmem:[#allocation80_spill] sm:$0xff] %v16765_v44 }
 0x207   :  { %12449 = vmatmul.mubr.f32.gmra.mrb[50].mxu0 %v16747_v27  ;;  %v16767_v27 = vld [vmem:[#allocation3 + $0x2ea] sm:$0xff] }
 0x208   :  { %12451 = vmatprep.mubr.f32.mxu0 %v16749_v18  ;;  %21147 = vst [vmem:[#allocation81_spill] sm:$0xff] %v16767_v27  ;;  %v16771_v18 = vld [vmem:[#allocation3 + $0x2f2] sm:$0xff] }
 0x209   :  { %21148 = vst [vmem:[#allocation82_spill] sm:$0xff] %v16771_v18 }
 0x20b   :  { %12452 = vmatmul.mubr.f32.gmra.mrb[52].mxu0 %v16753_v12  ;;  %v16773_v12 = vld [vmem:[#allocation3 + $0x302] sm:$0xff] }
 0x20c   :  { %12454 = vmatprep.mubr.f32.mxu0 %v16755_v13  ;;  %21149 = vst [vmem:[#allocation83_spill] sm:$0xff] %v16773_v12  ;;  %v16777_v13 = vld [vmem:[#allocation3 + $0x30a] sm:$0xff] }
 0x20d   :  { %21150 = vst [vmem:[#allocation84_spill] sm:$0xff] %v16777_v13 }
 0x20f   :  { %12455 = vmatmul.mubr.f32.gmra.mrb[54].mxu0 %v16759_v24  ;;  %v16779_v24 = vld [vmem:[#allocation3 + $0x31a] sm:$0xff] }
 0x210   :  { %12457 = vmatprep.mubr.f32.mxu0 %v16761_v8  ;;  %21151 = vst [vmem:[#allocation85_spill] sm:$0xff] %v16779_v24  ;;  %v16783_v8 = vld [vmem:[#allocation3 + $0x322] sm:$0xff] }
 0x213   :  { %12458 = vmatmul.mubr.f32.gmra.mrb[56].mxu0 %v16765_v44  ;;  %v2173_v44 = vld [vmem:[#allocation6 + $0x210] sm:$0xff] }
 0x214   :  { %12460 = vmatprep.mubr.f32.mxu0 %v16767_v27  ;;  %v2174_v27 = vld [vmem:[#allocation6 + $0x218] sm:$0xff] }
 0x215   :  { %v14521_v23 = vpack.c.bf16 %v2174_v27, %v2173_v44  ;;  %v2179_v44 = vld [vmem:[#allocation6 + $0x240] sm:$0xff]  ;;  %v2180_v27 = vld [vmem:[#allocation6 + $0x248] sm:$0xff] }
 0x217   :  { %12461 = vmatmul.mubr.f32.gmra.mrb[58].mxu0 %v16771_v18  ;;  %v2175_v18 = vld [vmem:[#allocation6 + $0x220] sm:$0xff] }
 0x218   :  { %12463 = vmatprep.mubr.f32.mxu0 %v16773_v12  ;;  %v2178_v12 = vld [vmem:[#allocation6 + $0x238] sm:$0xff] }
 0x21b   :  { %12464 = vmatmul.mubr.f32.gmra.mrb[60].mxu0 %v16777_v13  ;;  %v14525_v13 = vpack.c.bf16 %v2176_v19, %v2175_v18  ;;  %v2182_v19 = vld [vmem:[#allocation6 + $0x258] sm:$0xff]  ;;  %v2713_v18 = vld [vmem:[#allocation6 + $0x2e0] sm:$0xff] }
 0x21c   :  { %12466 = vmatprep.mubr.f32.mxu0 %v16779_v24  ;;  %v2177_v24 = vld [vmem:[#allocation6 + $0x230] sm:$0xff] }
 0x21f   :  { %12467 = vmatmul.mubr.f32.gmra.mrb[62].mxu0 %v16783_v8 }
 0x220   :  { %12501 = vmatprep.mubr.f32.mxu0 %v16418_v55  ;;  %v14529_v55 = vpack.c.bf16 %v2178_v12, %v2177_v24  ;;  %v2184_v24 = vld [vmem:[#allocation6 + $0x268] sm:$0xff] }
 0x221   :  { %v2714_v12 = vld [vmem:[#allocation6 + $0x2e8] sm:$0xff] }
 0x223   :  { %12502 = vmatmul.mubr.f32.vlgmr.msra.gmra.mrb[0].mxu0 %v16422_v59  ;;  %v14533_v59 = vpack.c.bf16 %v2180_v27, %v2179_v44  ;;  %v14573_v44 = vpack.c.bf16 %v2714_v12, %v2713_v18  ;;  %v2715_v27 = vld [vmem:[#allocation6 + $0x2f0] sm:$0xff] }
 0x224   :  { %14520 = vmatpush3.bf16.msra.mxu0 %v16646_v14  ;;  %12504 = vmatprep.mubr.f32.mxu0 %v16424_v60  ;;  %v2181_v60 = vld [vmem:[#allocation6 + $0x250] sm:$0xff]  ;;  %v2186_v14 = vld [vmem:[#allocation6 + $0x278] sm:$0xff] }
 0x225   :  { %14522 = vmatprep.subr.bf16.mxu0 %v14521_v23  ;;  %v16997_v18 = vld [vmem:[#allocation3 + $0x289] sm:$0xff]  ;;  %v17001_v12 = vld [vmem:[#allocation3 + $0x291] sm:$0xff] }
 0x227   :  { %12505 = vmatmul.mubr.f32.gmra.mrb[2].mxu0 %v16428_v0  ;;  %v14537_v0 = vpack.c.bf16 %v2182_v19, %v2181_v60  ;;  %v16896_v60 = vld [vmem:[#allocation3 + $0xb1] sm:$0xff]  ;;  %v16898_v19 = vld [vmem:[#allocation3 + $0xc1] sm:$0xff] }
 0x228   :  { %12507 = vmatprep.mubr.f32.mxu0 %v16430_v1  ;;  %14524 = vmatpush3.bf16.msra.mxu0 %v14521_v23  ;;  %v2183_v1 = vld [vmem:[#allocation6 + $0x260] sm:$0xff]  ;;  %v2702_v23 = vld [vmem:[#allocation6 + $0x288] sm:$0xff] }
 0x229   :  { %14526 = vmatprep.subr.bf16.mxu0 %v14525_v13 }
 0x22b   :  { %12508 = vmatmul.mubr.f32.gmra.mrb[4].mxu0 %v16434_v5  ;;  %v14541_v5 = vpack.c.bf16 %v2184_v24, %v2183_v1  ;;  %v3232_v1 = vld [vmem:[#allocation6 + $0x300] sm:$0xff]  ;;  %v3233_v24 = vld [vmem:[#allocation6 + $0x308] sm:$0xff] }
 0x22c   :  { %12510 = vmatprep.mubr.f32.mxu0 %v16436_v6  ;;  %14528 = vmatpush3.bf16.msra.mxu0 %v14525_v13  ;;  %v2185_v6 = vld [vmem:[#allocation6 + $0x270] sm:$0xff]  ;;  %v16890_v13 = vld [vmem:[#allocation3 + $0x99] sm:$0xff] }
 0x22d   :  { %14530 = vmatprep.subr.bf16.mxu0 %v14529_v55 }
 0x22f   :  { %12511 = vmatmul.mubr.f32.gmra.mrb[6].mxu0 %v16440_v10  ;;  %v14545_v10 = vpack.c.bf16 %v2186_v14, %v2185_v6  ;;  %v16904_v6 = vld [vmem:[#allocation3 + $0xd9] sm:$0xff]  ;;  %v16906_v14 = vpack.c.bf16 %v3233_v24, %v3232_v1  ;;  %v17015_v1 = vld [vmem:[#allocation3 + $0x2d1] sm:$0xff] }
 0x230   :  { %12513 = vmatprep.mubr.f32.mxu0 %v16442_v11  ;;  %14532 = vmatpush3.bf16.msra.mxu0 %v14529_v55  ;;  %v2701_v11 = vld [vmem:[#allocation6 + $0x280] sm:$0xff]  ;;  %v16892_v55 = vld [vmem:[#allocation3 + $0xa9] sm:$0xff]  ;;  %21173 = vst [vmem:[#allocation87_spill] sm:$0xff] %v17015_v1 }
 0x231   :  { %14534 = vmatprep.subr.bf16.mxu0 %v14533_v59  ;;  %v17019_v24 = vld [vmem:[#allocation3 + $0x2d9] sm:$0xff] }
 0x232   :  { %21174 = vst [vmem:[#allocation88_spill] sm:$0xff] %v17019_v24 }
 0x233   :  { %12514 = vmatmul.mubr.f32.gmra.mrb[8].mxu0 %v16446_v15  ;;  %v16802_v15 = vpack.c.bf16 %v2702_v23, %v2701_v11  ;;  %v16912_v11 = vld [vmem:[#allocation3 + $0xf1] sm:$0xff]  ;;  %v16917_v23 = vld [vmem:[#allocation3 + $0xf9] sm:$0xff] }
 0x234   :  { %12516 = vmatprep.mubr.f32.mxu0 %v16448_v16  ;;  %14536 = vmatpush3.bf16.msra.mxu0 %v14533_v59  ;;  %v16819_v16 = vld [vmem:[#allocation3 + $0x180] sm:$0xff]  ;;  %v2716_v59 = vld [vmem:[#allocation6 + $0x2f8] sm:$0xff] }
 0x235   :  { %14538 = vmatprep.subr.bf16.mxu0 %v14537_v0 }
 0x237   :  { %12517 = vmatmul.mubr.f32.gmra.mrb[10].mxu0 %v16452_v20  ;;  %v16823_v20 = vld [vmem:[#allocation3 + $0x188] sm:$0xff] }
 0x238   :  { %12519 = vmatprep.mubr.f32.mxu0 %v16454_v21  ;;  %14540 = vmatpush3.bf16.msra.mxu0 %v14537_v0  ;;  %v21152_v21 = vld [vmem:[#allocation21_spill] sm:$0xff]  ;;  %v14577_v0 = vpack.c.bf16 %v2716_v59, %v2715_v27  ;;  %v17009_v59 = vld [vmem:[#allocation3 + $0x2b9] sm:$0xff] }
 0x239   :  { %14542 = vmatprep.subr.bf16.mxu0 %v14541_v5  ;;  %v17007_v27 = vld [vmem:[#allocation3 + $0x2a9] sm:$0xff] }
 0x23b   :  { %12520 = vmatmul.mubr.f32.gmra.mrb[12].mxu0 %v16458_v25  ;;  %v21153_v25 = vld [vmem:[#allocation22_spill] sm:$0xff] }
 0x23c   :  { %12522 = vmatprep.mubr.f32.mxu0 %v16460_v26  ;;  %14544 = vmatpush3.bf16.msra.mxu0 %v14541_v5  ;;  %v21154_v26 = vld [vmem:[#allocation23_spill] sm:$0xff]  ;;  %v16902_v5 = vld [vmem:[#allocation3 + $0xc9] sm:$0xff] }
 0x23d   :  { %14546 = vmatprep.subr.bf16.mxu0 %v14545_v10 }
 0x23f   :  { %12523 = vmatmul.mubr.f32.gmra.mrb[14].mxu0 %v16466_v28  ;;  %v21155_v28 = vld [vmem:[#allocation24_spill] sm:$0xff] }
 0x240   :  { %12525 = vmatprep.mubr.f32.mxu0 %v16468_v29  ;;  %14548 = vmatpush3.bf16.msra.mxu0 %v14545_v10  ;;  %v21156_v29 = vld [vmem:[#allocation25_spill] sm:$0xff] }
 0x241   :  { %14550 = vmatprep.subr.bf16.mxu0 %v16802_v15  ;;  %v16910_v10 = vld [vmem:[#allocation3 + $0xe1] sm:$0xff] }
 0x243   :  { %12526 = vmatmul.mubr.f32.gmra.mrb[16].mxu0 %v16473_v30  ;;  %v21157_v30 = vld [vmem:[#allocation26_spill] sm:$0xff] }
 0x244   :  { %12528 = vmatprep.mubr.f32.mxu0 %v16475_v31  ;;  %v21158_v31 = vld [vmem:[#allocation27_spill] sm:$0xff]  ;;  %21167 = vst [vmem:[#allocation26_spill] sm:$0xff] %v16997_v18 }
 0x245   :  { %21168 = vst [vmem:[#allocation27_spill] sm:$0xff] %v17001_v12 }
 0x247   :  { %12529 = vmatmul.mubr.f32.gmra.mrb[18].mxu0 %v16479_v32  ;;  %v21159_v32 = vld [vmem:[#allocation28_spill] sm:$0xff] }
 0x248   :  { %12531 = vmatprep.mubr.f32.mxu0 %v16481_v33  ;;  %v21160_v33 = vld [vmem:[#allocation29_spill] sm:$0xff] }
 0x249   :  { %21170 = vst [vmem:[#allocation29_spill] sm:$0xff] %v17007_v27 }
 0x24b   :  { %12532 = vmatmul.mubr.f32.gmra.mrb[20].mxu0 %v16485_v34  ;;  %v16855_v34 = vld [vmem:[#allocation3 + $0x330] sm:$0xff] }
 0x24c   :  { %12534 = vmatprep.mubr.f32.mxu0 %v16487_v35  ;;  %v21161_v35 = vld [vmem:[#allocation30_spill] sm:$0xff] }
 0x24d   :  { %21171 = vst [vmem:[#allocation30_spill] sm:$0xff] %v17009_v59 }
 0x24f   :  { %12535 = vmatmul.mubr.f32.gmra.mrb[22].mxu0 %v16491_v36  ;;  %v16859_v36 = vld [vmem:[#allocation3 + $0x338] sm:$0xff] }
 0x250   :  { %12537 = vmatprep.mubr.f32.mxu0 %v16493_v37  ;;  %v2106_v37 = vld [vmem:[#allocation3 + $0x19] sm:$0xff] }
 0x253   :  { %12538 = vmatmul.mubr.f32.gmra.mrb[24].mxu0 %v16497_v38  ;;  %v2703_v38 = vld [vmem:[#allocation6 + $0x290] sm:$0xff] }
 0x254   :  { %12540 = vmatprep.mubr.f32.mxu0 %v16499_v39  ;;  %v2704_v39 = vld [vmem:[#allocation6 + $0x298] sm:$0xff] }
 0x257   :  { %12541 = vmatmul.mubr.f32.gmra.mrb[26].mxu0 %v16503_v40  ;;  %v2107_v40 = vld [vmem:[#allocation3 + $0x21] sm:$0xff] }
 0x258   :  { %12543 = vmatprep.mubr.f32.mxu0 %v16505_v41  ;;  %v16862_v41 = vld [vmem:[#allocation3 + $0x31] sm:$0xff] }
 0x25b   :  { %12544 = vmatmul.mubr.f32.gmra.mrb[28].mxu0 %v16509_v42  ;;  %v14553_v42 = vpack.c.bf16 %v2704_v39, %v2703_v38  ;;  %v2138_v38 = vld [vmem:[#allocation3 + $0x1c9] sm:$0xff]  ;;  %v2139_v39 = vld [vmem:[#allocation3 + $0x1d1] sm:$0xff] }
 0x25c   :  { %12546 = vmatprep.mubr.f32.mxu0 %v16819_v16 }
 0x25f   :  { %12547 = vmatmul.mubr.f32.gmra.mrb[30].mxu0 %v16823_v20 }
 0x260   :  { %12549 = vmatprep.mubr.f32.mxu0 %v16512_v45  ;;  %v2705_v45 = vld [vmem:[#allocation6 + $0x2a0] sm:$0xff] }
 0x263   :  { %12550 = vmatmul.mubr.f32.gmra.mrb[32].mxu0 %v16515_v46  ;;  %v2706_v46 = vld [vmem:[#allocation6 + $0x2a8] sm:$0xff] }
 0x264   :  { %12552 = vmatprep.mubr.f32.mxu0 %v16517_v47  ;;  %v16866_v47 = vld [vmem:[#allocation3 + $0x39] sm:$0xff] }
 0x267   :  { %12553 = vmatmul.mubr.f32.gmra.mrb[34].mxu0 %v16521_v48  ;;  %v16868_v48 = vld [vmem:[#allocation3 + $0x49] sm:$0xff] }
 0x268   :  { %12555 = vmatprep.mubr.f32.mxu0 %v16523_v49  ;;  %v14557_v49 = vpack.c.bf16 %v2706_v46, %v2705_v45  ;;  %v16961_v45 = vld [vmem:[#allocation3 + $0x1f9] sm:$0xff]  ;;  %v16965_v46 = vld [vmem:[#allocation3 + $0x201] sm:$0xff] }
 0x26b   :  { %12556 = vmatmul.mubr.f32.gmra.mrb[36].mxu0 %v16527_v50  ;;  %v2707_v50 = vld [vmem:[#allocation6 + $0x2b0] sm:$0xff] }
 0x26c   :  { %12558 = vmatprep.mubr.f32.mxu0 %v16529_v51  ;;  %v2708_v51 = vld [vmem:[#allocation6 + $0x2b8] sm:$0xff] }
 0x26f   :  { %12559 = vmatmul.mubr.f32.gmra.mrb[38].mxu0 %v16533_v52  ;;  %v16872_v52 = vld [vmem:[#allocation3 + $0x51] sm:$0xff] }
 0x270   :  { %12561 = vmatprep.mubr.f32.mxu0 %v16535_v53  ;;  %v16874_v53 = vld [vmem:[#allocation3 + $0x61] sm:$0xff] }
 0x273   :  { %12562 = vmatmul.mubr.f32.gmra.mrb[40].mxu0 %v16539_v54  ;;  %v14561_v54 = vpack.c.bf16 %v2708_v51, %v2707_v50  ;;  %v16971_v50 = vld [vmem:[#allocation3 + $0x219] sm:$0xff]  ;;  %v16973_v51 = vld [vmem:[#allocation3 + $0x229] sm:$0xff] }
 0x274   :  { %12564 = vmatprep.mubr.f32.mxu0 %v16541_v56  ;;  %v2709_v56 = vld [vmem:[#allocation6 + $0x2c0] sm:$0xff] }
 0x277   :  { %12565 = vmatmul.mubr.f32.gmra.mrb[42].mxu0 %v16545_v57  ;;  %v2710_v57 = vld [vmem:[#allocation6 + $0x2c8] sm:$0xff] }
 0x278   :  { %12567 = vmatprep.mubr.f32.mxu0 %v16547_v58  ;;  %v16878_v58 = vld [vmem:[#allocation3 + $0x69] sm:$0xff] }
 0x27b   :  { %12568 = vmatmul.mubr.f32.gmra.mrb[44].mxu0 %v16551_v61  ;;  %v16880_v61 = vld [vmem:[#allocation3 + $0x79] sm:$0xff] }
 0x27c   :  { %12570 = vmatprep.mubr.f32.mxu0 %v16553_v62  ;;  %v14565_v62 = vpack.c.bf16 %v2710_v57, %v2709_v56  ;;  %v16979_v56 = vld [vmem:[#allocation3 + $0x241] sm:$0xff]  ;;  %v16983_v57 = vld [vmem:[#allocation3 + $0x249] sm:$0xff] }
 0x27d   :  { %21162 = vst [vmem:[#allocation21_spill] sm:$0xff] %v16983_v57 }
 0x27f   :  { %12571 = vmatmul.mubr.f32.gmra.mrb[46].mxu0 %v16557_v63  ;;  %v2711_v63 = vld [vmem:[#allocation6 + $0x2d0] sm:$0xff] }
 0x280   :  { %12573 = vmatprep.mubr.f32.mxu0 %v16559_v2  ;;  %v2712_v2 = vld [vmem:[#allocation6 + $0x2d8] sm:$0xff] }
 0x283   :  { %12574 = vmatmul.mubr.f32.gmra.mrb[48].mxu0 %v16563_v3  ;;  %v16884_v3 = vld [vmem:[#allocation3 + $0x81] sm:$0xff] }
 0x284   :  { %12576 = vmatprep.mubr.f32.mxu0 %v16565_v4  ;;  %v16886_v4 = vld [vmem:[#allocation3 + $0x91] sm:$0xff] }
 0x287   :  { %12577 = vmatmul.mubr.f32.gmra.mrb[50].mxu0 %v16569_v7  ;;  %v14569_v7 = vpack.c.bf16 %v2712_v2, %v2711_v63  ;;  %v16989_v63 = vld [vmem:[#allocation3 + $0x261] sm:$0xff]  ;;  %v16991_v2 = vld [vmem:[#allocation3 + $0x271] sm:$0xff] }
 0x288   :  { %12579 = vmatprep.mubr.f32.mxu0 %v21152_v21  ;;  %v16923_v21 = vld [vmem:[#allocation3 + $0x111] sm:$0xff]  ;;  %21164 = vst [vmem:[#allocation23_spill] sm:$0xff] %v16989_v63  ;;  %21165 = vst [vmem:[#allocation24_spill] sm:$0xff] %v16991_v2 }
 0x28b   :  { %12580 = vmatmul.mubr.f32.gmra.mrb[52].mxu0 %v21153_v25  ;;  %v16925_v25 = vld [vmem:[#allocation3 + $0x121] sm:$0xff] }
 0x28c   :  { %12582 = vmatprep.mubr.f32.mxu0 %v21154_v26  ;;  %v16929_v26 = vld [vmem:[#allocation3 + $0x129] sm:$0xff] }
 0x28f   :  { %12583 = vmatmul.mubr.f32.gmra.mrb[54].mxu0 %v21155_v28  ;;  %v16931_v28 = vld [vmem:[#allocation3 + $0x139] sm:$0xff] }
 0x290   :  { %12585 = vmatprep.mubr.f32.mxu0 %v21156_v29  ;;  %v16935_v29 = vld [vmem:[#allocation3 + $0x141] sm:$0xff] }
 0x293   :  { %12586 = vmatmul.mubr.f32.gmra.mrb[56].mxu0 %v21157_v30  ;;  %v16937_v30 = vld [vmem:[#allocation3 + $0x151] sm:$0xff] }
 0x294   :  { %12588 = vmatprep.mubr.f32.mxu0 %v21158_v31  ;;  %v16941_v31 = vld [vmem:[#allocation3 + $0x159] sm:$0xff] }
 0x297   :  { %12589 = vmatmul.mubr.f32.gmra.mrb[58].mxu0 %v21159_v32  ;;  %v16943_v32 = vld [vmem:[#allocation3 + $0x169] sm:$0xff] }
 0x298   :  { %12591 = vmatprep.mubr.f32.mxu0 %v21160_v33  ;;  %v16947_v33 = vld [vmem:[#allocation3 + $0x171] sm:$0xff] }
 0x29b   :  { %12592 = vmatmul.mubr.f32.gmra.mrb[60].mxu0 %v21161_v35  ;;  %v16949_v35 = vld [vmem:[#allocation3 + $0x181] sm:$0xff] }
 0x29c   :  { %12594 = vmatprep.mubr.f32.mxu0 %v16855_v34 }
 0x29f   :  { %12595 = vmatmul.mubr.f32.gmra.mrb[62].mxu0 %v16859_v36 }
 0x2a0   :  { %12629 = vmatprep.mubr.f32.mxu0 %v2106_v37  ;;  %v16953_v37 = vld [vmem:[#allocation3 + $0x189] sm:$0xff] }
 0x2a3   :  { %12630 = vmatmul.mubr.f32.vlgmr.msra.gmra.mrb[0].mxu0 %v2107_v40  ;;  %v16956_v40 = vld [vmem:[#allocation3 + $0x1e1] sm:$0xff] }
 0x2a4   :  { %14552 = vmatpush3.bf16.msra.mxu0 %v16802_v15  ;;  %12632 = vmatprep.mubr.f32.mxu0 %v16862_v41  ;;  %v16919_v15 = vld [vmem:[#allocation3 + $0x109] sm:$0xff] }
 0x2a5   :  { %14554 = vmatprep.subr.bf16.mxu0 %v14553_v42 }
 0x2a7   :  { %12633 = vmatmul.mubr.f32.gmra.mrb[2].mxu0 %v16866_v47 }
 0x2a8   :  { %12635 = vmatprep.mubr.f32.mxu0 %v16868_v48  ;;  %14556 = vmatpush3.bf16.msra.mxu0 %v14553_v42  ;;  %v16959_v42 = vld [vmem:[#allocation3 + $0x1e9] sm:$0xff] }
 0x2a9   :  { %14558 = vmatprep.subr.bf16.mxu0 %v14557_v49 }
 0x2ab   :  { %12636 = vmatmul.mubr.f32.gmra.mrb[4].mxu0 %v16872_v52 }
 0x2ac   :  { %12638 = vmatprep.mubr.f32.mxu0 %v16874_v53  ;;  %14560 = vmatpush3.bf16.msra.mxu0 %v14557_v49  ;;  %v16967_v49 = vld [vmem:[#allocation3 + $0x211] sm:$0xff] }
 0x2ad   :  { %14562 = vmatprep.subr.bf16.mxu0 %v14561_v54 }
 0x2af   :  { %12639 = vmatmul.mubr.f32.gmra.mrb[6].mxu0 %v16878_v58 }
 0x2b0   :  { %12641 = vmatprep.mubr.f32.mxu0 %v16880_v61  ;;  %14564 = vmatpush3.bf16.msra.mxu0 %v14561_v54  ;;  %v16977_v54 = vld [vmem:[#allocation3 + $0x231] sm:$0xff] }
 0x2b1   :  { %14566 = vmatprep.subr.bf16.mxu0 %v14565_v62 }
 0x2b3   :  { %12642 = vmatmul.mubr.f32.gmra.mrb[8].mxu0 %v16884_v3 }
 0x2b4   :  { %12644 = vmatprep.mubr.f32.mxu0 %v16886_v4  ;;  %14568 = vmatpush3.bf16.msra.mxu0 %v14565_v62  ;;  %v16985_v62 = vld [vmem:[#allocation3 + $0x259] sm:$0xff] }
 0x2b5   :  { %14570 = vmatprep.subr.bf16.mxu0 %v14569_v7  ;;  %21163 = vst [vmem:[#allocation22_spill] sm:$0xff] %v16985_v62 }
 0x2b7   :  { %12645 = vmatmul.mubr.f32.gmra.mrb[10].mxu0 %v16890_v13 }
 0x2b8   :  { %12647 = vmatprep.mubr.f32.mxu0 %v16892_v55  ;;  %14572 = vmatpush3.bf16.msra.mxu0 %v14569_v7  ;;  %v16995_v7 = vld [vmem:[#allocation3 + $0x279] sm:$0xff] }
 0x2b9   :  { %14574 = vmatprep.subr.bf16.mxu0 %v14573_v44  ;;  %21166 = vst [vmem:[#allocation25_spill] sm:$0xff] %v16995_v7 }
 0x2bb   :  { %12648 = vmatmul.mubr.f32.gmra.mrb[12].mxu0 %v16896_v60 }
 0x2bc   :  { %12650 = vmatprep.mubr.f32.mxu0 %v16898_v19  ;;  %14576 = vmatpush3.bf16.msra.mxu0 %v14573_v44  ;;  %v17003_v44 = vld [vmem:[#allocation3 + $0x2a1] sm:$0xff] }
 0x2bd   :  { %14578 = vmatprep.subr.bf16.mxu0 %v14577_v0  ;;  %21169 = vst [vmem:[#allocation28_spill] sm:$0xff] %v17003_v44 }
 0x2bf   :  { %12651 = vmatmul.mubr.f32.gmra.mrb[14].mxu0 %v16902_v5 }
 0x2c0   :  { %12653 = vmatprep.mubr.f32.mxu0 %v16904_v6  ;;  %14580 = vmatpush3.bf16.msra.mxu0 %v14577_v0  ;;  %v17013_v0 = vld [vmem:[#allocation3 + $0x2c1] sm:$0xff] }
 0x2c1   :  { %14582 = vmatprep.subr.bf16.mxu0 %v16906_v14  ;;  %21172 = vst [vmem:[#allocation86_spill] sm:$0xff] %v17013_v0 }
 0x2c3   :  { %12654 = vmatmul.mubr.f32.gmra.mrb[16].mxu0 %v16910_v10 }
 0x2c4   :  { %12656 = vmatprep.mubr.f32.mxu0 %v16912_v11 }
 0x2c7   :  { %12657 = vmatmul.mubr.f32.gmra.mrb[18].mxu0 %v16917_v23 }
 0x2c8   :  { %12659 = vmatprep.mubr.f32.mxu0 %v16919_v15 }
 0x2cb   :  { %12660 = vmatmul.mubr.f32.gmra.mrb[20].mxu0 %v16923_v21 }
 0x2cc   :  { %12662 = vmatprep.mubr.f32.mxu0 %v16925_v25 }
 0x2cf   :  { %12663 = vmatmul.mubr.f32.gmra.mrb[22].mxu0 %v16929_v26 }
 0x2d0   :  { %12665 = vmatprep.mubr.f32.mxu0 %v16931_v28 }
 0x2d3   :  { %12666 = vmatmul.mubr.f32.gmra.mrb[24].mxu0 %v16935_v29 }
 0x2d4   :  { %12668 = vmatprep.mubr.f32.mxu0 %v16937_v30 }
 0x2d7   :  { %12669 = vmatmul.mubr.f32.gmra.mrb[26].mxu0 %v16941_v31 }
 0x2d8   :  { %12671 = vmatprep.mubr.f32.mxu0 %v16943_v32 }
 0x2db   :  { %12672 = vmatmul.mubr.f32.gmra.mrb[28].mxu0 %v16947_v33 }
 0x2dc   :  { %12674 = vmatprep.mubr.f32.mxu0 %v16949_v35 }
 0x2df   :  { %12675 = vmatmul.mubr.f32.gmra.mrb[30].mxu0 %v16953_v37 }
 0x2e0   :  { %12677 = vmatprep.mubr.f32.mxu0 %v2138_v38  ;;  %v17021_v38 = vld [vmem:[#allocation3 + $0x2e9] sm:$0xff] }
 0x2e1   :  { %21175 = vst [vmem:[#allocation89_spill] sm:$0xff] %v17021_v38 }
 0x2e3   :  { %12678 = vmatmul.mubr.f32.gmra.mrb[32].mxu0 %v2139_v39  ;;  %v17025_v39 = vld [vmem:[#allocation3 + $0x2f1] sm:$0xff] }
 0x2e4   :  { %12680 = vmatprep.mubr.f32.mxu0 %v16956_v40  ;;  %21176 = vst [vmem:[#allocation90_spill] sm:$0xff] %v17025_v39 }
 0x2e7   :  { %12681 = vmatmul.mubr.f32.gmra.mrb[34].mxu0 %v16959_v42 }
 0x2e8   :  { %12683 = vmatprep.mubr.f32.mxu0 %v16961_v45 }
 0x2eb   :  { %12684 = vmatmul.mubr.f32.gmra.mrb[36].mxu0 %v16965_v46 }
 0x2ec   :  { %12686 = vmatprep.mubr.f32.mxu0 %v16967_v49 }
 0x2ef   :  { %12687 = vmatmul.mubr.f32.gmra.mrb[38].mxu0 %v16971_v50 }
 0x2f0   :  { %12689 = vmatprep.mubr.f32.mxu0 %v16973_v51 }
 0x2f3   :  { %12690 = vmatmul.mubr.f32.gmra.mrb[40].mxu0 %v16977_v54 }
 0x2f4   :  { %12692 = vmatprep.mubr.f32.mxu0 %v16979_v56 }
 0x2f7   :  { %12693 = vmatmul.mubr.f32.gmra.mrb[42].mxu0 %v16983_v57  ;;  %v21191_v57 = vld [vmem:[#allocation39_spill] sm:$0xff] }
 0x2f8   :  { %12695 = vmatprep.mubr.f32.mxu0 %v16985_v62  ;;  %v21187_v62 = vld [vmem:[#allocation35_spill] sm:$0xff] }
 0x2fb   :  { %12696 = vmatmul.mubr.f32.gmra.mrb[44].mxu0 %v16989_v63  ;;  %v21186_v63 = vld [vmem:[#allocation34_spill] sm:$0xff] }
 0x2fc   :  { %12698 = vmatprep.mubr.f32.mxu0 %v16991_v2  ;;  %v3239_v2 = vld [vmem:[#allocation6 + $0x338] sm:$0xff] }
 0x2ff   :  { %12699 = vmatmul.mubr.f32.gmra.mrb[46].mxu0 %v16995_v7  ;;  %v21185_v7 = vld [vmem:[#allocation33_spill] sm:$0xff] }
 0x300   :  { %12701 = vmatprep.mubr.f32.mxu0 %v16997_v18  ;;  %v3237_v18 = vld [vmem:[#allocation6 + $0x328] sm:$0xff] }
 0x303   :  { %12702 = vmatmul.mubr.f32.gmra.mrb[48].mxu0 %v17001_v12 }
 0x304   :  { %12704 = vmatprep.mubr.f32.mxu0 %v17003_v44  ;;  %v21183_v44 = vld [vmem:[#allocation31_spill] sm:$0xff] }
 0x307   :  { %12705 = vmatmul.mubr.f32.gmra.mrb[50].mxu0 %v17007_v27  ;;  %v17027_v27 = vld [vmem:[#allocation3 + $0x301] sm:$0xff] }
 0x308   :  { %12707 = vmatprep.mubr.f32.mxu0 %v17009_v59  ;;  %21177 = vst [vmem:[#allocation91_spill] sm:$0xff] %v17027_v27  ;;  %v17031_v59 = vld [vmem:[#allocation3 + $0x309] sm:$0xff] }
 0x309   :  { %21178 = vst [vmem:[#allocation92_spill] sm:$0xff] %v17031_v59 }
 0x30b   :  { %12708 = vmatmul.mubr.f32.gmra.mrb[52].mxu0 %v17013_v0  ;;  %v17033_v0 = vld [vmem:[#allocation3 + $0x319] sm:$0xff] }
 0x30c   :  { %12710 = vmatprep.mubr.f32.mxu0 %v17015_v1  ;;  %21179 = vst [vmem:[#allocation93_spill] sm:$0xff] %v17033_v0  ;;  %v17037_v1 = vld [vmem:[#allocation3 + $0x321] sm:$0xff] }
 0x30d   :  { %21180 = vst [vmem:[#allocation94_spill] sm:$0xff] %v17037_v1 }
 0x30f   :  { %12711 = vmatmul.mubr.f32.gmra.mrb[54].mxu0 %v17019_v24  ;;  %v17039_v24 = vld [vmem:[#allocation3 + $0x331] sm:$0xff] }
 0x310   :  { %12713 = vmatprep.mubr.f32.mxu0 %v17021_v38  ;;  %21181 = vst [vmem:[#allocation95_spill] sm:$0xff] %v17039_v24  ;;  %v17043_v38 = vld [vmem:[#allocation3 + $0x339] sm:$0xff] }
 0x311   :  { %21182 = vst [vmem:[#allocation96_spill] sm:$0xff] %v17043_v38 }
 0x313   :  { %12714 = vmatmul.mubr.f32.gmra.mrb[56].mxu0 %v17025_v39  ;;  %v3234_v39 = vld [vmem:[#allocation6 + $0x310] sm:$0xff] }
 0x314   :  { %12716 = vmatprep.mubr.f32.mxu0 %v17027_v27  ;;  %v3235_v27 = vld [vmem:[#allocation6 + $0x318] sm:$0xff] }
 0x315   :  { %v14585_v12 = vpack.c.bf16 %v3235_v27, %v3234_v39  ;;  %v3240_v27 = vld [vmem:[#allocation6 + $0x340] sm:$0xff]  ;;  %v3241_v39 = vld [vmem:[#allocation6 + $0x348] sm:$0xff] }
 0x317   :  { %12717 = vmatmul.mubr.f32.gmra.mrb[58].mxu0 %v17031_v59  ;;  %v3236_v59 = vld [vmem:[#allocation6 + $0x320] sm:$0xff] }
 0x318   :  { %12719 = vmatprep.mubr.f32.mxu0 %v17033_v0  ;;  %v21184_v0 = vld [vmem:[#allocation32_spill] sm:$0xff] }
 0x31b   :  { %12720 = vmatmul.mubr.f32.gmra.mrb[60].mxu0 %v17037_v1  ;;  %v14589_v1 = vpack.c.bf16 %v3237_v18, %v3236_v59  ;;  %v3243_v18 = vld [vmem:[#allocation6 + $0x358] sm:$0xff]  ;;  %v21190_v59 = vld [vmem:[#allocation38_spill] sm:$0xff] }
 0x31c   :  { %12722 = vmatprep.mubr.f32.mxu0 %v17039_v24  ;;  %v3238_v24 = vld [vmem:[#allocation6 + $0x330] sm:$0xff] }
 0x31f   :  { %12723 = vmatmul.mubr.f32.gmra.mrb[62].mxu0 %v17043_v38  ;;  %v21188_v38 = vld [vmem:[#allocation36_spill] sm:$0xff] }
 0x320   :  { %12757 = vmatprep.mubr.f32.mxu0 %v21183_v44  ;;  %v14593_v44 = vpack.c.bf16 %v3239_v2, %v3238_v24  ;;  %v3245_v2 = vld [vmem:[#allocation6 + $0x368] sm:$0xff]  ;;  %v3247_v24 = vld [vmem:[#allocation6 + $0x378] sm:$0xff] }
 0x323   :  { %12758 = vmatmul.mubr.f32.vlgmr.msra.gmra.mrb[0].mxu0 %v21184_v0  ;;  %v21189_v0 = vld [vmem:[#allocation37_spill] sm:$0xff] }
 0x324   :  { %14584 = vmatpush3.bf16.msra.mxu0 %v16906_v14  ;;  %12760 = vmatprep.mubr.f32.mxu0 %v21185_v7  ;;  %v14597_v14 = vpack.c.bf16 %v3241_v39, %v3240_v27  ;;  %v3242_v7 = vld [vmem:[#allocation6 + $0x350] sm:$0xff]  ;;  %v21192_v27 = vld [vmem:[#allocation40_spill] sm:$0xff]  ;;  %v21193_v39 = vld [vmem:[#allocation41_spill] sm:$0xff] }
 0x325   :  { %14586 = vmatprep.subr.bf16.mxu0 %v14585_v12 }
 0x327   :  { %12761 = vmatmul.mubr.f32.gmra.mrb[2].mxu0 %v21186_v63  ;;  %v3244_v63 = vld [vmem:[#allocation6 + $0x360] sm:$0xff] }
 0x328   :  { %12763 = vmatprep.mubr.f32.mxu0 %v21187_v62  ;;  %14588 = vmatpush3.bf16.msra.mxu0 %v14585_v12  ;;  %v14601_v62 = vpack.c.bf16 %v3243_v18, %v3242_v7  ;;  %v14605_v12 = vpack.c.bf16 %v3245_v2, %v3244_v63  ;;  %v21199_v7 = vld [vmem:[#allocation47_spill] sm:$0xff]  ;;  %v21200_v18 = vld [vmem:[#allocation48_spill] sm:$0xff] }
 0x329   :  { %14590 = vmatprep.subr.bf16.mxu0 %v14589_v1  ;;  %v21203_v63 = vld [vmem:[#allocation51_spill] sm:$0xff]  ;;  %v21204_v2 = vld [vmem:[#allocation52_spill] sm:$0xff] }
 0x32b   :  { %12764 = vmatmul.mubr.f32.gmra.mrb[4].mxu0 %v21188_v38  ;;  %v3762_v38 = vld [vmem:[#allocation6 + $0x380] sm:$0xff] }
 0x32c   :  { %12766 = vmatprep.mubr.f32.mxu0 %v21189_v0  ;;  %14592 = vmatpush3.bf16.msra.mxu0 %v14589_v1  ;;  %v3246_v1 = vld [vmem:[#allocation6 + $0x370] sm:$0xff]  ;;  %v21195_v0 = vld [vmem:[#allocation43_spill] sm:$0xff] }
 0x32d   :  { %14594 = vmatprep.subr.bf16.mxu0 %v14593_v44 }
 0x32f   :  { %12767 = vmatmul.mubr.f32.gmra.mrb[6].mxu0 %v21190_v59  ;;  %v21201_v59 = vld [vmem:[#allocation49_spill] sm:$0xff] }
 0x330   :  { %12769 = vmatprep.mubr.f32.mxu0 %v21191_v57  ;;  %14596 = vmatpush3.bf16.msra.mxu0 %v14593_v44  ;;  %v14609_v57 = vpack.c.bf16 %v3247_v24, %v3246_v1  ;;  %v3763_v44 = vld [vmem:[#allocation6 + $0x388] sm:$0xff]  ;;  %v21206_v1 = vld [vmem:[#allocation54_spill] sm:$0xff]  ;;  %v21207_v24 = vld [vmem:[#allocation55_spill] sm:$0xff] }
 0x331   :  { %14598 = vmatprep.subr.bf16.mxu0 %v14597_v14 }
 0x333   :  { %12770 = vmatmul.mubr.f32.gmra.mrb[8].mxu0 %v16630_v9  ;;  %v17062_v9 = vpack.c.bf16 %v3763_v44, %v3762_v38  ;;  %v21208_v38 = vld [vmem:[#allocation56_spill] sm:$0xff]  ;;  %v17083_v44 = vld [vmem:[#allocation3 + $0x18a] sm:$0xff] }
 0x334   :  { %12772 = vmatprep.mubr.f32.mxu0 %v16632_v43  ;;  %14600 = vmatpush3.bf16.msra.mxu0 %v14597_v14  ;;  %v21194_v43 = vld [vmem:[#allocation42_spill] sm:$0xff] }
 0x335   :  { %14602 = vmatprep.subr.bf16.mxu0 %v14601_v62  ;;  %v21198_v14 = vld [vmem:[#allocation46_spill] sm:$0xff] }
 0x337   :  { %12773 = vmatmul.mubr.f32.gmra.mrb[10].mxu0 %v16636_v17  ;;  %v21196_v17 = vld [vmem:[#allocation44_spill] sm:$0xff] }
 0x338   :  { %12775 = vmatprep.mubr.f32.mxu0 %v16638_v22  ;;  %14604 = vmatpush3.bf16.msra.mxu0 %v14601_v62  ;;  %v21197_v22 = vld [vmem:[#allocation45_spill] sm:$0xff]  ;;  %v21202_v62 = vld [vmem:[#allocation50_spill] sm:$0xff] }
 0x339   :  { %14606 = vmatprep.subr.bf16.mxu0 %v14605_v12 }
 0x33b   :  { %12776 = vmatmul.mubr.f32.gmra.mrb[12].mxu0 %v21192_v27  ;;  %v21209_v27 = vld [vmem:[#allocation57_spill] sm:$0xff] }
 0x33c   :  { %12778 = vmatprep.mubr.f32.mxu0 %v21193_v39  ;;  %14608 = vmatpush3.bf16.msra.mxu0 %v14605_v12  ;;  %v21205_v12 = vld [vmem:[#allocation53_spill] sm:$0xff]  ;;  %v21210_v39 = vld [vmem:[#allocation58_spill] sm:$0xff] }
 0x33d   :  { %14610 = vmatprep.subr.bf16.mxu0 %v14609_v57 }
 0x33f   :  { %12779 = vmatmul.mubr.f32.gmra.mrb[14].mxu0 %v21194_v43  ;;  %v21211_v43 = vld [vmem:[#allocation59_spill] sm:$0xff] }
 0x340   :  { %12781 = vmatprep.mubr.f32.mxu0 %v21195_v0  ;;  %14612 = vmatpush3.bf16.msra.mxu0 %v14609_v57  ;;  %v17079_v57 = vld [vmem:[#allocation3 + $0x182] sm:$0xff] }
 0x341   :  { %14614 = vmatprep.subr.bf16.mxu0 %v17062_v9  ;;  %v21212_v0 = vld [vmem:[#allocation60_spill] sm:$0xff] }
 0x343   :  { %12782 = vmatmul.mubr.f32.gmra.mrb[16].mxu0 %v21196_v17  ;;  %v21213_v17 = vld [vmem:[#allocation61_spill] sm:$0xff] }
 0x344   :  { %12784 = vmatprep.mubr.f32.mxu0 %v21197_v22  ;;  %v21214_v22 = vld [vmem:[#allocation62_spill] sm:$0xff] }
 0x347   :  { %12785 = vmatmul.mubr.f32.gmra.mrb[18].mxu0 %v21198_v14  ;;  %v21215_v14 = vld [vmem:[#allocation63_spill] sm:$0xff] }
 0x348   :  { %12787 = vmatprep.mubr.f32.mxu0 %v21199_v7  ;;  %v21216_v7 = vld [vmem:[#allocation64_spill] sm:$0xff] }
 0x34b   :  { %12788 = vmatmul.mubr.f32.gmra.mrb[20].mxu0 %v21200_v18  ;;  %v21217_v18 = vld [vmem:[#allocation65_spill] sm:$0xff] }
 0x34c   :  { %12790 = vmatprep.mubr.f32.mxu0 %v21201_v59  ;;  %v21218_v59 = vld [vmem:[#allocation66_spill] sm:$0xff] }
 0x34f   :  { %12791 = vmatmul.mubr.f32.gmra.mrb[22].mxu0 %v21202_v62  ;;  %v21219_v62 = vld [vmem:[#allocation67_spill] sm:$0xff] }
 0x350   :  { %12793 = vmatprep.mubr.f32.mxu0 %v21203_v63  ;;  %v21220_v63 = vld [vmem:[#allocation68_spill] sm:$0xff] }
 0x353   :  { %12794 = vmatmul.mubr.f32.gmra.mrb[24].mxu0 %v21204_v2  ;;  %v21221_v2 = vld [vmem:[#allocation69_spill] sm:$0xff] }
 0x354   :  { %12796 = vmatprep.mubr.f32.mxu0 %v21205_v12  ;;  %v21222_v12 = vld [vmem:[#allocation70_spill] sm:$0xff] }
 0x357   :  { %12797 = vmatmul.mubr.f32.gmra.mrb[26].mxu0 %v21206_v1  ;;  %v21223_v1 = vld [vmem:[#allocation71_spill] sm:$0xff] }
 0x358   :  { %12799 = vmatprep.mubr.f32.mxu0 %v21207_v24  ;;  %v21224_v24 = vld [vmem:[#allocation72_spill] sm:$0xff] }
 0x35b   :  { %12800 = vmatmul.mubr.f32.gmra.mrb[28].mxu0 %v21208_v38  ;;  %v21225_v38 = vld [vmem:[#allocation73_spill] sm:$0xff] }
 0x35c   :  { %12802 = vmatprep.mubr.f32.mxu0 %v17079_v57 }
 0x35f   :  { %12803 = vmatmul.mubr.f32.gmra.mrb[30].mxu0 %v17083_v44 }
 0x360   :  { %12805 = vmatprep.mubr.f32.mxu0 %v21209_v27  ;;  %v21226_v27 = vld [vmem:[#allocation74_spill] sm:$0xff] }
 0x363   :  { %12806 = vmatmul.mubr.f32.gmra.mrb[32].mxu0 %v21210_v39  ;;  %v21227_v39 = vld [vmem:[#allocation75_spill] sm:$0xff] }
 0x364   :  { %12808 = vmatprep.mubr.f32.mxu0 %v21211_v43  ;;  %v21228_v43 = vld [vmem:[#allocation76_spill] sm:$0xff] }
 0x367   :  { %12809 = vmatmul.mubr.f32.gmra.mrb[34].mxu0 %v21212_v0  ;;  %v21229_v0 = vld [vmem:[#allocation77_spill] sm:$0xff] }
 0x368   :  { %12811 = vmatprep.mubr.f32.mxu0 %v21213_v17  ;;  %v21230_v17 = vld [vmem:[#allocation78_spill] sm:$0xff] }
 0x36b   :  { %12812 = vmatmul.mubr.f32.gmra.mrb[36].mxu0 %v21214_v22  ;;  %v21231_v22 = vld [vmem:[#allocation79_spill] sm:$0xff] }
 0x36c   :  { %12814 = vmatprep.mubr.f32.mxu0 %v21215_v14  ;;  %v21232_v14 = vld [vmem:[#allocation80_spill] sm:$0xff] }
 0x36f   :  { %12815 = vmatmul.mubr.f32.gmra.mrb[38].mxu0 %v21216_v7  ;;  %v21233_v7 = vld [vmem:[#allocation81_spill] sm:$0xff] }
 0x370   :  { %12817 = vmatprep.mubr.f32.mxu0 %v21217_v18  ;;  %v21234_v18 = vld [vmem:[#allocation82_spill] sm:$0xff] }
 0x373   :  { %12818 = vmatmul.mubr.f32.gmra.mrb[40].mxu0 %v21218_v59  ;;  %v21235_v59 = vld [vmem:[#allocation83_spill] sm:$0xff] }
 0x374   :  { %12820 = vmatprep.mubr.f32.mxu0 %v21219_v62  ;;  %v21236_v62 = vld [vmem:[#allocation84_spill] sm:$0xff] }
 0x377   :  { %12821 = vmatmul.mubr.f32.gmra.mrb[42].mxu0 %v21220_v63  ;;  %v21237_v63 = vld [vmem:[#allocation85_spill] sm:$0xff] }
 0x378   :  { %12823 = vmatprep.mubr.f32.mxu0 %v21221_v2  ;;  %v17115_v2 = vld [vmem:[#allocation3 + $0x332] sm:$0xff] }
 0x37b   :  { %12824 = vmatmul.mubr.f32.gmra.mrb[44].mxu0 %v21222_v12  ;;  %v17119_v12 = vld [vmem:[#allocation3 + $0x33a] sm:$0xff] }
 0x37c   :  { %12826 = vmatprep.mubr.f32.mxu0 %v21223_v1  ;;  %v3167_v1 = vld [vmem:[#allocation3 + $0x30] sm:$0xff] }
 0x37f   :  { %12827 = vmatmul.mubr.f32.gmra.mrb[46].mxu0 %v21224_v24  ;;  %v3764_v24 = vld [vmem:[#allocation6 + $0x390] sm:$0xff] }
 0x380   :  { %12829 = vmatprep.mubr.f32.mxu0 %v21225_v38  ;;  %v3765_v38 = vld [vmem:[#allocation6 + $0x398] sm:$0xff] }
 0x383   :  { %12830 = vmatmul.mubr.f32.gmra.mrb[48].mxu0 %v21226_v27  ;;  %v3168_v27 = vld [vmem:[#allocation3 + $0x38] sm:$0xff] }
 0x384   :  { %12832 = vmatprep.mubr.f32.mxu0 %v21227_v39  ;;  %v3169_v39 = vld [vmem:[#allocation3 + $0x48] sm:$0xff] }
 0x387   :  { %12833 = vmatmul.mubr.f32.gmra.mrb[50].mxu0 %v21228_v43  ;;  %v14617_v43 = vpack.c.bf16 %v3765_v38, %v3764_v24  ;;  %v3771_v24 = vld [vmem:[#allocation6 + $0x3c8] sm:$0xff]  ;;  %v3174_v38 = vld [vmem:[#allocation3 + $0x80] sm:$0xff] }
 0x388   :  { %12835 = vmatprep.mubr.f32.mxu0 %v21229_v0  ;;  %v3766_v0 = vld [vmem:[#allocation6 + $0x3a0] sm:$0xff] }
 0x38b   :  { %12836 = vmatmul.mubr.f32.gmra.mrb[52].mxu0 %v21230_v17  ;;  %v3767_v17 = vld [vmem:[#allocation6 + $0x3a8] sm:$0xff] }
 0x38c   :  { %12838 = vmatprep.mubr.f32.mxu0 %v21231_v22  ;;  %v3171_v22 = vld [vmem:[#allocation3 + $0x60] sm:$0xff] }
 0x38f   :  { %12839 = vmatmul.mubr.f32.gmra.mrb[54].mxu0 %v21232_v14  ;;  %v14621_v14 = vpack.c.bf16 %v3767_v17, %v3766_v0  ;;  %v3773_v0 = vld [vmem:[#allocation6 + $0x3d8] sm:$0xff] }
 0x390   :  { %12841 = vmatprep.mubr.f32.mxu0 %v21233_v7  ;;  %v3768_v7 = vld [vmem:[#allocation6 + $0x3b0] sm:$0xff]  ;;  %v3176_v17 = vld [vmem:[#allocation3 + $0x98] sm:$0xff] }
 0x393   :  { %12842 = vmatmul.mubr.f32.gmra.mrb[56].mxu0 %v21234_v18  ;;  %v3769_v18 = vld [vmem:[#allocation6 + $0x3b8] sm:$0xff] }
 0x394   :  { %12844 = vmatprep.mubr.f32.mxu0 %v21235_v59  ;;  %v3172_v59 = vld [vmem:[#allocation3 + $0x68] sm:$0xff] }
 0x397   :  { %12845 = vmatmul.mubr.f32.gmra.mrb[58].mxu0 %v21236_v62  ;;  %v3173_v62 = vld [vmem:[#allocation3 + $0x78] sm:$0xff] }
 0x398   :  { %12847 = vmatprep.mubr.f32.mxu0 %v21237_v63  ;;  %v14625_v63 = vpack.c.bf16 %v3769_v18, %v3768_v7  ;;  %v3775_v7 = vld [vmem:[#allocation6 + $0x3e8] sm:$0xff]  ;;  %v3178_v18 = vld [vmem:[#allocation3 + $0xb0] sm:$0xff] }
 0x39b   :  { %12848 = vmatmul.mubr.f32.gmra.mrb[60].mxu0 %v16783_v8  ;;  %v3170_v8 = vld [vmem:[#allocation3 + $0x50] sm:$0xff] }
 0x39c   :  { %12850 = vmatprep.mubr.f32.mxu0 %v17115_v2 }
 0x39f   :  { %12851 = vmatmul.mubr.f32.gmra.mrb[62].mxu0 %v17119_v12 }
 0x3a0   :  { %12885 = vmatprep.mubr.f32.mxu0 %v3167_v1  ;;  %v3770_v1 = vld [vmem:[#allocation6 + $0x3c0] sm:$0xff] }
 0x3a3   :  { %12886 = vmatmul.mubr.f32.vlgmr.msra.gmra.mrb[0].mxu0 %v3168_v27  ;;  %v14629_v27 = vpack.c.bf16 %v3771_v24, %v3770_v1  ;;  %v3777_v1 = vld [vmem:[#allocation6 + $0x3f8] sm:$0xff]  ;;  %v3180_v24 = vld [vmem:[#allocation3 + $0xc8] sm:$0xff] }
 0x3a4   :  { %14616 = vmatpush3.bf16.msra.mxu0 %v17062_v9  ;;  %12888 = vmatprep.mubr.f32.mxu0 %v3169_v39  ;;  %v3175_v9 = vld [vmem:[#allocation3 + $0x90] sm:$0xff] }
 0x3a5   :  { %14618 = vmatprep.subr.bf16.mxu0 %v14617_v43  ;;  %v3772_v39 = vld [vmem:[#allocation6 + $0x3d0] sm:$0xff] }
 0x3a7   :  { %12889 = vmatmul.mubr.f32.gmra.mrb[2].mxu0 %v3170_v8  ;;  %v3177_v8 = vld [vmem:[#allocation3 + $0xa8] sm:$0xff] }
 0x3a8   :  { %12891 = vmatprep.mubr.f32.mxu0 %v3171_v22  ;;  %14620 = vmatpush3.bf16.msra.mxu0 %v14617_v43  ;;  %v14633_v43 = vpack.c.bf16 %v3773_v0, %v3772_v39  ;;  %v3774_v22 = vld [vmem:[#allocation6 + $0x3e0] sm:$0xff]  ;;  %v4293_v39 = vld [vmem:[#allocation6 + $0x408] sm:$0xff] }
 0x3a9   :  { %14622 = vmatprep.subr.bf16.mxu0 %v14621_v14  ;;  %v3182_v0 = vld [vmem:[#allocation3 + $0xe0] sm:$0xff] }
 0x3ab   :  { %12892 = vmatmul.mubr.f32.gmra.mrb[4].mxu0 %v3172_v59  ;;  %v3179_v59 = vld [vmem:[#allocation3 + $0xc0] sm:$0xff] }
 0x3ac   :  { %12894 = vmatprep.mubr.f32.mxu0 %v3173_v62  ;;  %14624 = vmatpush3.bf16.msra.mxu0 %v14621_v14  ;;  %v14637_v14 = vpack.c.bf16 %v3775_v7, %v3774_v22  ;;  %v3776_v62 = vld [vmem:[#allocation6 + $0x3f0] sm:$0xff]  ;;  %v3185_v22 = vld [vmem:[#allocation3 + $0x108] sm:$0xff]  ;;  %v3187_v7 = vld [vmem:[#allocation3 + $0x120] sm:$0xff] }
 0x3ad   :  { %14626 = vmatprep.subr.bf16.mxu0 %v14625_v63 }
 0x3af   :  { %12895 = vmatmul.mubr.f32.gmra.mrb[6].mxu0 %v3174_v38  ;;  %v3181_v38 = vld [vmem:[#allocation3 + $0xd8] sm:$0xff] }
 0x3b0   :  { %12897 = vmatprep.mubr.f32.mxu0 %v3175_v9  ;;  %14628 = vmatpush3.bf16.msra.mxu0 %v14625_v63  ;;  %v14641_v63 = vpack.c.bf16 %v3777_v1, %v3776_v62  ;;  %v4292_v9 = vld [vmem:[#allocation6 + $0x400] sm:$0xff]  ;;  %v3191_v62 = vld [vmem:[#allocation3 + $0x150] sm:$0xff]  ;;  %v3192_v1 = vld [vmem:[#allocation3 + $0x158] sm:$0xff] }
 0x3b1   :  { %14630 = vmatprep.subr.bf16.mxu0 %v14629_v27 }
 0x3b3   :  { %12898 = vmatmul.mubr.f32.gmra.mrb[8].mxu0 %v3176_v17  ;;  %v3183_v17 = vld [vmem:[#allocation3 + $0xf0] sm:$0xff] }
 0x3b4   :  { %12900 = vmatprep.mubr.f32.mxu0 %v3177_v8  ;;  %14632 = vmatpush3.bf16.msra.mxu0 %v14629_v27  ;;  %v17123_v27 = vpack.c.bf16 %v4293_v39, %v4292_v9  ;;  %v3184_v8 = vld [vmem:[#allocation3 + $0xf8] sm:$0xff]  ;;  %v3198_v9 = vld [vmem:[#allocation3 + $0x1a0] sm:$0xff] }
 0x3b5   :  { %14634 = vmatprep.subr.bf16.mxu0 %v14633_v43  ;;  %v3199_v39 = vld [vmem:[#allocation3 + $0x1e0] sm:$0xff] }
 0x3b7   :  { %12901 = vmatmul.mubr.f32.gmra.mrb[10].mxu0 %v3178_v18  ;;  %v3188_v18 = vld [vmem:[#allocation3 + $0x128] sm:$0xff] }
 0x3b8   :  { %12903 = vmatprep.mubr.f32.mxu0 %v3179_v59  ;;  %14636 = vmatpush3.bf16.msra.mxu0 %v14633_v43  ;;  %v3186_v43 = vld [vmem:[#allocation3 + $0x110] sm:$0xff]  ;;  %v3189_v59 = vld [vmem:[#allocation3 + $0x138] sm:$0xff] }
 0x3b9   :  { %14638 = vmatprep.subr.bf16.mxu0 %v14637_v14 }
 0x3bb   :  { %12904 = vmatmul.mubr.f32.gmra.mrb[12].mxu0 %v3180_v24  ;;  %v3193_v24 = vld [vmem:[#allocation3 + $0x168] sm:$0xff] }
 0x3bc   :  { %12906 = vmatprep.mubr.f32.mxu0 %v3181_v38  ;;  %14640 = vmatpush3.bf16.msra.mxu0 %v14637_v14  ;;  %v3190_v14 = vld [vmem:[#allocation3 + $0x140] sm:$0xff]  ;;  %v3194_v38 = vld [vmem:[#allocation3 + $0x170] sm:$0xff] }
 0x3bd   :  { %14642 = vmatprep.subr.bf16.mxu0 %v14641_v63 }
 0x3bf   :  { %12907 = vmatmul.mubr.f32.gmra.mrb[14].mxu0 %v3182_v0  ;;  %v3200_v0 = vld [vmem:[#allocation3 + $0x1e8] sm:$0xff] }
 0x3c0   :  { %12909 = vmatprep.mubr.f32.mxu0 %v3183_v17  ;;  %14644 = vmatpush3.bf16.msra.mxu0 %v14641_v63  ;;  %v3197_v63 = vld [vmem:[#allocation3 + $0x198] sm:$0xff] }
 0x3c1   :  { %14646 = vmatprep.subr.bf16.mxu0 %v17123_v27  ;;  %v3201_v17 = vld [vmem:[#allocation3 + $0x1f8] sm:$0xff] }
 0x3c3   :  { %12910 = vmatmul.mubr.f32.gmra.mrb[16].mxu0 %v3184_v8  ;;  %v3202_v8 = vld [vmem:[#allocation3 + $0x200] sm:$0xff] }
 0x3c4   :  { %12912 = vmatprep.mubr.f32.mxu0 %v3185_v22  ;;  %v3203_v22 = vld [vmem:[#allocation3 + $0x210] sm:$0xff] }
 0x3c7   :  { %12913 = vmatmul.mubr.f32.gmra.mrb[18].mxu0 %v3186_v43  ;;  %v3204_v43 = vld [vmem:[#allocation3 + $0x218] sm:$0xff] }
 0x3c8   :  { %12915 = vmatprep.mubr.f32.mxu0 %v3187_v7  ;;  %v3205_v7 = vld [vmem:[#allocation3 + $0x228] sm:$0xff] }
 0x3cb   :  { %12916 = vmatmul.mubr.f32.gmra.mrb[20].mxu0 %v3188_v18  ;;  %v3207_v18 = vld [vmem:[#allocation3 + $0x240] sm:$0xff] }
 0x3cc   :  { %12918 = vmatprep.mubr.f32.mxu0 %v3189_v59  ;;  %v3209_v59 = vld [vmem:[#allocation3 + $0x258] sm:$0xff] }
 0x3cf   :  { %12919 = vmatmul.mubr.f32.gmra.mrb[22].mxu0 %v3190_v14  ;;  %v3210_v14 = vld [vmem:[#allocation3 + $0x260] sm:$0xff] }
 0x3d0   :  { %12921 = vmatprep.mubr.f32.mxu0 %v3191_v62  ;;  %v3211_v62 = vld [vmem:[#allocation3 + $0x270] sm:$0xff] }
 0x3d3   :  { %12922 = vmatmul.mubr.f32.gmra.mrb[24].mxu0 %v3192_v1  ;;  %v3212_v1 = vld [vmem:[#allocation3 + $0x278] sm:$0xff] }
 0x3d4   :  { %12924 = vmatprep.mubr.f32.mxu0 %v3193_v24  ;;  %v3213_v24 = vld [vmem:[#allocation3 + $0x288] sm:$0xff] }
 0x3d7   :  { %12925 = vmatmul.mubr.f32.gmra.mrb[26].mxu0 %v3194_v38  ;;  %v3214_v38 = vld [vmem:[#allocation3 + $0x290] sm:$0xff] }
 0x3d8   :  { %12927 = vmatprep.mubr.f32.mxu0 %v16819_v16  ;;  %v3206_v16 = vld [vmem:[#allocation3 + $0x230] sm:$0xff] }
 0x3db   :  { %12928 = vmatmul.mubr.f32.gmra.mrb[28].mxu0 %v16823_v20  ;;  %v3208_v20 = vld [vmem:[#allocation3 + $0x248] sm:$0xff] }
 0x3dc   :  { %12930 = vmatprep.mubr.f32.mxu0 %v3197_v63  ;;  %v3215_v63 = vld [vmem:[#allocation3 + $0x2a0] sm:$0xff] }
 0x3df   :  { %12931 = vmatmul.mubr.f32.gmra.mrb[30].mxu0 %v3198_v9  ;;  %v3216_v9 = vld [vmem:[#allocation3 + $0x2a8] sm:$0xff] }
 0x3e0   :  { %12933 = vmatprep.mubr.f32.mxu0 %v3199_v39  ;;  %v3217_v39 = vld [vmem:[#allocation3 + $0x2b8] sm:$0xff] }
 0x3e3   :  { %12934 = vmatmul.mubr.f32.gmra.mrb[32].mxu0 %v3200_v0  ;;  %v3218_v0 = vld [vmem:[#allocation3 + $0x2c0] sm:$0xff] }
 0x3e4   :  { %12936 = vmatprep.mubr.f32.mxu0 %v3201_v17  ;;  %v3219_v17 = vld [vmem:[#allocation3 + $0x2d0] sm:$0xff] }
 0x3e7   :  { %12937 = vmatmul.mubr.f32.gmra.mrb[34].mxu0 %v3202_v8  ;;  %v3220_v8 = vld [vmem:[#allocation3 + $0x2d8] sm:$0xff] }
 0x3e8   :  { %12939 = vmatprep.mubr.f32.mxu0 %v3203_v22  ;;  %v3221_v22 = vld [vmem:[#allocation3 + $0x2e8] sm:$0xff] }
 0x3eb   :  { %12940 = vmatmul.mubr.f32.gmra.mrb[36].mxu0 %v3204_v43  ;;  %v3222_v43 = vld [vmem:[#allocation3 + $0x2f0] sm:$0xff] }
 0x3ec   :  { %12942 = vmatprep.mubr.f32.mxu0 %v3205_v7  ;;  %v3223_v7 = vld [vmem:[#allocation3 + $0x300] sm:$0xff] }
 0x3ef   :  { %12943 = vmatmul.mubr.f32.gmra.mrb[38].mxu0 %v3206_v16  ;;  %v3224_v16 = vld [vmem:[#allocation3 + $0x308] sm:$0xff] }
 0x3f0   :  { %12945 = vmatprep.mubr.f32.mxu0 %v3207_v18  ;;  %v3225_v18 = vld [vmem:[#allocation3 + $0x318] sm:$0xff] }
 0x3f3   :  { %12946 = vmatmul.mubr.f32.gmra.mrb[40].mxu0 %v3208_v20  ;;  %v3226_v20 = vld [vmem:[#allocation3 + $0x320] sm:$0xff] }
 0x3f4   :  { %12948 = vmatprep.mubr.f32.mxu0 %v3209_v59  ;;  %v3229_v59 = vld [vmem:[#allocation3 + $0x348] sm:$0xff] }
 0x3f7   :  { %12949 = vmatmul.mubr.f32.gmra.mrb[42].mxu0 %v3210_v14  ;;  %v3230_v14 = vld [vmem:[#allocation3 + $0x350] sm:$0xff] }
 0x3f8   :  { %12951 = vmatprep.mubr.f32.mxu0 %v3211_v62  ;;  %v4294_v62 = vld [vmem:[#allocation6 + $0x410] sm:$0xff] }
 0x3fb   :  { %12952 = vmatmul.mubr.f32.gmra.mrb[44].mxu0 %v3212_v1  ;;  %v4295_v1 = vld [vmem:[#allocation6 + $0x418] sm:$0xff] }
 0x3fc   :  { %12954 = vmatprep.mubr.f32.mxu0 %v3213_v24  ;;  %v14649_v24 = vpack.c.bf16 %v4295_v1, %v4294_v62  ;;  %v4241_v62 = vld [vmem:[#allocation3 + $0xda] sm:$0xff]  ;;  %v4242_v1 = vld [vmem:[#allocation3 + $0xe2] sm:$0xff] }
 0x3ff   :  { %12955 = vmatmul.mubr.f32.gmra.mrb[46].mxu0 %v3214_v38  ;;  %v4296_v38 = vld [vmem:[#allocation6 + $0x420] sm:$0xff] }
 0x400   :  { %12957 = vmatprep.mubr.f32.mxu0 %v3215_v63  ;;  %v4297_v63 = vld [vmem:[#allocation6 + $0x428] sm:$0xff] }
 0x403   :  { %12958 = vmatmul.mubr.f32.gmra.mrb[48].mxu0 %v3216_v9  ;;  %v4298_v9 = vld [vmem:[#allocation6 + $0x430] sm:$0xff] }
 0x404   :  { %12960 = vmatprep.mubr.f32.mxu0 %v3217_v39  ;;  %v4300_v39 = vld [vmem:[#allocation6 + $0x440] sm:$0xff] }
 0x407   :  { %12961 = vmatmul.mubr.f32.gmra.mrb[50].mxu0 %v3218_v0  ;;  %v4301_v0 = vld [vmem:[#allocation6 + $0x448] sm:$0xff] }
 0x408   :  { %12963 = vmatprep.mubr.f32.mxu0 %v3219_v17  ;;  %v4305_v17 = vld [vmem:[#allocation6 + $0x468] sm:$0xff] }
 0x40b   :  { %12964 = vmatmul.mubr.f32.gmra.mrb[52].mxu0 %v3220_v8  ;;  %v4307_v8 = vld [vmem:[#allocation6 + $0x478] sm:$0xff] }
 0x40c   :  { %12966 = vmatprep.mubr.f32.mxu0 %v3221_v22  ;;  %v4233_v22 = vld [vmem:[#allocation3 + $0x7a] sm:$0xff] }
 0x40f   :  { %12967 = vmatmul.mubr.f32.gmra.mrb[54].mxu0 %v3222_v43  ;;  %v4234_v43 = vld [vmem:[#allocation3 + $0x82] sm:$0xff] }
 0x410   :  { %12969 = vmatprep.mubr.f32.mxu0 %v3223_v7  ;;  %v4235_v7 = vld [vmem:[#allocation3 + $0x92] sm:$0xff] }
 0x413   :  { %12970 = vmatmul.mubr.f32.gmra.mrb[56].mxu0 %v3224_v16  ;;  %v4236_v16 = vld [vmem:[#allocation3 + $0x9a] sm:$0xff] }
 0x414   :  { %12972 = vmatprep.mubr.f32.mxu0 %v3225_v18  ;;  %v4237_v18 = vld [vmem:[#allocation3 + $0xaa] sm:$0xff] }
 0x417   :  { %12973 = vmatmul.mubr.f32.gmra.mrb[58].mxu0 %v3226_v20  ;;  %v4238_v20 = vld [vmem:[#allocation3 + $0xb2] sm:$0xff] }
 0x418   :  { %12975 = vmatprep.mubr.f32.mxu0 %v16855_v34  ;;  %v14653_v34 = vpack.c.bf16 %v4297_v63, %v4296_v38  ;;  %v4244_v38 = vld [vmem:[#allocation3 + $0xfa] sm:$0xff]  ;;  %v4245_v63 = vld [vmem:[#allocation3 + $0x10a] sm:$0xff] }
 0x41b   :  { %12976 = vmatmul.mubr.f32.gmra.mrb[60].mxu0 %v16859_v36  ;;  %v4299_v36 = vld [vmem:[#allocation6 + $0x438] sm:$0xff] }
 0x41c   :  { %12978 = vmatprep.mubr.f32.mxu0 %v3229_v59  ;;  %v4239_v59 = vld [vmem:[#allocation3 + $0xc2] sm:$0xff] }
 0x41f   :  { %12979 = vmatmul.mubr.f32.gmra.mrb[62].mxu0 %v3230_v14  ;;  %v4240_v14 = vld [vmem:[#allocation3 + $0xca] sm:$0xff] }
 0x420   :  { %13013 = vmatprep.mubr.f32.mxu0 %v16862_v41  ;;  %v14657_v41 = vpack.c.bf16 %v4299_v36, %v4298_v9  ;;  %v4247_v9 = vld [vmem:[#allocation3 + $0x122] sm:$0xff]  ;;  %v4248_v36 = vld [vmem:[#allocation3 + $0x12a] sm:$0xff] }
 0x423   :  { %13014 = vmatmul.mubr.f32.vlgmr.msra.gmra.mrb[0].mxu0 %v16866_v47  ;;  %v14661_v47 = vpack.c.bf16 %v4301_v0, %v4300_v39  ;;  %v4250_v39 = vld [vmem:[#allocation3 + $0x142] sm:$0xff]  ;;  %v4251_v0 = vld [vmem:[#allocation3 + $0x152] sm:$0xff] }
 0x424   :  { %14648 = vmatpush3.bf16.msra.mxu0 %v17123_v27  ;;  %13016 = vmatprep.mubr.f32.mxu0 %v16868_v48  ;;  %v4302_v48 = vld [vmem:[#allocation6 + $0x450] sm:$0xff]  ;;  %v4303_v27 = vld [vmem:[#allocation6 + $0x458] sm:$0xff] }
 0x425   :  { %14650 = vmatprep.subr.bf16.mxu0 %v14649_v24 }
 0x427   :  { %13017 = vmatmul.mubr.f32.gmra.mrb[2].mxu0 %v16872_v52  ;;  %v14665_v52 = vpack.c.bf16 %v4303_v27, %v4302_v48  ;;  %v4253_v48 = vld [vmem:[#allocation3 + $0x16a] sm:$0xff]  ;;  %v4254_v27 = vld [vmem:[#allocation3 + $0x172] sm:$0xff] }
 0x428   :  { %13019 = vmatprep.mubr.f32.mxu0 %v16874_v53  ;;  %14652 = vmatpush3.bf16.msra.mxu0 %v14649_v24  ;;  %v4304_v53 = vld [vmem:[#allocation6 + $0x460] sm:$0xff]  ;;  %v4243_v24 = vld [vmem:[#allocation3 + $0xf2] sm:$0xff] }
 0x429   :  { %14654 = vmatprep.subr.bf16.mxu0 %v14653_v34 }
 0x42b   :  { %13020 = vmatmul.mubr.f32.gmra.mrb[4].mxu0 %v16878_v58  ;;  %v14669_v58 = vpack.c.bf16 %v4305_v17, %v4304_v53  ;;  %v4258_v53 = vld [vmem:[#allocation3 + $0x1a2] sm:$0xff] }
 0x42c   :  { %13022 = vmatprep.mubr.f32.mxu0 %v16880_v61  ;;  %14656 = vmatpush3.bf16.msra.mxu0 %v14653_v34  ;;  %v4306_v61 = vld [vmem:[#allocation6 + $0x470] sm:$0xff]  ;;  %v4259_v17 = vld [vmem:[#allocation3 + $0x1e2] sm:$0xff] }
 0x42d   :  { %14658 = vmatprep.subr.bf16.mxu0 %v14657_v41  ;;  %v4246_v34 = vld [vmem:[#allocation3 + $0x112] sm:$0xff] }
 0x42f   :  { %13023 = vmatmul.mubr.f32.gmra.mrb[6].mxu0 %v16884_v3  ;;  %v14673_v3 = vpack.c.bf16 %v4307_v8, %v4306_v61  ;;  %v4261_v61 = vld [vmem:[#allocation3 + $0x1fa] sm:$0xff]  ;;  %v4262_v8 = vld [vmem:[#allocation3 + $0x202] sm:$0xff] }
 0x430   :  { %13025 = vmatprep.mubr.f32.mxu0 %v16886_v4  ;;  %14660 = vmatpush3.bf16.msra.mxu0 %v14657_v41  ;;  %v3727_v4 = vld [vmem:[#allocation3 + $0x199] sm:$0xff] }
 0x431   :  { %14662 = vmatprep.subr.bf16.mxu0 %v14661_v47  ;;  %v4249_v41 = vld [vmem:[#allocation3 + $0x13a] sm:$0xff] }
 0x433   :  { %13026 = vmatmul.mubr.f32.gmra.mrb[8].mxu0 %v16890_v13  ;;  %v3728_v13 = vld [vmem:[#allocation3 + $0x1a1] sm:$0xff] }
 0x434   :  { %13028 = vmatprep.mubr.f32.mxu0 %v16892_v55  ;;  %14664 = vmatpush3.bf16.msra.mxu0 %v14661_v47  ;;  %v21238_v55 = vld [vmem:[#allocation21_spill] sm:$0xff]  ;;  %v4252_v47 = vld [vmem:[#allocation3 + $0x15a] sm:$0xff] }
 0x435   :  { %14666 = vmatprep.subr.bf16.mxu0 %v14665_v52 }
 0x437   :  { %13029 = vmatmul.mubr.f32.gmra.mrb[10].mxu0 %v16896_v60  ;;  %v21239_v60 = vld [vmem:[#allocation22_spill] sm:$0xff] }
 0x438   :  { %13031 = vmatprep.mubr.f32.mxu0 %v16898_v19  ;;  %14668 = vmatpush3.bf16.msra.mxu0 %v14665_v52  ;;  %v21240_v19 = vld [vmem:[#allocation23_spill] sm:$0xff] }
 0x439   :  { %14670 = vmatprep.subr.bf16.mxu0 %v14669_v58  ;;  %v4257_v52 = vld [vmem:[#allocation3 + $0x19a] sm:$0xff] }
 0x43b   :  { %13032 = vmatmul.mubr.f32.gmra.mrb[12].mxu0 %v16902_v5  ;;  %v21241_v5 = vld [vmem:[#allocation24_spill] sm:$0xff] }
 0x43c   :  { %13034 = vmatprep.mubr.f32.mxu0 %v16904_v6  ;;  %14672 = vmatpush3.bf16.msra.mxu0 %v14669_v58  ;;  %v21242_v6 = vld [vmem:[#allocation25_spill] sm:$0xff] }
 0x43d   :  { %14674 = vmatprep.subr.bf16.mxu0 %v14673_v3  ;;  %v4260_v58 = vld [vmem:[#allocation3 + $0x1ea] sm:$0xff] }
 0x43f   :  { %13035 = vmatmul.mubr.f32.gmra.mrb[14].mxu0 %v16910_v10  ;;  %v21243_v10 = vld [vmem:[#allocation26_spill] sm:$0xff] }
 0x440   :  { %13037 = vmatprep.mubr.f32.mxu0 %v16912_v11  ;;  %14676 = vmatpush3.bf16.msra.mxu0 %v14673_v3  ;;  %v21244_v11 = vld [vmem:[#allocation27_spill] sm:$0xff] }
 0x441   :  { %v4263_v3 = vld [vmem:[#allocation3 + $0x212] sm:$0xff] }
 0x443   :  { %13038 = vmatmul.mubr.f32.gmra.mrb[16].mxu0 %v16917_v23  ;;  %v21245_v23 = vld [vmem:[#allocation28_spill] sm:$0xff] }
 0x444   :  { %13040 = vmatprep.mubr.f32.mxu0 %v16919_v15  ;;  %v21246_v15 = vld [vmem:[#allocation29_spill] sm:$0xff] }
 0x447   :  { %13041 = vmatmul.mubr.f32.gmra.mrb[18].mxu0 %v16923_v21  ;;  %v21247_v21 = vld [vmem:[#allocation30_spill] sm:$0xff] }
 0x448   :  { %13043 = vmatprep.mubr.f32.mxu0 %v16925_v25  ;;  %v21248_v25 = vld [vmem:[#allocation86_spill] sm:$0xff] }
 0x44b   :  { %13044 = vmatmul.mubr.f32.gmra.mrb[20].mxu0 %v16929_v26  ;;  %v21249_v26 = vld [vmem:[#allocation87_spill] sm:$0xff] }
 0x44c   :  { %13046 = vmatprep.mubr.f32.mxu0 %v16931_v28  ;;  %v21250_v28 = vld [vmem:[#allocation88_spill] sm:$0xff] }
 0x44f   :  { %13047 = vmatmul.mubr.f32.gmra.mrb[22].mxu0 %v16935_v29  ;;  %v21251_v29 = vld [vmem:[#allocation89_spill] sm:$0xff] }
 0x450   :  { %13049 = vmatprep.mubr.f32.mxu0 %v16937_v30  ;;  %v21252_v30 = vld [vmem:[#allocation90_spill] sm:$0xff] }
 0x453   :  { %13050 = vmatmul.mubr.f32.gmra.mrb[24].mxu0 %v16941_v31  ;;  %v21253_v31 = vld [vmem:[#allocation91_spill] sm:$0xff] }
 0x454   :  { %13052 = vmatprep.mubr.f32.mxu0 %v16943_v32  ;;  %v21254_v32 = vld [vmem:[#allocation92_spill] sm:$0xff] }
 0x457   :  { %13053 = vmatmul.mubr.f32.gmra.mrb[26].mxu0 %v16947_v33  ;;  %v21255_v33 = vld [vmem:[#allocation93_spill] sm:$0xff] }
 0x458   :  { %13055 = vmatprep.mubr.f32.mxu0 %v16949_v35  ;;  %v21256_v35 = vld [vmem:[#allocation94_spill] sm:$0xff] }
 0x45b   :  { %13056 = vmatmul.mubr.f32.gmra.mrb[28].mxu0 %v16953_v37  ;;  %v21257_v37 = vld [vmem:[#allocation95_spill] sm:$0xff] }
 0x45c   :  { %13058 = vmatprep.mubr.f32.mxu0 %v3727_v4  ;;  %v4264_v4 = vld [vmem:[#allocation3 + $0x21a] sm:$0xff] }
 0x45f   :  { %13059 = vmatmul.mubr.f32.gmra.mrb[30].mxu0 %v3728_v13  ;;  %v4265_v13 = vld [vmem:[#allocation3 + $0x22a] sm:$0xff] }
 0x460   :  { %13061 = vmatprep.mubr.f32.mxu0 %v16956_v40  ;;  %v3759_v40 = vld [vmem:[#allocation3 + $0x349] sm:$0xff] }
 0x463   :  { %13062 = vmatmul.mubr.f32.gmra.mrb[32].mxu0 %v16959_v42  ;;  %v21258_v42 = vld [vmem:[#allocation96_spill] sm:$0xff] }
 0x464   :  { %13064 = vmatprep.mubr.f32.mxu0 %v16961_v45  ;;  %v3760_v45 = vld [vmem:[#allocation3 + $0x351] sm:$0xff] }
 0x467   :  { %13065 = vmatmul.mubr.f32.gmra.mrb[34].mxu0 %v16965_v46  ;;  %v4227_v46 = vld [vmem:[#allocation3 + $0x32] sm:$0xff] }
 0x468   :  { %13067 = vmatprep.mubr.f32.mxu0 %v16967_v49  ;;  %v4228_v49 = vld [vmem:[#allocation3 + $0x3a] sm:$0xff] }
 0x46b   :  { %13068 = vmatmul.mubr.f32.gmra.mrb[36].mxu0 %v16971_v50  ;;  %v4229_v50 = vld [vmem:[#allocation3 + $0x4a] sm:$0xff] }
 0x46c   :  { %13070 = vmatprep.mubr.f32.mxu0 %v16973_v51  ;;  %v4230_v51 = vld [vmem:[#allocation3 + $0x52] sm:$0xff] }
 0x46f   :  { %13071 = vmatmul.mubr.f32.gmra.mrb[38].mxu0 %v16977_v54  ;;  %v4231_v54 = vld [vmem:[#allocation3 + $0x62] sm:$0xff] }
 0x470   :  { %13073 = vmatprep.mubr.f32.mxu0 %v16979_v56  ;;  %v4232_v56 = vld [vmem:[#allocation3 + $0x6a] sm:$0xff] }
 0x473   :  { %13074 = vmatmul.mubr.f32.gmra.mrb[40].mxu0 %v21238_v55  ;;  %v4267_v55 = vld [vmem:[#allocation3 + $0x242] sm:$0xff] }
 0x474   :  { %13076 = vmatprep.mubr.f32.mxu0 %v21239_v60  ;;  %v4269_v60 = vld [vmem:[#allocation3 + $0x25a] sm:$0xff] }
 0x477   :  { %13077 = vmatmul.mubr.f32.gmra.mrb[42].mxu0 %v21240_v19  ;;  %v4270_v19 = vld [vmem:[#allocation3 + $0x262] sm:$0xff] }
 0x478   :  { %13079 = vmatprep.mubr.f32.mxu0 %v21241_v5  ;;  %v4271_v5 = vld [vmem:[#allocation3 + $0x272] sm:$0xff] }
 0x47b   :  { %13080 = vmatmul.mubr.f32.gmra.mrb[44].mxu0 %v21242_v6  ;;  %v4272_v6 = vld [vmem:[#allocation3 + $0x27a] sm:$0xff] }
 0x47c   :  { %13082 = vmatprep.mubr.f32.mxu0 %v21243_v10  ;;  %v4273_v10 = vld [vmem:[#allocation3 + $0x28a] sm:$0xff] }
 0x47f   :  { %13083 = vmatmul.mubr.f32.gmra.mrb[46].mxu0 %v21244_v11  ;;  %v4274_v11 = vld [vmem:[#allocation3 + $0x292] sm:$0xff] }
 0x480   :  { %13085 = vmatprep.mubr.f32.mxu0 %v21245_v23  ;;  %v4275_v23 = vld [vmem:[#allocation3 + $0x2a2] sm:$0xff] }
 0x483   :  { %13086 = vmatmul.mubr.f32.gmra.mrb[48].mxu0 %v21246_v15  ;;  %v4276_v15 = vld [vmem:[#allocation3 + $0x2aa] sm:$0xff] }
 0x484   :  { %13088 = vmatprep.mubr.f32.mxu0 %v21247_v21  ;;  %v4277_v21 = vld [vmem:[#allocation3 + $0x2ba] sm:$0xff] }
 0x487   :  { %13089 = vmatmul.mubr.f32.gmra.mrb[50].mxu0 %v21248_v25  ;;  %v4278_v25 = vld [vmem:[#allocation3 + $0x2c2] sm:$0xff] }
 0x488   :  { %13091 = vmatprep.mubr.f32.mxu0 %v21249_v26  ;;  %v4279_v26 = vld [vmem:[#allocation3 + $0x2d2] sm:$0xff] }
 0x48b   :  { %13092 = vmatmul.mubr.f32.gmra.mrb[52].mxu0 %v21250_v28  ;;  %v4280_v28 = vld [vmem:[#allocation3 + $0x2da] sm:$0xff] }
 0x48c   :  { %13094 = vmatprep.mubr.f32.mxu0 %v21251_v29  ;;  %v4281_v29 = vld [vmem:[#allocation3 + $0x2ea] sm:$0xff] }
 0x48f   :  { %13095 = vmatmul.mubr.f32.gmra.mrb[54].mxu0 %v21252_v30  ;;  %v4282_v30 = vld [vmem:[#allocation3 + $0x2f2] sm:$0xff] }
 0x490   :  { %13097 = vmatprep.mubr.f32.mxu0 %v21253_v31  ;;  %v4283_v31 = vld [vmem:[#allocation3 + $0x302] sm:$0xff] }
 0x493   :  { %13098 = vmatmul.mubr.f32.gmra.mrb[56].mxu0 %v21254_v32  ;;  %v4284_v32 = vld [vmem:[#allocation3 + $0x30a] sm:$0xff] }
 0x494   :  { %13100 = vmatprep.mubr.f32.mxu0 %v21255_v33  ;;  %v4285_v33 = vld [vmem:[#allocation3 + $0x31a] sm:$0xff] }
 0x497   :  { %13101 = vmatmul.mubr.f32.gmra.mrb[58].mxu0 %v21256_v35  ;;  %v4286_v35 = vld [vmem:[#allocation3 + $0x322] sm:$0xff] }
 0x498   :  { %13103 = vmatprep.mubr.f32.mxu0 %v21257_v37  ;;  %v4289_v37 = vld [vmem:[#allocation3 + $0x34a] sm:$0xff] }
 0x49b   :  { %13104 = vmatmul.mubr.f32.gmra.mrb[60].mxu0 %v21258_v42 }
 0x49c   :  { %13106 = vmatprep.mubr.f32.mxu0 %v3759_v40  ;;  %v4290_v40 = vld [vmem:[#allocation3 + $0x352] sm:$0xff] }
 0x49f   :  { %13107 = vmatmul.mubr.f32.gmra.mrb[62].mxu0 %v3760_v45 }
 0x4a0   :  { %13141 = vmatprep.mubr.f32.mxu0 %v4227_v46 }
 0x4a3   :  { %13142 = vmatmul.mubr.f32.vlgmr.msra.gmra.mrb[0].mxu0 %v4228_v49 }
 0x4a4   :  { %13144 = vmatprep.mubr.f32.mxu0 %v4229_v50 }
 0x4a7   :  { %13145 = vmatmul.mubr.f32.gmra.mrb[2].mxu0 %v4230_v51 }
 0x4a8   :  { %13147 = vmatprep.mubr.f32.mxu0 %v4231_v54 }
 0x4ab   :  { %13148 = vmatmul.mubr.f32.gmra.mrb[4].mxu0 %v4232_v56 }
 0x4ac   :  { %13150 = vmatprep.mubr.f32.mxu0 %v4233_v22 }
 0x4af   :  { %13151 = vmatmul.mubr.f32.gmra.mrb[6].mxu0 %v4234_v43 }
 0x4b0   :  { %13153 = vmatprep.mubr.f32.mxu0 %v4235_v7 }
 0x4b3   :  { %13154 = vmatmul.mubr.f32.gmra.mrb[8].mxu0 %v4236_v16 }
 0x4b4   :  { %13156 = vmatprep.mubr.f32.mxu0 %v4237_v18 }
 0x4b7   :  { %13157 = vmatmul.mubr.f32.gmra.mrb[10].mxu0 %v4238_v20 }
 0x4b8   :  { %13159 = vmatprep.mubr.f32.mxu0 %v4239_v59 }
 0x4bb   :  { %13160 = vmatmul.mubr.f32.gmra.mrb[12].mxu0 %v4240_v14 }
 0x4bc   :  { %13162 = vmatprep.mubr.f32.mxu0 %v4241_v62 }
 0x4bf   :  { %13163 = vmatmul.mubr.f32.gmra.mrb[14].mxu0 %v4242_v1 }
 0x4c0   :  { %13165 = vmatprep.mubr.f32.mxu0 %v4243_v24 }
 0x4c3   :  { %13166 = vmatmul.mubr.f32.gmra.mrb[16].mxu0 %v4244_v38 }
 0x4c4   :  { %13168 = vmatprep.mubr.f32.mxu0 %v4245_v63 }
 0x4c7   :  { %13169 = vmatmul.mubr.f32.gmra.mrb[18].mxu0 %v4246_v34 }
 0x4c8   :  { %13171 = vmatprep.mubr.f32.mxu0 %v4247_v9 }
 0x4cb   :  { %13172 = vmatmul.mubr.f32.gmra.mrb[20].mxu0 %v4248_v36 }
 0x4cc   :  { %13174 = vmatprep.mubr.f32.mxu0 %v4249_v41 }
 0x4cf   :  { %13175 = vmatmul.mubr.f32.gmra.mrb[22].mxu0 %v4250_v39 }
 0x4d0   :  { %13177 = vmatprep.mubr.f32.mxu0 %v4251_v0 }
 0x4d3   :  { %13178 = vmatmul.mubr.f32.gmra.mrb[24].mxu0 %v4252_v47 }
 0x4d4   :  { %13180 = vmatprep.mubr.f32.mxu0 %v4253_v48 }
 0x4d7   :  { %13181 = vmatmul.mubr.f32.gmra.mrb[26].mxu0 %v4254_v27 }
 0x4d8   :  { %13183 = vmatprep.mubr.f32.mxu0 %v17079_v57  ;;  %v4266_v57 = vld [vmem:[#allocation3 + $0x232] sm:$0xff] }
 0x4db   :  { %13184 = vmatmul.mubr.f32.gmra.mrb[28].mxu0 %v17083_v44  ;;  %v4268_v44 = vld [vmem:[#allocation3 + $0x24a] sm:$0xff] }
 0x4dc   :  { %13186 = vmatprep.mubr.f32.mxu0 %v4257_v52 }
 0x4df   :  { %13187 = vmatmul.mubr.f32.gmra.mrb[30].mxu0 %v4258_v53 }
 0x4e0   :  { %13189 = vmatprep.mubr.f32.mxu0 %v4259_v17 }
 0x4e3   :  { %13190 = vmatmul.mubr.f32.gmra.mrb[32].mxu0 %v4260_v58 }
 0x4e4   :  { %13192 = vmatprep.mubr.f32.mxu0 %v4261_v61 }
 0x4e7   :  { %13193 = vmatmul.mubr.f32.gmra.mrb[34].mxu0 %v4262_v8 }
 0x4e8   :  { %13195 = vmatprep.mubr.f32.mxu0 %v4263_v3 }
 0x4eb   :  { %13196 = vmatmul.mubr.f32.gmra.mrb[36].mxu0 %v4264_v4 }
 0x4ec   :  { %13198 = vmatprep.mubr.f32.mxu0 %v4265_v13 }
 0x4ef   :  { %13199 = vmatmul.mubr.f32.gmra.mrb[38].mxu0 %v4266_v57 }
 0x4f0   :  { %13201 = vmatprep.mubr.f32.mxu0 %v4267_v55 }
 0x4f3   :  { %13202 = vmatmul.mubr.f32.gmra.mrb[40].mxu0 %v4268_v44 }
 0x4f4   :  { %13204 = vmatprep.mubr.f32.mxu0 %v4269_v60 }
 0x4f7   :  { %13205 = vmatmul.mubr.f32.gmra.mrb[42].mxu0 %v4270_v19 }
 0x4f8   :  { %13207 = vmatprep.mubr.f32.mxu0 %v4271_v5 }
 0x4fb   :  { %13208 = vmatmul.mubr.f32.gmra.mrb[44].mxu0 %v4272_v6 }
 0x4fc   :  { %13210 = vmatprep.mubr.f32.mxu0 %v4273_v10 }
 0x4ff   :  { %13211 = vmatmul.mubr.f32.gmra.mrb[46].mxu0 %v4274_v11 }
 0x500   :  { %13213 = vmatprep.mubr.f32.mxu0 %v4275_v23 }
 0x503   :  { %13214 = vmatmul.mubr.f32.gmra.mrb[48].mxu0 %v4276_v15 }
 0x504   :  { %13216 = vmatprep.mubr.f32.mxu0 %v4277_v21 }
 0x507   :  { %13217 = vmatmul.mubr.f32.gmra.mrb[50].mxu0 %v4278_v25 }
 0x508   :  { %13219 = vmatprep.mubr.f32.mxu0 %v4279_v26 }
 0x50b   :  { %13220 = vmatmul.mubr.f32.gmra.mrb[52].mxu0 %v4280_v28 }
 0x50c   :  { %13222 = vmatprep.mubr.f32.mxu0 %v4281_v29 }
 0x50f   :  { %13223 = vmatmul.mubr.f32.gmra.mrb[54].mxu0 %v4282_v30 }
 0x510   :  { %13225 = vmatprep.mubr.f32.mxu0 %v4283_v31 }
 0x513   :  { %13226 = vmatmul.mubr.f32.gmra.mrb[56].mxu0 %v4284_v32 }
 0x514   :  { %13228 = vmatprep.mubr.f32.mxu0 %v4285_v33 }
 0x517   :  { %13229 = vmatmul.mubr.f32.gmra.mrb[58].mxu0 %v4286_v35 }
 0x518   :  { %13231 = vmatprep.mubr.f32.mxu0 %v17115_v2 }
 0x51b   :  { %13232 = vmatmul.mubr.f32.gmra.mrb[60].mxu0 %v17119_v12 }
 0x51c   :  { %13234 = vmatprep.mubr.f32.mxu0 %v4289_v37 }
 0x51f   :  { %13235 = vmatmul.mubr.f32.gmra.mrb[62].mxu0 %v4290_v40 }
 0x576   :  { %v17195_v42 = vpop.f32.mrb[0].mxu0 }
 0x577   :  { %v4829_v45 = vmul.f32 %v17195_v42, %v17195_v42  ;;  %v17199_v46 = vpop.f32.mrb[1].mxu0 }
 0x578   :  { %v4759_v49 = vadd.f32 %v17195_v42, %v17199_v46  ;;  %v4828_v50 = vmul.f32 %v17199_v46, %v17199_v46 }
 0x57a   :  { %v4892_v2 = vadd.f32 %v4829_v45, %v4828_v50  ;;  %v17205_v51 = vpop.f32.mrb[2].mxu0 }
 0x57b   :  { %v17207_v12 = vpop.f32.mrb[3].mxu0  ;;  %v4831_v22 = vmul.f32 %v17205_v51, %v17205_v51 }
 0x57c   :  { %v4760_v54 = vadd.f32 %v4759_v49, %v17207_v12  ;;  %v4830_v56 = vmul.f32 %v17207_v12, %v17207_v12 }
 0x57e   :  { %v4761_v43 = vadd.f32 %v17205_v51, %v4760_v54  ;;  %v4893_v7 = vadd.f32 %v4892_v2, %v4830_v56  ;;  %v17215_v16 = vpop.f32.mrb[4].mxu0 }
 0x57f   :  { %v17217_v18 = vpop.f32.mrb[5].mxu0  ;;  %v4833_v62 = vmul.f32 %v17215_v16, %v17215_v16 }
 0x580   :  { %v4894_v20 = vadd.f32 %v4893_v7, %v4831_v22  ;;  %v4762_v59 = vadd.f32 %v4761_v43, %v17217_v18  ;;  %v4832_v14 = vmul.f32 %v17217_v18, %v17217_v18 }
 0x582   :  { %v4895_v1 = vadd.f32 %v4894_v20, %v4832_v14  ;;  %v17224_v24 = vpop.f32.mrb[6].mxu0  ;;  %v4763_v38 = vadd.f32 %v17215_v16, %v4762_v59 }
 0x583   :  { %v17227_v63 = vpop.f32.mrb[7].mxu0  ;;  %v4835_v41 = vmul.f32 %v17224_v24, %v17224_v24 }
 0x584   :  { %v4764_v34 = vadd.f32 %v4763_v38, %v17227_v63  ;;  %v4834_v9 = vmul.f32 %v17227_v63, %v17227_v63  ;;  %v4896_v36 = vadd.f32 %v4895_v1, %v4833_v62 }
 0x586   :  { %v4897_v39 = vadd.f32 %v4896_v36, %v4834_v9  ;;  %v17234_v0 = vpop.f32.mrb[8].mxu0  ;;  %v4765_v47 = vadd.f32 %v17224_v24, %v4764_v34 }
 0x587   :  { %v17237_v48 = vpop.f32.mrb[9].mxu0  ;;  %v4837_v17 = vmul.f32 %v17234_v0, %v17234_v0 }
 0x588   :  { %v4766_v27 = vadd.f32 %v4765_v47, %v17237_v48  ;;  %v4836_v52 = vmul.f32 %v17237_v48, %v17237_v48  ;;  %v4898_v53 = vadd.f32 %v4897_v39, %v4835_v41 }
 0x58a   :  { %v4899_v58 = vadd.f32 %v4898_v53, %v4836_v52  ;;  %v17244_v61 = vpop.f32.mrb[10].mxu0  ;;  %v4767_v8 = vadd.f32 %v17234_v0, %v4766_v27 }
 0x58b   :  { %v17247_v3 = vpop.f32.mrb[11].mxu0  ;;  %v4839_v55 = vmul.f32 %v17244_v61, %v17244_v61 }
 0x58c   :  { %v4768_v4 = vadd.f32 %v4767_v8, %v17247_v3  ;;  %v4838_v13 = vmul.f32 %v17247_v3, %v17247_v3  ;;  %v4900_v57 = vadd.f32 %v4899_v58, %v4837_v17 }
 0x58e   :  { %v4901_v44 = vadd.f32 %v4900_v57, %v4838_v13  ;;  %v17254_v60 = vpop.f32.mrb[12].mxu0  ;;  %v4769_v19 = vadd.f32 %v17244_v61, %v4768_v4 }
 0x58f   :  { %v17257_v5 = vpop.f32.mrb[13].mxu0  ;;  %v4841_v23 = vmul.f32 %v17254_v60, %v17254_v60 }
 0x590   :  { %v4770_v6 = vadd.f32 %v4769_v19, %v17257_v5  ;;  %v4840_v10 = vmul.f32 %v17257_v5, %v17257_v5  ;;  %v4902_v11 = vadd.f32 %v4901_v44, %v4839_v55  ;;  %v5521_v55 = vld [vmem:[#allocation8 + $0x80] sm:$0xff]  ;;  %v5522_v44 = vld [vmem:[#allocation8 + $0x88] sm:$0xff] }
 0x592   :  { %v4903_v15 = vadd.f32 %v4902_v11, %v4840_v10  ;;  %v17264_v21 = vpop.f32.mrb[14].mxu0  ;;  %v4771_v25 = vadd.f32 %v17254_v60, %v4770_v6  ;;  %v14677_v6 = vpack.c.bf16 %v5522_v44, %v5521_v55 }
 0x593   :  { %v17267_v26 = vpop.f32.mrb[15].mxu0  ;;  %v4843_v31 = vmul.f32 %v17264_v21, %v17264_v21 }
 0x594   :  { %v4772_v28 = vadd.f32 %v4771_v25, %v17267_v26  ;;  %v4842_v29 = vmul.f32 %v17267_v26, %v17267_v26  ;;  %v4904_v30 = vadd.f32 %v4903_v15, %v4841_v23  ;;  %14678 = vmatprep.subr.bf16.mxu1 %v14677_v6 }
 0x595   :  { %14680 = vmatpush3.bf16.msra.mxu1 %v14677_v6 }
 0x596   :  { %v4905_v32 = vadd.f32 %v4904_v30, %v4842_v29  ;;  %v17274_v33 = vpop.f32.mrb[16].mxu0  ;;  %v4773_v35 = vadd.f32 %v17264_v21, %v4772_v28  ;;  %v5523_v30 = vld [vmem:[#allocation8 + $0x90] sm:$0xff] }
 0x597   :  { %v17277_v37 = vpop.f32.mrb[17].mxu0  ;;  %v4845_v50 = vmul.f32 %v17274_v33, %v17274_v33 }
 0x598   :  { %v4774_v40 = vadd.f32 %v4773_v35, %v17277_v37  ;;  %v4844_v45 = vmul.f32 %v17277_v37, %v17277_v37  ;;  %v4906_v49 = vadd.f32 %v4905_v32, %v4843_v31  ;;  %v5524_v31 = vld [vmem:[#allocation8 + $0x98] sm:$0xff] }
 0x599   :  { %v14681_v35 = vpack.c.bf16 %v5524_v31, %v5523_v30 }
 0x59a   :  { %v4907_v2 = vadd.f32 %v4906_v49, %v4844_v45  ;;  %v17284_v54 = vpop.f32.mrb[18].mxu0  ;;  %v4775_v56 = vadd.f32 %v17274_v33, %v4774_v40 }
 0x59b   :  { %v17287_v22 = vpop.f32.mrb[19].mxu0  ;;  %v4847_v59 = vmul.f32 %v17284_v54, %v17284_v54  ;;  %14682 = vmatprep.subr.bf16.mxu1 %v14681_v35 }
 0x59c   :  { %v4776_v43 = vadd.f32 %v4775_v56, %v17287_v22  ;;  %v4846_v7 = vmul.f32 %v17287_v22, %v17287_v22  ;;  %v4908_v20 = vadd.f32 %v4907_v2, %v4845_v50  ;;  %14684 = vmatpush3.bf16.msra.mxu1 %v14681_v35 }
 0x59e   :  { %v4909_v14 = vadd.f32 %v4908_v20, %v4846_v7  ;;  %v17294_v62 = vpop.f32.mrb[20].mxu0  ;;  %v4777_v1 = vadd.f32 %v17284_v54, %v4776_v43  ;;  %v5525_v7 = vld [vmem:[#allocation8 + $0xa0] sm:$0xff]  ;;  %v5526_v20 = vld [vmem:[#allocation8 + $0xa8] sm:$0xff] }
 0x59f   :  { %v17297_v38 = vpop.f32.mrb[21].mxu0  ;;  %v4849_v41 = vmul.f32 %v17294_v62, %v17294_v62 }
 0x5a0   :  { %v4778_v34 = vadd.f32 %v4777_v1, %v17297_v38  ;;  %v4848_v9 = vmul.f32 %v17297_v38, %v17297_v38  ;;  %v4910_v36 = vadd.f32 %v4909_v14, %v4847_v59  ;;  %v14685_v14 = vpack.c.bf16 %v5526_v20, %v5525_v7 }
 0x5a2   :  { %v4911_v39 = vadd.f32 %v4910_v36, %v4848_v9  ;;  %v17304_v47 = vpop.f32.mrb[22].mxu0  ;;  %v4779_v27 = vadd.f32 %v17294_v62, %v4778_v34  ;;  %14686 = vmatprep.subr.bf16.mxu1 %v14685_v14 }
 0x5a3   :  { %v17307_v52 = vpop.f32.mrb[23].mxu0  ;;  %v4851_v8 = vmul.f32 %v17304_v47, %v17304_v47  ;;  %14688 = vmatpush3.bf16.msra.mxu1 %v14685_v14 }
 0x5a4   :  { %v4780_v53 = vadd.f32 %v4779_v27, %v17307_v52  ;;  %v4850_v17 = vmul.f32 %v17307_v52, %v17307_v52  ;;  %v4912_v58 = vadd.f32 %v4911_v39, %v4849_v41 }
 0x5a6   :  { %v4913_v4 = vadd.f32 %v4912_v58, %v4850_v17  ;;  %v17314_v13 = vpop.f32.mrb[24].mxu0  ;;  %v4781_v57 = vadd.f32 %v17304_v47, %v4780_v53  ;;  %v5527_v53 = vld [vmem:[#allocation8 + $0xb0] sm:$0xff]  ;;  %v5528_v17 = vld [vmem:[#allocation8 + $0xb8] sm:$0xff] }
 0x5a7   :  { %v17317_v19 = vpop.f32.mrb[25].mxu0  ;;  %v4853_v15 = vmul.f32 %v17314_v13, %v17314_v13 }
 0x5a8   :  { %v4782_v10 = vadd.f32 %v4781_v57, %v17317_v19  ;;  %v4852_v11 = vmul.f32 %v17317_v19, %v17317_v19  ;;  %v4914_v23 = vadd.f32 %v4913_v4, %v4851_v8  ;;  %v14689_v8 = vpack.c.bf16 %v5528_v17, %v5527_v53  ;;  %v5533_v53 = vld [vmem:[#allocation8 + $0xe0] sm:$0xff]  ;;  %v5534_v17 = vld [vmem:[#allocation8 + $0xe8] sm:$0xff] }
 0x5aa   :  { %v4915_v25 = vadd.f32 %v4914_v23, %v4852_v11  ;;  %v17324_v28 = vpop.f32.mrb[26].mxu0  ;;  %v4783_v29 = vadd.f32 %v17314_v13, %v4782_v10  ;;  %14690 = vmatprep.subr.bf16.mxu1 %v14689_v8  ;;  %v5529_v23 = vld [vmem:[#allocation8 + $0xc0] sm:$0xff] }
 0x5ab   :  { %v17327_v32 = vpop.f32.mrb[27].mxu0  ;;  %v4855_v50 = vmul.f32 %v17324_v28, %v17324_v28  ;;  %14692 = vmatpush3.bf16.msra.mxu1 %v14689_v8 }
 0x5ac   :  { %v4784_v40 = vadd.f32 %v4783_v29, %v17327_v32  ;;  %v4854_v45 = vmul.f32 %v17327_v32, %v17327_v32  ;;  %v4916_v49 = vadd.f32 %v4915_v25, %v4853_v15  ;;  %v5530_v15 = vld [vmem:[#allocation8 + $0xc8] sm:$0xff] }
 0x5ad   :  { %v14693_v29 = vpack.c.bf16 %v5530_v15, %v5529_v23 }
 0x5ae   :  { %v4917_v2 = vadd.f32 %v4916_v49, %v4854_v45  ;;  %v17334_v56 = vpop.f32.mrb[28].mxu0  ;;  %v4785_v43 = vadd.f32 %v17324_v28, %v4784_v40 }
 0x5af   :  { %v17337_v59 = vpop.f32.mrb[29].mxu0  ;;  %v4857_v36 = vmul.f32 %v17334_v56, %v17334_v56  ;;  %14694 = vmatprep.subr.bf16.mxu1 %v14693_v29 }
 0x5b0   :  { %v4786_v1 = vadd.f32 %v4785_v43, %v17337_v59  ;;  %v4856_v34 = vmul.f32 %v17337_v59, %v17337_v59  ;;  %v4918_v9 = vadd.f32 %v4917_v2, %v4855_v50  ;;  %14696 = vmatpush3.bf16.msra.mxu1 %v14693_v29  ;;  %v5531_v2 = vld [vmem:[#allocation8 + $0xd0] sm:$0xff]  ;;  %v5532_v43 = vld [vmem:[#allocation8 + $0xd8] sm:$0xff] }
 0x5b1   :  { %v14697_v20 = vpack.c.bf16 %v5532_v43, %v5531_v2 }
 0x5b2   :  { %v4919_v41 = vadd.f32 %v4918_v9, %v4856_v34  ;;  %v17344_v39 = vpop.f32.mrb[30].mxu0  ;;  %v4787_v27 = vadd.f32 %v17334_v56, %v4786_v1 }
 0x5b3   :  { %v17347_v58 = vpop.f32.mrb[31].mxu0  ;;  %v4859_v44 = vmul.f32 %v17344_v39, %v17344_v39  ;;  %14698 = vmatprep.subr.bf16.mxu1 %v14697_v20 }
 0x5b4   :  { %v4788_v4 = vadd.f32 %v4787_v27, %v17347_v58  ;;  %v4858_v57 = vmul.f32 %v17347_v58, %v17347_v58  ;;  %v4920_v55 = vadd.f32 %v4919_v41, %v4857_v36  ;;  %14700 = vmatpush3.bf16.msra.mxu1 %v14697_v20 }
 0x5b6   :  { %v4921_v6 = vadd.f32 %v4920_v55, %v4858_v57  ;;  %v17354_v10 = vpop.f32.mrb[32].mxu0  ;;  %v4789_v11 = vadd.f32 %v17344_v39, %v4788_v4  ;;  %v17379_v4 = vpack.c.bf16 %v5534_v17, %v5533_v53 }
 0x5b7   :  { %v17357_v25 = vpop.f32.mrb[33].mxu0  ;;  %v4861_v40 = vmul.f32 %v17354_v10, %v17354_v10 }
 0x5b8   :  { %v4790_v30 = vadd.f32 %v4789_v11, %v17357_v25  ;;  %v4860_v31 = vmul.f32 %v17357_v25, %v17357_v25  ;;  %v4922_v35 = vadd.f32 %v4921_v6, %v4859_v44  ;;  %v16265_v6 = vmov 0.0   ;;  %14702 = vmatprep.subr.bf16.mxu1 %v17379_v4 }
 0x5b9   :  { %5234 = vst [vmem:[#allocation2] sm:$0xff] %v16265_v6  ;;  %5235 = vst [vmem:[#allocation2 + $0x8] sm:$0xff] %v16265_v6  ;;  %14704 = vmatpush3.bf16.msra.mxu1 %v17379_v4 }
 0x5ba   :  { %v4923_v45 = vadd.f32 %v4922_v35, %v4860_v31  ;;  %v17364_v49 = vpop.f32.mrb[34].mxu0  ;;  %v4791_v50 = vadd.f32 %v17354_v10, %v4790_v30  ;;  %5236 = vst [vmem:[#allocation2 + $0x10] sm:$0x3] %v16265_v6  ;;  %5237 = vst [vmem:[#allocation2 + $0x1b0] sm:$0xff] %v16265_v6  ;;  %v5535_v30 = vld [vmem:[#allocation8 + $0xf0] sm:$0xff]  ;;  %v5536_v31 = vld [vmem:[#allocation8 + $0xf8] sm:$0xff] }
 0x5bb   :  { %v17367_v7 = vpop.f32.mrb[35].mxu0  ;;  %v4863_v9 = vmul.f32 %v17364_v49, %v17364_v49  ;;  %5238 = vst [vmem:[#allocation2 + $0x1b8] sm:$0xff] %v16265_v6  ;;  %5239 = vst [vmem:[#allocation2 + $0x1c0] sm:$0x3] %v16265_v6 }
 0x5bc   :  { %v4792_v14 = vadd.f32 %v4791_v50, %v17367_v7  ;;  %v4862_v1 = vmul.f32 %v17367_v7, %v17367_v7  ;;  %v4924_v34 = vadd.f32 %v4923_v45, %v4861_v40  ;;  %5241 = vst [vmem:[#allocation2 + $0x198] sm:$0xff] %v16265_v6  ;;  %5242 = vst [vmem:[#allocation2 + $0x1a0] sm:$0xff] %v16265_v6 }
 0x5bd   :  { %5243 = vst [vmem:[#allocation2 + $0x1a8] sm:$0x3] %v16265_v6  ;;  %5244 = vst [vmem:[#allocation2 + $0x348] sm:$0xff] %v16265_v6  ;;  %v14705_v40 = vpack.c.bf16 %v5536_v31, %v5535_v30  ;;  %v5440_v30 = vld [vmem:[#allocation8] sm:$0xff]  ;;  %v5441_v31 = vld [vmem:[#allocation8 + $0x8] sm:$0xff] }
 0x5be   :  { %v4925_v36 = vadd.f32 %v4924_v34, %v4862_v1  ;;  %v17374_v41 = vpop.f32.mrb[36].mxu0  ;;  %v4793_v27 = vadd.f32 %v17364_v49, %v4792_v14  ;;  %5245 = vst [vmem:[#allocation2 + $0x350] sm:$0xff] %v16265_v6  ;;  %5246 = vst [vmem:[#allocation2 + $0x358] sm:$0x3] %v16265_v6 }
 0x5bf   :  { %v17377_v8 = vpop.f32.mrb[37].mxu0  ;;  %5248 = vst [vmem:[#allocation2 + $0x18] sm:$0x1] %v16265_v6  ;;  %5249 = vst [vmem:[#allocation2 + $0x30] sm:$0x1] %v16265_v6  ;;  %v4865_v11 = vmul.f32 %v17374_v41, %v17374_v41  ;;  %14706 = vmatprep.subr.bf16.mxu1 %v14705_v40 }
 0x5c0   :  { %v17382_v57 = vadd.f32 %v4793_v27, %v17377_v8  ;;  %v17386_v55 = vmul.f32 %v17377_v8, %v17377_v8  ;;  %v17388_v44 = vadd.f32 %v4925_v36, %v4863_v9  ;;  %5250 = vst [vmem:[#allocation2 + $0x48] sm:$0x1] %v16265_v6  ;;  %5251 = vst [vmem:[#allocation2 + $0x60] sm:$0x1] %v16265_v6  ;;  %14708 = vmatpush3.bf16.msra.mxu1 %v14705_v40  ;;  %v5456_v9 = vld [vmem:[#allocation2 + $0x1] sm:$0xff]  ;;  %v5442_v40 = vld [vmem:[#allocation8 + $0x10] sm:$0xff] }
 0x5c1   :  { %5252 = vst [vmem:[#allocation2 + $0x78] sm:$0x1] %v16265_v6  ;;  %5253 = vst [vmem:[#allocation2 + $0x90] sm:$0x1] %v16265_v6  ;;  %13269 = vmatprep.mubr.f32.mxu1 %v5456_v9  ;;  %v5457_v17 = vld [vmem:[#allocation2 + $0x9] sm:$0xff] }
 0x5c2   :  { %5254 = vst [vmem:[#allocation2 + $0xa8] sm:$0x1] %v16265_v6  ;;  %5255 = vst [vmem:[#allocation2 + $0xc0] sm:$0x1] %v16265_v6  ;;  %v4927_v23 = vadd.f32 %v17388_v44, %v17386_v55  ;;  %v17471_v15 = vpop.f32.mrb[38].mxu0  ;;  %v4795_v29 = vadd.f32 %v17374_v41, %v17382_v57 }
 0x5c3   :  { %5256 = vst [vmem:[#allocation2 + $0xd8] sm:$0x1] %v16265_v6  ;;  %5257 = vst [vmem:[#allocation2 + $0xf0] sm:$0x1] %v16265_v6  ;;  %v17476_v35 = vpop.f32.mrb[39].mxu0  ;;  %v4867_v43 = vmul.f32 %v17471_v15, %v17471_v15  ;;  %13270 = vmatmul.mubr.f32.vlgmr.msra.gmra.mrb[0].mxu1 %v5457_v17 }
 0x5c4   :  { %5258 = vst [vmem:[#allocation2 + $0x108] sm:$0x1] %v16265_v6  ;;  %5259 = vst [vmem:[#allocation2 + $0x120] sm:$0x1] %v16265_v6  ;;  %v4796_v45 = vadd.f32 %v4795_v29, %v17476_v35  ;;  %v4866_v50 = vmul.f32 %v17476_v35, %v17476_v35  ;;  %v4928_v2 = vadd.f32 %v4927_v23, %v4865_v11 }
 0x5c5   :  { %5260 = vst [vmem:[#allocation2 + $0x138] sm:$0x1] %v16265_v6  ;;  %5261 = vst [vmem:[#allocation2 + $0x150] sm:$0x1] %v16265_v6 }
 0x5c6   :  { %5262 = vst [vmem:[#allocation2 + $0x168] sm:$0x1] %v16265_v6  ;;  %5263 = vst [vmem:[#allocation2 + $0x180] sm:$0x1] %v16265_v6  ;;  %v4929_v20 = vadd.f32 %v4928_v2, %v4866_v50  ;;  %v17483_v14 = vpop.f32.mrb[40].mxu0  ;;  %v4797_v1 = vadd.f32 %v17471_v15, %v4796_v45  ;;  %v14709_v45 = vpack.c.bf16 %v5441_v31, %v5440_v30  ;;  %v5443_v50 = vld [vmem:[#allocation8 + $0x18] sm:$0xff] }
 0x5c7   :  { %5264 = vst [vmem:[#allocation2 + $0x1c8] sm:$0x1] %v16265_v6  ;;  %5265 = vst [vmem:[#allocation2 + $0x1e0] sm:$0x1] %v16265_v6  ;;  %v17486_v34 = vpop.f32.mrb[41].mxu0  ;;  %v4869_v4 = vmul.f32 %v17483_v14, %v17483_v14  ;;  %v14713_v9 = vpack.c.bf16 %v5443_v50, %v5442_v40 }
 0x5c8   :  { %5266 = vst [vmem:[#allocation2 + $0x1f8] sm:$0x1] %v16265_v6  ;;  %5267 = vst [vmem:[#allocation2 + $0x210] sm:$0x1] %v16265_v6  ;;  %v4798_v36 = vadd.f32 %v4797_v1, %v17486_v34  ;;  %v4868_v27 = vmul.f32 %v17486_v34, %v17486_v34  ;;  %v4930_v53 = vadd.f32 %v4929_v20, %v4867_v43  ;;  %14710 = vmatprep.subr.bf16.mxu1 %v14709_v45 }
 0x5c9   :  { %5268 = vst [vmem:[#allocation2 + $0x228] sm:$0x1] %v16265_v6  ;;  %5269 = vst [vmem:[#allocation2 + $0x240] sm:$0x1] %v16265_v6  ;;  %14712 = vmatpush3.bf16.msra.mxu1 %v14709_v45 }
 0x5ca   :  { %5270 = vst [vmem:[#allocation2 + $0x258] sm:$0x1] %v16265_v6  ;;  %5271 = vst [vmem:[#allocation2 + $0x270] sm:$0x1] %v16265_v6  ;;  %v4931_v57 = vadd.f32 %v4930_v53, %v4868_v27  ;;  %v17493_v55 = vpop.f32.mrb[42].mxu0  ;;  %v4799_v44 = vadd.f32 %v17483_v14, %v4798_v36  ;;  %14714 = vmatprep.subr.bf16.mxu1 %v14713_v9 }
 0x5cb   :  { %5272 = vst [vmem:[#allocation2 + $0x288] sm:$0x1] %v16265_v6  ;;  %5273 = vst [vmem:[#allocation2 + $0x2a0] sm:$0x1] %v16265_v6  ;;  %v4871_v2 = vmul.f32 %v17493_v55, %v17493_v55 }
 0x5cc   :  { %5274 = vst [vmem:[#allocation2 + $0x2b8] sm:$0x1] %v16265_v6  ;;  %5275 = vst [vmem:[#allocation2 + $0x2d0] sm:$0x1] %v16265_v6  ;;  %v4932_v29 = vadd.f32 %v4931_v57, %v4869_v4 }
 0x5cd   :  { %5276 = vst [vmem:[#allocation2 + $0x2e8] sm:$0x1] %v16265_v6  ;;  %5277 = vst [vmem:[#allocation2 + $0x300] sm:$0x1] %v16265_v6  ;;  %14716 = vmatpush3.bf16.msra.mxu1 %v14713_v9 }
 0x5ce   :  { %5278 = vst [vmem:[#allocation2 + $0x318] sm:$0x1] %v16265_v6  ;;  %5279 = vst [vmem:[#allocation2 + $0x330] sm:$0x1] %v16265_v6 }
 0x5cf   :  { %5280 = vst [vmem:[#allocation2 + $0x29] sm:$0x1] %v16265_v6  ;;  %5281 = vst [vmem:[#allocation2 + $0x41] sm:$0x1] %v16265_v6 }
 0x5d0   :  { %5282 = vst [vmem:[#allocation2 + $0x59] sm:$0x1] %v16265_v6  ;;  %5283 = vst [vmem:[#allocation2 + $0x71] sm:$0x1] %v16265_v6 }
 0x5d1   :  { %5284 = vst [vmem:[#allocation2 + $0x89] sm:$0x1] %v16265_v6  ;;  %5285 = vst [vmem:[#allocation2 + $0xa1] sm:$0x1] %v16265_v6 }
 0x5d2   :  { %5286 = vst [vmem:[#allocation2 + $0xb9] sm:$0x1] %v16265_v6  ;;  %5287 = vst [vmem:[#allocation2 + $0xd1] sm:$0x1] %v16265_v6 }
 0x5d3   :  { %5288 = vst [vmem:[#allocation2 + $0xe9] sm:$0x1] %v16265_v6  ;;  %5289 = vst [vmem:[#allocation2 + $0x101] sm:$0x1] %v16265_v6 }
 0x5d4   :  { %5290 = vst [vmem:[#allocation2 + $0x119] sm:$0x1] %v16265_v6  ;;  %5291 = vst [vmem:[#allocation2 + $0x131] sm:$0x1] %v16265_v6 }
 0x5d5   :  { %5292 = vst [vmem:[#allocation2 + $0x149] sm:$0x1] %v16265_v6  ;;  %5293 = vst [vmem:[#allocation2 + $0x161] sm:$0x1] %v16265_v6 }
 0x5d6   :  { %5294 = vst [vmem:[#allocation2 + $0x179] sm:$0x1] %v16265_v6  ;;  %5295 = vst [vmem:[#allocation2 + $0x191] sm:$0x1] %v16265_v6 }
 0x5d7   :  { %5296 = vst [vmem:[#allocation2 + $0x1d9] sm:$0x1] %v16265_v6  ;;  %5297 = vst [vmem:[#allocation2 + $0x1f1] sm:$0x1] %v16265_v6 }
 0x5d8   :  { %5298 = vst [vmem:[#allocation2 + $0x209] sm:$0x1] %v16265_v6  ;;  %5299 = vst [vmem:[#allocation2 + $0x221] sm:$0x1] %v16265_v6 }
 0x5d9   :  { %5300 = vst [vmem:[#allocation2 + $0x239] sm:$0x1] %v16265_v6  ;;  %5301 = vst [vmem:[#allocation2 + $0x251] sm:$0x1] %v16265_v6 }
 0x5da   :  { %5302 = vst [vmem:[#allocation2 + $0x269] sm:$0x1] %v16265_v6  ;;  %5303 = vst [vmem:[#allocation2 + $0x281] sm:$0x1] %v16265_v6 }
 0x5db   :  { %5304 = vst [vmem:[#allocation2 + $0x299] sm:$0x1] %v16265_v6  ;;  %5305 = vst [vmem:[#allocation2 + $0x2b1] sm:$0x1] %v16265_v6 }
 0x5dc   :  { %5306 = vst [vmem:[#allocation2 + $0x2c9] sm:$0x1] %v16265_v6  ;;  %5307 = vst [vmem:[#allocation2 + $0x2e1] sm:$0x1] %v16265_v6 }
 0x5dd   :  { %5308 = vst [vmem:[#allocation2 + $0x2f9] sm:$0x1] %v16265_v6  ;;  %5309 = vst [vmem:[#allocation2 + $0x311] sm:$0x1] %v16265_v6 }
 0x5de   :  { %5310 = vst [vmem:[#allocation2 + $0x329] sm:$0x1] %v16265_v6  ;;  %5311 = vst [vmem:[#allocation2 + $0x341] sm:$0x1] %v16265_v6  ;;  %v17496_v6 = vpop.f32.mrb[43].mxu0 }
 0x5df   :  { %21259 = vst [vmem:[#allocation31_spill] sm:$0xff] %v17483_v14  ;;  %21260 = vst [vmem:[#allocation32_spill] sm:$0xff] %v17493_v55  ;;  %v4800_v11 = vadd.f32 %v4799_v44, %v17496_v6  ;;  %v4870_v23 = vmul.f32 %v17496_v6, %v17496_v6  ;;  %v17503_v20 = vpop.f32.mrb[44].mxu0 }
 0x5e0   :  { %21261 = vst [vmem:[#allocation33_spill] sm:$0xff] %v17496_v6  ;;  %21262 = vst [vmem:[#allocation34_spill] sm:$0xff] %v17503_v20  ;;  %v17506_v36 = vpop.f32.mrb[45].mxu0  ;;  %v4873_v4 = vmul.f32 %v17503_v20, %v17503_v20 }
 0x5e1   :  { %v4933_v43 = vadd.f32 %v4932_v29, %v4870_v23  ;;  %v4801_v1 = vadd.f32 %v17493_v55, %v4800_v11  ;;  %21263 = vst [vmem:[#allocation35_spill] sm:$0xff] %v17506_v36  ;;  %v4872_v53 = vmul.f32 %v17506_v36, %v17506_v36  ;;  %v17513_v44 = vpop.f32.mrb[46].mxu0 }
 0x5e2   :  { %21264 = vst [vmem:[#allocation36_spill] sm:$0xff] %v17513_v44  ;;  %v17516_v23 = vpop.f32.mrb[47].mxu0  ;;  %v4875_v40 = vmul.f32 %v17513_v44, %v17513_v44 }
 0x5e3   :  { %v4802_v27 = vadd.f32 %v4801_v1, %v17506_v36  ;;  %v4934_v17 = vadd.f32 %v4933_v43, %v4871_v2  ;;  %21265 = vst [vmem:[#allocation37_spill] sm:$0xff] %v17516_v23  ;;  %v4874_v30 = vmul.f32 %v17516_v23, %v17516_v23  ;;  %v17523_v50 = vpop.f32.mrb[48].mxu0 }
 0x5e4   :  { %21266 = vst [vmem:[#allocation38_spill] sm:$0xff] %v17523_v50  ;;  %v17526_v43 = vpop.f32.mrb[49].mxu0 }
 0x5e5   :  { %v4935_v57 = vadd.f32 %v4934_v17, %v4872_v53  ;;  %v4803_v11 = vadd.f32 %v17503_v20, %v4802_v27  ;;  %21267 = vst [vmem:[#allocation39_spill] sm:$0xff] %v17526_v43  ;;  %v4876_v27 = vmul.f32 %v17526_v43, %v17526_v43  ;;  %v4877_v17 = vmul.f32 %v17523_v50, %v17523_v50 }
 0x5e7   :  { %v4804_v29 = vadd.f32 %v4803_v11, %v17516_v23  ;;  %v4936_v31 = vadd.f32 %v4935_v57, %v4873_v4  ;;  %v17533_v4 = vpop.f32.mrb[50].mxu0  ;;  %v5444_v11 = vld [vmem:[#allocation8 + $0x20] sm:$0xff] }
 0x5e8   :  { %21268 = vst [vmem:[#allocation40_spill] sm:$0xff] %v17533_v4  ;;  %v5448_v23 = vld [vmem:[#allocation8 + $0x40] sm:$0xff] }
 0x5e9   :  { %v4937_v45 = vadd.f32 %v4936_v31, %v4874_v30  ;;  %v4805_v2 = vadd.f32 %v17513_v44, %v4804_v29  ;;  %v5445_v30 = vld [vmem:[#allocation8 + $0x28] sm:$0xff]  ;;  %v17536_v31 = vpop.f32.mrb[51].mxu0 }
 0x5ea   :  { %21269 = vst [vmem:[#allocation41_spill] sm:$0xff] %v17536_v31  ;;  %v14717_v29 = vpack.c.bf16 %v5445_v30, %v5444_v11 }
 0x5eb   :  { %v4806_v1 = vadd.f32 %v4805_v2, %v17526_v43  ;;  %v4938_v53 = vadd.f32 %v4937_v45, %v4875_v40  ;;  %v4878_v2 = vmul.f32 %v17536_v31, %v17536_v31  ;;  %v4879_v40 = vmul.f32 %v17533_v4, %v17533_v4 }
 0x5ec   :  { %14718 = vmatprep.subr.bf16.mxu1 %v14717_v29 }
 0x5ed   :  { %v4939_v9 = vadd.f32 %v4938_v53, %v4876_v27  ;;  %v4807_v57 = vadd.f32 %v17523_v50, %v4806_v1  ;;  %v17543_v27 = vpop.f32.mrb[52].mxu0  ;;  %14720 = vmatpush3.bf16.msra.mxu1 %v14717_v29 }
 0x5ee   :  { %21270 = vst [vmem:[#allocation42_spill] sm:$0xff] %v17543_v27  ;;  %v17546_v53 = vpop.f32.mrb[53].mxu0 }
 0x5ef   :  { %v4808_v44 = vadd.f32 %v4807_v57, %v17536_v31  ;;  %v4940_v43 = vadd.f32 %v4939_v9, %v4877_v17  ;;  %21271 = vst [vmem:[#allocation43_spill] sm:$0xff] %v17546_v53  ;;  %v4880_v57 = vmul.f32 %v17546_v53, %v17546_v53  ;;  %v4881_v17 = vmul.f32 %v17543_v27, %v17543_v27  ;;  %v17553_v31 = vpop.f32.mrb[54].mxu0 }
 0x5f0   :  { %21272 = vst [vmem:[#allocation44_spill] sm:$0xff] %v17553_v31 }
 0x5f1   :  { %v4941_v45 = vadd.f32 %v4940_v43, %v4878_v2  ;;  %v4809_v1 = vadd.f32 %v17533_v4, %v4808_v44  ;;  %v17556_v2 = vpop.f32.mrb[55].mxu0  ;;  %v5447_v4 = vld [vmem:[#allocation8 + $0x38] sm:$0xff] }
 0x5f2   :  { %21273 = vst [vmem:[#allocation45_spill] sm:$0xff] %v17556_v2  ;;  %v4882_v29 = vmul.f32 %v17556_v2, %v17556_v2 }
 0x5f3   :  { %v4810_v11 = vadd.f32 %v4809_v1, %v17546_v53  ;;  %v4942_v30 = vadd.f32 %v4941_v45, %v4879_v40  ;;  %v4883_v53 = vmul.f32 %v17553_v31, %v17553_v31  ;;  %v17563_v45 = vpop.f32.mrb[56].mxu0 }
 0x5f4   :  { %21274 = vst [vmem:[#allocation46_spill] sm:$0xff] %v17563_v45 }
 0x5f5   :  { %v4943_v9 = vadd.f32 %v4942_v30, %v4880_v57  ;;  %v4811_v43 = vadd.f32 %v17543_v27, %v4810_v11  ;;  %v17566_v30 = vpop.f32.mrb[57].mxu0 }
 0x5f6   :  { %21275 = vst [vmem:[#allocation47_spill] sm:$0xff] %v17566_v30  ;;  %v4884_v27 = vmul.f32 %v17566_v30, %v17566_v30 }
 0x5f7   :  { %v4812_v44 = vadd.f32 %v4811_v43, %v17556_v2  ;;  %v4944_v1 = vadd.f32 %v4943_v9, %v4881_v17  ;;  %v4885_v2 = vmul.f32 %v17563_v45, %v17563_v45  ;;  %v17573_v9 = vpop.f32.mrb[58].mxu0 }
 0x5f8   :  { %21276 = vst [vmem:[#allocation48_spill] sm:$0xff] %v17573_v9  ;;  %v17576_v50 = vpop.f32.mrb[59].mxu0 }
 0x5f9   :  { %v4945_v40 = vadd.f32 %v4944_v1, %v4882_v29  ;;  %v4813_v57 = vadd.f32 %v17553_v31, %v4812_v44  ;;  %v5446_v1 = vld [vmem:[#allocation8 + $0x30] sm:$0xff]  ;;  %21277 = vst [vmem:[#allocation49_spill] sm:$0xff] %v17576_v50 }
 0x5fa   :  { %v14721_v44 = vpack.c.bf16 %v5447_v4, %v5446_v1 }
 0x5fb   :  { %v4814_v11 = vadd.f32 %v4813_v57, %v17566_v30  ;;  %v4946_v43 = vadd.f32 %v4945_v40, %v4883_v53  ;;  %v4886_v57 = vmul.f32 %v17576_v50, %v17576_v50  ;;  %v4887_v53 = vmul.f32 %v17573_v9, %v17573_v9  ;;  %v17583_v40 = vpop.f32.mrb[60].mxu0 }
 0x5fc   :  { %14722 = vmatprep.subr.bf16.mxu1 %v14721_v44  ;;  %21278 = vst [vmem:[#allocation50_spill] sm:$0xff] %v17583_v40 }
 0x5fd   :  { %v4947_v17 = vadd.f32 %v4946_v43, %v4884_v27  ;;  %v4815_v29 = vadd.f32 %v17563_v45, %v4814_v11  ;;  %14724 = vmatpush3.bf16.msra.mxu1 %v14721_v44  ;;  %v17586_v43 = vpop.f32.mrb[61].mxu0 }
 0x5fe   :  { %21279 = vst [vmem:[#allocation51_spill] sm:$0xff] %v17586_v43 }
 0x5ff   :  { %v4816_v31 = vadd.f32 %v4815_v29, %v17576_v50  ;;  %v4948_v30 = vadd.f32 %v4947_v17, %v4885_v2  ;;  %v4888_v29 = vmul.f32 %v17586_v43, %v17586_v43  ;;  %v4889_v2 = vmul.f32 %v17583_v40, %v17583_v40  ;;  %v17593_v50 = vpop.f32.mrb[62].mxu0 }
 0x601   :  { %v4949_v27 = vadd.f32 %v4948_v30, %v4886_v57  ;;  %v4817_v11 = vadd.f32 %v17573_v9, %v4816_v31  ;;  %v17596_v57 = vpop.f32.mrb[63].mxu0 }
 0x602   :  { %v4890_v44 = vmul.f32 %v17596_v57, %v17596_v57 }
 0x603   :  { %v4818_v4 = vadd.f32 %v4817_v11, %v17586_v43  ;;  %v4950_v1 = vadd.f32 %v4949_v27, %v4887_v53  ;;  %v4891_v43 = vmul.f32 %v17593_v50, %v17593_v50 }
 0x605   :  { %v4951_v17 = vadd.f32 %v4950_v1, %v4888_v29  ;;  %v4819_v30 = vadd.f32 %v17583_v40, %v4818_v4  ;;  %v5449_v4 = vld [vmem:[#allocation8 + $0x48] sm:$0xff] }
 0x606   :  { %v14725_v40 = vpack.c.bf16 %v5449_v4, %v5448_v23 }
 0x607   :  { %v4820_v31 = vadd.f32 %v4819_v30, %v17596_v57  ;;  %v4952_v11 = vadd.f32 %v4951_v17, %v4889_v2  ;;  %v5032_v30 = vlaneseq }
 0x608   :  { %14726 = vmatprep.subr.bf16.mxu1 %v14725_v40 }
 0x609   :  { %v4821_v53 = vadd.f32 %v17593_v50, %v4820_v31  ;;  %v4953_v27 = vadd.f32 %v4952_v11, %v4890_v44  ;;  %14728 = vmatpush3.bf16.msra.mxu1 %v14725_v40  ;;  %v17604_v14 = vshrl.u32 %v5032_v30, 7  ;;  %v21300_v30 = vld [vmem:[#allocation51_spill] sm:$0xff] }
 0x60b   :  { %v4822_v9 = vrot.slane %v4821_v53, 4  ;;  %v4954_v29 = vadd.f32 %v4953_v27, %v4891_v43  ;;  %21280 = vst [vmem:[#allocation52_spill] sm:$0xff] %v17604_v14 }
 0x60d   :  { %v4823_v1 = vadd.f32 %v4822_v9, %v4821_v53  ;;  %v4955_v45 = vrot.slane %v4954_v29, 4  ;;  %v21302_v9 = vsub.s32 0, %v17604_v14 }
 0x60f   :  { %v4824_v20 = vrot.slane %v4823_v1, 2  ;;  %v4956_v36 = vadd.f32 %v4955_v45, %v4954_v29  ;;  %v4757_v45 = vld [vmem:[#allocation9] sm:$0x1]  ;;  %v17743_v29 = vld [vmem:[#allocation11] ss:$0 sm:$0xff] }
 0x611   :  { %v4825_v55 = vadd.f32 %v4824_v20, %v4823_v1  ;;  %v4957_v6 = vrot.slane %v4956_v36, 2 }
 0x613   :  { %v4826_v2 = vrot.slane %v4825_v55, 1  ;;  %v4958_v17 = vadd.f32 %v4957_v6, %v4956_v36  ;;  %v5450_v36 = vld [vmem:[#allocation8 + $0x50] sm:$0xff]  ;;  %v21295_v6 = vld [vmem:[#allocation44_spill] sm:$0xff] }
 0x615   :  { %v4827_v31 = vadd.f32 %v4826_v2, %v4825_v55  ;;  %v4959_v44 = vrot.slane %v4958_v17, 1 }
 0x617   :  { %v4960_v11 = vadd.f32 %v4959_v44, %v4958_v17  ;;  %v17606_v43 = vmul.f32 0.001953125, %v4827_v31  ;;  %v21298_v17 = vld [vmem:[#allocation49_spill] sm:$0xff] }
 0x619   :  { %v4962_v53 = vmul.f32 0.001953125, %v4960_v11  ;;  %v4963_v23 = vmul.f32 %v17606_v43, %v17606_v43  ;;  %v5451_v11 = vld [vmem:[#allocation8 + $0x58] sm:$0xff]  ;;  %v21303_v40 = vsub.f32 %v17596_v57, %v17606_v43  ;;  %v21307_v57 = vsub.f32 %v17205_v51, %v17606_v43 }
 0x61a   :  { %v14729_v2 = vpack.c.bf16 %v5451_v11, %v5450_v36  ;;  %v21305_v36 = vsub.f32 %v17195_v42, %v17606_v43  ;;  %v21309_v11 = vsub.f32 %v17215_v16, %v17606_v43  ;;  %v21312_v16 = vsub.f32 %v17237_v48, %v17606_v43 }
 0x61b   :  { %v4964_v27 = vsub.f32 %v4962_v53, %v4963_v23  ;;  %v21281_v53 = vld [vmem:[#allocation31_spill] sm:$0xff] }
 0x61c   :  { %14730 = vmatprep.subr.bf16.mxu1 %v14729_v2 }
 0x61d   :  { %v4965_v44 = vadd.f32 1e-05, %v4964_v27  ;;  %v21301_v27 = vld [vmem:[#allocation50_spill] sm:$0xff]  ;;  %14732 = vmatpush3.bf16.msra.mxu1 %v14729_v2  ;;  %v21306_v2 = vsub.f32 %v17207_v12, %v17606_v43 }
 0x61f   :  { %16000 = vrsqrt.f32 %v4965_v44  ;;  %v21299_v44 = vld [vmem:[#allocation48_spill] sm:$0xff] }
 0x629   :  { %v16001_v1 = vpop.eup %16000 }
 0x62a   :  { %v4967_v31 = vmul.f32 %v16001_v1, %v4757_v45  ;;  %v21304_v45 = vsub.f32 %v17199_v46, %v17606_v43 }
 0x62c   :  { %v17741_v4 = vrot.slane %v4967_v31, %v21302_v9 }
 0x62e   :  { %v5098_v23 = vmul.f32 %v17741_v4, %v21303_v40  ;;  %v17753_v1 = vmul.f32 %v17741_v4, %v21304_v45  ;;  %v17759_v9 = vmul.f32 %v17741_v4, %v21305_v36  ;;  %v17765_v31 = vmul.f32 %v17741_v4, %v21306_v2 }
 0x62f   :  { %v17771_v46 = vmul.f32 %v17741_v4, %v21307_v57  ;;  %v21308_v40 = vsub.f32 %v17217_v18, %v17606_v43  ;;  %v17783_v12 = vmul.f32 %v17741_v4, %v21309_v11  ;;  %v21310_v45 = vsub.f32 %v17227_v63, %v17606_v43 }
 0x630   :  { %v5168_v36 = vadd.f32 %v17743_v29, %v5098_v23  ;;  %v21311_v18 = vsub.f32 %v17224_v24, %v17606_v43  ;;  %v17802_v57 = vmul.f32 %v17741_v4, %v21312_v16  ;;  %v21313_v63 = vsub.f32 %v17234_v0, %v17606_v43 }
 0x631   :  { %v17777_v42 = vmul.f32 %v17741_v4, %v21308_v40  ;;  %v17789_v51 = vmul.f32 %v17741_v4, %v21310_v45  ;;  %v21314_v23 = vsub.f32 %v17247_v3, %v17606_v43  ;;  %v21315_v11 = vsub.f32 %v17244_v61, %v17606_v43 }
 0x632   :  { %v17796_v2 = vmul.f32 %v17741_v4, %v21311_v18  ;;  %v17808_v40 = vmul.f32 %v17741_v4, %v21313_v63  ;;  %v21316_v45 = vsub.f32 %v17257_v5, %v17606_v43  ;;  %v21317_v18 = vsub.f32 %v17254_v60, %v17606_v43 }
 0x633   :  { %v17814_v24 = vmul.f32 %v17741_v4, %v21314_v23  ;;  %v17820_v48 = vmul.f32 %v17741_v4, %v21315_v11  ;;  %v5232_v16 = vmax.f32 %v5168_v36, 0.0  ;;  %v21318_v63 = vsub.f32 %v17267_v26, %v17606_v43 }
 0x634   :  { %v17826_v0 = vmul.f32 %v17741_v4, %v21316_v45  ;;  %v17832_v3 = vmul.f32 %v17741_v4, %v21317_v18  ;;  %v21319_v23 = vsub.f32 %v17264_v21, %v17606_v43  ;;  %v21320_v11 = vsub.f32 %v17277_v37, %v17606_v43 }
 0x635   :  { %v17838_v61 = vmul.f32 %v17741_v4, %v21318_v63  ;;  %v21321_v36 = vsub.f32 %v17274_v33, %v17606_v43  ;;  %v21322_v45 = vsub.f32 %v17287_v22, %v17606_v43  ;;  %v21323_v18 = vsub.f32 %v17284_v54, %v17606_v43  ;;  %5374 = vst [vmem:[#allocation2 + $0x331] sm:$0xff] %v5232_v16 }
 0x636   :  { %v17844_v5 = vmul.f32 %v17741_v4, %v21319_v23  ;;  %v17850_v60 = vmul.f32 %v17741_v4, %v21320_v11  ;;  %v21324_v63 = vsub.f32 %v17297_v38, %v17606_v43  ;;  %v21325_v23 = vsub.f32 %v17294_v62, %v17606_v43 }
 0x637   :  { %v17856_v26 = vmul.f32 %v17741_v4, %v21321_v36  ;;  %v17862_v21 = vmul.f32 %v17741_v4, %v21322_v45  ;;  %v17868_v37 = vmul.f32 %v17741_v4, %v21323_v18  ;;  %v21326_v11 = vsub.f32 %v17307_v52, %v17606_v43 }
 0x638   :  { %v17874_v33 = vmul.f32 %v17741_v4, %v21324_v63  ;;  %v17880_v22 = vmul.f32 %v17741_v4, %v21325_v23  ;;  %v21327_v36 = vsub.f32 %v17304_v47, %v17606_v43  ;;  %v21328_v16 = vsub.f32 %v17317_v19, %v17606_v43 }
 0x639   :  { %v17886_v54 = vmul.f32 %v17741_v4, %v21326_v11  ;;  %v21329_v45 = vsub.f32 %v17314_v13, %v17606_v43  ;;  %v21330_v18 = vsub.f32 %v17327_v32, %v17606_v43  ;;  %v21331_v63 = vsub.f32 %v17324_v28, %v17606_v43 }
 0x63a   :  { %v17892_v38 = vmul.f32 %v17741_v4, %v21327_v36  ;;  %v17898_v62 = vmul.f32 %v17741_v4, %v21328_v16  ;;  %v21332_v23 = vsub.f32 %v17337_v59, %v17606_v43  ;;  %v21333_v11 = vsub.f32 %v17334_v56, %v17606_v43 }
 0x63b   :  { %v17904_v52 = vmul.f32 %v17741_v4, %v21329_v45  ;;  %v17910_v47 = vmul.f32 %v17741_v4, %v21330_v18  ;;  %v17916_v19 = vmul.f32 %v17741_v4, %v21331_v63  ;;  %v21334_v36 = vsub.f32 %v17347_v58, %v17606_v43 }
 0x63c   :  { %v17922_v13 = vmul.f32 %v17741_v4, %v21332_v23  ;;  %v17928_v32 = vmul.f32 %v17741_v4, %v21333_v11  ;;  %v21335_v16 = vsub.f32 %v17344_v39, %v17606_v43  ;;  %v21336_v45 = vsub.f32 %v17357_v25, %v17606_v43 }
 0x63d   :  { %v17934_v28 = vmul.f32 %v17741_v4, %v21334_v36  ;;  %v21337_v18 = vsub.f32 %v17354_v10, %v17606_v43  ;;  %v21338_v63 = vsub.f32 %v17367_v7, %v17606_v43  ;;  %v21339_v23 = vsub.f32 %v17364_v49, %v17606_v43 }
 0x63e   :  { %v17940_v59 = vmul.f32 %v17741_v4, %v21335_v16  ;;  %v17946_v56 = vmul.f32 %v17741_v4, %v21336_v45  ;;  %v21340_v11 = vsub.f32 %v17377_v8, %v17606_v43  ;;  %v21341_v36 = vsub.f32 %v17374_v41, %v17606_v43 }
 0x63f   :  { %v17952_v58 = vmul.f32 %v17741_v4, %v21337_v18  ;;  %v17958_v39 = vmul.f32 %v17741_v4, %v21338_v63  ;;  %v17964_v25 = vmul.f32 %v17741_v4, %v21339_v23  ;;  %v21342_v16 = vsub.f32 %v17476_v35, %v17606_v43  ;;  %v21346_v23 = vld [vmem:[#allocation33_spill] sm:$0xff] }
 0x640   :  { %v17970_v10 = vmul.f32 %v17741_v4, %v21340_v11  ;;  %v17976_v7 = vmul.f32 %v17741_v4, %v21341_v36  ;;  %v21343_v45 = vsub.f32 %v17471_v15, %v17606_v43  ;;  %v21344_v18 = vsub.f32 %v17486_v34, %v17606_v43  ;;  %v21348_v36 = vld [vmem:[#allocation32_spill] sm:$0xff] }
 0x641   :  { %v17982_v49 = vmul.f32 %v17741_v4, %v21342_v16  ;;  %v21345_v63 = vsub.f32 %v21281_v53, %v17606_v43  ;;  %v21347_v11 = vsub.f32 %v21346_v23, %v17606_v43  ;;  %v21349_v16 = vsub.f32 %v21348_v36, %v17606_v43 }
 0x642   :  { %v17988_v8 = vmul.f32 %v17741_v4, %v21343_v45  ;;  %v17994_v41 = vmul.f32 %v17741_v4, %v21344_v18  ;;  %v21350_v45 = vld [vmem:[#allocation35_spill] sm:$0xff] }
 0x643   :  { %v18000_v35 = vmul.f32 %v17741_v4, %v21345_v63  ;;  %v18006_v15 = vmul.f32 %v17741_v4, %v21347_v11  ;;  %v18012_v34 = vmul.f32 %v17741_v4, %v21349_v16  ;;  %v21351_v18 = vsub.f32 %v21350_v45, %v17606_v43  ;;  %v21353_v63 = vld [vmem:[#allocation34_spill] sm:$0xff]  ;;  %v21356_v11 = vld [vmem:[#allocation37_spill] sm:$0xff]  ;;  %v21359_v16 = vld [vmem:[#allocation36_spill] sm:$0xff] }
 0x644   :  { %v21354_v20 = vsub.f32 %v21353_v63, %v17606_v43  ;;  %v21357_v55 = vsub.f32 %v21356_v11, %v17606_v43  ;;  %v21360_v14 = vsub.f32 %v21359_v16, %v17606_v43 }
 0x645   :  { %v18018_v53 = vmul.f32 %v17741_v4, %v21351_v18  ;;  %v21362_v18 = vld [vmem:[#allocation39_spill] sm:$0xff] }
 0x646   :  { %v18024_v23 = vmul.f32 %v17741_v4, %v21354_v20  ;;  %v18030_v36 = vmul.f32 %v17741_v4, %v21357_v55  ;;  %v18036_v45 = vmul.f32 %v17741_v4, %v21360_v14  ;;  %v21365_v20 = vld [vmem:[#allocation38_spill] sm:$0xff]  ;;  %v21368_v55 = vld [vmem:[#allocation41_spill] sm:$0xff]  ;;  %v21371_v14 = vld [vmem:[#allocation40_spill] sm:$0xff] }
 0x647   :  { %21352 = vst [vmem:[#allocation53_spill] sm:$0xff] %v18018_v53  ;;  %v21363_v53 = vsub.f32 %v21362_v18, %v17606_v43 }
 0x648   :  { %21355 = vst [vmem:[#allocation54_spill] sm:$0xff] %v18024_v23  ;;  %21358 = vst [vmem:[#allocation55_spill] sm:$0xff] %v18030_v36  ;;  %v21366_v23 = vsub.f32 %v21365_v20, %v17606_v43  ;;  %v21369_v36 = vsub.f32 %v21368_v55, %v17606_v43 }
 0x649   :  { %21361 = vst [vmem:[#allocation56_spill] sm:$0xff] %v18036_v45  ;;  %v18042_v63 = vmul.f32 %v17741_v4, %v21363_v53  ;;  %v21372_v45 = vsub.f32 %v21371_v14, %v17606_v43  ;;  %v21373_v53 = vld [vmem:[#allocation43_spill] sm:$0xff] }
 0x64a   :  { %v18048_v11 = vmul.f32 %v17741_v4, %v21366_v23  ;;  %v18054_v16 = vmul.f32 %v17741_v4, %v21369_v36  ;;  %v21376_v23 = vld [vmem:[#allocation42_spill] sm:$0xff]  ;;  %v21379_v36 = vld [vmem:[#allocation45_spill] sm:$0xff] }
 0x64b   :  { %21364 = vst [vmem:[#allocation57_spill] sm:$0xff] %v18042_v63  ;;  %v18060_v18 = vmul.f32 %v17741_v4, %v21372_v45  ;;  %v21374_v63 = vsub.f32 %v21373_v53, %v17606_v43  ;;  %v21381_v45 = vsub.f32 %v21295_v6, %v17606_v43 }
 0x64c   :  { %21367 = vst [vmem:[#allocation58_spill] sm:$0xff] %v18048_v11  ;;  %21370 = vst [vmem:[#allocation59_spill] sm:$0xff] %v18054_v16  ;;  %v21377_v11 = vsub.f32 %v21376_v23, %v17606_v43  ;;  %v21380_v16 = vsub.f32 %v21379_v36, %v17606_v43 }
 0x64d   :  { %v18066_v20 = vmul.f32 %v17741_v4, %v21374_v63  ;;  %v18084_v53 = vmul.f32 %v17741_v4, %v21381_v45  ;;  %v21382_v63 = vld [vmem:[#allocation47_spill] sm:$0xff]  ;;  %v21387_v45 = vsub.f32 %v21299_v44, %v17606_v43 }
 0x64e   :  { %v18072_v55 = vmul.f32 %v17741_v4, %v21377_v11  ;;  %v18078_v14 = vmul.f32 %v17741_v4, %v21380_v16  ;;  %v21384_v11 = vld [vmem:[#allocation46_spill] sm:$0xff]  ;;  %v21386_v16 = vsub.f32 %v21298_v17, %v17606_v43 }
 0x64f   :  { %21375 = vst [vmem:[#allocation60_spill] sm:$0xff] %v18066_v20  ;;  %v21383_v20 = vsub.f32 %v21382_v63, %v17606_v43  ;;  %v18108_v63 = vmul.f32 %v17741_v4, %v21387_v45  ;;  %v18130_v45 = vadd.f32 %v17743_v29, %v17753_v1  ;;  %v18158_v1 = vadd.f32 %v17743_v29, %v17796_v2 }
 0x650   :  { %21378 = vst [vmem:[#allocation61_spill] sm:$0xff] %v18072_v55  ;;  %v21385_v55 = vsub.f32 %v21384_v11, %v17606_v43  ;;  %v18102_v6 = vmul.f32 %v17741_v4, %v21386_v16  ;;  %v21390_v16 = vsub.f32 %v17593_v50, %v17606_v43  ;;  %v18146_v50 = vadd.f32 %v17743_v29, %v17777_v42 }
 0x651   :  { %v18090_v23 = vmul.f32 %v17741_v4, %v21383_v20  ;;  %v21388_v20 = vsub.f32 %v21300_v30, %v17606_v43  ;;  %v18134_v30 = vadd.f32 %v17743_v29, %v17759_v9  ;;  %v18162_v9 = vadd.f32 %v17743_v29, %v17802_v57 }
 0x652   :  { %v18096_v36 = vmul.f32 %v17741_v4, %v21385_v55  ;;  %v21389_v55 = vsub.f32 %v21301_v27, %v17606_v43  ;;  %v18126_v44 = vmul.f32 %v17741_v4, %v21390_v16  ;;  %v18138_v27 = vadd.f32 %v17743_v29, %v17765_v31  ;;  %v21398_v16 = vld [vmem:[#allocation56_spill] sm:$0xff] }
 0x653   :  { %v18114_v11 = vmul.f32 %v17741_v4, %v21388_v20  ;;  %v18142_v20 = vadd.f32 %v17743_v29, %v17771_v46  ;;  %v18150_v43 = vadd.f32 %v17743_v29, %v17783_v12  ;;  %v18166_v31 = vadd.f32 %v17743_v29, %v17808_v40 }
 0x654   :  { %v18120_v17 = vmul.f32 %v17741_v4, %v21389_v55  ;;  %v18154_v4 = vadd.f32 %v17743_v29, %v17789_v51  ;;  %v18170_v46 = vadd.f32 %v17743_v29, %v17814_v24  ;;  %v18174_v42 = vadd.f32 %v17743_v29, %v17820_v48  ;;  %v21396_v55 = vld [vmem:[#allocation55_spill] sm:$0xff] }
 0x655   :  { %v18178_v12 = vadd.f32 %v17743_v29, %v17826_v0  ;;  %v18182_v51 = vadd.f32 %v17743_v29, %v17832_v3  ;;  %v18186_v2 = vadd.f32 %v17743_v29, %v17838_v61  ;;  %v18190_v57 = vadd.f32 %v17743_v29, %v17844_v5 }
 0x656   :  { %v18194_v40 = vadd.f32 %v17743_v29, %v17850_v60  ;;  %v18198_v24 = vadd.f32 %v17743_v29, %v17856_v26  ;;  %v18202_v48 = vadd.f32 %v17743_v29, %v17862_v21  ;;  %v18206_v0 = vadd.f32 %v17743_v29, %v17868_v37 }
 0x657   :  { %v18210_v3 = vadd.f32 %v17743_v29, %v17874_v33  ;;  %v18214_v61 = vadd.f32 %v17743_v29, %v17880_v22  ;;  %v18218_v5 = vadd.f32 %v17743_v29, %v17886_v54  ;;  %v18222_v60 = vadd.f32 %v17743_v29, %v17892_v38 }
 0x658   :  { %v18226_v26 = vadd.f32 %v17743_v29, %v17898_v62  ;;  %v18230_v21 = vadd.f32 %v17743_v29, %v17904_v52  ;;  %v18234_v37 = vadd.f32 %v17743_v29, %v17910_v47  ;;  %v18238_v33 = vadd.f32 %v17743_v29, %v17916_v19 }
 0x659   :  { %v18242_v22 = vadd.f32 %v17743_v29, %v17922_v13  ;;  %v18246_v54 = vadd.f32 %v17743_v29, %v17928_v32  ;;  %v18250_v38 = vadd.f32 %v17743_v29, %v17934_v28  ;;  %v18254_v62 = vadd.f32 %v17743_v29, %v17940_v59 }
 0x65a   :  { %v18258_v52 = vadd.f32 %v17743_v29, %v17946_v56  ;;  %v18262_v47 = vadd.f32 %v17743_v29, %v17952_v58  ;;  %v18266_v19 = vadd.f32 %v17743_v29, %v17958_v39  ;;  %v18270_v13 = vadd.f32 %v17743_v29, %v17964_v25 }
 0x65b   :  { %v18274_v32 = vadd.f32 %v17743_v29, %v17970_v10  ;;  %v18278_v28 = vadd.f32 %v17743_v29, %v17976_v7  ;;  %v18282_v59 = vadd.f32 %v17743_v29, %v17982_v49  ;;  %v18286_v56 = vadd.f32 %v17743_v29, %v17988_v8  ;;  %v21393_v7 = vld [vmem:[#allocation53_spill] sm:$0xff]  ;;  %v21395_v8 = vld [vmem:[#allocation54_spill] sm:$0xff] }
 0x65c   :  { %v18290_v58 = vadd.f32 %v17743_v29, %v17994_v41  ;;  %v18294_v39 = vadd.f32 %v17743_v29, %v18000_v35  ;;  %v18298_v25 = vadd.f32 %v17743_v29, %v18006_v15  ;;  %v18302_v10 = vadd.f32 %v17743_v29, %v18012_v34 }
 0x65d   :  { %v18306_v49 = vadd.f32 %v17743_v29, %v21393_v7  ;;  %v18310_v41 = vadd.f32 %v17743_v29, %v21395_v8  ;;  %v18314_v35 = vadd.f32 %v17743_v29, %v21396_v55  ;;  %v18318_v15 = vadd.f32 %v17743_v29, %v21398_v16 }
 0x65e   :  { %21391 = vst [vmem:[#allocation62_spill] sm:$0xff] %v18298_v25  ;;  %21392 = vst [vmem:[#allocation63_spill] sm:$0xff] %v18302_v10  ;;  %v21400_v25 = vld [vmem:[#allocation57_spill] sm:$0xff]  ;;  %v21401_v10 = vld [vmem:[#allocation58_spill] sm:$0xff]  ;;  %v18334_v55 = vadd.f32 %v17743_v29, %v18060_v18  ;;  %v18354_v18 = vadd.f32 %v17743_v29, %v18090_v23  ;;  %v18374_v23 = vadd.f32 %v17743_v29, %v18120_v17  ;;  %v20904_v17 = vmax.f32 %v18158_v1, 0.0 }
 0x65f   :  { %21394 = vst [vmem:[#allocation64_spill] sm:$0xff] %v18306_v49  ;;  %21397 = vst [vmem:[#allocation65_spill] sm:$0xff] %v18314_v35  ;;  %v18322_v34 = vadd.f32 %v17743_v29, %v21400_v25  ;;  %v18326_v7 = vadd.f32 %v17743_v29, %v21401_v10  ;;  %v21402_v49 = vld [vmem:[#allocation59_spill] sm:$0xff]  ;;  %v21403_v35 = vld [vmem:[#allocation60_spill] sm:$0xff]  ;;  %v18346_v10 = vadd.f32 %v17743_v29, %v18078_v14 }
 0x660   :  { %21399 = vst [vmem:[#allocation66_spill] sm:$0xff] %v18318_v15  ;;  %v18330_v8 = vadd.f32 %v17743_v29, %v21402_v49  ;;  %v18338_v16 = vadd.f32 %v17743_v29, %v21403_v35  ;;  %v21404_v15 = vld [vmem:[#allocation61_spill] sm:$0xff]  ;;  %v18350_v49 = vadd.f32 %v17743_v29, %v18084_v53  ;;  %v18358_v35 = vadd.f32 %v17743_v29, %v18096_v36 }
 0x661   :  { %v18342_v25 = vadd.f32 %v17743_v29, %v21404_v15  ;;  %v18362_v15 = vadd.f32 %v17743_v29, %v18102_v6  ;;  %v18366_v14 = vadd.f32 %v17743_v29, %v18108_v63  ;;  %v18370_v53 = vadd.f32 %v17743_v29, %v18114_v11  ;;  %21409 = vst [vmem:[#allocation71_spill] sm:$0xff] %v18374_v23 }
 0x662   :  { %21405 = vst [vmem:[#allocation67_spill] sm:$0xff] %v18358_v35  ;;  %v18378_v36 = vadd.f32 %v17743_v29, %v18126_v44  ;;  %v5170_v35 = vmax.f32 %v18130_v45, 0.0  ;;  %v5171_v6 = vmax.f32 %v18134_v30, 0.0  ;;  %v5173_v63 = vmax.f32 %v18142_v20, 0.0  ;;  %5319 = vst [vmem:[#allocation2 + $0x69] sm:$0xff] %v20904_v17 }
 0x663   :  { %21406 = vst [vmem:[#allocation68_spill] sm:$0xff] %v18362_v15  ;;  %21407 = vst [vmem:[#allocation69_spill] sm:$0xff] %v18366_v14  ;;  %v5172_v15 = vmax.f32 %v18138_v27, 0.0  ;;  %v5174_v14 = vmax.f32 %v18146_v50, 0.0  ;;  %v20903_v11 = vmax.f32 %v18150_v43, 0.0  ;;  %v20905_v23 = vmax.f32 %v18162_v9, 0.0 }
 0x664   :  { %21408 = vst [vmem:[#allocation70_spill] sm:$0xff] %v18370_v53  ;;  %v20902_v53 = vmax.f32 %v18154_v4, 0.0  ;;  %v20907_v29 = vmax.f32 %v18166_v31, 0.0  ;;  %v20906_v44 = vmax.f32 %v18170_v46, 0.0  ;;  %5312 = vst [vmem:[#allocation2 + $0x19] sm:$0xff] %v5170_v35  ;;  %13272 = vmatprep.mubr.f32.mxu1 %v5170_v35  ;;  %v20909_v27 = vmax.f32 %v18182_v51, 0.0 }
 0x665   :  { %5313 = vst [vmem:[#allocation2 + $0x21] sm:$0xff] %v5171_v6  ;;  %5314 = vst [vmem:[#allocation2 + $0x31] sm:$0xff] %v5172_v15  ;;  %v20908_v20 = vmax.f32 %v18186_v2, 0.0  ;;  %13273 = vmatmul.mubr.f32.gmra.mrb[2].mxu1 %v5171_v6  ;;  %v20912_v50 = vmax.f32 %v18190_v57, 0.0  ;;  %v20911_v35 = vmax.f32 %v18194_v40, 0.0  ;;  %v20910_v45 = vmax.f32 %v18198_v24, 0.0 }
 0x666   :  { %5315 = vst [vmem:[#allocation2 + $0x39] sm:$0xff] %v5173_v63  ;;  %5316 = vst [vmem:[#allocation2 + $0x49] sm:$0xff] %v5174_v14  ;;  %13275 = vmatprep.mubr.f32.mxu1 %v5172_v15  ;;  %v20921_v6 = vmax.f32 %v18206_v0, 0.0  ;;  %v21410_v17 = vmax.f32 %v18174_v42, 0.0  ;;  %v20917_v15 = vmax.f32 %v18222_v60, 0.0  ;;  %v5200_v30 = vmax.f32 %v18250_v38, 0.0 }
 0x667   :  { %5317 = vst [vmem:[#allocation2 + $0x51] sm:$0xff] %v20903_v11  ;;  %5318 = vst [vmem:[#allocation2 + $0x61] sm:$0xff] %v20902_v53  ;;  %v20914_v53 = vmax.f32 %v18210_v3, 0.0  ;;  %v20913_v11 = vmax.f32 %v18214_v61, 0.0  ;;  %v20922_v38 = vmax.f32 %v18266_v19, 0.0 }
 0x668   :  { %5320 = vst [vmem:[#allocation2 + $0x79] sm:$0xff] %v20905_v23  ;;  %5321 = vst [vmem:[#allocation2 + $0x81] sm:$0xff] %v20907_v29  ;;  %v21411_v23 = vmax.f32 %v18178_v12, 0.0  ;;  %v20915_v29 = vmax.f32 %v18230_v21, 0.0 }
 0x669   :  { %5322 = vst [vmem:[#allocation2 + $0x91] sm:$0xff] %v20906_v44  ;;  %5323 = vst [vmem:[#allocation2 + $0x99] sm:$0xff] %v21410_v17  ;;  %v20916_v44 = vmax.f32 %v18226_v26, 0.0  ;;  %v20920_v17 = vmax.f32 %v18238_v33, 0.0  ;;  %13276 = vmatmul.mubr.f32.gmra.mrb[4].mxu1 %v5173_v63  ;;  %v20926_v63 = vmax.f32 %v18274_v32, 0.0 }
 0x66a   :  { %5324 = vst [vmem:[#allocation2 + $0xa9] sm:$0xff] %v21411_v23  ;;  %5325 = vst [vmem:[#allocation2 + $0xb1] sm:$0xff] %v20909_v27  ;;  %v21412_v23 = vmax.f32 %v18202_v48, 0.0  ;;  %v20918_v27 = vmax.f32 %v18246_v54, 0.0  ;;  %13278 = vmatprep.mubr.f32.mxu1 %v5174_v14  ;;  %v20929_v14 = vmax.f32 %v18286_v56, 0.0 }
 0x66b   :  { %5326 = vst [vmem:[#allocation2 + $0xc1] sm:$0xff] %v20908_v20  ;;  %5327 = vst [vmem:[#allocation2 + $0xc9] sm:$0xff] %v20912_v50  ;;  %v20919_v20 = vmax.f32 %v18242_v22, 0.0  ;;  %v20923_v50 = vmax.f32 %v18262_v47, 0.0 }
 0x66c   :  { %5328 = vst [vmem:[#allocation2 + $0xd9] sm:$0xff] %v20911_v35  ;;  %5329 = vst [vmem:[#allocation2 + $0xe1] sm:$0xff] %v20910_v45  ;;  %v21413_v45 = vmax.f32 %v18218_v5, 0.0  ;;  %v20924_v35 = vmax.f32 %v18258_v52, 0.0 }
 0x66d   :  { %5330 = vst [vmem:[#allocation2 + $0xf1] sm:$0xff] %v21412_v23  ;;  %5331 = vst [vmem:[#allocation2 + $0xf9] sm:$0xff] %v20921_v6  ;;  %v5201_v23 = vmax.f32 %v18254_v62, 0.0  ;;  %v20925_v62 = vmax.f32 %v18270_v13, 0.0  ;;  %v20931_v6 = vmax.f32 %v18310_v41, 0.0 }
 0x66e   :  { %5332 = vst [vmem:[#allocation2 + $0x109] sm:$0xff] %v20914_v53  ;;  %5333 = vst [vmem:[#allocation2 + $0x111] sm:$0xff] %v20913_v11  ;;  %v20927_v11 = vmax.f32 %v18278_v28, 0.0  ;;  %v20928_v53 = vmax.f32 %v18282_v59, 0.0 }
 0x66f   :  { %5334 = vst [vmem:[#allocation2 + $0x121] sm:$0xff] %v21413_v45  ;;  %5335 = vst [vmem:[#allocation2 + $0x129] sm:$0xff] %v20917_v15  ;;  %v21414_v45 = vmax.f32 %v18234_v37, 0.0 }
 0x670   :  { %5336 = vst [vmem:[#allocation2 + $0x139] sm:$0xff] %v20916_v44  ;;  %5337 = vst [vmem:[#allocation2 + $0x141] sm:$0xff] %v20915_v29  ;;  %v21415_v44 = vld [vmem:[#allocation62_spill] sm:$0xff]  ;;  %v20938_v29 = vmax.f32 %v18326_v7, 0.0 }
 0x671   :  { %5338 = vst [vmem:[#allocation2 + $0x151] sm:$0xff] %v21414_v45  ;;  %5339 = vst [vmem:[#allocation2 + $0x159] sm:$0xff] %v20920_v17  ;;  %v20930_v15 = vmax.f32 %v21415_v44, 0.0  ;;  %v21418_v45 = vld [vmem:[#allocation65_spill] sm:$0xff] }
 0x672   :  { %5340 = vst [vmem:[#allocation2 + $0x169] sm:$0xff] %v20919_v20  ;;  %5341 = vst [vmem:[#allocation2 + $0x171] sm:$0xff] %v20918_v27  ;;  %v21416_v27 = vld [vmem:[#allocation63_spill] sm:$0xff]  ;;  %v21417_v20 = vld [vmem:[#allocation64_spill] sm:$0xff] }
 0x673   :  { %5342 = vst [vmem:[#allocation2 + $0x181] sm:$0xff] %v5200_v30  ;;  %5343 = vst [vmem:[#allocation2 + $0x189] sm:$0xff] %v5201_v23  ;;  %v20933_v30 = vmax.f32 %v21416_v27, 0.0  ;;  %v20932_v17 = vmax.f32 %v21417_v20, 0.0  ;;  %v21419_v23 = vmax.f32 %v18150_v43, 0.0  ;;  %v21423_v43 = vmax.f32 %v18154_v4, 0.0 }
 0x674   :  { %5344 = vst [vmem:[#allocation2 + $0x1c9] sm:$0xff] %v20924_v35  ;;  %5345 = vst [vmem:[#allocation2 + $0x1d1] sm:$0xff] %v20923_v50  ;;  %v20937_v35 = vmax.f32 %v18322_v34, 0.0  ;;  %v21424_v4 = vmax.f32 %v21418_v45, 0.0  ;;  %v21430_v45 = vld [vmem:[#allocation71_spill] sm:$0xff] }
 0x675   :  { %5346 = vst [vmem:[#allocation2 + $0x1e1] sm:$0xff] %v20922_v38  ;;  %5347 = vst [vmem:[#allocation2 + $0x1e9] sm:$0xff] %v20925_v62  ;;  %13279 = vmatmul.mubr.f32.gmra.mrb[6].mxu1 %v21419_v23  ;;  %v21420_v38 = vld [vmem:[#allocation66_spill] sm:$0xff]  ;;  %v21425_v62 = vld [vmem:[#allocation67_spill] sm:$0xff] }
 0x676   :  { %5348 = vst [vmem:[#allocation2 + $0x1f9] sm:$0xff] %v20926_v63  ;;  %5349 = vst [vmem:[#allocation2 + $0x201] sm:$0xff] %v20927_v11  ;;  %v20936_v50 = vmax.f32 %v21420_v38, 0.0  ;;  %v21421_v63 = vmax.f32 %v18290_v58, 0.0  ;;  %v21422_v11 = vmax.f32 %v18294_v39, 0.0  ;;  %13281 = vmatprep.mubr.f32.mxu1 %v21423_v43  ;;  %v21429_v43 = vld [vmem:[#allocation70_spill] sm:$0xff] }
 0x677   :  { %5350 = vst [vmem:[#allocation2 + $0x211] sm:$0xff] %v20928_v53  ;;  %5351 = vst [vmem:[#allocation2 + $0x219] sm:$0xff] %v20929_v14  ;;  %v21426_v53 = vld [vmem:[#allocation68_spill] sm:$0xff]  ;;  %v5233_v38 = vmax.f32 %v18378_v36, 0.0  ;;  %v21436_v14 = vmax.f32 %v18350_v49, 0.0  ;;  %v21437_v36 = vmax.f32 %v18354_v18, 0.0 }
 0x678   :  { %5352 = vst [vmem:[#allocation2 + $0x229] sm:$0xff] %v21421_v63  ;;  %5353 = vst [vmem:[#allocation2 + $0x231] sm:$0xff] %v21422_v11  ;;  %v5452_v11 = vld [vmem:[#allocation8 + $0x60] sm:$0xff]  ;;  %v5453_v63 = vld [vmem:[#allocation8 + $0x68] sm:$0xff] }
 0x679   :  { %5354 = vst [vmem:[#allocation2 + $0x241] sm:$0xff] %v20930_v15  ;;  %5355 = vst [vmem:[#allocation2 + $0x249] sm:$0xff] %v20933_v30  ;;  %v21428_v30 = vld [vmem:[#allocation69_spill] sm:$0xff]  ;;  %v21435_v15 = vmax.f32 %v18158_v1, 0.0  ;;  %v14733_v23 = vpack.c.bf16 %v5453_v63, %v5452_v11  ;;  %v21442_v1 = vmax.f32 %v21429_v43, 0.0  ;;  %v21446_v63 = vmax.f32 %v18174_v42, 0.0 }
 0x67a   :  { %5356 = vst [vmem:[#allocation2 + $0x259] sm:$0xff] %v20932_v17  ;;  %5357 = vst [vmem:[#allocation2 + $0x261] sm:$0xff] %v20931_v6  ;;  %v5454_v6 = vld [vmem:[#allocation8 + $0x70] sm:$0xff]  ;;  %v5455_v17 = vld [vmem:[#allocation8 + $0x78] sm:$0xff]  ;;  %v21452_v42 = vmax.f32 %v18198_v24, 0.0  ;;  %v21459_v24 = vmax.f32 %v18226_v26, 0.0 }
 0x67b   :  { %5358 = vst [vmem:[#allocation2 + $0x271] sm:$0xff] %v21424_v4  ;;  %5359 = vst [vmem:[#allocation2 + $0x279] sm:$0xff] %v20936_v50  ;;  %v21427_v4 = vmax.f32 %v18330_v8, 0.0  ;;  %v21431_v50 = vmax.f32 %v18334_v55, 0.0  ;;  %13282 = vmatmul.mubr.f32.gmra.mrb[8].mxu1 %v21435_v15  ;;  %v21443_v15 = vmax.f32 %v21430_v45, 0.0  ;;  %14734 = vmatprep.subr.bf16.mxu1 %v14733_v23  ;;  %v21465_v26 = vmax.f32 %v18258_v52, 0.0 }
 0x67c   :  { %5360 = vst [vmem:[#allocation2 + $0x289] sm:$0xff] %v20937_v35  ;;  %5361 = vst [vmem:[#allocation2 + $0x291] sm:$0xff] %v20938_v29  ;;  %v21432_v35 = vmax.f32 %v18338_v16, 0.0  ;;  %v21433_v29 = vmax.f32 %v18342_v25, 0.0  ;;  %14736 = vmatpush3.bf16.msra.mxu1 %v14733_v23  ;;  %v21464_v23 = vmax.f32 %v18246_v54, 0.0  ;;  %v21470_v54 = vmax.f32 %v18278_v28, 0.0 }
 0x67d   :  { %5362 = vst [vmem:[#allocation2 + $0x2a1] sm:$0xff] %v21427_v4  ;;  %5363 = vst [vmem:[#allocation2 + $0x2a9] sm:$0xff] %v21431_v50  ;;  %v21434_v4 = vmax.f32 %v18346_v10, 0.0  ;;  %v21438_v50 = vmax.f32 %v21425_v62, 0.0  ;;  %v21472_v52 = vmax.f32 %v18286_v56, 0.0  ;;  %v21477_v28 = vmax.f32 %v21417_v20, 0.0 }
 0x67e   :  { %5364 = vst [vmem:[#allocation2 + $0x2b9] sm:$0xff] %v21432_v35  ;;  %5365 = vst [vmem:[#allocation2 + $0x2c1] sm:$0xff] %v21433_v29  ;;  %v21439_v35 = vmax.f32 %v21426_v53, 0.0  ;;  %v21440_v29 = vmax.f32 %v18162_v9, 0.0  ;;  %v21445_v9 = vmax.f32 %v18170_v46, 0.0  ;;  %v21450_v46 = vmax.f32 %v18190_v57, 0.0 }
 0x67f   :  { %5366 = vst [vmem:[#allocation2 + $0x2d1] sm:$0xff] %v21434_v4  ;;  %5367 = vst [vmem:[#allocation2 + $0x2d9] sm:$0xff] %v21436_v14  ;;  %v21441_v4 = vmax.f32 %v21428_v30, 0.0  ;;  %v14737_v14 = vpack.c.bf16 %v5455_v17, %v5454_v6  ;;  %v21448_v6 = vmax.f32 %v18182_v51, 0.0  ;;  %v21451_v17 = vmax.f32 %v18194_v40, 0.0  ;;  %v21479_v56 = vld [vmem:[#allocation65_spill] sm:$0xff] }
 0x680   :  { %5368 = vst [vmem:[#allocation2 + $0x2e9] sm:$0xff] %v21437_v36  ;;  %5369 = vst [vmem:[#allocation2 + $0x2f1] sm:$0xff] %v21438_v50  ;;  %13284 = vmatprep.mubr.f32.mxu1 %v21440_v29  ;;  %v6372_v36 = vld [vmem:[#allocation8 + $0x100] sm:$0xff]  ;;  %v6373_v50 = vld [vmem:[#allocation8 + $0x108] sm:$0xff]  ;;  %v21447_v29 = vmax.f32 %v18178_v12, 0.0  ;;  %v21453_v12 = vmax.f32 %v18202_v48, 0.0 }
 0x681   :  { %5370 = vst [vmem:[#allocation2 + $0x301] sm:$0xff] %v21439_v35  ;;  %5371 = vst [vmem:[#allocation2 + $0x309] sm:$0xff] %v21441_v4  ;;  %v21444_v35 = vmax.f32 %v18166_v31, 0.0  ;;  %14738 = vmatprep.subr.bf16.mxu1 %v14737_v14  ;;  %v18565_v11 = vpack.c.bf16 %v6373_v50, %v6372_v36  ;;  %v21449_v31 = vmax.f32 %v18186_v2, 0.0  ;;  %v21455_v51 = vmax.f32 %v18210_v3, 0.0  ;;  %v6375_v50 = vld [vmem:[#allocation8 + $0x118] sm:$0xff] }
 0x682   :  { %5372 = vst [vmem:[#allocation2 + $0x319] sm:$0xff] %v21442_v1  ;;  %5373 = vst [vmem:[#allocation2 + $0x321] sm:$0xff] %v21443_v15  ;;  %14740 = vmatpush3.bf16.msra.mxu1 %v14737_v14  ;;  %v21456_v2 = vmax.f32 %v18214_v61, 0.0  ;;  %v21457_v57 = vmax.f32 %v18218_v5, 0.0  ;;  %v21458_v40 = vmax.f32 %v18222_v60, 0.0  ;;  %v21460_v48 = vmax.f32 %v18230_v21, 0.0 }
 0x683   :  { %5375 = vst [vmem:[#allocation2 + $0x339] sm:$0xff] %v5233_v38  ;;  %13285 = vmatmul.mubr.f32.gmra.mrb[10].mxu1 %v21444_v35  ;;  %14742 = vmatprep.subr.bf16.mxu1 %v18565_v11  ;;  %v21454_v38 = vmax.f32 %v18206_v0, 0.0  ;;  %v21461_v0 = vmax.f32 %v18234_v37, 0.0  ;;  %v21462_v3 = vmax.f32 %v18238_v33, 0.0  ;;  %v21463_v61 = vmax.f32 %v18242_v22, 0.0  ;;  %v5488_v5 = vld [vmem:[#allocation2 + $0x1b1] sm:$0xff] }
 0x684   :  { %13287 = vmatprep.mubr.f32.mxu1 %v21445_v9  ;;  %v5489_v60 = vld [vmem:[#allocation2 + $0x1b9] sm:$0xff]  ;;  %v21466_v21 = vmax.f32 %v18262_v47, 0.0  ;;  %v21467_v37 = vmax.f32 %v18266_v19, 0.0  ;;  %v21468_v33 = vmax.f32 %v18270_v13, 0.0  ;;  %v21469_v22 = vmax.f32 %v18274_v32, 0.0  ;;  %v6377_v9 = vld [vmem:[#allocation8 + $0x128] sm:$0xff] }
 0x685   :  { %v21471_v4 = vmax.f32 %v18282_v59, 0.0  ;;  %v21473_v47 = vmax.f32 %v18290_v58, 0.0  ;;  %v21474_v19 = vmax.f32 %v18294_v39, 0.0  ;;  %v21475_v13 = vmax.f32 %v21415_v44, 0.0  ;;  %v21481_v58 = vld [vmem:[#allocation66_spill] sm:$0xff]  ;;  %v18666_v35 = vld [vmem:[#allocation2] sm:$0xff] }
 0x686   :  { %v21476_v32 = vmax.f32 %v21416_v27, 0.0  ;;  %v21478_v59 = vmax.f32 %v18310_v41, 0.0  ;;  %v21480_v1 = vmax.f32 %v21479_v56, 0.0  ;;  %v21482_v15 = vmax.f32 %v21481_v58, 0.0  ;;  %v18737_v56 = vld [vmem:[#allocation2 + $0x110] sm:$0xff]  ;;  %v18743_v58 = vld [vmem:[#allocation2 + $0x128] sm:$0xff] }
 0x687   :  { %13288 = vmatmul.mubr.f32.gmra.mrb[12].mxu1 %v21446_v63  ;;  %v21483_v39 = vmax.f32 %v18322_v34, 0.0  ;;  %v21484_v44 = vmax.f32 %v18326_v7, 0.0  ;;  %v21485_v27 = vmax.f32 %v18330_v8, 0.0  ;;  %v21486_v20 = vmax.f32 %v18334_v55, 0.0  ;;  %v6379_v63 = vld [vmem:[#allocation8 + $0x138] sm:$0xff] }
 0x688   :  { %13290 = vmatprep.mubr.f32.mxu1 %v21447_v29  ;;  %v21487_v41 = vmax.f32 %v18338_v16, 0.0  ;;  %v21488_v14 = vmax.f32 %v18342_v25, 0.0  ;;  %v21489_v36 = vmax.f32 %v18346_v10, 0.0  ;;  %v21490_v34 = vmax.f32 %v18350_v49, 0.0  ;;  %v6374_v10 = vld [vmem:[#allocation8 + $0x110] sm:$0xff] }
 0x689   :  { %v21491_v7 = vmax.f32 %v18354_v18, 0.0  ;;  %v21492_v8 = vmax.f32 %v21425_v62, 0.0  ;;  %v21493_v55 = vmax.f32 %v21426_v53, 0.0  ;;  %v21494_v16 = vmax.f32 %v21428_v30, 0.0  ;;  %v6376_v62 = vld [vmem:[#allocation8 + $0x120] sm:$0xff]  ;;  %v18670_v53 = vld [vmem:[#allocation2 + $0x18] sm:$0xff] }
 0x68a   :  { %v21495_v25 = vmax.f32 %v21429_v43, 0.0  ;;  %v21496_v49 = vmax.f32 %v21430_v45, 0.0  ;;  %v14745_v18 = vpack.c.bf16 %v6375_v50, %v6374_v10  ;;  %v14749_v30 = vpack.c.bf16 %v6377_v9, %v6376_v62  ;;  %v18674_v43 = vld [vmem:[#allocation2 + $0x20] sm:$0xff]  ;;  %v6378_v45 = vld [vmem:[#allocation8 + $0x130] sm:$0xff]  ;;  %v18790_v10 = vld [vmem:[#allocation2 + $0x228] sm:$0xff] }
 0x68b   :  { %13291 = vmatmul.mubr.f32.gmra.mrb[14].mxu1 %v21448_v6  ;;  %v18677_v29 = vld [vmem:[#allocation2 + $0x30] sm:$0xff]  ;;  %v14753_v6 = vpack.c.bf16 %v6379_v63, %v6378_v45  ;;  %v18805_v62 = vld [vmem:[#allocation2 + $0x260] sm:$0xff]  ;;  %v18814_v45 = vld [vmem:[#allocation2 + $0x288] sm:$0xff] }
 0x68c   :  { %13293 = vmatprep.mubr.f32.mxu1 %v21449_v31  ;;  %v18680_v31 = vld [vmem:[#allocation2 + $0x38] sm:$0xff]  ;;  %v18793_v50 = vld [vmem:[#allocation2 + $0x230] sm:$0xff] }
 0x68d   :  { %v18808_v9 = vld [vmem:[#allocation2 + $0x270] sm:$0xff] }
 0x68e   :  { %v18817_v63 = vld [vmem:[#allocation2 + $0x290] sm:$0xff] }
 0x68f   :  { %13294 = vmatmul.mubr.f32.gmra.mrb[16].mxu1 %v21450_v46  ;;  %v6380_v46 = vld [vmem:[#allocation8 + $0x140] sm:$0xff] }
 0x690   :  { %13296 = vmatprep.mubr.f32.mxu1 %v21451_v17  ;;  %v6381_v17 = vld [vmem:[#allocation8 + $0x148] sm:$0xff] }
 0x693   :  { %13297 = vmatmul.mubr.f32.gmra.mrb[18].mxu1 %v21452_v42  ;;  %v14757_v42 = vpack.c.bf16 %v6381_v17, %v6380_v46  ;;  %v18823_v46 = vld [vmem:[#allocation2 + $0x2a8] sm:$0xff]  ;;  %v18826_v17 = vld [vmem:[#allocation2 + $0x2b8] sm:$0xff] }
 0x694   :  { %13299 = vmatprep.mubr.f32.mxu1 %v21453_v12  ;;  %v18686_v12 = vld [vmem:[#allocation2 + $0x50] sm:$0xff]  ;;  %21497 = vst [vmem:[#allocation72_spill] sm:$0xff] %v18826_v17 }
 0x697   :  { %13300 = vmatmul.mubr.f32.gmra.mrb[20].mxu1 %v21454_v38  ;;  %v6382_v38 = vld [vmem:[#allocation8 + $0x150] sm:$0xff] }
 0x698   :  { %13302 = vmatprep.mubr.f32.mxu1 %v21455_v51  ;;  %v6383_v51 = vld [vmem:[#allocation8 + $0x158] sm:$0xff] }
 0x69b   :  { %13303 = vmatmul.mubr.f32.gmra.mrb[22].mxu1 %v21456_v2  ;;  %v18689_v2 = vld [vmem:[#allocation2 + $0x60] sm:$0xff] }
 0x69c   :  { %13305 = vmatprep.mubr.f32.mxu1 %v21457_v57  ;;  %v14761_v57 = vpack.c.bf16 %v6383_v51, %v6382_v38  ;;  %v18832_v38 = vld [vmem:[#allocation2 + $0x2d0] sm:$0xff]  ;;  %v18835_v51 = vld [vmem:[#allocation2 + $0x2d8] sm:$0xff] }
 0x69d   :  { %21499 = vst [vmem:[#allocation74_spill] sm:$0xff] %v18832_v38  ;;  %21500 = vst [vmem:[#allocation75_spill] sm:$0xff] %v18835_v51 }
 0x69f   :  { %13306 = vmatmul.mubr.f32.gmra.mrb[24].mxu1 %v21458_v40  ;;  %v18692_v40 = vld [vmem:[#allocation2 + $0x68] sm:$0xff] }
 0x6a0   :  { %13308 = vmatprep.mubr.f32.mxu1 %v21459_v24  ;;  %v6384_v24 = vld [vmem:[#allocation8 + $0x160] sm:$0xff] }
 0x6a3   :  { %13309 = vmatmul.mubr.f32.gmra.mrb[26].mxu1 %v21460_v48  ;;  %v6385_v48 = vld [vmem:[#allocation8 + $0x168] sm:$0xff] }
 0x6a4   :  { %13311 = vmatprep.mubr.f32.mxu1 %v21461_v0  ;;  %v18695_v0 = vld [vmem:[#allocation2 + $0x78] sm:$0xff] }
 0x6a7   :  { %13312 = vmatmul.mubr.f32.gmra.mrb[28].mxu1 %v21462_v3  ;;  %v14765_v3 = vpack.c.bf16 %v6385_v48, %v6384_v24  ;;  %v18841_v24 = vld [vmem:[#allocation2 + $0x2f0] sm:$0xff]  ;;  %v18844_v48 = vld [vmem:[#allocation2 + $0x300] sm:$0xff] }
 0x6a8   :  { %13314 = vmatprep.mubr.f32.mxu1 %v21463_v61  ;;  %v18698_v61 = vld [vmem:[#allocation2 + $0x80] sm:$0xff]  ;;  %21502 = vst [vmem:[#allocation77_spill] sm:$0xff] %v18841_v24  ;;  %21503 = vst [vmem:[#allocation78_spill] sm:$0xff] %v18844_v48 }
 0x6ab   :  { %13315 = vmatmul.mubr.f32.gmra.mrb[30].mxu1 %v21464_v23  ;;  %v6387_v23 = vld [vmem:[#allocation8 + $0x178] sm:$0xff] }
 0x6ac   :  { %13317 = vmatprep.mubr.f32.mxu1 %v5488_v5  ;;  %v6386_v5 = vld [vmem:[#allocation8 + $0x170] sm:$0xff] }
 0x6af   :  { %13318 = vmatmul.mubr.f32.gmra.mrb[32].mxu1 %v5489_v60  ;;  %v18701_v60 = vld [vmem:[#allocation2 + $0x90] sm:$0xff] }
 0x6b0   :  { %13320 = vmatprep.mubr.f32.mxu1 %v21465_v26  ;;  %v14769_v26 = vpack.c.bf16 %v6387_v23, %v6386_v5  ;;  %v18850_v5 = vld [vmem:[#allocation2 + $0x318] sm:$0xff]  ;;  %v6307_v23 = vld [vmem:[#allocation2 + $0x2] sm:$0xff] }
 0x6b1   :  { %21505 = vst [vmem:[#allocation80_spill] sm:$0xff] %v18850_v5 }
 0x6b3   :  { %13321 = vmatmul.mubr.f32.gmra.mrb[34].mxu1 %v21466_v21  ;;  %v18704_v21 = vld [vmem:[#allocation2 + $0x98] sm:$0xff] }
 0x6b4   :  { %13323 = vmatprep.mubr.f32.mxu1 %v21467_v37  ;;  %v6902_v37 = vld [vmem:[#allocation8 + $0x180] sm:$0xff] }
 0x6b7   :  { %13324 = vmatmul.mubr.f32.gmra.mrb[36].mxu1 %v21468_v33  ;;  %v6903_v33 = vld [vmem:[#allocation8 + $0x188] sm:$0xff] }
 0x6b8   :  { %13326 = vmatprep.mubr.f32.mxu1 %v21469_v22  ;;  %v18707_v22 = vld [vmem:[#allocation2 + $0xa8] sm:$0xff] }
 0x6bb   :  { %13327 = vmatmul.mubr.f32.gmra.mrb[38].mxu1 %v21470_v54  ;;  %v18710_v54 = vpack.c.bf16 %v6903_v33, %v6902_v37  ;;  %v6904_v37 = vld [vmem:[#allocation8 + $0x190] sm:$0xff]  ;;  %v6905_v33 = vld [vmem:[#allocation8 + $0x198] sm:$0xff] }
 0x6bc   :  { %13329 = vmatprep.mubr.f32.mxu1 %v21471_v4  ;;  %v18712_v4 = vld [vmem:[#allocation2 + $0xb0] sm:$0xff] }
 0x6bf   :  { %13330 = vmatmul.mubr.f32.gmra.mrb[40].mxu1 %v21472_v52  ;;  %v18715_v52 = vld [vmem:[#allocation2 + $0xc0] sm:$0xff] }
 0x6c0   :  { %13332 = vmatprep.mubr.f32.mxu1 %v21473_v47  ;;  %v18719_v47 = vld [vmem:[#allocation2 + $0xc8] sm:$0xff] }
 0x6c3   :  { %13333 = vmatmul.mubr.f32.gmra.mrb[42].mxu1 %v21474_v19  ;;  %v18722_v19 = vld [vmem:[#allocation2 + $0xd8] sm:$0xff] }
 0x6c4   :  { %13335 = vmatprep.mubr.f32.mxu1 %v21475_v13  ;;  %v18725_v13 = vld [vmem:[#allocation2 + $0xe0] sm:$0xff] }
 0x6c7   :  { %13336 = vmatmul.mubr.f32.gmra.mrb[44].mxu1 %v21476_v32  ;;  %v18728_v32 = vld [vmem:[#allocation2 + $0xf0] sm:$0xff] }
 0x6c8   :  { %13338 = vmatprep.mubr.f32.mxu1 %v21477_v28  ;;  %v18731_v28 = vld [vmem:[#allocation2 + $0xf8] sm:$0xff] }
 0x6cb   :  { %13339 = vmatmul.mubr.f32.gmra.mrb[46].mxu1 %v21478_v59  ;;  %v18734_v59 = vld [vmem:[#allocation2 + $0x108] sm:$0xff] }
 0x6cc   :  { %13341 = vmatprep.mubr.f32.mxu1 %v21480_v1  ;;  %v18740_v1 = vld [vmem:[#allocation2 + $0x120] sm:$0xff] }
 0x6cf   :  { %13342 = vmatmul.mubr.f32.gmra.mrb[48].mxu1 %v21482_v15  ;;  %v18746_v15 = vld [vmem:[#allocation2 + $0x138] sm:$0xff] }
 0x6d0   :  { %13344 = vmatprep.mubr.f32.mxu1 %v21483_v39  ;;  %v18749_v39 = vld [vmem:[#allocation2 + $0x140] sm:$0xff] }
 0x6d3   :  { %13345 = vmatmul.mubr.f32.gmra.mrb[50].mxu1 %v21484_v44  ;;  %v18752_v44 = vld [vmem:[#allocation2 + $0x150] sm:$0xff] }
 0x6d4   :  { %13347 = vmatprep.mubr.f32.mxu1 %v21485_v27  ;;  %v18755_v27 = vld [vmem:[#allocation2 + $0x158] sm:$0xff] }
 0x6d7   :  { %13348 = vmatmul.mubr.f32.gmra.mrb[52].mxu1 %v21486_v20  ;;  %v18758_v20 = vld [vmem:[#allocation2 + $0x168] sm:$0xff] }
 0x6d8   :  { %13350 = vmatprep.mubr.f32.mxu1 %v21487_v41  ;;  %v18761_v41 = vld [vmem:[#allocation2 + $0x170] sm:$0xff] }
 0x6db   :  { %13351 = vmatmul.mubr.f32.gmra.mrb[54].mxu1 %v21488_v14  ;;  %v18766_v14 = vld [vmem:[#allocation2 + $0x1c8] sm:$0xff] }
 0x6dc   :  { %13353 = vmatprep.mubr.f32.mxu1 %v21489_v36  ;;  %v18769_v36 = vld [vmem:[#allocation2 + $0x1d0] sm:$0xff] }
 0x6df   :  { %13354 = vmatmul.mubr.f32.gmra.mrb[56].mxu1 %v21490_v34  ;;  %v18772_v34 = vld [vmem:[#allocation2 + $0x1e0] sm:$0xff] }
 0x6e0   :  { %13356 = vmatprep.mubr.f32.mxu1 %v21491_v7  ;;  %v18775_v7 = vld [vmem:[#allocation2 + $0x1e8] sm:$0xff] }
 0x6e3   :  { %13357 = vmatmul.mubr.f32.gmra.mrb[58].mxu1 %v21492_v8  ;;  %v18778_v8 = vld [vmem:[#allocation2 + $0x1f8] sm:$0xff] }
 0x6e4   :  { %13359 = vmatprep.mubr.f32.mxu1 %v21493_v55  ;;  %v18781_v55 = vld [vmem:[#allocation2 + $0x200] sm:$0xff] }
 0x6e7   :  { %13360 = vmatmul.mubr.f32.gmra.mrb[60].mxu1 %v21494_v16  ;;  %v18784_v16 = vld [vmem:[#allocation2 + $0x210] sm:$0xff] }
 0x6e8   :  { %13362 = vmatprep.mubr.f32.mxu1 %v21495_v25  ;;  %v18787_v25 = vld [vmem:[#allocation2 + $0x218] sm:$0xff] }
 0x6eb   :  { %13363 = vmatmul.mubr.f32.gmra.mrb[62].mxu1 %v21496_v49  ;;  %v18796_v49 = vld [vmem:[#allocation2 + $0x240] sm:$0xff] }
 0x6ec   :  { %13397 = vmatprep.mubr.f32.mxu1 %v18666_v35 }
 0x6ef   :  { %13398 = vmatmul.mubr.f32.vlgmr.msra.gmra.mrb[0].mxu1 %v18666_v35 }
 0x6f0   :  { %13400 = vmatprep.mubr.f32.mxu1 %v18670_v53  ;;  %14744 = vmatpush3.bf16.msra.mxu1 %v18565_v11  ;;  %v18683_v11 = vld [vmem:[#allocation2 + $0x48] sm:$0xff] }
 0x6f1   :  { %14746 = vmatprep.subr.bf16.mxu1 %v14745_v18 }
 0x6f3   :  { %13401 = vmatmul.mubr.f32.gmra.mrb[2].mxu1 %v18674_v43 }
 0x6f4   :  { %13403 = vmatprep.mubr.f32.mxu1 %v18677_v29  ;;  %14748 = vmatpush3.bf16.msra.mxu1 %v14745_v18  ;;  %v18802_v18 = vld [vmem:[#allocation2 + $0x258] sm:$0xff] }
 0x6f5   :  { %14750 = vmatprep.subr.bf16.mxu1 %v14749_v30 }
 0x6f7   :  { %13404 = vmatmul.mubr.f32.gmra.mrb[4].mxu1 %v18680_v31 }
 0x6f8   :  { %13406 = vmatprep.mubr.f32.mxu1 %v18683_v11  ;;  %14752 = vmatpush3.bf16.msra.mxu1 %v14749_v30  ;;  %v18811_v30 = vld [vmem:[#allocation2 + $0x278] sm:$0xff] }
 0x6f9   :  { %14754 = vmatprep.subr.bf16.mxu1 %v14753_v6 }
 0x6fb   :  { %13407 = vmatmul.mubr.f32.gmra.mrb[6].mxu1 %v18686_v12 }
 0x6fc   :  { %13409 = vmatprep.mubr.f32.mxu1 %v18689_v2  ;;  %14756 = vmatpush3.bf16.msra.mxu1 %v14753_v6  ;;  %v18820_v6 = vld [vmem:[#allocation2 + $0x2a0] sm:$0xff] }
 0x6fd   :  { %14758 = vmatprep.subr.bf16.mxu1 %v14757_v42 }
 0x6ff   :  { %13410 = vmatmul.mubr.f32.gmra.mrb[8].mxu1 %v18692_v40 }
 0x700   :  { %13412 = vmatprep.mubr.f32.mxu1 %v18695_v0  ;;  %14760 = vmatpush3.bf16.msra.mxu1 %v14757_v42  ;;  %v18829_v42 = vld [vmem:[#allocation2 + $0x2c0] sm:$0xff] }
 0x701   :  { %14762 = vmatprep.subr.bf16.mxu1 %v14761_v57  ;;  %21498 = vst [vmem:[#allocation73_spill] sm:$0xff] %v18829_v42 }
 0x703   :  { %13413 = vmatmul.mubr.f32.gmra.mrb[10].mxu1 %v18698_v61 }
 0x704   :  { %13415 = vmatprep.mubr.f32.mxu1 %v18701_v60  ;;  %14764 = vmatpush3.bf16.msra.mxu1 %v14761_v57  ;;  %v18838_v57 = vld [vmem:[#allocation2 + $0x2e8] sm:$0xff] }
 0x705   :  { %14766 = vmatprep.subr.bf16.mxu1 %v14765_v3  ;;  %21501 = vst [vmem:[#allocation76_spill] sm:$0xff] %v18838_v57 }
 0x707   :  { %13416 = vmatmul.mubr.f32.gmra.mrb[12].mxu1 %v18704_v21 }
 0x708   :  { %13418 = vmatprep.mubr.f32.mxu1 %v18707_v22  ;;  %14768 = vmatpush3.bf16.msra.mxu1 %v14765_v3  ;;  %v18847_v3 = vld [vmem:[#allocation2 + $0x308] sm:$0xff] }
 0x709   :  { %14770 = vmatprep.subr.bf16.mxu1 %v14769_v26  ;;  %21504 = vst [vmem:[#allocation79_spill] sm:$0xff] %v18847_v3 }
 0x70b   :  { %13419 = vmatmul.mubr.f32.gmra.mrb[14].mxu1 %v18712_v4 }
 0x70c   :  { %13421 = vmatprep.mubr.f32.mxu1 %v18715_v52  ;;  %14772 = vmatpush3.bf16.msra.mxu1 %v14769_v26  ;;  %v18853_v26 = vld [vmem:[#allocation2 + $0x320] sm:$0xff] }
 0x70d   :  { %14774 = vmatprep.subr.bf16.mxu1 %v18710_v54 }
 0x70f   :  { %13422 = vmatmul.mubr.f32.gmra.mrb[16].mxu1 %v18719_v47 }
 0x710   :  { %13424 = vmatprep.mubr.f32.mxu1 %v18722_v19 }
 0x713   :  { %13425 = vmatmul.mubr.f32.gmra.mrb[18].mxu1 %v18725_v13 }
 0x714   :  { %13427 = vmatprep.mubr.f32.mxu1 %v18728_v32 }
 0x717   :  { %13428 = vmatmul.mubr.f32.gmra.mrb[20].mxu1 %v18731_v28 }
 0x718   :  { %13430 = vmatprep.mubr.f32.mxu1 %v18734_v59 }
 0x71b   :  { %13431 = vmatmul.mubr.f32.gmra.mrb[22].mxu1 %v18737_v56 }
 0x71c   :  { %13433 = vmatprep.mubr.f32.mxu1 %v18740_v1 }
 0x71f   :  { %13434 = vmatmul.mubr.f32.gmra.mrb[24].mxu1 %v18743_v58 }
 0x720   :  { %13436 = vmatprep.mubr.f32.mxu1 %v18746_v15 }
 0x723   :  { %13437 = vmatmul.mubr.f32.gmra.mrb[26].mxu1 %v18749_v39 }
 0x724   :  { %13439 = vmatprep.mubr.f32.mxu1 %v18752_v44 }
 0x727   :  { %13440 = vmatmul.mubr.f32.gmra.mrb[28].mxu1 %v18755_v27 }
 0x728   :  { %13442 = vmatprep.mubr.f32.mxu1 %v18758_v20 }
 0x72b   :  { %13443 = vmatmul.mubr.f32.gmra.mrb[30].mxu1 %v18761_v41 }
 0x72c   :  { %13445 = vmatprep.mubr.f32.mxu1 %v18666_v35 }
 0x72f   :  { %13446 = vmatmul.mubr.f32.gmra.mrb[32].mxu1 %v18666_v35  ;;  %v18799_v35 = vld [vmem:[#allocation2 + $0x248] sm:$0xff] }
 0x730   :  { %13448 = vmatprep.mubr.f32.mxu1 %v18766_v14 }
 0x733   :  { %13449 = vmatmul.mubr.f32.gmra.mrb[34].mxu1 %v18769_v36 }
 0x734   :  { %13451 = vmatprep.mubr.f32.mxu1 %v18772_v34 }
 0x737   :  { %13452 = vmatmul.mubr.f32.gmra.mrb[36].mxu1 %v18775_v7 }
 0x738   :  { %13454 = vmatprep.mubr.f32.mxu1 %v18778_v8 }
 0x73b   :  { %13455 = vmatmul.mubr.f32.gmra.mrb[38].mxu1 %v18781_v55 }
 0x73c   :  { %13457 = vmatprep.mubr.f32.mxu1 %v18784_v16 }
 0x73f   :  { %13458 = vmatmul.mubr.f32.gmra.mrb[40].mxu1 %v18787_v25 }
 0x740   :  { %13460 = vmatprep.mubr.f32.mxu1 %v18790_v10 }
 0x743   :  { %13461 = vmatmul.mubr.f32.gmra.mrb[42].mxu1 %v18793_v50 }
 0x744   :  { %13463 = vmatprep.mubr.f32.mxu1 %v18796_v49 }
 0x747   :  { %13464 = vmatmul.mubr.f32.gmra.mrb[44].mxu1 %v18799_v35 }
 0x748   :  { %13466 = vmatprep.mubr.f32.mxu1 %v18802_v18 }
 0x74b   :  { %13467 = vmatmul.mubr.f32.gmra.mrb[46].mxu1 %v18805_v62 }
 0x74c   :  { %13469 = vmatprep.mubr.f32.mxu1 %v18808_v9 }
 0x74f   :  { %13470 = vmatmul.mubr.f32.gmra.mrb[48].mxu1 %v18811_v30 }
 0x750   :  { %13472 = vmatprep.mubr.f32.mxu1 %v18814_v45 }
 0x753   :  { %13473 = vmatmul.mubr.f32.gmra.mrb[50].mxu1 %v18817_v63 }
 0x754   :  { %13475 = vmatprep.mubr.f32.mxu1 %v18820_v6 }
 0x757   :  { %13476 = vmatmul.mubr.f32.gmra.mrb[52].mxu1 %v18823_v46 }
 0x758   :  { %13478 = vmatprep.mubr.f32.mxu1 %v18826_v17  ;;  %v6909_v17 = vld [vmem:[#allocation8 + $0x1b8] sm:$0xff] }
 0x75b   :  { %13479 = vmatmul.mubr.f32.gmra.mrb[54].mxu1 %v18829_v42  ;;  %v6908_v42 = vld [vmem:[#allocation8 + $0x1b0] sm:$0xff] }
 0x75c   :  { %13481 = vmatprep.mubr.f32.mxu1 %v18832_v38  ;;  %v18856_v38 = vld [vmem:[#allocation2 + $0x1a] sm:$0xff] }
 0x75d   :  { %21506 = vst [vmem:[#allocation81_spill] sm:$0xff] %v18856_v38 }
 0x75f   :  { %13482 = vmatmul.mubr.f32.gmra.mrb[56].mxu1 %v18835_v51  ;;  %v6906_v51 = vld [vmem:[#allocation8 + $0x1a0] sm:$0xff] }
 0x760   :  { %13484 = vmatprep.mubr.f32.mxu1 %v18838_v57  ;;  %v14777_v57 = vpack.c.bf16 %v6905_v33, %v6904_v37  ;;  %v18866_v37 = vld [vmem:[#allocation2 + $0x3a] sm:$0xff] }
 0x761   :  { %21509 = vst [vmem:[#allocation84_spill] sm:$0xff] %v18866_v37  ;;  %v6910_v33 = vld [vmem:[#allocation8 + $0x1c0] sm:$0xff] }
 0x763   :  { %13485 = vmatmul.mubr.f32.gmra.mrb[58].mxu1 %v18841_v24  ;;  %v6308_v24 = vld [vmem:[#allocation2 + $0xa] sm:$0xff] }
 0x764   :  { %13487 = vmatprep.mubr.f32.mxu1 %v18844_v48  ;;  %v6907_v48 = vld [vmem:[#allocation8 + $0x1a8] sm:$0xff] }
 0x767   :  { %13488 = vmatmul.mubr.f32.gmra.mrb[60].mxu1 %v18847_v3  ;;  %v18860_v3 = vld [vmem:[#allocation2 + $0x22] sm:$0xff] }
 0x768   :  { %13490 = vmatprep.mubr.f32.mxu1 %v18850_v5  ;;  %v14781_v5 = vpack.c.bf16 %v6907_v48, %v6906_v51  ;;  %21507 = vst [vmem:[#allocation82_spill] sm:$0xff] %v18860_v3  ;;  %v18872_v48 = vld [vmem:[#allocation2 + $0x52] sm:$0xff] }
 0x769   :  { %21511 = vst [vmem:[#allocation21_spill] sm:$0xff] %v18872_v48 }
 0x76b   :  { %13491 = vmatmul.mubr.f32.gmra.mrb[62].mxu1 %v18853_v26 }
 0x76c   :  { %13525 = vmatprep.mubr.f32.mxu1 %v6307_v23  ;;  %v18863_v23 = vld [vmem:[#allocation2 + $0x32] sm:$0xff] }
 0x76d   :  { %21508 = vst [vmem:[#allocation83_spill] sm:$0xff] %v18863_v23 }
 0x76f   :  { %13526 = vmatmul.mubr.f32.vlgmr.msra.gmra.mrb[0].mxu1 %v6308_v24  ;;  %v14785_v24 = vpack.c.bf16 %v6909_v17, %v6908_v42  ;;  %v18875_v17 = vld [vmem:[#allocation2 + $0x62] sm:$0xff] }
 0x770   :  { %13528 = vmatprep.mubr.f32.mxu1 %v18856_v38  ;;  %14776 = vmatpush3.bf16.msra.mxu1 %v18710_v54  ;;  %v6911_v38 = vld [vmem:[#allocation8 + $0x1c8] sm:$0xff]  ;;  %21512 = vst [vmem:[#allocation22_spill] sm:$0xff] %v18875_v17 }
 0x771   :  { %14778 = vmatprep.subr.bf16.mxu1 %v14777_v57  ;;  %v18869_v54 = vld [vmem:[#allocation2 + $0x4a] sm:$0xff]  ;;  %v14789_v51 = vpack.c.bf16 %v6911_v38, %v6910_v33  ;;  %v18881_v38 = vld [vmem:[#allocation2 + $0x7a] sm:$0xff]  ;;  %v18884_v33 = vld [vmem:[#allocation2 + $0x82] sm:$0xff] }
 0x772   :  { %21510 = vst [vmem:[#allocation85_spill] sm:$0xff] %v18869_v54  ;;  %21514 = vst [vmem:[#allocation24_spill] sm:$0xff] %v18881_v38 }
 0x773   :  { %13529 = vmatmul.mubr.f32.gmra.mrb[2].mxu1 %v18860_v3  ;;  %v6912_v3 = vld [vmem:[#allocation8 + $0x1d0] sm:$0xff] }
 0x774   :  { %13531 = vmatprep.mubr.f32.mxu1 %v18863_v23  ;;  %14780 = vmatpush3.bf16.msra.mxu1 %v14777_v57  ;;  %v6913_v23 = vld [vmem:[#allocation8 + $0x1d8] sm:$0xff]  ;;  %v18878_v57 = vld [vmem:[#allocation2 + $0x6a] sm:$0xff] }
 0x775   :  { %14782 = vmatprep.subr.bf16.mxu1 %v14781_v5  ;;  %v14793_v42 = vpack.c.bf16 %v6913_v23, %v6912_v3  ;;  %21513 = vst [vmem:[#allocation23_spill] sm:$0xff] %v18878_v57  ;;  %v18887_v3 = vld [vmem:[#allocation2 + $0x92] sm:$0xff] }
 0x777   :  { %13532 = vmatmul.mubr.f32.gmra.mrb[4].mxu1 %v18866_v37  ;;  %v6914_v37 = vld [vmem:[#allocation8 + $0x1e0] sm:$0xff] }
 0x778   :  { %13534 = vmatprep.mubr.f32.mxu1 %v18869_v54  ;;  %14784 = vmatpush3.bf16.msra.mxu1 %v14781_v5  ;;  %v6915_v54 = vld [vmem:[#allocation8 + $0x1e8] sm:$0xff] }
 0x779   :  { %14786 = vmatprep.subr.bf16.mxu1 %v14785_v24  ;;  %v14797_v5 = vpack.c.bf16 %v6915_v54, %v6914_v37  ;;  %v18893_v37 = vld [vmem:[#allocation2 + $0xaa] sm:$0xff] }
 0x77a   :  { %21515 = vst [vmem:[#allocation25_spill] sm:$0xff] %v18893_v37 }
 0x77b   :  { %13535 = vmatmul.mubr.f32.gmra.mrb[6].mxu1 %v18872_v48  ;;  %v6916_v48 = vld [vmem:[#allocation8 + $0x1f0] sm:$0xff] }
 0x77c   :  { %13537 = vmatprep.mubr.f32.mxu1 %v18875_v17  ;;  %14788 = vmatpush3.bf16.msra.mxu1 %v14785_v24  ;;  %v6917_v17 = vld [vmem:[#allocation8 + $0x1f8] sm:$0xff] }
 0x77d   :  { %14790 = vmatprep.subr.bf16.mxu1 %v14789_v51  ;;  %v14801_v23 = vpack.c.bf16 %v6917_v17, %v6916_v48  ;;  %v18890_v24 = vld [vmem:[#allocation2 + $0x9a] sm:$0xff]  ;;  %v18905_v48 = vld [vmem:[#allocation2 + $0xca] sm:$0xff] }
 0x77e   :  { %21518 = vst [vmem:[#allocation28_spill] sm:$0xff] %v18905_v48  ;;  %v18908_v17 = vld [vmem:[#allocation2 + $0xda] sm:$0xff] }
 0x77f   :  { %13538 = vmatmul.mubr.f32.gmra.mrb[8].mxu1 %v18878_v57  ;;  %v7432_v57 = vld [vmem:[#allocation8 + $0x200] sm:$0xff]  ;;  %21519 = vst [vmem:[#allocation29_spill] sm:$0xff] %v18908_v17 }
 0x780   :  { %13540 = vmatprep.mubr.f32.mxu1 %v18881_v38  ;;  %14792 = vmatpush3.bf16.msra.mxu1 %v14789_v51  ;;  %v7433_v38 = vld [vmem:[#allocation8 + $0x208] sm:$0xff]  ;;  %v18898_v51 = vld [vmem:[#allocation2 + $0xb2] sm:$0xff] }
 0x781   :  { %14794 = vmatprep.subr.bf16.mxu1 %v14793_v42  ;;  %v18896_v54 = vpack.c.bf16 %v7433_v38, %v7432_v57  ;;  %21516 = vst [vmem:[#allocation26_spill] sm:$0xff] %v18898_v51  ;;  %v18911_v57 = vld [vmem:[#allocation2 + $0xe2] sm:$0xff]  ;;  %v18914_v38 = vld [vmem:[#allocation2 + $0xf2] sm:$0xff] }
 0x782   :  { %21520 = vst [vmem:[#allocation30_spill] sm:$0xff] %v18911_v57  ;;  %21521 = vst [vmem:[#allocation86_spill] sm:$0xff] %v18914_v38 }
 0x783   :  { %13541 = vmatmul.mubr.f32.gmra.mrb[10].mxu1 %v18884_v33 }
 0x784   :  { %13543 = vmatprep.mubr.f32.mxu1 %v18887_v3  ;;  %14796 = vmatpush3.bf16.msra.mxu1 %v14793_v42  ;;  %v18901_v42 = vld [vmem:[#allocation2 + $0xc2] sm:$0xff] }
 0x785   :  { %14798 = vmatprep.subr.bf16.mxu1 %v14797_v5  ;;  %21517 = vst [vmem:[#allocation27_spill] sm:$0xff] %v18901_v42 }
 0x787   :  { %13544 = vmatmul.mubr.f32.gmra.mrb[12].mxu1 %v18890_v24 }
 0x788   :  { %13546 = vmatprep.mubr.f32.mxu1 %v18893_v37  ;;  %14800 = vmatpush3.bf16.msra.mxu1 %v14797_v5  ;;  %v18917_v5 = vld [vmem:[#allocation2 + $0xfa] sm:$0xff]  ;;  %v7437_v37 = vld [vmem:[#allocation8 + $0x228] sm:$0xff] }
 0x789   :  { %14802 = vmatprep.subr.bf16.mxu1 %v14801_v23  ;;  %21522 = vst [vmem:[#allocation87_spill] sm:$0xff] %v18917_v5 }
 0x78b   :  { %13547 = vmatmul.mubr.f32.gmra.mrb[14].mxu1 %v18898_v51  ;;  %v7436_v51 = vld [vmem:[#allocation8 + $0x220] sm:$0xff] }
 0x78c   :  { %13549 = vmatprep.mubr.f32.mxu1 %v18901_v42  ;;  %14804 = vmatpush3.bf16.msra.mxu1 %v14801_v23  ;;  %v18920_v23 = vld [vmem:[#allocation2 + $0x10a] sm:$0xff]  ;;  %v18947_v42 = vld [vmem:[#allocation2 + $0x172] sm:$0xff] }
 0x78d   :  { %14806 = vmatprep.subr.bf16.mxu1 %v18896_v54  ;;  %21523 = vst [vmem:[#allocation88_spill] sm:$0xff] %v18920_v23  ;;  %21532 = vst [vmem:[#allocation31_spill] sm:$0xff] %v18947_v42 }
 0x78f   :  { %13550 = vmatmul.mubr.f32.gmra.mrb[16].mxu1 %v18905_v48  ;;  %v18923_v48 = vld [vmem:[#allocation2 + $0x112] sm:$0xff] }
 0x790   :  { %13552 = vmatprep.mubr.f32.mxu1 %v18908_v17  ;;  %21524 = vst [vmem:[#allocation89_spill] sm:$0xff] %v18923_v48  ;;  %v18926_v17 = vld [vmem:[#allocation2 + $0x122] sm:$0xff] }
 0x791   :  { %21525 = vst [vmem:[#allocation90_spill] sm:$0xff] %v18926_v17 }
 0x793   :  { %13553 = vmatmul.mubr.f32.gmra.mrb[18].mxu1 %v18911_v57  ;;  %v18929_v57 = vld [vmem:[#allocation2 + $0x12a] sm:$0xff] }
 0x794   :  { %13555 = vmatprep.mubr.f32.mxu1 %v18914_v38  ;;  %21526 = vst [vmem:[#allocation91_spill] sm:$0xff] %v18929_v57  ;;  %v18932_v38 = vld [vmem:[#allocation2 + $0x13a] sm:$0xff] }
 0x795   :  { %21527 = vst [vmem:[#allocation92_spill] sm:$0xff] %v18932_v38 }
 0x797   :  { %13556 = vmatmul.mubr.f32.gmra.mrb[20].mxu1 %v18917_v5  ;;  %v18935_v5 = vld [vmem:[#allocation2 + $0x142] sm:$0xff] }
 0x798   :  { %13558 = vmatprep.mubr.f32.mxu1 %v18920_v23  ;;  %21528 = vst [vmem:[#allocation93_spill] sm:$0xff] %v18935_v5  ;;  %v18938_v23 = vld [vmem:[#allocation2 + $0x152] sm:$0xff] }
 0x799   :  { %21529 = vst [vmem:[#allocation94_spill] sm:$0xff] %v18938_v23 }
 0x79b   :  { %13559 = vmatmul.mubr.f32.gmra.mrb[22].mxu1 %v18923_v48  ;;  %v18941_v48 = vld [vmem:[#allocation2 + $0x15a] sm:$0xff] }
 0x79c   :  { %13561 = vmatprep.mubr.f32.mxu1 %v18926_v17  ;;  %21530 = vst [vmem:[#allocation95_spill] sm:$0xff] %v18941_v48  ;;  %v18944_v17 = vld [vmem:[#allocation2 + $0x16a] sm:$0xff] }
 0x79d   :  { %21531 = vst [vmem:[#allocation96_spill] sm:$0xff] %v18944_v17 }
 0x79f   :  { %13562 = vmatmul.mubr.f32.gmra.mrb[24].mxu1 %v18929_v57  ;;  %v6339_v57 = vld [vmem:[#allocation2 + $0x1b2] sm:$0xff] }
 0x7a0   :  { %13564 = vmatprep.mubr.f32.mxu1 %v18932_v38  ;;  %v6340_v38 = vld [vmem:[#allocation2 + $0x1ba] sm:$0xff] }
 0x7a3   :  { %13565 = vmatmul.mubr.f32.gmra.mrb[26].mxu1 %v18935_v5  ;;  %v18950_v5 = vld [vmem:[#allocation2 + $0x1ca] sm:$0xff] }
 0x7a4   :  { %13567 = vmatprep.mubr.f32.mxu1 %v18938_v23  ;;  %21533 = vst [vmem:[#allocation44_spill] sm:$0xff] %v18950_v5  ;;  %v18953_v23 = vld [vmem:[#allocation2 + $0x1d2] sm:$0xff] }
 0x7a5   :  { %21534 = vst [vmem:[#allocation49_spill] sm:$0xff] %v18953_v23 }
 0x7a7   :  { %13568 = vmatmul.mubr.f32.gmra.mrb[28].mxu1 %v18941_v48  ;;  %v18956_v48 = vld [vmem:[#allocation2 + $0x1e2] sm:$0xff] }
 0x7a8   :  { %13570 = vmatprep.mubr.f32.mxu1 %v18944_v17  ;;  %21535 = vst [vmem:[#allocation48_spill] sm:$0xff] %v18956_v48  ;;  %v18959_v17 = vld [vmem:[#allocation2 + $0x1ea] sm:$0xff] }
 0x7a9   :  { %21536 = vst [vmem:[#allocation51_spill] sm:$0xff] %v18959_v17 }
 0x7ab   :  { %13571 = vmatmul.mubr.f32.gmra.mrb[30].mxu1 %v18947_v42  ;;  %v18962_v42 = vld [vmem:[#allocation2 + $0x1fa] sm:$0xff] }
 0x7ac   :  { %13573 = vmatprep.mubr.f32.mxu1 %v6339_v57  ;;  %21537 = vst [vmem:[#allocation50_spill] sm:$0xff] %v18962_v42  ;;  %v18965_v57 = vld [vmem:[#allocation2 + $0x202] sm:$0xff] }
 0x7ad   :  { %21538 = vst [vmem:[#allocation33_spill] sm:$0xff] %v18965_v57 }
 0x7af   :  { %13574 = vmatmul.mubr.f32.gmra.mrb[32].mxu1 %v6340_v38  ;;  %v18968_v38 = vld [vmem:[#allocation2 + $0x212] sm:$0xff] }
 0x7b0   :  { %13576 = vmatprep.mubr.f32.mxu1 %v18950_v5  ;;  %21539 = vst [vmem:[#allocation32_spill] sm:$0xff] %v18968_v38  ;;  %v7434_v5 = vld [vmem:[#allocation8 + $0x210] sm:$0xff] }
 0x7b3   :  { %13577 = vmatmul.mubr.f32.gmra.mrb[34].mxu1 %v18953_v23  ;;  %v18971_v23 = vld [vmem:[#allocation2 + $0x21a] sm:$0xff] }
 0x7b4   :  { %13579 = vmatprep.mubr.f32.mxu1 %v18956_v48  ;;  %21540 = vst [vmem:[#allocation35_spill] sm:$0xff] %v18971_v23  ;;  %v18974_v48 = vld [vmem:[#allocation2 + $0x22a] sm:$0xff] }
 0x7b5   :  { %21541 = vst [vmem:[#allocation34_spill] sm:$0xff] %v18974_v48 }
 0x7b7   :  { %13580 = vmatmul.mubr.f32.gmra.mrb[36].mxu1 %v18959_v17  ;;  %v18977_v17 = vld [vmem:[#allocation2 + $0x232] sm:$0xff] }
 0x7b8   :  { %13582 = vmatprep.mubr.f32.mxu1 %v18962_v42  ;;  %21542 = vst [vmem:[#allocation37_spill] sm:$0xff] %v18977_v17  ;;  %v18980_v42 = vld [vmem:[#allocation2 + $0x242] sm:$0xff] }
 0x7b9   :  { %21543 = vst [vmem:[#allocation36_spill] sm:$0xff] %v18980_v42 }
 0x7bb   :  { %13583 = vmatmul.mubr.f32.gmra.mrb[38].mxu1 %v18965_v57  ;;  %v18983_v57 = vld [vmem:[#allocation2 + $0x24a] sm:$0xff] }
 0x7bc   :  { %13585 = vmatprep.mubr.f32.mxu1 %v18968_v38  ;;  %21544 = vst [vmem:[#allocation39_spill] sm:$0xff] %v18983_v57  ;;  %v18986_v38 = vld [vmem:[#allocation2 + $0x25a] sm:$0xff] }
 0x7bd   :  { %21545 = vst [vmem:[#allocation38_spill] sm:$0xff] %v18986_v38 }
 0x7bf   :  { %13586 = vmatmul.mubr.f32.gmra.mrb[40].mxu1 %v18971_v23  ;;  %v18989_v23 = vld [vmem:[#allocation2 + $0x262] sm:$0xff] }
 0x7c0   :  { %13588 = vmatprep.mubr.f32.mxu1 %v18974_v48  ;;  %21546 = vst [vmem:[#allocation41_spill] sm:$0xff] %v18989_v23  ;;  %v18992_v48 = vld [vmem:[#allocation2 + $0x272] sm:$0xff] }
 0x7c1   :  { %21547 = vst [vmem:[#allocation40_spill] sm:$0xff] %v18992_v48 }
 0x7c3   :  { %13589 = vmatmul.mubr.f32.gmra.mrb[42].mxu1 %v18977_v17  ;;  %v18995_v17 = vld [vmem:[#allocation2 + $0x27a] sm:$0xff] }
 0x7c4   :  { %13591 = vmatprep.mubr.f32.mxu1 %v18980_v42  ;;  %21548 = vst [vmem:[#allocation43_spill] sm:$0xff] %v18995_v17  ;;  %v18998_v42 = vld [vmem:[#allocation2 + $0x28a] sm:$0xff] }
 0x7c5   :  { %21549 = vst [vmem:[#allocation42_spill] sm:$0xff] %v18998_v42 }
 0x7c7   :  { %13592 = vmatmul.mubr.f32.gmra.mrb[44].mxu1 %v18983_v57  ;;  %v19001_v57 = vld [vmem:[#allocation2 + $0x292] sm:$0xff] }
 0x7c8   :  { %13594 = vmatprep.mubr.f32.mxu1 %v18986_v38  ;;  %21550 = vst [vmem:[#allocation45_spill] sm:$0xff] %v19001_v57  ;;  %v19004_v38 = vld [vmem:[#allocation2 + $0x2a2] sm:$0xff] }
 0x7c9   :  { %21551 = vst [vmem:[#allocation47_spill] sm:$0xff] %v19004_v38 }
 0x7cb   :  { %13595 = vmatmul.mubr.f32.gmra.mrb[46].mxu1 %v18989_v23  ;;  %v19007_v23 = vld [vmem:[#allocation2 + $0x2aa] sm:$0xff] }
 0x7cc   :  { %13597 = vmatprep.mubr.f32.mxu1 %v18992_v48  ;;  %21552 = vst [vmem:[#allocation46_spill] sm:$0xff] %v19007_v23  ;;  %v19010_v48 = vld [vmem:[#allocation2 + $0x2ba] sm:$0xff] }
 0x7cd   :  { %21553 = vst [vmem:[#allocation53_spill] sm:$0xff] %v19010_v48 }
 0x7cf   :  { %13598 = vmatmul.mubr.f32.gmra.mrb[48].mxu1 %v18995_v17  ;;  %v19013_v17 = vld [vmem:[#allocation2 + $0x2c2] sm:$0xff] }
 0x7d0   :  { %13600 = vmatprep.mubr.f32.mxu1 %v18998_v42  ;;  %21554 = vst [vmem:[#allocation54_spill] sm:$0xff] %v19013_v17  ;;  %v19016_v42 = vld [vmem:[#allocation2 + $0x2d2] sm:$0xff] }
 0x7d1   :  { %21555 = vst [vmem:[#allocation55_spill] sm:$0xff] %v19016_v42 }
 0x7d3   :  { %13601 = vmatmul.mubr.f32.gmra.mrb[50].mxu1 %v19001_v57  ;;  %v19019_v57 = vld [vmem:[#allocation2 + $0x2da] sm:$0xff] }
 0x7d4   :  { %13603 = vmatprep.mubr.f32.mxu1 %v19004_v38  ;;  %21556 = vst [vmem:[#allocation56_spill] sm:$0xff] %v19019_v57  ;;  %v19022_v38 = vld [vmem:[#allocation2 + $0x2ea] sm:$0xff] }
 0x7d5   :  { %21557 = vst [vmem:[#allocation57_spill] sm:$0xff] %v19022_v38 }
 0x7d7   :  { %13604 = vmatmul.mubr.f32.gmra.mrb[52].mxu1 %v19007_v23  ;;  %v19025_v23 = vld [vmem:[#allocation2 + $0x2f2] sm:$0xff] }
 0x7d8   :  { %13606 = vmatprep.mubr.f32.mxu1 %v19010_v48  ;;  %21558 = vst [vmem:[#allocation58_spill] sm:$0xff] %v19025_v23  ;;  %v19028_v48 = vld [vmem:[#allocation2 + $0x302] sm:$0xff] }
 0x7d9   :  { %21559 = vst [vmem:[#allocation59_spill] sm:$0xff] %v19028_v48 }
 0x7db   :  { %13607 = vmatmul.mubr.f32.gmra.mrb[54].mxu1 %v19013_v17  ;;  %v19031_v17 = vld [vmem:[#allocation2 + $0x30a] sm:$0xff] }
 0x7dc   :  { %13609 = vmatprep.mubr.f32.mxu1 %v19016_v42  ;;  %21560 = vst [vmem:[#allocation60_spill] sm:$0xff] %v19031_v17  ;;  %v19034_v42 = vld [vmem:[#allocation2 + $0x31a] sm:$0xff] }
 0x7dd   :  { %21561 = vst [vmem:[#allocation61_spill] sm:$0xff] %v19034_v42 }
 0x7df   :  { %13610 = vmatmul.mubr.f32.gmra.mrb[56].mxu1 %v19019_v57  ;;  %v19037_v57 = vld [vmem:[#allocation2 + $0x322] sm:$0xff] }
 0x7e0   :  { %13612 = vmatprep.mubr.f32.mxu1 %v19022_v38  ;;  %v7435_v38 = vld [vmem:[#allocation8 + $0x218] sm:$0xff] }
 0x7e3   :  { %13613 = vmatmul.mubr.f32.gmra.mrb[58].mxu1 %v19025_v23  ;;  %v14809_v23 = vpack.c.bf16 %v7435_v38, %v7434_v5  ;;  %v7440_v5 = vld [vmem:[#allocation8 + $0x240] sm:$0xff]  ;;  %v7441_v38 = vld [vmem:[#allocation8 + $0x248] sm:$0xff] }
 0x7e4   :  { %13615 = vmatprep.mubr.f32.mxu1 %v19028_v48  ;;  %v7439_v48 = vld [vmem:[#allocation8 + $0x238] sm:$0xff] }
 0x7e7   :  { %13616 = vmatmul.mubr.f32.gmra.mrb[60].mxu1 %v19031_v17  ;;  %v14813_v17 = vpack.c.bf16 %v7437_v37, %v7436_v51  ;;  %v7443_v37 = vld [vmem:[#allocation8 + $0x258] sm:$0xff] }
 0x7e8   :  { %13618 = vmatprep.mubr.f32.mxu1 %v19034_v42  ;;  %v7438_v42 = vld [vmem:[#allocation8 + $0x230] sm:$0xff]  ;;  %v7447_v51 = vld [vmem:[#allocation8 + $0x278] sm:$0xff] }
 0x7eb   :  { %13619 = vmatmul.mubr.f32.gmra.mrb[62].mxu1 %v19037_v57 }
 0x7ec   :  { %13653 = vmatprep.mubr.f32.mxu1 %v18670_v53  ;;  %v14817_v53 = vpack.c.bf16 %v7439_v48, %v7438_v42  ;;  %v7963_v42 = vld [vmem:[#allocation8 + $0x288] sm:$0xff] }
 0x7ef   :  { %13654 = vmatmul.mubr.f32.vlgmr.msra.gmra.mrb[0].mxu1 %v18674_v43  ;;  %v14821_v43 = vpack.c.bf16 %v7441_v38, %v7440_v5  ;;  %v19147_v5 = vld [vmem:[#allocation2 + $0xa9] sm:$0xff] }
 0x7f0   :  { %13656 = vmatprep.mubr.f32.mxu1 %v18677_v29  ;;  %14808 = vmatpush3.bf16.msra.mxu1 %v18896_v54  ;;  %v7442_v29 = vld [vmem:[#allocation8 + $0x250] sm:$0xff]  ;;  %v7445_v54 = vld [vmem:[#allocation8 + $0x268] sm:$0xff] }
 0x7f1   :  { %14810 = vmatprep.subr.bf16.mxu1 %v14809_v23 }
 0x7f3   :  { %13657 = vmatmul.mubr.f32.gmra.mrb[2].mxu1 %v18680_v31  ;;  %v14825_v31 = vpack.c.bf16 %v7443_v37, %v7442_v29  ;;  %v8493_v29 = vld [vmem:[#allocation8 + $0x300] sm:$0xff]  ;;  %v8494_v37 = vld [vmem:[#allocation8 + $0x308] sm:$0xff] }
 0x7f4   :  { %13659 = vmatprep.mubr.f32.mxu1 %v18683_v11  ;;  %14812 = vmatpush3.bf16.msra.mxu1 %v14809_v23  ;;  %v7444_v11 = vld [vmem:[#allocation8 + $0x260] sm:$0xff]  ;;  %v7976_v23 = vld [vmem:[#allocation8 + $0x2f0] sm:$0xff] }
 0x7f5   :  { %14814 = vmatprep.subr.bf16.mxu1 %v14813_v17 }
 0x7f7   :  { %13660 = vmatmul.mubr.f32.gmra.mrb[4].mxu1 %v18686_v12  ;;  %v14829_v12 = vpack.c.bf16 %v7445_v54, %v7444_v11  ;;  %v19156_v11 = vpack.c.bf16 %v8494_v37, %v8493_v29  ;;  %v19158_v54 = vld [vmem:[#allocation2 + $0xc9] sm:$0xff]  ;;  %v19273_v29 = vld [vmem:[#allocation2 + $0x2d9] sm:$0xff] }
 0x7f8   :  { %13662 = vmatprep.mubr.f32.mxu1 %v18689_v2  ;;  %14816 = vmatpush3.bf16.msra.mxu1 %v14813_v17  ;;  %v7446_v2 = vld [vmem:[#allocation8 + $0x270] sm:$0xff]  ;;  %v19144_v17 = vld [vmem:[#allocation2 + $0x99] sm:$0xff] }
 0x7f9   :  { %14818 = vmatprep.subr.bf16.mxu1 %v14817_v53  ;;  %v19276_v37 = vld [vmem:[#allocation2 + $0x2e9] sm:$0xff] }
 0x7fb   :  { %13663 = vmatmul.mubr.f32.gmra.mrb[6].mxu1 %v18692_v40  ;;  %v14833_v40 = vpack.c.bf16 %v7447_v51, %v7446_v2  ;;  %v19165_v2 = vld [vmem:[#allocation2 + $0xe1] sm:$0xff]  ;;  %v19168_v51 = vld [vmem:[#allocation2 + $0xf1] sm:$0xff] }
 0x7fc   :  { %13665 = vmatprep.mubr.f32.mxu1 %v18695_v0  ;;  %14820 = vmatpush3.bf16.msra.mxu1 %v14817_v53  ;;  %v7962_v0 = vld [vmem:[#allocation8 + $0x280] sm:$0xff]  ;;  %v7977_v53 = vld [vmem:[#allocation8 + $0x2f8] sm:$0xff] }
 0x7fd   :  { %14822 = vmatprep.subr.bf16.mxu1 %v14821_v43  ;;  %v14865_v38 = vpack.c.bf16 %v7977_v53, %v7976_v23  ;;  %v19264_v23 = vld [vmem:[#allocation2 + $0x2b9] sm:$0xff]  ;;  %v19267_v53 = vld [vmem:[#allocation2 + $0x2c1] sm:$0xff] }
 0x7fe   :  { %21579 = vst [vmem:[#allocation65_spill] sm:$0xff] %v19264_v23  ;;  %21580 = vst [vmem:[#allocation66_spill] sm:$0xff] %v19267_v53 }
 0x7ff   :  { %13666 = vmatmul.mubr.f32.gmra.mrb[8].mxu1 %v18698_v61  ;;  %v19056_v61 = vpack.c.bf16 %v7963_v42, %v7962_v0  ;;  %v19174_v0 = vld [vmem:[#allocation2 + $0x109] sm:$0xff]  ;;  %v19177_v42 = vld [vmem:[#allocation2 + $0x111] sm:$0xff] }
 0x800   :  { %13668 = vmatprep.mubr.f32.mxu1 %v18701_v60  ;;  %14824 = vmatpush3.bf16.msra.mxu1 %v14821_v43  ;;  %v19074_v60 = vld [vmem:[#allocation2 + $0x180] sm:$0xff]  ;;  %v19150_v43 = vld [vmem:[#allocation2 + $0xb1] sm:$0xff] }
 0x801   :  { %14826 = vmatprep.subr.bf16.mxu1 %v14825_v31 }
 0x803   :  { %13669 = vmatmul.mubr.f32.gmra.mrb[10].mxu1 %v18704_v21  ;;  %v19077_v21 = vld [vmem:[#allocation2 + $0x188] sm:$0xff] }
 0x804   :  { %13671 = vmatprep.mubr.f32.mxu1 %v18707_v22  ;;  %14828 = vmatpush3.bf16.msra.mxu1 %v14825_v31  ;;  %v21562_v22 = vld [vmem:[#allocation72_spill] sm:$0xff] }
 0x805   :  { %14830 = vmatprep.subr.bf16.mxu1 %v14829_v12  ;;  %v19153_v31 = vld [vmem:[#allocation2 + $0xc1] sm:$0xff] }
 0x807   :  { %13672 = vmatmul.mubr.f32.gmra.mrb[12].mxu1 %v18712_v4  ;;  %v21563_v4 = vld [vmem:[#allocation73_spill] sm:$0xff] }
 0x808   :  { %13674 = vmatprep.mubr.f32.mxu1 %v18715_v52  ;;  %14832 = vmatpush3.bf16.msra.mxu1 %v14829_v12  ;;  %v21564_v52 = vld [vmem:[#allocation74_spill] sm:$0xff]  ;;  %v19161_v12 = vld [vmem:[#allocation2 + $0xd9] sm:$0xff]  ;;  %21582 = vst [vmem:[#allocation73_spill] sm:$0xff] %v19273_v29 }
 0x809   :  { %14834 = vmatprep.subr.bf16.mxu1 %v14833_v40  ;;  %21583 = vst [vmem:[#allocation74_spill] sm:$0xff] %v19276_v37 }
 0x80b   :  { %13675 = vmatmul.mubr.f32.gmra.mrb[14].mxu1 %v18719_v47  ;;  %v21565_v47 = vld [vmem:[#allocation75_spill] sm:$0xff] }
 0x80c   :  { %13677 = vmatprep.mubr.f32.mxu1 %v18722_v19  ;;  %14836 = vmatpush3.bf16.msra.mxu1 %v14833_v40  ;;  %v21566_v19 = vld [vmem:[#allocation76_spill] sm:$0xff] }
 0x80d   :  { %14838 = vmatprep.subr.bf16.mxu1 %v19056_v61  ;;  %v19171_v40 = vld [vmem:[#allocation2 + $0xf9] sm:$0xff] }
 0x80f   :  { %13678 = vmatmul.mubr.f32.gmra.mrb[16].mxu1 %v18725_v13  ;;  %v21567_v13 = vld [vmem:[#allocation77_spill] sm:$0xff] }
 0x810   :  { %13680 = vmatprep.mubr.f32.mxu1 %v18728_v32  ;;  %v21568_v32 = vld [vmem:[#allocation78_spill] sm:$0xff] }
 0x813   :  { %13681 = vmatmul.mubr.f32.gmra.mrb[18].mxu1 %v18731_v28  ;;  %v21569_v28 = vld [vmem:[#allocation79_spill] sm:$0xff] }
 0x814   :  { %13683 = vmatprep.mubr.f32.mxu1 %v18734_v59  ;;  %v21570_v59 = vld [vmem:[#allocation80_spill] sm:$0xff] }
 0x817   :  { %13684 = vmatmul.mubr.f32.gmra.mrb[20].mxu1 %v18737_v56  ;;  %v19110_v56 = vld [vmem:[#allocation2 + $0x330] sm:$0xff] }
 0x818   :  { %13686 = vmatprep.mubr.f32.mxu1 %v18740_v1  ;;  %v19113_v1 = vld [vmem:[#allocation2 + $0x338] sm:$0xff] }
 0x81b   :  { %13687 = vmatmul.mubr.f32.gmra.mrb[22].mxu1 %v18743_v58  ;;  %v7964_v58 = vld [vmem:[#allocation8 + $0x290] sm:$0xff] }
 0x81c   :  { %13689 = vmatprep.mubr.f32.mxu1 %v18746_v15  ;;  %v7965_v15 = vld [vmem:[#allocation8 + $0x298] sm:$0xff] }
 0x81f   :  { %13690 = vmatmul.mubr.f32.gmra.mrb[24].mxu1 %v18749_v39  ;;  %v7367_v39 = vld [vmem:[#allocation2 + $0x19] sm:$0xff] }
 0x820   :  { %13692 = vmatprep.mubr.f32.mxu1 %v18752_v44  ;;  %v14841_v44 = vpack.c.bf16 %v7965_v15, %v7964_v58  ;;  %v7399_v58 = vld [vmem:[#allocation2 + $0x1c9] sm:$0xff]  ;;  %v7400_v15 = vld [vmem:[#allocation2 + $0x1d1] sm:$0xff] }
 0x823   :  { %13693 = vmatmul.mubr.f32.gmra.mrb[26].mxu1 %v18755_v27  ;;  %v7368_v27 = vld [vmem:[#allocation2 + $0x21] sm:$0xff] }
 0x824   :  { %13695 = vmatprep.mubr.f32.mxu1 %v18758_v20  ;;  %v7966_v20 = vld [vmem:[#allocation8 + $0x2a0] sm:$0xff] }
 0x827   :  { %13696 = vmatmul.mubr.f32.gmra.mrb[28].mxu1 %v18761_v41  ;;  %v7967_v41 = vld [vmem:[#allocation8 + $0x2a8] sm:$0xff] }
 0x828   :  { %13698 = vmatprep.mubr.f32.mxu1 %v19074_v60 }
 0x82b   :  { %13699 = vmatmul.mubr.f32.gmra.mrb[30].mxu1 %v19077_v21 }
 0x82c   :  { %13701 = vmatprep.mubr.f32.mxu1 %v18766_v14  ;;  %v19116_v14 = vld [vmem:[#allocation2 + $0x31] sm:$0xff] }
 0x82f   :  { %13702 = vmatmul.mubr.f32.gmra.mrb[32].mxu1 %v18769_v36  ;;  %v14845_v36 = vpack.c.bf16 %v7967_v41, %v7966_v20  ;;  %v19219_v20 = vld [vmem:[#allocation2 + $0x201] sm:$0xff]  ;;  %v19222_v41 = vld [vmem:[#allocation2 + $0x211] sm:$0xff] }
 0x830   :  { %13704 = vmatprep.mubr.f32.mxu1 %v18772_v34  ;;  %v19120_v34 = vld [vmem:[#allocation2 + $0x39] sm:$0xff] }
 0x833   :  { %13705 = vmatmul.mubr.f32.gmra.mrb[34].mxu1 %v18775_v7  ;;  %v7968_v7 = vld [vmem:[#allocation8 + $0x2b0] sm:$0xff] }
 0x834   :  { %13707 = vmatprep.mubr.f32.mxu1 %v18778_v8  ;;  %v7969_v8 = vld [vmem:[#allocation8 + $0x2b8] sm:$0xff] }
 0x837   :  { %13708 = vmatmul.mubr.f32.gmra.mrb[36].mxu1 %v18781_v55  ;;  %v19123_v55 = vld [vmem:[#allocation2 + $0x49] sm:$0xff] }
 0x838   :  { %13710 = vmatprep.mubr.f32.mxu1 %v18784_v16  ;;  %v14849_v16 = vpack.c.bf16 %v7969_v8, %v7968_v7  ;;  %v19228_v7 = vld [vmem:[#allocation2 + $0x229] sm:$0xff]  ;;  %v19231_v8 = vld [vmem:[#allocation2 + $0x231] sm:$0xff] }
 0x83b   :  { %13711 = vmatmul.mubr.f32.gmra.mrb[38].mxu1 %v18787_v25  ;;  %v19126_v25 = vld [vmem:[#allocation2 + $0x51] sm:$0xff] }
 0x83c   :  { %13713 = vmatprep.mubr.f32.mxu1 %v18790_v10  ;;  %v7970_v10 = vld [vmem:[#allocation8 + $0x2c0] sm:$0xff] }
 0x83f   :  { %13714 = vmatmul.mubr.f32.gmra.mrb[40].mxu1 %v18793_v50  ;;  %v7971_v50 = vld [vmem:[#allocation8 + $0x2c8] sm:$0xff] }
 0x840   :  { %13716 = vmatprep.mubr.f32.mxu1 %v18796_v49  ;;  %v19129_v49 = vld [vmem:[#allocation2 + $0x61] sm:$0xff] }
 0x843   :  { %13717 = vmatmul.mubr.f32.gmra.mrb[42].mxu1 %v18799_v35  ;;  %v14853_v35 = vpack.c.bf16 %v7971_v50, %v7970_v10  ;;  %v19237_v10 = vld [vmem:[#allocation2 + $0x249] sm:$0xff]  ;;  %v19240_v50 = vld [vmem:[#allocation2 + $0x259] sm:$0xff] }
 0x844   :  { %13719 = vmatprep.mubr.f32.mxu1 %v18802_v18  ;;  %v19132_v18 = vld [vmem:[#allocation2 + $0x69] sm:$0xff]  ;;  %21571 = vst [vmem:[#allocation62_spill] sm:$0xff] %v19240_v50 }
 0x847   :  { %13720 = vmatmul.mubr.f32.gmra.mrb[44].mxu1 %v18805_v62  ;;  %v7972_v62 = vld [vmem:[#allocation8 + $0x2d0] sm:$0xff] }
 0x848   :  { %13722 = vmatprep.mubr.f32.mxu1 %v18808_v9  ;;  %v7973_v9 = vld [vmem:[#allocation8 + $0x2d8] sm:$0xff] }
 0x84b   :  { %13723 = vmatmul.mubr.f32.gmra.mrb[46].mxu1 %v18811_v30  ;;  %v19135_v30 = vld [vmem:[#allocation2 + $0x79] sm:$0xff] }
 0x84c   :  { %13725 = vmatprep.mubr.f32.mxu1 %v18814_v45  ;;  %v14857_v45 = vpack.c.bf16 %v7973_v9, %v7972_v62  ;;  %v19246_v62 = vld [vmem:[#allocation2 + $0x271] sm:$0xff]  ;;  %v19249_v9 = vld [vmem:[#allocation2 + $0x279] sm:$0xff] }
 0x84d   :  { %21573 = vst [vmem:[#allocation64_spill] sm:$0xff] %v19246_v62  ;;  %21574 = vst [vmem:[#allocation67_spill] sm:$0xff] %v19249_v9 }
 0x84f   :  { %13726 = vmatmul.mubr.f32.gmra.mrb[48].mxu1 %v18817_v63  ;;  %v19138_v63 = vld [vmem:[#allocation2 + $0x81] sm:$0xff] }
 0x850   :  { %13728 = vmatprep.mubr.f32.mxu1 %v18820_v6  ;;  %v7974_v6 = vld [vmem:[#allocation8 + $0x2e0] sm:$0xff] }
 0x853   :  { %13729 = vmatmul.mubr.f32.gmra.mrb[50].mxu1 %v18823_v46  ;;  %v7975_v46 = vld [vmem:[#allocation8 + $0x2e8] sm:$0xff] }
 0x854   :  { %13731 = vmatprep.mubr.f32.mxu1 %v21562_v22  ;;  %v14861_v48 = vpack.c.bf16 %v7975_v46, %v7974_v6  ;;  %v19183_v22 = vld [vmem:[#allocation2 + $0x129] sm:$0xff]  ;;  %v19255_v6 = vld [vmem:[#allocation2 + $0x291] sm:$0xff]  ;;  %v19258_v46 = vld [vmem:[#allocation2 + $0x2a1] sm:$0xff] }
 0x855   :  { %21576 = vst [vmem:[#allocation69_spill] sm:$0xff] %v19255_v6  ;;  %21577 = vst [vmem:[#allocation70_spill] sm:$0xff] %v19258_v46 }
 0x857   :  { %13732 = vmatmul.mubr.f32.gmra.mrb[52].mxu1 %v21563_v4  ;;  %v19186_v4 = vld [vmem:[#allocation2 + $0x139] sm:$0xff] }
 0x858   :  { %13734 = vmatprep.mubr.f32.mxu1 %v21564_v52  ;;  %v19189_v52 = vld [vmem:[#allocation2 + $0x141] sm:$0xff] }
 0x85b   :  { %13735 = vmatmul.mubr.f32.gmra.mrb[54].mxu1 %v21565_v47  ;;  %v19192_v47 = vld [vmem:[#allocation2 + $0x151] sm:$0xff] }
 0x85c   :  { %13737 = vmatprep.mubr.f32.mxu1 %v21566_v19  ;;  %v19195_v19 = vld [vmem:[#allocation2 + $0x159] sm:$0xff] }
 0x85f   :  { %13738 = vmatmul.mubr.f32.gmra.mrb[56].mxu1 %v21567_v13  ;;  %v19198_v13 = vld [vmem:[#allocation2 + $0x169] sm:$0xff] }
 0x860   :  { %13740 = vmatprep.mubr.f32.mxu1 %v21568_v32  ;;  %v19201_v32 = vld [vmem:[#allocation2 + $0x171] sm:$0xff] }
 0x863   :  { %13741 = vmatmul.mubr.f32.gmra.mrb[58].mxu1 %v21569_v28  ;;  %v19204_v28 = vld [vmem:[#allocation2 + $0x181] sm:$0xff] }
 0x864   :  { %13743 = vmatprep.mubr.f32.mxu1 %v21570_v59  ;;  %v19207_v59 = vld [vmem:[#allocation2 + $0x189] sm:$0xff] }
 0x867   :  { %13744 = vmatmul.mubr.f32.gmra.mrb[60].mxu1 %v18853_v26  ;;  %v19141_v26 = vld [vmem:[#allocation2 + $0x91] sm:$0xff] }
 0x868   :  { %13746 = vmatprep.mubr.f32.mxu1 %v19110_v56 }
 0x86b   :  { %13747 = vmatmul.mubr.f32.gmra.mrb[62].mxu1 %v19113_v1 }
 0x86c   :  { %13781 = vmatprep.mubr.f32.mxu1 %v7367_v39  ;;  %v19210_v39 = vld [vmem:[#allocation2 + $0x1e1] sm:$0xff] }
 0x86f   :  { %13782 = vmatmul.mubr.f32.vlgmr.msra.gmra.mrb[0].mxu1 %v7368_v27  ;;  %v19216_v27 = vld [vmem:[#allocation2 + $0x1f9] sm:$0xff] }
 0x870   :  { %13784 = vmatprep.mubr.f32.mxu1 %v19116_v14  ;;  %14840 = vmatpush3.bf16.msra.mxu1 %v19056_v61  ;;  %v19180_v61 = vld [vmem:[#allocation2 + $0x121] sm:$0xff] }
 0x871   :  { %14842 = vmatprep.subr.bf16.mxu1 %v14841_v44 }
 0x873   :  { %13785 = vmatmul.mubr.f32.gmra.mrb[2].mxu1 %v19120_v34 }
 0x874   :  { %13787 = vmatprep.mubr.f32.mxu1 %v19123_v55  ;;  %14844 = vmatpush3.bf16.msra.mxu1 %v14841_v44  ;;  %v19213_v44 = vld [vmem:[#allocation2 + $0x1e9] sm:$0xff] }
 0x875   :  { %14846 = vmatprep.subr.bf16.mxu1 %v14845_v36 }
 0x877   :  { %13788 = vmatmul.mubr.f32.gmra.mrb[4].mxu1 %v19126_v25 }
 0x878   :  { %13790 = vmatprep.mubr.f32.mxu1 %v19129_v49  ;;  %14848 = vmatpush3.bf16.msra.mxu1 %v14845_v36  ;;  %v19225_v36 = vld [vmem:[#allocation2 + $0x219] sm:$0xff] }
 0x879   :  { %14850 = vmatprep.subr.bf16.mxu1 %v14849_v16 }
 0x87b   :  { %13791 = vmatmul.mubr.f32.gmra.mrb[6].mxu1 %v19132_v18 }
 0x87c   :  { %13793 = vmatprep.mubr.f32.mxu1 %v19135_v30  ;;  %14852 = vmatpush3.bf16.msra.mxu1 %v14849_v16  ;;  %v19234_v16 = vld [vmem:[#allocation2 + $0x241] sm:$0xff] }
 0x87d   :  { %14854 = vmatprep.subr.bf16.mxu1 %v14853_v35 }
 0x87f   :  { %13794 = vmatmul.mubr.f32.gmra.mrb[8].mxu1 %v19138_v63 }
 0x880   :  { %13796 = vmatprep.mubr.f32.mxu1 %v19141_v26  ;;  %14856 = vmatpush3.bf16.msra.mxu1 %v14853_v35  ;;  %v19243_v35 = vld [vmem:[#allocation2 + $0x261] sm:$0xff] }
 0x881   :  { %14858 = vmatprep.subr.bf16.mxu1 %v14857_v45  ;;  %21572 = vst [vmem:[#allocation63_spill] sm:$0xff] %v19243_v35 }
 0x883   :  { %13797 = vmatmul.mubr.f32.gmra.mrb[10].mxu1 %v19144_v17 }
 0x884   :  { %13799 = vmatprep.mubr.f32.mxu1 %v19147_v5  ;;  %14860 = vmatpush3.bf16.msra.mxu1 %v14857_v45  ;;  %v19252_v45 = vld [vmem:[#allocation2 + $0x289] sm:$0xff] }
 0x885   :  { %14862 = vmatprep.subr.bf16.mxu1 %v14861_v48  ;;  %21575 = vst [vmem:[#allocation68_spill] sm:$0xff] %v19252_v45 }
 0x887   :  { %13800 = vmatmul.mubr.f32.gmra.mrb[12].mxu1 %v19150_v43 }
 0x888   :  { %13802 = vmatprep.mubr.f32.mxu1 %v19153_v31  ;;  %14864 = vmatpush3.bf16.msra.mxu1 %v14861_v48  ;;  %v19261_v48 = vld [vmem:[#allocation2 + $0x2a9] sm:$0xff] }
 0x889   :  { %14866 = vmatprep.subr.bf16.mxu1 %v14865_v38  ;;  %21578 = vst [vmem:[#allocation71_spill] sm:$0xff] %v19261_v48 }
 0x88b   :  { %13803 = vmatmul.mubr.f32.gmra.mrb[14].mxu1 %v19158_v54 }
 0x88c   :  { %13805 = vmatprep.mubr.f32.mxu1 %v19161_v12  ;;  %14868 = vmatpush3.bf16.msra.mxu1 %v14865_v38  ;;  %v19270_v38 = vld [vmem:[#allocation2 + $0x2d1] sm:$0xff] }
 0x88d   :  { %14870 = vmatprep.subr.bf16.mxu1 %v19156_v11  ;;  %21581 = vst [vmem:[#allocation72_spill] sm:$0xff] %v19270_v38 }
 0x88f   :  { %13806 = vmatmul.mubr.f32.gmra.mrb[16].mxu1 %v19165_v2 }
 0x890   :  { %13808 = vmatprep.mubr.f32.mxu1 %v19168_v51 }
 0x893   :  { %13809 = vmatmul.mubr.f32.gmra.mrb[18].mxu1 %v19171_v40 }
 0x894   :  { %13811 = vmatprep.mubr.f32.mxu1 %v19174_v0 }
 0x897   :  { %13812 = vmatmul.mubr.f32.gmra.mrb[20].mxu1 %v19177_v42 }
 0x898   :  { %13814 = vmatprep.mubr.f32.mxu1 %v19180_v61 }
 0x89b   :  { %13815 = vmatmul.mubr.f32.gmra.mrb[22].mxu1 %v19183_v22 }
 0x89c   :  { %13817 = vmatprep.mubr.f32.mxu1 %v19186_v4 }
 0x89f   :  { %13818 = vmatmul.mubr.f32.gmra.mrb[24].mxu1 %v19189_v52 }
 0x8a0   :  { %13820 = vmatprep.mubr.f32.mxu1 %v19192_v47 }
 0x8a3   :  { %13821 = vmatmul.mubr.f32.gmra.mrb[26].mxu1 %v19195_v19 }
 0x8a4   :  { %13823 = vmatprep.mubr.f32.mxu1 %v19198_v13 }
 0x8a7   :  { %13824 = vmatmul.mubr.f32.gmra.mrb[28].mxu1 %v19201_v32 }
 0x8a8   :  { %13826 = vmatprep.mubr.f32.mxu1 %v19204_v28 }
 0x8ab   :  { %13827 = vmatmul.mubr.f32.gmra.mrb[30].mxu1 %v19207_v59 }
 0x8ac   :  { %13829 = vmatprep.mubr.f32.mxu1 %v7399_v58  ;;  %v19279_v58 = vld [vmem:[#allocation2 + $0x2f1] sm:$0xff] }
 0x8ad   :  { %21584 = vst [vmem:[#allocation75_spill] sm:$0xff] %v19279_v58 }
 0x8af   :  { %13830 = vmatmul.mubr.f32.gmra.mrb[32].mxu1 %v7400_v15  ;;  %v19282_v15 = vld [vmem:[#allocation2 + $0x301] sm:$0xff] }
 0x8b0   :  { %13832 = vmatprep.mubr.f32.mxu1 %v19210_v39  ;;  %21585 = vst [vmem:[#allocation76_spill] sm:$0xff] %v19282_v15 }
 0x8b3   :  { %13833 = vmatmul.mubr.f32.gmra.mrb[34].mxu1 %v19213_v44 }
 0x8b4   :  { %13835 = vmatprep.mubr.f32.mxu1 %v19216_v27 }
 0x8b7   :  { %13836 = vmatmul.mubr.f32.gmra.mrb[36].mxu1 %v19219_v20 }
 0x8b8   :  { %13838 = vmatprep.mubr.f32.mxu1 %v19222_v41 }
 0x8bb   :  { %13839 = vmatmul.mubr.f32.gmra.mrb[38].mxu1 %v19225_v36 }
 0x8bc   :  { %13841 = vmatprep.mubr.f32.mxu1 %v19228_v7 }
 0x8bf   :  { %13842 = vmatmul.mubr.f32.gmra.mrb[40].mxu1 %v19231_v8 }
 0x8c0   :  { %13844 = vmatprep.mubr.f32.mxu1 %v19234_v16 }
 0x8c3   :  { %13845 = vmatmul.mubr.f32.gmra.mrb[42].mxu1 %v19237_v10 }
 0x8c4   :  { %13847 = vmatprep.mubr.f32.mxu1 %v19240_v50  ;;  %v21599_v50 = vld [vmem:[#allocation24_spill] sm:$0xff] }
 0x8c7   :  { %13848 = vmatmul.mubr.f32.gmra.mrb[44].mxu1 %v19243_v35  ;;  %v21595_v35 = vld [vmem:[#allocation85_spill] sm:$0xff] }
 0x8c8   :  { %13850 = vmatprep.mubr.f32.mxu1 %v19246_v62  ;;  %v21594_v62 = vld [vmem:[#allocation84_spill] sm:$0xff] }
 0x8cb   :  { %13851 = vmatmul.mubr.f32.gmra.mrb[46].mxu1 %v19249_v9  ;;  %v8500_v9 = vld [vmem:[#allocation8 + $0x338] sm:$0xff] }
 0x8cc   :  { %13853 = vmatprep.mubr.f32.mxu1 %v19252_v45  ;;  %v21593_v45 = vld [vmem:[#allocation83_spill] sm:$0xff] }
 0x8cf   :  { %13854 = vmatmul.mubr.f32.gmra.mrb[48].mxu1 %v19255_v6  ;;  %v8498_v6 = vld [vmem:[#allocation8 + $0x328] sm:$0xff] }
 0x8d0   :  { %13856 = vmatprep.mubr.f32.mxu1 %v19258_v46  ;;  %v8497_v46 = vld [vmem:[#allocation8 + $0x320] sm:$0xff] }
 0x8d3   :  { %13857 = vmatmul.mubr.f32.gmra.mrb[50].mxu1 %v19261_v48  ;;  %v21591_v48 = vld [vmem:[#allocation81_spill] sm:$0xff] }
 0x8d4   :  { %13859 = vmatprep.mubr.f32.mxu1 %v19264_v23  ;;  %v8495_v23 = vld [vmem:[#allocation8 + $0x310] sm:$0xff] }
 0x8d7   :  { %13860 = vmatmul.mubr.f32.gmra.mrb[52].mxu1 %v19267_v53  ;;  %v19285_v53 = vld [vmem:[#allocation2 + $0x309] sm:$0xff] }
 0x8d8   :  { %13862 = vmatprep.mubr.f32.mxu1 %v19270_v38  ;;  %21586 = vst [vmem:[#allocation77_spill] sm:$0xff] %v19285_v53  ;;  %v19288_v38 = vld [vmem:[#allocation2 + $0x319] sm:$0xff] }
 0x8d9   :  { %21587 = vst [vmem:[#allocation78_spill] sm:$0xff] %v19288_v38 }
 0x8db   :  { %13863 = vmatmul.mubr.f32.gmra.mrb[54].mxu1 %v19273_v29  ;;  %v19291_v29 = vld [vmem:[#allocation2 + $0x321] sm:$0xff] }
 0x8dc   :  { %13865 = vmatprep.mubr.f32.mxu1 %v19276_v37  ;;  %21588 = vst [vmem:[#allocation79_spill] sm:$0xff] %v19291_v29  ;;  %v19294_v37 = vld [vmem:[#allocation2 + $0x331] sm:$0xff] }
 0x8dd   :  { %21589 = vst [vmem:[#allocation80_spill] sm:$0xff] %v19294_v37 }
 0x8df   :  { %13866 = vmatmul.mubr.f32.gmra.mrb[56].mxu1 %v19279_v58  ;;  %v19297_v58 = vld [vmem:[#allocation2 + $0x339] sm:$0xff] }
 0x8e0   :  { %13868 = vmatprep.mubr.f32.mxu1 %v19282_v15  ;;  %21590 = vst [vmem:[#allocation97_spill] sm:$0xff] %v19297_v58  ;;  %v8496_v15 = vld [vmem:[#allocation8 + $0x318] sm:$0xff] }
 0x8e3   :  { %13869 = vmatmul.mubr.f32.gmra.mrb[58].mxu1 %v19285_v53  ;;  %v14873_v53 = vpack.c.bf16 %v8496_v15, %v8495_v23  ;;  %v8501_v23 = vld [vmem:[#allocation8 + $0x340] sm:$0xff]  ;;  %v8502_v15 = vld [vmem:[#allocation8 + $0x348] sm:$0xff] }
 0x8e4   :  { %13871 = vmatprep.mubr.f32.mxu1 %v19288_v38  ;;  %v21592_v38 = vld [vmem:[#allocation82_spill] sm:$0xff] }
 0x8e7   :  { %13872 = vmatmul.mubr.f32.gmra.mrb[60].mxu1 %v19291_v29  ;;  %v14877_v29 = vpack.c.bf16 %v8498_v6, %v8497_v46  ;;  %v8504_v6 = vld [vmem:[#allocation8 + $0x358] sm:$0xff] }
 0x8e8   :  { %13874 = vmatprep.mubr.f32.mxu1 %v19294_v37  ;;  %v8499_v37 = vld [vmem:[#allocation8 + $0x330] sm:$0xff]  ;;  %v21598_v46 = vld [vmem:[#allocation23_spill] sm:$0xff] }
 0x8eb   :  { %13875 = vmatmul.mubr.f32.gmra.mrb[62].mxu1 %v19297_v58  ;;  %v21596_v58 = vld [vmem:[#allocation21_spill] sm:$0xff] }
 0x8ec   :  { %13909 = vmatprep.mubr.f32.mxu1 %v21591_v48  ;;  %v14881_v48 = vpack.c.bf16 %v8500_v9, %v8499_v37  ;;  %v8506_v9 = vld [vmem:[#allocation8 + $0x368] sm:$0xff]  ;;  %v8508_v37 = vld [vmem:[#allocation8 + $0x378] sm:$0xff] }
 0x8ef   :  { %13910 = vmatmul.mubr.f32.vlgmr.msra.gmra.mrb[0].mxu1 %v21592_v38  ;;  %v21597_v38 = vld [vmem:[#allocation22_spill] sm:$0xff] }
 0x8f0   :  { %13912 = vmatprep.mubr.f32.mxu1 %v21593_v45  ;;  %14872 = vmatpush3.bf16.msra.mxu1 %v19156_v11  ;;  %v14885_v11 = vpack.c.bf16 %v8502_v15, %v8501_v23  ;;  %v8503_v45 = vld [vmem:[#allocation8 + $0x350] sm:$0xff]  ;;  %v9024_v23 = vld [vmem:[#allocation8 + $0x388] sm:$0xff] }
 0x8f1   :  { %14874 = vmatprep.subr.bf16.mxu1 %v14873_v53  ;;  %v21601_v15 = vld [vmem:[#allocation26_spill] sm:$0xff] }
 0x8f3   :  { %13913 = vmatmul.mubr.f32.gmra.mrb[2].mxu1 %v21594_v62  ;;  %v8505_v62 = vld [vmem:[#allocation8 + $0x360] sm:$0xff] }
 0x8f4   :  { %13915 = vmatprep.mubr.f32.mxu1 %v21595_v35  ;;  %14876 = vmatpush3.bf16.msra.mxu1 %v14873_v53  ;;  %v14889_v35 = vpack.c.bf16 %v8504_v6, %v8503_v45  ;;  %v14893_v53 = vpack.c.bf16 %v8506_v9, %v8505_v62  ;;  %v21606_v45 = vld [vmem:[#allocation86_spill] sm:$0xff]  ;;  %v21607_v6 = vld [vmem:[#allocation87_spill] sm:$0xff] }
 0x8f5   :  { %14878 = vmatprep.subr.bf16.mxu1 %v14877_v29  ;;  %v21610_v62 = vld [vmem:[#allocation90_spill] sm:$0xff]  ;;  %v21611_v9 = vld [vmem:[#allocation91_spill] sm:$0xff] }
 0x8f7   :  { %13916 = vmatmul.mubr.f32.gmra.mrb[4].mxu1 %v21596_v58  ;;  %v21600_v58 = vld [vmem:[#allocation25_spill] sm:$0xff] }
 0x8f8   :  { %13918 = vmatprep.mubr.f32.mxu1 %v21597_v38  ;;  %14880 = vmatpush3.bf16.msra.mxu1 %v14877_v29  ;;  %v8507_v29 = vld [vmem:[#allocation8 + $0x370] sm:$0xff]  ;;  %v21602_v38 = vld [vmem:[#allocation27_spill] sm:$0xff] }
 0x8f9   :  { %14882 = vmatprep.subr.bf16.mxu1 %v14881_v48 }
 0x8fb   :  { %13919 = vmatmul.mubr.f32.gmra.mrb[6].mxu1 %v21598_v46  ;;  %v21608_v46 = vld [vmem:[#allocation88_spill] sm:$0xff] }
 0x8fc   :  { %13921 = vmatprep.mubr.f32.mxu1 %v21599_v50  ;;  %14884 = vmatpush3.bf16.msra.mxu1 %v14881_v48  ;;  %v14897_v50 = vpack.c.bf16 %v8508_v37, %v8507_v29  ;;  %v9023_v48 = vld [vmem:[#allocation8 + $0x380] sm:$0xff]  ;;  %v21613_v29 = vld [vmem:[#allocation93_spill] sm:$0xff]  ;;  %v21614_v37 = vld [vmem:[#allocation94_spill] sm:$0xff] }
 0x8fd   :  { %14886 = vmatprep.subr.bf16.mxu1 %v14885_v11 }
 0x8ff   :  { %13922 = vmatmul.mubr.f32.gmra.mrb[8].mxu1 %v18884_v33  ;;  %v19316_v33 = vpack.c.bf16 %v9024_v23, %v9023_v48  ;;  %v21617_v48 = vld [vmem:[#allocation31_spill] sm:$0xff]  ;;  %v19334_v23 = vld [vmem:[#allocation2 + $0x182] sm:$0xff] }
 0x900   :  { %13924 = vmatprep.mubr.f32.mxu1 %v18887_v3  ;;  %14888 = vmatpush3.bf16.msra.mxu1 %v14885_v11  ;;  %v21603_v3 = vld [vmem:[#allocation28_spill] sm:$0xff]  ;;  %v21604_v11 = vld [vmem:[#allocation29_spill] sm:$0xff] }
 0x901   :  { %14890 = vmatprep.subr.bf16.mxu1 %v14889_v35 }
 0x903   :  { %13925 = vmatmul.mubr.f32.gmra.mrb[10].mxu1 %v18890_v24  ;;  %v21605_v24 = vld [vmem:[#allocation30_spill] sm:$0xff] }
 0x904   :  { %13927 = vmatprep.mubr.f32.mxu1 %v21600_v58  ;;  %14892 = vmatpush3.bf16.msra.mxu1 %v14889_v35  ;;  %v21609_v35 = vld [vmem:[#allocation89_spill] sm:$0xff]  ;;  %v21615_v58 = vld [vmem:[#allocation95_spill] sm:$0xff] }
 0x905   :  { %14894 = vmatprep.subr.bf16.mxu1 %v14893_v53 }
 0x907   :  { %13928 = vmatmul.mubr.f32.gmra.mrb[12].mxu1 %v21601_v15  ;;  %v19337_v15 = vld [vmem:[#allocation2 + $0x18a] sm:$0xff] }
 0x908   :  { %13930 = vmatprep.mubr.f32.mxu1 %v21602_v38  ;;  %14896 = vmatpush3.bf16.msra.mxu1 %v14893_v53  ;;  %v21612_v53 = vld [vmem:[#allocation92_spill] sm:$0xff] }
 0x909   :  { %14898 = vmatprep.subr.bf16.mxu1 %v14897_v50  ;;  %v21618_v38 = vld [vmem:[#allocation44_spill] sm:$0xff] }
 0x90b   :  { %13931 = vmatmul.mubr.f32.gmra.mrb[14].mxu1 %v21603_v3  ;;  %v21619_v3 = vld [vmem:[#allocation49_spill] sm:$0xff] }
 0x90c   :  { %13933 = vmatprep.mubr.f32.mxu1 %v21604_v11  ;;  %14900 = vmatpush3.bf16.msra.mxu1 %v14897_v50  ;;  %v21616_v50 = vld [vmem:[#allocation96_spill] sm:$0xff] }
 0x90d   :  { %14902 = vmatprep.subr.bf16.mxu1 %v19316_v33  ;;  %v21620_v11 = vld [vmem:[#allocation48_spill] sm:$0xff] }
 0x90f   :  { %13934 = vmatmul.mubr.f32.gmra.mrb[16].mxu1 %v21605_v24  ;;  %v21621_v24 = vld [vmem:[#allocation51_spill] sm:$0xff] }
 0x910   :  { %13936 = vmatprep.mubr.f32.mxu1 %v21606_v45  ;;  %v21622_v45 = vld [vmem:[#allocation50_spill] sm:$0xff] }
 0x913   :  { %13937 = vmatmul.mubr.f32.gmra.mrb[18].mxu1 %v21607_v6  ;;  %v21623_v6 = vld [vmem:[#allocation33_spill] sm:$0xff] }
 0x914   :  { %13939 = vmatprep.mubr.f32.mxu1 %v21608_v46  ;;  %v21624_v46 = vld [vmem:[#allocation32_spill] sm:$0xff] }
 0x917   :  { %13940 = vmatmul.mubr.f32.gmra.mrb[20].mxu1 %v21609_v35  ;;  %v21625_v35 = vld [vmem:[#allocation35_spill] sm:$0xff] }
 0x918   :  { %13942 = vmatprep.mubr.f32.mxu1 %v21610_v62  ;;  %v21626_v62 = vld [vmem:[#allocation34_spill] sm:$0xff] }
 0x91b   :  { %13943 = vmatmul.mubr.f32.gmra.mrb[22].mxu1 %v21611_v9  ;;  %v21627_v9 = vld [vmem:[#allocation37_spill] sm:$0xff] }
 0x91c   :  { %13945 = vmatprep.mubr.f32.mxu1 %v21612_v53  ;;  %v21628_v53 = vld [vmem:[#allocation36_spill] sm:$0xff] }
 0x91f   :  { %13946 = vmatmul.mubr.f32.gmra.mrb[24].mxu1 %v21613_v29  ;;  %v21629_v29 = vld [vmem:[#allocation39_spill] sm:$0xff] }
 0x920   :  { %13948 = vmatprep.mubr.f32.mxu1 %v21614_v37  ;;  %v21630_v37 = vld [vmem:[#allocation38_spill] sm:$0xff] }
 0x923   :  { %13949 = vmatmul.mubr.f32.gmra.mrb[26].mxu1 %v21615_v58  ;;  %v21631_v58 = vld [vmem:[#allocation41_spill] sm:$0xff] }
 0x924   :  { %13951 = vmatprep.mubr.f32.mxu1 %v21616_v50  ;;  %v21632_v50 = vld [vmem:[#allocation40_spill] sm:$0xff] }
 0x927   :  { %13952 = vmatmul.mubr.f32.gmra.mrb[28].mxu1 %v21617_v48  ;;  %v21633_v48 = vld [vmem:[#allocation43_spill] sm:$0xff] }
 0x928   :  { %13954 = vmatprep.mubr.f32.mxu1 %v19334_v23 }
 0x92b   :  { %13955 = vmatmul.mubr.f32.gmra.mrb[30].mxu1 %v19337_v15 }
 0x92c   :  { %13957 = vmatprep.mubr.f32.mxu1 %v21618_v38  ;;  %v21634_v38 = vld [vmem:[#allocation42_spill] sm:$0xff] }
 0x92f   :  { %13958 = vmatmul.mubr.f32.gmra.mrb[32].mxu1 %v21619_v3  ;;  %v21635_v3 = vld [vmem:[#allocation45_spill] sm:$0xff] }
 0x930   :  { %13960 = vmatprep.mubr.f32.mxu1 %v21620_v11  ;;  %v21636_v11 = vld [vmem:[#allocation47_spill] sm:$0xff] }
 0x933   :  { %13961 = vmatmul.mubr.f32.gmra.mrb[34].mxu1 %v21621_v24  ;;  %v21637_v24 = vld [vmem:[#allocation46_spill] sm:$0xff] }
 0x934   :  { %13963 = vmatprep.mubr.f32.mxu1 %v21622_v45  ;;  %v21638_v45 = vld [vmem:[#allocation53_spill] sm:$0xff] }
 0x937   :  { %13964 = vmatmul.mubr.f32.gmra.mrb[36].mxu1 %v21623_v6  ;;  %v21639_v6 = vld [vmem:[#allocation54_spill] sm:$0xff] }
 0x938   :  { %13966 = vmatprep.mubr.f32.mxu1 %v21624_v46  ;;  %v21640_v46 = vld [vmem:[#allocation55_spill] sm:$0xff] }
 0x93b   :  { %13967 = vmatmul.mubr.f32.gmra.mrb[38].mxu1 %v21625_v35  ;;  %v21641_v35 = vld [vmem:[#allocation56_spill] sm:$0xff] }
 0x93c   :  { %13969 = vmatprep.mubr.f32.mxu1 %v21626_v62  ;;  %v21642_v62 = vld [vmem:[#allocation57_spill] sm:$0xff] }
 0x93f   :  { %13970 = vmatmul.mubr.f32.gmra.mrb[40].mxu1 %v21627_v9  ;;  %v21643_v9 = vld [vmem:[#allocation58_spill] sm:$0xff] }
 0x940   :  { %13972 = vmatprep.mubr.f32.mxu1 %v21628_v53  ;;  %v21644_v53 = vld [vmem:[#allocation59_spill] sm:$0xff] }
 0x943   :  { %13973 = vmatmul.mubr.f32.gmra.mrb[42].mxu1 %v21629_v29  ;;  %v21645_v29 = vld [vmem:[#allocation60_spill] sm:$0xff] }
 0x944   :  { %13975 = vmatprep.mubr.f32.mxu1 %v21630_v37  ;;  %v21646_v37 = vld [vmem:[#allocation61_spill] sm:$0xff] }
 0x947   :  { %13976 = vmatmul.mubr.f32.gmra.mrb[44].mxu1 %v21631_v58  ;;  %v19370_v58 = vld [vmem:[#allocation2 + $0x332] sm:$0xff] }
 0x948   :  { %13978 = vmatprep.mubr.f32.mxu1 %v21632_v50  ;;  %v19373_v50 = vld [vmem:[#allocation2 + $0x33a] sm:$0xff] }
 0x94b   :  { %13979 = vmatmul.mubr.f32.gmra.mrb[46].mxu1 %v21633_v48  ;;  %v9025_v48 = vld [vmem:[#allocation8 + $0x390] sm:$0xff] }
 0x94c   :  { %13981 = vmatprep.mubr.f32.mxu1 %v21634_v38  ;;  %v9026_v38 = vld [vmem:[#allocation8 + $0x398] sm:$0xff] }
 0x94f   :  { %13982 = vmatmul.mubr.f32.gmra.mrb[48].mxu1 %v21635_v3  ;;  %v8428_v3 = vld [vmem:[#allocation2 + $0x30] sm:$0xff] }
 0x950   :  { %13984 = vmatprep.mubr.f32.mxu1 %v21636_v11  ;;  %v14905_v11 = vpack.c.bf16 %v9026_v38, %v9025_v48  ;;  %v9031_v48 = vld [vmem:[#allocation8 + $0x3c0] sm:$0xff]  ;;  %v9032_v38 = vld [vmem:[#allocation8 + $0x3c8] sm:$0xff] }
 0x953   :  { %13985 = vmatmul.mubr.f32.gmra.mrb[50].mxu1 %v21637_v24  ;;  %v8429_v24 = vld [vmem:[#allocation2 + $0x38] sm:$0xff] }
 0x954   :  { %13987 = vmatprep.mubr.f32.mxu1 %v21638_v45  ;;  %v9027_v45 = vld [vmem:[#allocation8 + $0x3a0] sm:$0xff] }
 0x957   :  { %13988 = vmatmul.mubr.f32.gmra.mrb[52].mxu1 %v21639_v6  ;;  %v9028_v6 = vld [vmem:[#allocation8 + $0x3a8] sm:$0xff] }
 0x958   :  { %13990 = vmatprep.mubr.f32.mxu1 %v21640_v46  ;;  %v8430_v46 = vld [vmem:[#allocation2 + $0x48] sm:$0xff] }
 0x95b   :  { %13991 = vmatmul.mubr.f32.gmra.mrb[54].mxu1 %v21641_v35  ;;  %v8431_v35 = vld [vmem:[#allocation2 + $0x50] sm:$0xff] }
 0x95c   :  { %13993 = vmatprep.mubr.f32.mxu1 %v21642_v62  ;;  %v9029_v62 = vld [vmem:[#allocation8 + $0x3b0] sm:$0xff] }
 0x95f   :  { %13994 = vmatmul.mubr.f32.gmra.mrb[56].mxu1 %v21643_v9  ;;  %v9030_v9 = vld [vmem:[#allocation8 + $0x3b8] sm:$0xff] }
 0x960   :  { %13996 = vmatprep.mubr.f32.mxu1 %v21644_v53  ;;  %v8432_v53 = vld [vmem:[#allocation2 + $0x60] sm:$0xff] }
 0x963   :  { %13997 = vmatmul.mubr.f32.gmra.mrb[58].mxu1 %v21645_v29  ;;  %v14913_v29 = vpack.c.bf16 %v9030_v9, %v9029_v62  ;;  %v9035_v62 = vld [vmem:[#allocation8 + $0x3e0] sm:$0xff]  ;;  %v9036_v9 = vld [vmem:[#allocation8 + $0x3e8] sm:$0xff] }
 0x964   :  { %13999 = vmatprep.mubr.f32.mxu1 %v21646_v37  ;;  %v8433_v37 = vld [vmem:[#allocation2 + $0x68] sm:$0xff] }
 0x967   :  { %14000 = vmatmul.mubr.f32.gmra.mrb[60].mxu1 %v19037_v57  ;;  %v14909_v57 = vpack.c.bf16 %v9028_v6, %v9027_v45  ;;  %v9033_v45 = vld [vmem:[#allocation8 + $0x3d0] sm:$0xff]  ;;  %v9034_v6 = vld [vmem:[#allocation8 + $0x3d8] sm:$0xff] }
 0x968   :  { %14002 = vmatprep.mubr.f32.mxu1 %v19370_v58 }
 0x96b   :  { %14003 = vmatmul.mubr.f32.gmra.mrb[62].mxu1 %v19373_v50 }
 0x96c   :  { %14037 = vmatprep.mubr.f32.mxu1 %v8428_v3  ;;  %v8434_v3 = vld [vmem:[#allocation2 + $0x78] sm:$0xff] }
 0x96f   :  { %14038 = vmatmul.mubr.f32.vlgmr.msra.gmra.mrb[0].mxu1 %v8429_v24  ;;  %v8435_v24 = vld [vmem:[#allocation2 + $0x80] sm:$0xff] }
 0x970   :  { %14040 = vmatprep.mubr.f32.mxu1 %v8430_v46  ;;  %14904 = vmatpush3.bf16.msra.mxu1 %v19316_v33  ;;  %v14917_v33 = vpack.c.bf16 %v9032_v38, %v9031_v48  ;;  %v8436_v46 = vld [vmem:[#allocation2 + $0x90] sm:$0xff]  ;;  %v9038_v38 = vld [vmem:[#allocation8 + $0x3f8] sm:$0xff] }
 0x971   :  { %14906 = vmatprep.subr.bf16.mxu1 %v14905_v11  ;;  %v9037_v48 = vld [vmem:[#allocation8 + $0x3f0] sm:$0xff] }
 0x973   :  { %14041 = vmatmul.mubr.f32.gmra.mrb[2].mxu1 %v8431_v35  ;;  %v8437_v35 = vld [vmem:[#allocation2 + $0x98] sm:$0xff] }
 0x974   :  { %14043 = vmatprep.mubr.f32.mxu1 %v8432_v53  ;;  %14908 = vmatpush3.bf16.msra.mxu1 %v14905_v11  ;;  %v14921_v11 = vpack.c.bf16 %v9034_v6, %v9033_v45  ;;  %v8438_v53 = vld [vmem:[#allocation2 + $0xa8] sm:$0xff]  ;;  %v9553_v45 = vld [vmem:[#allocation8 + $0x400] sm:$0xff] }
 0x975   :  { %14910 = vmatprep.subr.bf16.mxu1 %v14909_v57  ;;  %v9554_v6 = vld [vmem:[#allocation8 + $0x408] sm:$0xff] }
 0x977   :  { %14044 = vmatmul.mubr.f32.gmra.mrb[4].mxu1 %v8433_v37  ;;  %v8439_v37 = vld [vmem:[#allocation2 + $0xb0] sm:$0xff] }
 0x978   :  { %14046 = vmatprep.mubr.f32.mxu1 %v8434_v3  ;;  %14912 = vmatpush3.bf16.msra.mxu1 %v14909_v57  ;;  %v14925_v57 = vpack.c.bf16 %v9036_v9, %v9035_v62  ;;  %v8440_v3 = vld [vmem:[#allocation2 + $0xc0] sm:$0xff]  ;;  %v8444_v62 = vld [vmem:[#allocation2 + $0xf0] sm:$0xff]  ;;  %v8446_v9 = vld [vmem:[#allocation2 + $0x108] sm:$0xff] }
 0x979   :  { %14914 = vmatprep.subr.bf16.mxu1 %v14913_v29 }
 0x97b   :  { %14047 = vmatmul.mubr.f32.gmra.mrb[6].mxu1 %v8435_v24  ;;  %v8441_v24 = vld [vmem:[#allocation2 + $0xc8] sm:$0xff] }
 0x97c   :  { %14049 = vmatprep.mubr.f32.mxu1 %v8436_v46  ;;  %14916 = vmatpush3.bf16.msra.mxu1 %v14913_v29  ;;  %v14929_v29 = vpack.c.bf16 %v9038_v38, %v9037_v48  ;;  %v8442_v46 = vld [vmem:[#allocation2 + $0xd8] sm:$0xff]  ;;  %v8449_v48 = vld [vmem:[#allocation2 + $0x128] sm:$0xff]  ;;  %v8451_v38 = vld [vmem:[#allocation2 + $0x140] sm:$0xff] }
 0x97d   :  { %14918 = vmatprep.subr.bf16.mxu1 %v14917_v33 }
 0x97f   :  { %14050 = vmatmul.mubr.f32.gmra.mrb[8].mxu1 %v8437_v35  ;;  %v8443_v35 = vld [vmem:[#allocation2 + $0xe0] sm:$0xff] }
 0x980   :  { %14052 = vmatprep.mubr.f32.mxu1 %v8438_v53  ;;  %14920 = vmatpush3.bf16.msra.mxu1 %v14917_v33  ;;  %v19377_v33 = vpack.c.bf16 %v9554_v6, %v9553_v45  ;;  %v8447_v53 = vld [vmem:[#allocation2 + $0x110] sm:$0xff]  ;;  %v19382_v6 = vld [vmem:[#allocation2] sm:$0xff] }
 0x981   :  { %14922 = vmatprep.subr.bf16.mxu1 %v14921_v11  ;;  %v8455_v45 = vld [vmem:[#allocation2 + $0x170] sm:$0xff] }
 0x983   :  { %14053 = vmatmul.mubr.f32.gmra.mrb[10].mxu1 %v8439_v37  ;;  %v8448_v37 = vld [vmem:[#allocation2 + $0x120] sm:$0xff] }
 0x984   :  { %14055 = vmatprep.mubr.f32.mxu1 %v8440_v3  ;;  %14924 = vmatpush3.bf16.msra.mxu1 %v14921_v11  ;;  %v8445_v11 = vld [vmem:[#allocation2 + $0xf8] sm:$0xff]  ;;  %v8452_v3 = vld [vmem:[#allocation2 + $0x150] sm:$0xff] }
 0x985   :  { %14926 = vmatprep.subr.bf16.mxu1 %v14925_v57 }
 0x987   :  { %14056 = vmatmul.mubr.f32.gmra.mrb[12].mxu1 %v8441_v24  ;;  %v8453_v24 = vld [vmem:[#allocation2 + $0x158] sm:$0xff] }
 0x988   :  { %14058 = vmatprep.mubr.f32.mxu1 %v8442_v46  ;;  %14928 = vmatpush3.bf16.msra.mxu1 %v14925_v57  ;;  %v8450_v57 = vld [vmem:[#allocation2 + $0x138] sm:$0xff]  ;;  %v8460_v46 = vld [vmem:[#allocation2 + $0x1e0] sm:$0xff] }
 0x989   :  { %14930 = vmatprep.subr.bf16.mxu1 %v14929_v29 }
 0x98b   :  { %14059 = vmatmul.mubr.f32.gmra.mrb[14].mxu1 %v8443_v35  ;;  %v8461_v35 = vld [vmem:[#allocation2 + $0x1e8] sm:$0xff] }
 0x98c   :  { %14061 = vmatprep.mubr.f32.mxu1 %v8444_v62  ;;  %14932 = vmatpush3.bf16.msra.mxu1 %v14929_v29  ;;  %v8454_v29 = vld [vmem:[#allocation2 + $0x168] sm:$0xff]  ;;  %v8462_v62 = vld [vmem:[#allocation2 + $0x1f8] sm:$0xff] }
 0x98d   :  { %14934 = vmatprep.subr.bf16.mxu1 %v19377_v33 }
 0x98f   :  { %14062 = vmatmul.mubr.f32.gmra.mrb[16].mxu1 %v8445_v11  ;;  %v8463_v11 = vld [vmem:[#allocation2 + $0x200] sm:$0xff] }
 0x990   :  { %14064 = vmatprep.mubr.f32.mxu1 %v8446_v9  ;;  %v8464_v9 = vld [vmem:[#allocation2 + $0x210] sm:$0xff] }
 0x993   :  { %14065 = vmatmul.mubr.f32.gmra.mrb[18].mxu1 %v8447_v53  ;;  %v8465_v53 = vld [vmem:[#allocation2 + $0x218] sm:$0xff] }
 0x994   :  { %14067 = vmatprep.mubr.f32.mxu1 %v8448_v37  ;;  %v8468_v37 = vld [vmem:[#allocation2 + $0x240] sm:$0xff] }
 0x997   :  { %14068 = vmatmul.mubr.f32.gmra.mrb[20].mxu1 %v8449_v48  ;;  %v8469_v48 = vld [vmem:[#allocation2 + $0x248] sm:$0xff] }
 0x998   :  { %14070 = vmatprep.mubr.f32.mxu1 %v8450_v57  ;;  %v8470_v57 = vld [vmem:[#allocation2 + $0x258] sm:$0xff] }
 0x99b   :  { %14071 = vmatmul.mubr.f32.gmra.mrb[22].mxu1 %v8451_v38  ;;  %v8471_v38 = vld [vmem:[#allocation2 + $0x260] sm:$0xff] }
 0x99c   :  { %14073 = vmatprep.mubr.f32.mxu1 %v8452_v3  ;;  %v8472_v3 = vld [vmem:[#allocation2 + $0x270] sm:$0xff] }
 0x99f   :  { %14074 = vmatmul.mubr.f32.gmra.mrb[24].mxu1 %v8453_v24  ;;  %v8473_v24 = vld [vmem:[#allocation2 + $0x278] sm:$0xff] }
 0x9a0   :  { %14076 = vmatprep.mubr.f32.mxu1 %v8454_v29  ;;  %v8474_v29 = vld [vmem:[#allocation2 + $0x288] sm:$0xff] }
 0x9a3   :  { %14077 = vmatmul.mubr.f32.gmra.mrb[26].mxu1 %v8455_v45  ;;  %v8475_v45 = vld [vmem:[#allocation2 + $0x290] sm:$0xff] }
 0x9a4   :  { %14079 = vmatprep.mubr.f32.mxu1 %v19074_v60  ;;  %v8466_v60 = vld [vmem:[#allocation2 + $0x228] sm:$0xff] }
 0x9a7   :  { %14080 = vmatmul.mubr.f32.gmra.mrb[28].mxu1 %v19077_v21  ;;  %v8467_v21 = vld [vmem:[#allocation2 + $0x230] sm:$0xff] }
 0x9a8   :  { %14082 = vmatprep.mubr.f32.mxu1 %v19382_v6 }
 0x9ab   :  { %14083 = vmatmul.mubr.f32.gmra.mrb[30].mxu1 %v19382_v6 }
 0x9ac   :  { %14085 = vmatprep.mubr.f32.mxu1 %v8460_v46  ;;  %v8476_v46 = vld [vmem:[#allocation2 + $0x2a0] sm:$0xff] }
 0x9af   :  { %14086 = vmatmul.mubr.f32.gmra.mrb[32].mxu1 %v8461_v35  ;;  %v8477_v35 = vld [vmem:[#allocation2 + $0x2a8] sm:$0xff] }
 0x9b0   :  { %14088 = vmatprep.mubr.f32.mxu1 %v8462_v62  ;;  %v8478_v62 = vld [vmem:[#allocation2 + $0x2b8] sm:$0xff] }
 0x9b3   :  { %14089 = vmatmul.mubr.f32.gmra.mrb[34].mxu1 %v8463_v11  ;;  %v8479_v11 = vld [vmem:[#allocation2 + $0x2c0] sm:$0xff] }
 0x9b4   :  { %14091 = vmatprep.mubr.f32.mxu1 %v8464_v9  ;;  %v8480_v9 = vld [vmem:[#allocation2 + $0x2d0] sm:$0xff] }
 0x9b7   :  { %14092 = vmatmul.mubr.f32.gmra.mrb[36].mxu1 %v8465_v53  ;;  %v8481_v53 = vld [vmem:[#allocation2 + $0x2d8] sm:$0xff] }
 0x9b8   :  { %14094 = vmatprep.mubr.f32.mxu1 %v8466_v60  ;;  %v8482_v60 = vld [vmem:[#allocation2 + $0x2e8] sm:$0xff] }
 0x9bb   :  { %14095 = vmatmul.mubr.f32.gmra.mrb[38].mxu1 %v8467_v21  ;;  %v8483_v21 = vld [vmem:[#allocation2 + $0x2f0] sm:$0xff] }
 0x9bc   :  { %14097 = vmatprep.mubr.f32.mxu1 %v8468_v37  ;;  %v8484_v37 = vld [vmem:[#allocation2 + $0x300] sm:$0xff] }
 0x9bf   :  { %14098 = vmatmul.mubr.f32.gmra.mrb[40].mxu1 %v8469_v48  ;;  %v8485_v48 = vld [vmem:[#allocation2 + $0x308] sm:$0xff] }
 0x9c0   :  { %14100 = vmatprep.mubr.f32.mxu1 %v8470_v57  ;;  %v8486_v57 = vld [vmem:[#allocation2 + $0x318] sm:$0xff] }
 0x9c3   :  { %14101 = vmatmul.mubr.f32.gmra.mrb[42].mxu1 %v8471_v38  ;;  %v8487_v38 = vld [vmem:[#allocation2 + $0x320] sm:$0xff] }
 0x9c4   :  { %14103 = vmatprep.mubr.f32.mxu1 %v8472_v3  ;;  %v9555_v3 = vld [vmem:[#allocation8 + $0x410] sm:$0xff] }
 0x9c7   :  { %14104 = vmatmul.mubr.f32.gmra.mrb[44].mxu1 %v8473_v24  ;;  %v9556_v24 = vld [vmem:[#allocation8 + $0x418] sm:$0xff] }
 0x9c8   :  { %14106 = vmatprep.mubr.f32.mxu1 %v8474_v29  ;;  %v14937_v29 = vpack.c.bf16 %v9556_v24, %v9555_v3  ;;  %v9503_v3 = vld [vmem:[#allocation2 + $0xe2] sm:$0xff]  ;;  %v9504_v24 = vld [vmem:[#allocation2 + $0xf2] sm:$0xff] }
 0x9cb   :  { %14107 = vmatmul.mubr.f32.gmra.mrb[46].mxu1 %v8475_v45  ;;  %v9557_v45 = vld [vmem:[#allocation8 + $0x420] sm:$0xff] }
 0x9cc   :  { %14109 = vmatprep.mubr.f32.mxu1 %v8476_v46  ;;  %v9558_v46 = vld [vmem:[#allocation8 + $0x428] sm:$0xff] }
 0x9cf   :  { %14110 = vmatmul.mubr.f32.gmra.mrb[48].mxu1 %v8477_v35  ;;  %v9560_v35 = vld [vmem:[#allocation8 + $0x438] sm:$0xff] }
 0x9d0   :  { %14112 = vmatprep.mubr.f32.mxu1 %v8478_v62  ;;  %v9562_v62 = vld [vmem:[#allocation8 + $0x448] sm:$0xff] }
 0x9d3   :  { %14113 = vmatmul.mubr.f32.gmra.mrb[50].mxu1 %v8479_v11  ;;  %v9566_v11 = vld [vmem:[#allocation8 + $0x468] sm:$0xff] }
 0x9d4   :  { %14115 = vmatprep.mubr.f32.mxu1 %v8480_v9  ;;  %v9568_v9 = vld [vmem:[#allocation8 + $0x478] sm:$0xff] }
 0x9d7   :  { %14116 = vmatmul.mubr.f32.gmra.mrb[52].mxu1 %v8481_v53  ;;  %v9496_v53 = vld [vmem:[#allocation2 + $0x92] sm:$0xff] }
 0x9d8   :  { %14118 = vmatprep.mubr.f32.mxu1 %v8482_v60  ;;  %v9497_v60 = vld [vmem:[#allocation2 + $0x9a] sm:$0xff] }
 0x9db   :  { %14119 = vmatmul.mubr.f32.gmra.mrb[54].mxu1 %v8483_v21  ;;  %v9498_v21 = vld [vmem:[#allocation2 + $0xaa] sm:$0xff] }
 0x9dc   :  { %14121 = vmatprep.mubr.f32.mxu1 %v8484_v37  ;;  %v9499_v37 = vld [vmem:[#allocation2 + $0xb2] sm:$0xff] }
 0x9df   :  { %14122 = vmatmul.mubr.f32.gmra.mrb[56].mxu1 %v8485_v48  ;;  %v9500_v48 = vld [vmem:[#allocation2 + $0xc2] sm:$0xff] }
 0x9e0   :  { %14124 = vmatprep.mubr.f32.mxu1 %v8486_v57  ;;  %v9501_v57 = vld [vmem:[#allocation2 + $0xca] sm:$0xff] }
 0x9e3   :  { %14125 = vmatmul.mubr.f32.gmra.mrb[58].mxu1 %v8487_v38  ;;  %v9502_v38 = vld [vmem:[#allocation2 + $0xda] sm:$0xff] }
 0x9e4   :  { %14127 = vmatprep.mubr.f32.mxu1 %v19110_v56  ;;  %v14941_v56 = vpack.c.bf16 %v9558_v46, %v9557_v45  ;;  %v9506_v45 = vld [vmem:[#allocation2 + $0x10a] sm:$0xff]  ;;  %v9507_v46 = vld [vmem:[#allocation2 + $0x112] sm:$0xff] }
 0x9e7   :  { %14128 = vmatmul.mubr.f32.gmra.mrb[60].mxu1 %v19113_v1  ;;  %v9559_v1 = vld [vmem:[#allocation8 + $0x430] sm:$0xff] }
 0x9e8   :  { %14130 = vmatprep.mubr.f32.mxu1 %v19382_v6 }
 0x9eb   :  { %14131 = vmatmul.mubr.f32.gmra.mrb[62].mxu1 %v19382_v6  ;;  %v9561_v6 = vld [vmem:[#allocation8 + $0x440] sm:$0xff] }
 0x9ec   :  { %14165 = vmatprep.mubr.f32.mxu1 %v19116_v14  ;;  %v14945_v14 = vpack.c.bf16 %v9560_v35, %v9559_v1  ;;  %v9509_v1 = vld [vmem:[#allocation2 + $0x12a] sm:$0xff]  ;;  %v9510_v35 = vld [vmem:[#allocation2 + $0x13a] sm:$0xff] }
 0x9ef   :  { %14166 = vmatmul.mubr.f32.vlgmr.msra.gmra.mrb[0].mxu1 %v19120_v34  ;;  %v14949_v34 = vpack.c.bf16 %v9562_v62, %v9561_v6  ;;  %v9512_v6 = vld [vmem:[#allocation2 + $0x152] sm:$0xff]  ;;  %v9513_v62 = vld [vmem:[#allocation2 + $0x15a] sm:$0xff] }
 0x9f0   :  { %14168 = vmatprep.mubr.f32.mxu1 %v19123_v55  ;;  %14936 = vmatpush3.bf16.msra.mxu1 %v19377_v33  ;;  %v9563_v55 = vld [vmem:[#allocation8 + $0x450] sm:$0xff]  ;;  %v9564_v33 = vld [vmem:[#allocation8 + $0x458] sm:$0xff] }
 0x9f1   :  { %14938 = vmatprep.subr.bf16.mxu1 %v14937_v29 }
 0x9f3   :  { %14169 = vmatmul.mubr.f32.gmra.mrb[2].mxu1 %v19126_v25  ;;  %v14953_v25 = vpack.c.bf16 %v9564_v33, %v9563_v55  ;;  %v9515_v55 = vld [vmem:[#allocation2 + $0x172] sm:$0xff]  ;;  %v9518_v33 = vld [vmem:[#allocation2 + $0x19a] sm:$0xff] }
 0x9f4   :  { %14171 = vmatprep.mubr.f32.mxu1 %v19129_v49  ;;  %14940 = vmatpush3.bf16.msra.mxu1 %v14937_v29  ;;  %v9565_v49 = vld [vmem:[#allocation8 + $0x460] sm:$0xff] }
 0x9f5   :  { %14942 = vmatprep.subr.bf16.mxu1 %v14941_v56  ;;  %v9505_v29 = vld [vmem:[#allocation2 + $0xfa] sm:$0xff] }
 0x9f7   :  { %14172 = vmatmul.mubr.f32.gmra.mrb[4].mxu1 %v19132_v18  ;;  %v14957_v18 = vpack.c.bf16 %v9566_v11, %v9565_v49  ;;  %v9520_v49 = vld [vmem:[#allocation2 + $0x1e2] sm:$0xff]  ;;  %v9521_v11 = vld [vmem:[#allocation2 + $0x1ea] sm:$0xff] }
 0x9f8   :  { %14174 = vmatprep.mubr.f32.mxu1 %v19135_v30  ;;  %14944 = vmatpush3.bf16.msra.mxu1 %v14941_v56  ;;  %v9567_v30 = vld [vmem:[#allocation8 + $0x470] sm:$0xff]  ;;  %v9508_v56 = vld [vmem:[#allocation2 + $0x122] sm:$0xff] }
 0x9f9   :  { %14946 = vmatprep.subr.bf16.mxu1 %v14945_v14 }
 0x9fb   :  { %14175 = vmatmul.mubr.f32.gmra.mrb[6].mxu1 %v19138_v63  ;;  %v14961_v63 = vpack.c.bf16 %v9568_v9, %v9567_v30  ;;  %v9523_v30 = vld [vmem:[#allocation2 + $0x202] sm:$0xff]  ;;  %v9524_v9 = vld [vmem:[#allocation2 + $0x212] sm:$0xff] }
 0x9fc   :  { %14177 = vmatprep.mubr.f32.mxu1 %v19141_v26  ;;  %14948 = vmatpush3.bf16.msra.mxu1 %v14945_v14  ;;  %v8988_v26 = vld [vmem:[#allocation2 + $0x199] sm:$0xff]  ;;  %v9511_v14 = vld [vmem:[#allocation2 + $0x142] sm:$0xff] }
 0x9fd   :  { %14950 = vmatprep.subr.bf16.mxu1 %v14949_v34 }
 0x9ff   :  { %14178 = vmatmul.mubr.f32.gmra.mrb[8].mxu1 %v19144_v17  ;;  %v8989_v17 = vld [vmem:[#allocation2 + $0x1a1] sm:$0xff] }
 0xa00   :  { %14180 = vmatprep.mubr.f32.mxu1 %v19147_v5  ;;  %14952 = vmatpush3.bf16.msra.mxu1 %v14949_v34  ;;  %v21647_v5 = vld [vmem:[#allocation62_spill] sm:$0xff] }
 0xa01   :  { %14954 = vmatprep.subr.bf16.mxu1 %v14953_v25  ;;  %v9514_v34 = vld [vmem:[#allocation2 + $0x16a] sm:$0xff] }
 0xa03   :  { %14181 = vmatmul.mubr.f32.gmra.mrb[10].mxu1 %v19150_v43  ;;  %v21648_v43 = vld [vmem:[#allocation63_spill] sm:$0xff] }
 0xa04   :  { %14183 = vmatprep.mubr.f32.mxu1 %v19153_v31  ;;  %14956 = vmatpush3.bf16.msra.mxu1 %v14953_v25  ;;  %v21649_v31 = vld [vmem:[#allocation64_spill] sm:$0xff] }
 0xa05   :  { %14958 = vmatprep.subr.bf16.mxu1 %v14957_v18  ;;  %v9519_v25 = vld [vmem:[#allocation2 + $0x1a2] sm:$0xff] }
 0xa07   :  { %14184 = vmatmul.mubr.f32.gmra.mrb[12].mxu1 %v19158_v54  ;;  %v21650_v54 = vld [vmem:[#allocation67_spill] sm:$0xff] }
 0xa08   :  { %14186 = vmatprep.mubr.f32.mxu1 %v19161_v12  ;;  %14960 = vmatpush3.bf16.msra.mxu1 %v14957_v18  ;;  %v21651_v12 = vld [vmem:[#allocation68_spill] sm:$0xff] }
 0xa09   :  { %14962 = vmatprep.subr.bf16.mxu1 %v14961_v63  ;;  %v9522_v18 = vld [vmem:[#allocation2 + $0x1fa] sm:$0xff] }
 0xa0b   :  { %14187 = vmatmul.mubr.f32.gmra.mrb[14].mxu1 %v19165_v2  ;;  %v21652_v2 = vld [vmem:[#allocation69_spill] sm:$0xff] }
 0xa0c   :  { %14189 = vmatprep.mubr.f32.mxu1 %v19168_v51  ;;  %14964 = vmatpush3.bf16.msra.mxu1 %v14961_v63  ;;  %v21653_v51 = vld [vmem:[#allocation70_spill] sm:$0xff]  ;;  %v9525_v63 = vld [vmem:[#allocation2 + $0x21a] sm:$0xff] }
 0xa0f   :  { %14190 = vmatmul.mubr.f32.gmra.mrb[16].mxu1 %v19171_v40  ;;  %v21654_v40 = vld [vmem:[#allocation71_spill] sm:$0xff] }
 0xa10   :  { %14192 = vmatprep.mubr.f32.mxu1 %v19174_v0  ;;  %v21655_v0 = vld [vmem:[#allocation65_spill] sm:$0xff] }
 0xa13   :  { %14193 = vmatmul.mubr.f32.gmra.mrb[18].mxu1 %v19177_v42  ;;  %v21656_v42 = vld [vmem:[#allocation66_spill] sm:$0xff] }
 0xa14   :  { %14195 = vmatprep.mubr.f32.mxu1 %v19180_v61  ;;  %v21657_v61 = vld [vmem:[#allocation72_spill] sm:$0xff] }
 0xa17   :  { %14196 = vmatmul.mubr.f32.gmra.mrb[20].mxu1 %v19183_v22  ;;  %v21658_v22 = vld [vmem:[#allocation73_spill] sm:$0xff] }
 0xa18   :  { %14198 = vmatprep.mubr.f32.mxu1 %v19186_v4  ;;  %v21659_v4 = vld [vmem:[#allocation74_spill] sm:$0xff] }
 0xa1b   :  { %14199 = vmatmul.mubr.f32.gmra.mrb[22].mxu1 %v19189_v52  ;;  %v21660_v52 = vld [vmem:[#allocation75_spill] sm:$0xff] }
 0xa1c   :  { %14201 = vmatprep.mubr.f32.mxu1 %v19192_v47  ;;  %v21661_v47 = vld [vmem:[#allocation76_spill] sm:$0xff] }
 0xa1f   :  { %14202 = vmatmul.mubr.f32.gmra.mrb[24].mxu1 %v19195_v19  ;;  %v21662_v19 = vld [vmem:[#allocation77_spill] sm:$0xff] }
 0xa20   :  { %14204 = vmatprep.mubr.f32.mxu1 %v19198_v13  ;;  %v21663_v13 = vld [vmem:[#allocation78_spill] sm:$0xff] }
 0xa23   :  { %14205 = vmatmul.mubr.f32.gmra.mrb[26].mxu1 %v19201_v32  ;;  %v21664_v32 = vld [vmem:[#allocation79_spill] sm:$0xff] }
 0xa24   :  { %14207 = vmatprep.mubr.f32.mxu1 %v19204_v28  ;;  %v21665_v28 = vld [vmem:[#allocation80_spill] sm:$0xff] }
 0xa27   :  { %14208 = vmatmul.mubr.f32.gmra.mrb[28].mxu1 %v19207_v59  ;;  %v9020_v59 = vld [vmem:[#allocation2 + $0x349] sm:$0xff] }
 0xa28   :  { %14210 = vmatprep.mubr.f32.mxu1 %v8988_v26  ;;  %v9526_v26 = vld [vmem:[#allocation2 + $0x22a] sm:$0xff] }
 0xa2b   :  { %14211 = vmatmul.mubr.f32.gmra.mrb[30].mxu1 %v8989_v17  ;;  %v9529_v17 = vld [vmem:[#allocation2 + $0x24a] sm:$0xff] }
 0xa2c   :  { %14213 = vmatprep.mubr.f32.mxu1 %v19210_v39  ;;  %v21666_v39 = vld [vmem:[#allocation97_spill] sm:$0xff] }
 0xa2f   :  { %14214 = vmatmul.mubr.f32.gmra.mrb[32].mxu1 %v19213_v44  ;;  %v9021_v44 = vld [vmem:[#allocation2 + $0x351] sm:$0xff] }
 0xa30   :  { %14216 = vmatprep.mubr.f32.mxu1 %v19216_v27  ;;  %v9488_v27 = vld [vmem:[#allocation2 + $0x32] sm:$0xff] }
 0xa33   :  { %14217 = vmatmul.mubr.f32.gmra.mrb[34].mxu1 %v19219_v20  ;;  %v9489_v20 = vld [vmem:[#allocation2 + $0x3a] sm:$0xff] }
 0xa34   :  { %14219 = vmatprep.mubr.f32.mxu1 %v19222_v41  ;;  %v9490_v41 = vld [vmem:[#allocation2 + $0x4a] sm:$0xff] }
 0xa37   :  { %14220 = vmatmul.mubr.f32.gmra.mrb[36].mxu1 %v19225_v36  ;;  %v9491_v36 = vld [vmem:[#allocation2 + $0x52] sm:$0xff] }
 0xa38   :  { %14222 = vmatprep.mubr.f32.mxu1 %v19228_v7  ;;  %v9492_v7 = vld [vmem:[#allocation2 + $0x62] sm:$0xff] }
 0xa3b   :  { %14223 = vmatmul.mubr.f32.gmra.mrb[38].mxu1 %v19231_v8  ;;  %v9493_v8 = vld [vmem:[#allocation2 + $0x6a] sm:$0xff] }
 0xa3c   :  { %14225 = vmatprep.mubr.f32.mxu1 %v19234_v16  ;;  %v9494_v16 = vld [vmem:[#allocation2 + $0x7a] sm:$0xff] }
 0xa3f   :  { %14226 = vmatmul.mubr.f32.gmra.mrb[40].mxu1 %v19237_v10  ;;  %v9495_v10 = vld [vmem:[#allocation2 + $0x82] sm:$0xff] }
 0xa40   :  { %14228 = vmatprep.mubr.f32.mxu1 %v21647_v5  ;;  %v9530_v5 = vld [vmem:[#allocation2 + $0x25a] sm:$0xff] }
 0xa43   :  { %14229 = vmatmul.mubr.f32.gmra.mrb[42].mxu1 %v21648_v43  ;;  %v9531_v43 = vld [vmem:[#allocation2 + $0x262] sm:$0xff] }
 0xa44   :  { %14231 = vmatprep.mubr.f32.mxu1 %v21649_v31  ;;  %v9532_v31 = vld [vmem:[#allocation2 + $0x272] sm:$0xff] }
 0xa47   :  { %14232 = vmatmul.mubr.f32.gmra.mrb[44].mxu1 %v21650_v54  ;;  %v9533_v54 = vld [vmem:[#allocation2 + $0x27a] sm:$0xff] }
 0xa48   :  { %14234 = vmatprep.mubr.f32.mxu1 %v21651_v12  ;;  %v9534_v12 = vld [vmem:[#allocation2 + $0x28a] sm:$0xff] }
 0xa4b   :  { %14235 = vmatmul.mubr.f32.gmra.mrb[46].mxu1 %v21652_v2  ;;  %v9535_v2 = vld [vmem:[#allocation2 + $0x292] sm:$0xff] }
 0xa4c   :  { %14237 = vmatprep.mubr.f32.mxu1 %v21653_v51  ;;  %v9536_v51 = vld [vmem:[#allocation2 + $0x2a2] sm:$0xff] }
 0xa4f   :  { %14238 = vmatmul.mubr.f32.gmra.mrb[48].mxu1 %v21654_v40  ;;  %v9537_v40 = vld [vmem:[#allocation2 + $0x2aa] sm:$0xff] }
 0xa50   :  { %14240 = vmatprep.mubr.f32.mxu1 %v21655_v0  ;;  %v9538_v0 = vld [vmem:[#allocation2 + $0x2ba] sm:$0xff] }
 0xa53   :  { %14241 = vmatmul.mubr.f32.gmra.mrb[50].mxu1 %v21656_v42  ;;  %v9539_v42 = vld [vmem:[#allocation2 + $0x2c2] sm:$0xff] }
 0xa54   :  { %14243 = vmatprep.mubr.f32.mxu1 %v21657_v61  ;;  %v9540_v61 = vld [vmem:[#allocation2 + $0x2d2] sm:$0xff] }
 0xa57   :  { %14244 = vmatmul.mubr.f32.gmra.mrb[52].mxu1 %v21658_v22  ;;  %v9541_v22 = vld [vmem:[#allocation2 + $0x2da] sm:$0xff] }
 0xa58   :  { %14246 = vmatprep.mubr.f32.mxu1 %v21659_v4  ;;  %v9542_v4 = vld [vmem:[#allocation2 + $0x2ea] sm:$0xff] }
 0xa5b   :  { %14247 = vmatmul.mubr.f32.gmra.mrb[54].mxu1 %v21660_v52  ;;  %v9543_v52 = vld [vmem:[#allocation2 + $0x2f2] sm:$0xff] }
 0xa5c   :  { %14249 = vmatprep.mubr.f32.mxu1 %v21661_v47  ;;  %v9544_v47 = vld [vmem:[#allocation2 + $0x302] sm:$0xff] }
 0xa5f   :  { %14250 = vmatmul.mubr.f32.gmra.mrb[56].mxu1 %v21662_v19  ;;  %v9545_v19 = vld [vmem:[#allocation2 + $0x30a] sm:$0xff] }
 0xa60   :  { %14252 = vmatprep.mubr.f32.mxu1 %v21663_v13  ;;  %v9546_v13 = vld [vmem:[#allocation2 + $0x31a] sm:$0xff] }
 0xa63   :  { %14253 = vmatmul.mubr.f32.gmra.mrb[58].mxu1 %v21664_v32  ;;  %v9547_v32 = vld [vmem:[#allocation2 + $0x322] sm:$0xff] }
 0xa64   :  { %14255 = vmatprep.mubr.f32.mxu1 %v21665_v28  ;;  %v9550_v28 = vld [vmem:[#allocation2 + $0x34a] sm:$0xff] }
 0xa67   :  { %14256 = vmatmul.mubr.f32.gmra.mrb[60].mxu1 %v21666_v39 }
 0xa68   :  { %14258 = vmatprep.mubr.f32.mxu1 %v9020_v59  ;;  %v9551_v59 = vld [vmem:[#allocation2 + $0x352] sm:$0xff] }
 0xa6b   :  { %14259 = vmatmul.mubr.f32.gmra.mrb[62].mxu1 %v9021_v44 }
 0xa6c   :  { %14293 = vmatprep.mubr.f32.mxu1 %v9488_v27 }
 0xa6f   :  { %14294 = vmatmul.mubr.f32.vlgmr.msra.gmra.mrb[0].mxu1 %v9489_v20 }
 0xa70   :  { %14296 = vmatprep.mubr.f32.mxu1 %v9490_v41 }
 0xa73   :  { %14297 = vmatmul.mubr.f32.gmra.mrb[2].mxu1 %v9491_v36 }
 0xa74   :  { %14299 = vmatprep.mubr.f32.mxu1 %v9492_v7 }
 0xa77   :  { %14300 = vmatmul.mubr.f32.gmra.mrb[4].mxu1 %v9493_v8 }
 0xa78   :  { %14302 = vmatprep.mubr.f32.mxu1 %v9494_v16 }
 0xa7b   :  { %14303 = vmatmul.mubr.f32.gmra.mrb[6].mxu1 %v9495_v10 }
 0xa7c   :  { %14305 = vmatprep.mubr.f32.mxu1 %v9496_v53 }
 0xa7f   :  { %14306 = vmatmul.mubr.f32.gmra.mrb[8].mxu1 %v9497_v60 }
 0xa80   :  { %14308 = vmatprep.mubr.f32.mxu1 %v9498_v21 }
 0xa83   :  { %14309 = vmatmul.mubr.f32.gmra.mrb[10].mxu1 %v9499_v37 }
 0xa84   :  { %14311 = vmatprep.mubr.f32.mxu1 %v9500_v48 }
 0xa87   :  { %14312 = vmatmul.mubr.f32.gmra.mrb[12].mxu1 %v9501_v57 }
 0xa88   :  { %14314 = vmatprep.mubr.f32.mxu1 %v9502_v38 }
 0xa8b   :  { %14315 = vmatmul.mubr.f32.gmra.mrb[14].mxu1 %v9503_v3 }
 0xa8c   :  { %14317 = vmatprep.mubr.f32.mxu1 %v9504_v24 }
 0xa8f   :  { %14318 = vmatmul.mubr.f32.gmra.mrb[16].mxu1 %v9505_v29 }
 0xa90   :  { %14320 = vmatprep.mubr.f32.mxu1 %v9506_v45 }
 0xa93   :  { %14321 = vmatmul.mubr.f32.gmra.mrb[18].mxu1 %v9507_v46 }
 0xa94   :  { %14323 = vmatprep.mubr.f32.mxu1 %v9508_v56 }
 0xa97   :  { %14324 = vmatmul.mubr.f32.gmra.mrb[20].mxu1 %v9509_v1 }
 0xa98   :  { %14326 = vmatprep.mubr.f32.mxu1 %v9510_v35 }
 0xa9b   :  { %14327 = vmatmul.mubr.f32.gmra.mrb[22].mxu1 %v9511_v14 }
 0xa9c   :  { %14329 = vmatprep.mubr.f32.mxu1 %v9512_v6 }
 0xa9f   :  { %14330 = vmatmul.mubr.f32.gmra.mrb[24].mxu1 %v9513_v62 }
 0xaa0   :  { %14332 = vmatprep.mubr.f32.mxu1 %v9514_v34 }
 0xaa3   :  { %14333 = vmatmul.mubr.f32.gmra.mrb[26].mxu1 %v9515_v55 }
 0xaa4   :  { %14335 = vmatprep.mubr.f32.mxu1 %v19334_v23  ;;  %v9527_v23 = vld [vmem:[#allocation2 + $0x232] sm:$0xff] }
 0xaa7   :  { %14336 = vmatmul.mubr.f32.gmra.mrb[28].mxu1 %v19337_v15  ;;  %v9528_v15 = vld [vmem:[#allocation2 + $0x242] sm:$0xff] }
 0xaa8   :  { %14338 = vmatprep.mubr.f32.mxu1 %v9518_v33 }
 0xaab   :  { %14339 = vmatmul.mubr.f32.gmra.mrb[30].mxu1 %v9519_v25 }
 0xaac   :  { %14341 = vmatprep.mubr.f32.mxu1 %v9520_v49 }
 0xaaf   :  { %14342 = vmatmul.mubr.f32.gmra.mrb[32].mxu1 %v9521_v11 }
 0xab0   :  { %14344 = vmatprep.mubr.f32.mxu1 %v9522_v18 }
 0xab3   :  { %14345 = vmatmul.mubr.f32.gmra.mrb[34].mxu1 %v9523_v30 }
 0xab4   :  { %14347 = vmatprep.mubr.f32.mxu1 %v9524_v9 }
 0xab7   :  { %14348 = vmatmul.mubr.f32.gmra.mrb[36].mxu1 %v9525_v63 }
 0xab8   :  { %14350 = vmatprep.mubr.f32.mxu1 %v9526_v26 }
 0xabb   :  { %14351 = vmatmul.mubr.f32.gmra.mrb[38].mxu1 %v9527_v23 }
 0xabc   :  { %14353 = vmatprep.mubr.f32.mxu1 %v9528_v15 }
 0xabf   :  { %14354 = vmatmul.mubr.f32.gmra.mrb[40].mxu1 %v9529_v17 }
 0xac0   :  { %14356 = vmatprep.mubr.f32.mxu1 %v9530_v5 }
 0xac3   :  { %14357 = vmatmul.mubr.f32.gmra.mrb[42].mxu1 %v9531_v43 }
 0xac4   :  { %14359 = vmatprep.mubr.f32.mxu1 %v9532_v31 }
 0xac7   :  { %14360 = vmatmul.mubr.f32.gmra.mrb[44].mxu1 %v9533_v54 }
 0xac8   :  { %14362 = vmatprep.mubr.f32.mxu1 %v9534_v12 }
 0xacb   :  { %14363 = vmatmul.mubr.f32.gmra.mrb[46].mxu1 %v9535_v2 }
 0xacc   :  { %14365 = vmatprep.mubr.f32.mxu1 %v9536_v51 }
 0xacf   :  { %14366 = vmatmul.mubr.f32.gmra.mrb[48].mxu1 %v9537_v40 }
 0xad0   :  { %14368 = vmatprep.mubr.f32.mxu1 %v9538_v0 }
 0xad3   :  { %14369 = vmatmul.mubr.f32.gmra.mrb[50].mxu1 %v9539_v42 }
 0xad4   :  { %14371 = vmatprep.mubr.f32.mxu1 %v9540_v61 }
 0xad7   :  { %14372 = vmatmul.mubr.f32.gmra.mrb[52].mxu1 %v9541_v22 }
 0xad8   :  { %14374 = vmatprep.mubr.f32.mxu1 %v9542_v4 }
 0xadb   :  { %14375 = vmatmul.mubr.f32.gmra.mrb[54].mxu1 %v9543_v52 }
 0xadc   :  { %14377 = vmatprep.mubr.f32.mxu1 %v9544_v47 }
 0xadf   :  { %14378 = vmatmul.mubr.f32.gmra.mrb[56].mxu1 %v9545_v19 }
 0xae0   :  { %14380 = vmatprep.mubr.f32.mxu1 %v9546_v13 }
 0xae3   :  { %14381 = vmatmul.mubr.f32.gmra.mrb[58].mxu1 %v9547_v32 }
 0xae4   :  { %14383 = vmatprep.mubr.f32.mxu1 %v19370_v58 }
 0xae7   :  { %14384 = vmatmul.mubr.f32.gmra.mrb[60].mxu1 %v19373_v50 }
 0xae8   :  { %14386 = vmatprep.mubr.f32.mxu1 %v9550_v28 }
 0xaeb   :  { %14387 = vmatmul.mubr.f32.gmra.mrb[62].mxu1 %v9551_v59 }
 0xb42   :  { %v19455_v39 = vpop.f32.mrb[0].mxu1 }
 0xb43   :  { %v10090_v44 = vmul.f32 %v19455_v39, %v19455_v39  ;;  %v19459_v27 = vpop.f32.mrb[1].mxu1 }
 0xb44   :  { %v10020_v20 = vadd.f32 %v19455_v39, %v19459_v27  ;;  %v10089_v41 = vmul.f32 %v19459_v27, %v19459_v27 }
 0xb46   :  { %v10153_v58 = vadd.f32 %v10090_v44, %v10089_v41  ;;  %v19465_v36 = vpop.f32.mrb[2].mxu1 }
 0xb47   :  { %v19467_v50 = vpop.f32.mrb[3].mxu1  ;;  %v10092_v16 = vmul.f32 %v19465_v36, %v19465_v36 }
 0xb48   :  { %v10021_v7 = vadd.f32 %v10020_v20, %v19467_v50  ;;  %v10091_v8 = vmul.f32 %v19467_v50, %v19467_v50 }
 0xb4a   :  { %v10022_v10 = vadd.f32 %v19465_v36, %v10021_v7  ;;  %v10154_v53 = vadd.f32 %v10153_v58, %v10091_v8  ;;  %v19475_v60 = vpop.f32.mrb[4].mxu1 }
 0xb4b   :  { %v19477_v21 = vpop.f32.mrb[5].mxu1  ;;  %v10094_v38 = vmul.f32 %v19475_v60, %v19475_v60 }
 0xb4c   :  { %v10155_v37 = vadd.f32 %v10154_v53, %v10092_v16  ;;  %v10023_v48 = vadd.f32 %v10022_v10, %v19477_v21  ;;  %v10093_v57 = vmul.f32 %v19477_v21, %v19477_v21 }
 0xb4e   :  { %v10156_v3 = vadd.f32 %v10155_v37, %v10093_v57  ;;  %v19484_v24 = vpop.f32.mrb[6].mxu1  ;;  %v10024_v29 = vadd.f32 %v19475_v60, %v10023_v48 }
 0xb4f   :  { %v19487_v45 = vpop.f32.mrb[7].mxu1  ;;  %v10096_v35 = vmul.f32 %v19484_v24, %v19484_v24 }
 0xb50   :  { %v10025_v46 = vadd.f32 %v10024_v29, %v19487_v45  ;;  %v10095_v56 = vmul.f32 %v19487_v45, %v19487_v45  ;;  %v10157_v1 = vadd.f32 %v10156_v3, %v10094_v38 }
 0xb52   :  { %v10158_v14 = vadd.f32 %v10157_v1, %v10095_v56  ;;  %v19494_v6 = vpop.f32.mrb[8].mxu1  ;;  %v10026_v62 = vadd.f32 %v19484_v24, %v10025_v46 }
 0xb53   :  { %v19497_v34 = vpop.f32.mrb[9].mxu1  ;;  %v10098_v49 = vmul.f32 %v19494_v6, %v19494_v6 }
 0xb54   :  { %v10027_v55 = vadd.f32 %v10026_v62, %v19497_v34  ;;  %v10097_v33 = vmul.f32 %v19497_v34, %v19497_v34  ;;  %v10159_v25 = vadd.f32 %v10158_v14, %v10096_v35 }
 0xb56   :  { %v10160_v11 = vadd.f32 %v10159_v25, %v10097_v33  ;;  %v19504_v18 = vpop.f32.mrb[10].mxu1  ;;  %v10028_v30 = vadd.f32 %v19494_v6, %v10027_v55 }
 0xb57   :  { %v19507_v9 = vpop.f32.mrb[11].mxu1  ;;  %v10100_v15 = vmul.f32 %v19504_v18, %v19504_v18 }
 0xb58   :  { %v10029_v63 = vadd.f32 %v10028_v30, %v19507_v9  ;;  %v10099_v26 = vmul.f32 %v19507_v9, %v19507_v9  ;;  %v10161_v23 = vadd.f32 %v10160_v11, %v10098_v49 }
 0xb5a   :  { %v10162_v17 = vadd.f32 %v10161_v23, %v10099_v26  ;;  %v19514_v5 = vpop.f32.mrb[12].mxu1  ;;  %v10030_v43 = vadd.f32 %v19504_v18, %v10029_v63 }
 0xb5b   :  { %v19517_v31 = vpop.f32.mrb[13].mxu1  ;;  %v10102_v51 = vmul.f32 %v19514_v5, %v19514_v5 }
 0xb5c   :  { %v10031_v54 = vadd.f32 %v10030_v43, %v19517_v31  ;;  %v10101_v12 = vmul.f32 %v19517_v31, %v19517_v31  ;;  %v10163_v2 = vadd.f32 %v10162_v17, %v10100_v15 }
 0xb5e   :  { %v10164_v40 = vadd.f32 %v10163_v2, %v10101_v12  ;;  %v19524_v0 = vpop.f32.mrb[14].mxu1  ;;  %v10032_v42 = vadd.f32 %v19514_v5, %v10031_v54 }
 0xb5f   :  { %v19527_v61 = vpop.f32.mrb[15].mxu1  ;;  %v10104_v47 = vmul.f32 %v19524_v0, %v19524_v0 }
 0xb60   :  { %v10033_v22 = vadd.f32 %v10032_v42, %v19527_v61  ;;  %v10103_v4 = vmul.f32 %v19527_v61, %v19527_v61  ;;  %v10165_v52 = vadd.f32 %v10164_v40, %v10102_v51 }
 0xb62   :  { %v10166_v19 = vadd.f32 %v10165_v52, %v10103_v4  ;;  %v19534_v13 = vpop.f32.mrb[16].mxu1  ;;  %v10034_v32 = vadd.f32 %v19524_v0, %v10033_v22 }
 0xb63   :  { %v19537_v28 = vpop.f32.mrb[17].mxu1  ;;  %v10106_v41 = vmul.f32 %v19534_v13, %v19534_v13 }
 0xb64   :  { %v10035_v59 = vadd.f32 %v10034_v32, %v19537_v28  ;;  %v10105_v44 = vmul.f32 %v19537_v28, %v19537_v28  ;;  %v10167_v20 = vadd.f32 %v10166_v19, %v10104_v47 }
 0xb66   :  { %v10168_v58 = vadd.f32 %v10167_v20, %v10105_v44  ;;  %v19544_v7 = vpop.f32.mrb[18].mxu1  ;;  %v10036_v8 = vadd.f32 %v19534_v13, %v10035_v59 }
 0xb67   :  { %v19547_v16 = vpop.f32.mrb[19].mxu1  ;;  %v10108_v48 = vmul.f32 %v19544_v7, %v19544_v7 }
 0xb68   :  { %v10037_v10 = vadd.f32 %v10036_v8, %v19547_v16  ;;  %v10107_v53 = vmul.f32 %v19547_v16, %v19547_v16  ;;  %v10169_v37 = vadd.f32 %v10168_v58, %v10106_v41 }
 0xb6a   :  { %v10170_v57 = vadd.f32 %v10169_v37, %v10107_v53  ;;  %v19554_v38 = vpop.f32.mrb[20].mxu1  ;;  %v10038_v3 = vadd.f32 %v19544_v7, %v10037_v10 }
 0xb6b   :  { %v19557_v29 = vpop.f32.mrb[21].mxu1  ;;  %v10110_v35 = vmul.f32 %v19554_v38, %v19554_v38 }
 0xb6c   :  { %v10039_v46 = vadd.f32 %v10038_v3, %v19557_v29  ;;  %v10109_v56 = vmul.f32 %v19557_v29, %v19557_v29  ;;  %v10171_v1 = vadd.f32 %v10170_v57, %v10108_v48 }
 0xb6e   :  { %v10172_v14 = vadd.f32 %v10171_v1, %v10109_v56  ;;  %v19564_v62 = vpop.f32.mrb[22].mxu1  ;;  %v10040_v55 = vadd.f32 %v19554_v38, %v10039_v46 }
 0xb6f   :  { %v19567_v33 = vpop.f32.mrb[23].mxu1  ;;  %v10112_v30 = vmul.f32 %v19564_v62, %v19564_v62 }
 0xb70   :  { %v10041_v25 = vadd.f32 %v10040_v55, %v19567_v33  ;;  %v10111_v49 = vmul.f32 %v19567_v33, %v19567_v33  ;;  %v10173_v11 = vadd.f32 %v10172_v14, %v10110_v35 }
 0xb72   :  { %v10174_v63 = vadd.f32 %v10173_v11, %v10111_v49  ;;  %v19574_v26 = vpop.f32.mrb[24].mxu1  ;;  %v10042_v23 = vadd.f32 %v19564_v62, %v10041_v25 }
 0xb73   :  { %v19577_v15 = vpop.f32.mrb[25].mxu1  ;;  %v10114_v12 = vmul.f32 %v19574_v26, %v19574_v26 }
 0xb74   :  { %v10043_v17 = vadd.f32 %v10042_v23, %v19577_v15  ;;  %v10113_v43 = vmul.f32 %v19577_v15, %v19577_v15  ;;  %v10175_v54 = vadd.f32 %v10174_v63, %v10112_v30 }
 0xb76   :  { %v10176_v2 = vadd.f32 %v10175_v54, %v10113_v43  ;;  %v19584_v51 = vpop.f32.mrb[26].mxu1  ;;  %v10044_v40 = vadd.f32 %v19574_v26, %v10043_v17 }
 0xb77   :  { %v19587_v42 = vpop.f32.mrb[27].mxu1  ;;  %v10116_v47 = vmul.f32 %v19584_v51, %v19584_v51 }
 0xb78   :  { %v10045_v22 = vadd.f32 %v10044_v40, %v19587_v42  ;;  %v10115_v4 = vmul.f32 %v19587_v42, %v19587_v42  ;;  %v10177_v52 = vadd.f32 %v10176_v2, %v10114_v12 }
 0xb7a   :  { %v10178_v19 = vadd.f32 %v10177_v52, %v10115_v4  ;;  %v19594_v32 = vpop.f32.mrb[28].mxu1  ;;  %v10046_v59 = vadd.f32 %v19584_v51, %v10045_v22 }
 0xb7b   :  { %v19597_v44 = vpop.f32.mrb[29].mxu1  ;;  %v10118_v8 = vmul.f32 %v19594_v32, %v19594_v32 }
 0xb7c   :  { %v10047_v20 = vadd.f32 %v10046_v59, %v19597_v44  ;;  %v10117_v41 = vmul.f32 %v19597_v44, %v19597_v44  ;;  %v10179_v58 = vadd.f32 %v10178_v19, %v10116_v47 }
 0xb7e   :  { %v10180_v10 = vadd.f32 %v10179_v58, %v10117_v41  ;;  %v19604_v53 = vpop.f32.mrb[30].mxu1  ;;  %v10048_v37 = vadd.f32 %v19594_v32, %v10047_v20 }
 0xb7f   :  { %v19607_v48 = vpop.f32.mrb[31].mxu1  ;;  %v10120_v56 = vmul.f32 %v19604_v53, %v19604_v53 }
 0xb80   :  { %v10049_v57 = vadd.f32 %v10048_v37, %v19607_v48  ;;  %v10119_v3 = vmul.f32 %v19607_v48, %v19607_v48  ;;  %v10181_v46 = vadd.f32 %v10180_v10, %v10118_v8 }
 0xb82   :  { %v10182_v1 = vadd.f32 %v10181_v46, %v10119_v3  ;;  %v19614_v35 = vpop.f32.mrb[32].mxu1  ;;  %v10050_v14 = vadd.f32 %v19604_v53, %v10049_v57 }
 0xb83   :  { %v19617_v55 = vpop.f32.mrb[33].mxu1  ;;  %v10122_v30 = vmul.f32 %v19614_v35, %v19614_v35 }
 0xb84   :  { %v10051_v25 = vadd.f32 %v10050_v14, %v19617_v55  ;;  %v10121_v49 = vmul.f32 %v19617_v55, %v19617_v55  ;;  %v10183_v11 = vadd.f32 %v10182_v1, %v10120_v56 }
 0xb86   :  { %v10184_v63 = vadd.f32 %v10183_v11, %v10121_v49  ;;  %v19624_v23 = vpop.f32.mrb[34].mxu1  ;;  %v10052_v17 = vadd.f32 %v19614_v35, %v10051_v25 }
 0xb87   :  { %v19627_v43 = vpop.f32.mrb[35].mxu1  ;;  %v10124_v40 = vmul.f32 %v19624_v23, %v19624_v23 }
 0xb88   :  { %v10053_v54 = vadd.f32 %v10052_v17, %v19627_v43  ;;  %v10123_v12 = vmul.f32 %v19627_v43, %v19627_v43  ;;  %v10185_v2 = vadd.f32 %v10184_v63, %v10122_v30 }
 0xb8a   :  { %v10186_v22 = vadd.f32 %v10185_v2, %v10123_v12  ;;  %v19634_v4 = vpop.f32.mrb[36].mxu1  ;;  %v10054_v52 = vadd.f32 %v19624_v23, %v10053_v54 }
 0xb8b   :  { %v19637_v47 = vpop.f32.mrb[37].mxu1  ;;  %v10126_v41 = vmul.f32 %v19634_v4, %v19634_v4 }
 0xb8c   :  { %v10055_v19 = vadd.f32 %v10054_v52, %v19637_v47  ;;  %v10125_v59 = vmul.f32 %v19637_v47, %v19637_v47  ;;  %v10187_v20 = vadd.f32 %v10186_v22, %v10124_v40 }
 0xb8e   :  { %v10188_v58 = vadd.f32 %v10187_v20, %v10125_v59  ;;  %v19644_v8 = vpop.f32.mrb[38].mxu1  ;;  %v10056_v10 = vadd.f32 %v19634_v4, %v10055_v19 }
 0xb8f   :  { %v19647_v37 = vpop.f32.mrb[39].mxu1  ;;  %v10128_v56 = vmul.f32 %v19644_v8, %v19644_v8 }
 0xb90   :  { %v10057_v57 = vadd.f32 %v10056_v10, %v19647_v37  ;;  %v10127_v3 = vmul.f32 %v19647_v37, %v19647_v37  ;;  %v10189_v46 = vadd.f32 %v10188_v58, %v10126_v41 }
 0xb92   :  { %v10190_v1 = vadd.f32 %v10189_v46, %v10127_v3  ;;  %v19654_v14 = vpop.f32.mrb[40].mxu1  ;;  %v10058_v25 = vadd.f32 %v19644_v8, %v10057_v57 }
 0xb93   :  { %21667 = vst [vmem:[#allocation81_spill] sm:$0xff] %v19654_v14  ;;  %v19657_v49 = vpop.f32.mrb[41].mxu1  ;;  %v10130_v17 = vmul.f32 %v19654_v14, %v19654_v14 }
 0xb94   :  { %v10059_v11 = vadd.f32 %v10058_v25, %v19657_v49  ;;  %v10129_v30 = vmul.f32 %v19657_v49, %v19657_v49  ;;  %v10191_v63 = vadd.f32 %v10190_v1, %v10128_v56 }
 0xb96   :  { %v10192_v54 = vadd.f32 %v10191_v63, %v10129_v30  ;;  %v19664_v12 = vpop.f32.mrb[42].mxu1  ;;  %v10060_v2 = vadd.f32 %v19654_v14, %v10059_v11 }
 0xb97   :  { %21668 = vst [vmem:[#allocation82_spill] sm:$0xff] %v19664_v12  ;;  %v19667_v40 = vpop.f32.mrb[43].mxu1  ;;  %v10132_v59 = vmul.f32 %v19664_v12, %v19664_v12 }
 0xb98   :  { %21669 = vst [vmem:[#allocation83_spill] sm:$0xff] %v19667_v40  ;;  %v10061_v22 = vadd.f32 %v10060_v2, %v19667_v40  ;;  %v10131_v52 = vmul.f32 %v19667_v40, %v19667_v40  ;;  %v10193_v19 = vadd.f32 %v10192_v54, %v10130_v17 }
 0xb9a   :  { %v10194_v20 = vadd.f32 %v10193_v19, %v10131_v52  ;;  %v19674_v41 = vpop.f32.mrb[44].mxu1  ;;  %v10062_v58 = vadd.f32 %v19664_v12, %v10061_v22 }
 0xb9b   :  { %21670 = vst [vmem:[#allocation84_spill] sm:$0xff] %v19674_v41  ;;  %v19677_v10 = vpop.f32.mrb[45].mxu1  ;;  %v10134_v56 = vmul.f32 %v19674_v41, %v19674_v41 }
 0xb9c   :  { %21671 = vst [vmem:[#allocation85_spill] sm:$0xff] %v19677_v10  ;;  %v10063_v57 = vadd.f32 %v10062_v58, %v19677_v10  ;;  %v10133_v3 = vmul.f32 %v19677_v10, %v19677_v10  ;;  %v10195_v46 = vadd.f32 %v10194_v20, %v10132_v59 }
 0xb9e   :  { %v10196_v1 = vadd.f32 %v10195_v46, %v10133_v3  ;;  %v19684_v25 = vpop.f32.mrb[46].mxu1  ;;  %v10064_v11 = vadd.f32 %v19674_v41, %v10063_v57 }
 0xb9f   :  { %21672 = vst [vmem:[#allocation21_spill] sm:$0xff] %v19684_v25  ;;  %v19687_v30 = vpop.f32.mrb[47].mxu1  ;;  %v10136_v2 = vmul.f32 %v19684_v25, %v19684_v25 }
 0xba0   :  { %21673 = vst [vmem:[#allocation22_spill] sm:$0xff] %v19687_v30  ;;  %v10065_v63 = vadd.f32 %v10064_v11, %v19687_v30  ;;  %v10135_v17 = vmul.f32 %v19687_v30, %v19687_v30  ;;  %v10197_v54 = vadd.f32 %v10196_v1, %v10134_v56 }
 0xba2   :  { %v10198_v22 = vadd.f32 %v10197_v54, %v10135_v17  ;;  %v19694_v52 = vpop.f32.mrb[48].mxu1  ;;  %v10066_v19 = vadd.f32 %v19684_v25, %v10065_v63 }
 0xba3   :  { %21674 = vst [vmem:[#allocation23_spill] sm:$0xff] %v19694_v52  ;;  %v19697_v59 = vpop.f32.mrb[49].mxu1  ;;  %v10138_v3 = vmul.f32 %v19694_v52, %v19694_v52 }
 0xba4   :  { %21675 = vst [vmem:[#allocation24_spill] sm:$0xff] %v19697_v59  ;;  %v10067_v20 = vadd.f32 %v10066_v19, %v19697_v59  ;;  %v10137_v58 = vmul.f32 %v19697_v59, %v19697_v59  ;;  %v10199_v57 = vadd.f32 %v10198_v22, %v10136_v2 }
 0xba6   :  { %v10200_v46 = vadd.f32 %v10199_v57, %v10137_v58  ;;  %v19704_v56 = vpop.f32.mrb[50].mxu1  ;;  %v10068_v1 = vadd.f32 %v19694_v52, %v10067_v20 }
 0xba7   :  { %21676 = vst [vmem:[#allocation25_spill] sm:$0xff] %v19704_v56  ;;  %v19707_v11 = vpop.f32.mrb[51].mxu1  ;;  %v10140_v19 = vmul.f32 %v19704_v56, %v19704_v56 }
 0xba8   :  { %21677 = vst [vmem:[#allocation26_spill] sm:$0xff] %v19707_v11  ;;  %v10069_v63 = vadd.f32 %v10068_v1, %v19707_v11  ;;  %v10139_v17 = vmul.f32 %v19707_v11, %v19707_v11  ;;  %v10201_v54 = vadd.f32 %v10200_v46, %v10138_v3 }
 0xbaa   :  { %v10202_v2 = vadd.f32 %v10201_v54, %v10139_v17  ;;  %v19714_v22 = vpop.f32.mrb[52].mxu1  ;;  %v10070_v58 = vadd.f32 %v19704_v56, %v10069_v63 }
 0xbab   :  { %21678 = vst [vmem:[#allocation27_spill] sm:$0xff] %v19714_v22  ;;  %v19717_v57 = vpop.f32.mrb[53].mxu1  ;;  %v10142_v11 = vmul.f32 %v19714_v22, %v19714_v22 }
 0xbac   :  { %21679 = vst [vmem:[#allocation28_spill] sm:$0xff] %v19717_v57  ;;  %v10071_v20 = vadd.f32 %v10070_v58, %v19717_v57  ;;  %v10141_v52 = vmul.f32 %v19717_v57, %v19717_v57  ;;  %v10203_v1 = vadd.f32 %v10202_v2, %v10140_v19 }
 0xbae   :  { %v10204_v3 = vadd.f32 %v10203_v1, %v10141_v52  ;;  %v19724_v46 = vpop.f32.mrb[54].mxu1  ;;  %v10072_v17 = vadd.f32 %v19714_v22, %v10071_v20 }
 0xbaf   :  { %21680 = vst [vmem:[#allocation29_spill] sm:$0xff] %v19724_v46  ;;  %v19727_v54 = vpop.f32.mrb[55].mxu1  ;;  %v10144_v57 = vmul.f32 %v19724_v46, %v19724_v46 }
 0xbb0   :  { %21681 = vst [vmem:[#allocation30_spill] sm:$0xff] %v19727_v54  ;;  %v10073_v63 = vadd.f32 %v10072_v17, %v19727_v54  ;;  %v10143_v56 = vmul.f32 %v19727_v54, %v19727_v54  ;;  %v10205_v58 = vadd.f32 %v10204_v3, %v10142_v11 }
 0xbb2   :  { %v10206_v19 = vadd.f32 %v10205_v58, %v10143_v56  ;;  %v19734_v2 = vpop.f32.mrb[56].mxu1  ;;  %v10074_v52 = vadd.f32 %v19724_v46, %v10073_v63 }
 0xbb3   :  { %21682 = vst [vmem:[#allocation86_spill] sm:$0xff] %v19734_v2  ;;  %v19737_v1 = vpop.f32.mrb[57].mxu1  ;;  %v10146_v54 = vmul.f32 %v19734_v2, %v19734_v2 }
 0xbb4   :  { %21683 = vst [vmem:[#allocation87_spill] sm:$0xff] %v19737_v1  ;;  %v10075_v20 = vadd.f32 %v10074_v52, %v19737_v1  ;;  %v10145_v22 = vmul.f32 %v19737_v1, %v19737_v1  ;;  %v10207_v17 = vadd.f32 %v10206_v19, %v10144_v57 }
 0xbb6   :  { %v10208_v11 = vadd.f32 %v10207_v17, %v10145_v22  ;;  %v19744_v3 = vpop.f32.mrb[58].mxu1  ;;  %v10076_v56 = vadd.f32 %v19734_v2, %v10075_v20 }
 0xbb7   :  { %21684 = vst [vmem:[#allocation88_spill] sm:$0xff] %v19744_v3  ;;  %v19747_v58 = vpop.f32.mrb[59].mxu1  ;;  %v10148_v1 = vmul.f32 %v19744_v3, %v19744_v3 }
 0xbb8   :  { %21685 = vst [vmem:[#allocation89_spill] sm:$0xff] %v19747_v58  ;;  %v10077_v63 = vadd.f32 %v10076_v56, %v19747_v58  ;;  %v10147_v46 = vmul.f32 %v19747_v58, %v19747_v58  ;;  %v10209_v52 = vadd.f32 %v10208_v11, %v10146_v54 }
 0xbba   :  { %v10210_v57 = vadd.f32 %v10209_v52, %v10147_v46  ;;  %v19754_v19 = vpop.f32.mrb[60].mxu1  ;;  %v10078_v22 = vadd.f32 %v19744_v3, %v10077_v63 }
 0xbbb   :  { %21686 = vst [vmem:[#allocation90_spill] sm:$0xff] %v19754_v19  ;;  %v19757_v17 = vpop.f32.mrb[61].mxu1  ;;  %v10150_v58 = vmul.f32 %v19754_v19, %v19754_v19 }
 0xbbc   :  { %21687 = vst [vmem:[#allocation91_spill] sm:$0xff] %v19757_v17  ;;  %v10079_v20 = vadd.f32 %v10078_v22, %v19757_v17  ;;  %v10149_v2 = vmul.f32 %v19757_v17, %v19757_v17  ;;  %v10211_v56 = vadd.f32 %v10210_v57, %v10148_v1 }
 0xbbe   :  { %v10212_v54 = vadd.f32 %v10211_v56, %v10149_v2  ;;  %v19764_v11 = vpop.f32.mrb[62].mxu1  ;;  %v10080_v46 = vadd.f32 %v19754_v19, %v10079_v20 }
 0xbbf   :  { %v19767_v52 = vpop.f32.mrb[63].mxu1  ;;  %v10152_v17 = vmul.f32 %v19764_v11, %v19764_v11 }
 0xbc0   :  { %v10081_v63 = vadd.f32 %v10080_v46, %v19767_v52  ;;  %v10151_v3 = vmul.f32 %v19767_v52, %v19767_v52  ;;  %v10213_v22 = vadd.f32 %v10212_v54, %v10150_v58 }
 0xbc2   :  { %v10082_v1 = vadd.f32 %v19764_v11, %v10081_v63  ;;  %v10214_v57 = vadd.f32 %v10213_v22, %v10151_v3  ;;  %v21706_v3 = vld [vmem:[#allocation88_spill] sm:$0xff] }
 0xbc4   :  { %v10083_v59 = vrot.slane %v10082_v1, 4  ;;  %v10215_v2 = vadd.f32 %v10214_v57, %v10152_v17 }
 0xbc6   :  { %v10084_v56 = vadd.f32 %v10083_v59, %v10082_v1  ;;  %v10216_v25 = vrot.slane %v10215_v2, 4  ;;  %v21705_v59 = vld [vmem:[#allocation89_spill] sm:$0xff] }
 0xbc8   :  { %v10085_v30 = vrot.slane %v10084_v56, 2  ;;  %v10217_v20 = vadd.f32 %v10216_v25, %v10215_v2  ;;  %v19911_v25 = vld [vmem:[#allocation14] ss:$0 sm:$0xff] }
 0xbca   :  { %v10086_v19 = vadd.f32 %v10085_v30, %v10084_v56  ;;  %v10218_v41 = vrot.slane %v10217_v20, 2  ;;  %v21708_v56 = vld [vmem:[#allocation90_spill] sm:$0xff] }
 0xbcc   :  { %v10087_v10 = vrot.slane %v10086_v19, 1  ;;  %v10219_v46 = vadd.f32 %v10218_v41, %v10217_v20  ;;  %v21688_v20 = vld [vmem:[#allocation81_spill] sm:$0xff]  ;;  %v10018_v41 = vld [vmem:[#allocation12] sm:$0x1] }
 0xbce   :  { %v10088_v12 = vadd.f32 %v10087_v10, %v10086_v19  ;;  %v10220_v40 = vrot.slane %v10219_v46, 1 }
 0xbd0   :  { %v10221_v14 = vadd.f32 %v10220_v40, %v10219_v46  ;;  %v19775_v58 = vmul.f32 0.001953125, %v10088_v12  ;;  %v21689_v46 = vld [vmem:[#allocation83_spill] sm:$0xff]  ;;  %v21709_v12 = vld [vmem:[#allocation52_spill] sm:$0xff] }
 0xbd2   :  { %v10223_v54 = vmul.f32 0.001953125, %v10221_v14  ;;  %v10224_v63 = vmul.f32 %v19775_v58, %v19775_v58  ;;  %v21710_v14 = vsub.s32 0, %v21709_v12  ;;  %v21711_v17 = vsub.f32 %v19767_v52, %v19775_v58 }
 0xbd3   :  { %v21712_v30 = vsub.f32 %v19459_v27, %v19775_v58  ;;  %v21715_v52 = vsub.f32 %v19465_v36, %v19775_v58 }
 0xbd4   :  { %v10225_v40 = vsub.f32 %v10223_v54, %v10224_v63  ;;  %v21690_v54 = vld [vmem:[#allocation82_spill] sm:$0xff]  ;;  %v21691_v63 = vld [vmem:[#allocation85_spill] sm:$0xff] }
 0xbd6   :  { %v10226_v2 = vadd.f32 1e-05, %v10225_v40 }
 0xbd8   :  { %16002 = vrsqrt.f32 %v10226_v2  ;;  %v21707_v2 = vld [vmem:[#allocation91_spill] sm:$0xff] }
 0xbe2   :  { %v16003_v1 = vpop.eup %16002 }
 0xbe3   :  { %v10228_v40 = vmul.f32 %v16003_v1, %v10018_v41  ;;  %v21713_v41 = vsub.f32 %v19455_v39, %v19775_v58 }
 0xbe5   :  { %v19909_v22 = vrot.slane %v10228_v40, %v21710_v14  ;;  %v21714_v14 = vsub.f32 %v19467_v50, %v19775_v58  ;;  %v21718_v40 = vsub.f32 %v19487_v45, %v19775_v58  ;;  %v21721_v45 = vsub.f32 %v19494_v6, %v19775_v58 }
 0xbe7   :  { %v10359_v19 = vmul.f32 %v19909_v22, %v21711_v17  ;;  %v19921_v10 = vmul.f32 %v19909_v22, %v21712_v30  ;;  %v19927_v12 = vmul.f32 %v19909_v22, %v21713_v41  ;;  %v19933_v1 = vmul.f32 %v19909_v22, %v21714_v14 }
 0xbe8   :  { %v19939_v27 = vmul.f32 %v19909_v22, %v21715_v52  ;;  %v21716_v30 = vsub.f32 %v19477_v21, %v19775_v58  ;;  %v21717_v17 = vsub.f32 %v19475_v60, %v19775_v58  ;;  %v19957_v36 = vmul.f32 %v19909_v22, %v21718_v40 }
 0xbe9   :  { %v10429_v41 = vadd.f32 %v19911_v25, %v10359_v19  ;;  %v21719_v21 = vsub.f32 %v19484_v24, %v19775_v58  ;;  %v21720_v60 = vsub.f32 %v19497_v34, %v19775_v58  ;;  %v21722_v19 = vsub.f32 %v19507_v9, %v19775_v58 }
 0xbea   :  { %v19945_v39 = vmul.f32 %v19909_v22, %v21716_v30  ;;  %v19951_v50 = vmul.f32 %v19909_v22, %v21717_v17  ;;  %v19976_v30 = vmul.f32 %v19909_v22, %v21721_v45  ;;  %v21723_v17 = vsub.f32 %v19504_v18, %v19775_v58 }
 0xbeb   :  { %v19964_v14 = vmul.f32 %v19909_v22, %v21719_v21  ;;  %v19970_v52 = vmul.f32 %v19909_v22, %v21720_v60  ;;  %v19982_v24 = vmul.f32 %v19909_v22, %v21722_v19  ;;  %v21724_v40 = vsub.f32 %v19517_v31, %v19775_v58 }
 0xbec   :  { %v19988_v34 = vmul.f32 %v19909_v22, %v21723_v17  ;;  %v21725_v21 = vsub.f32 %v19514_v5, %v19775_v58  ;;  %v10493_v60 = vmax.f32 %v10429_v41, 0.0  ;;  %v21726_v45 = vsub.f32 %v19527_v61, %v19775_v58 }
 0xbed   :  { %v19994_v6 = vmul.f32 %v19909_v22, %v21724_v40  ;;  %v21727_v19 = vsub.f32 %v19524_v0, %v19775_v58  ;;  %v21728_v17 = vsub.f32 %v19537_v28, %v19775_v58  ;;  %v21729_v41 = vsub.f32 %v19534_v13, %v19775_v58 }
 0xbee   :  { %v20000_v9 = vmul.f32 %v19909_v22, %v21725_v21  ;;  %v20006_v18 = vmul.f32 %v19909_v22, %v21726_v45  ;;  %v21730_v40 = vsub.f32 %v19547_v16, %v19775_v58  ;;  %v21731_v21 = vsub.f32 %v19544_v7, %v19775_v58 }
 0xbef   :  { %v20012_v31 = vmul.f32 %v19909_v22, %v21727_v19  ;;  %v20018_v5 = vmul.f32 %v19909_v22, %v21728_v17  ;;  %v20024_v61 = vmul.f32 %v19909_v22, %v21729_v41  ;;  %v21732_v45 = vsub.f32 %v19557_v29, %v19775_v58  ;;  %v16006_v19 = vld [vmem:[#allocation3 + $0x331] sm:$0xff] }
 0xbf0   :  { %v20030_v0 = vmul.f32 %v19909_v22, %v21730_v40  ;;  %v20036_v28 = vmul.f32 %v19909_v22, %v21731_v21  ;;  %v10557_v17 = vadd.f32 %v16006_v19, %v10493_v60  ;;  %v21733_v16 = vsub.f32 %v19554_v38, %v19775_v58 }
 0xbf1   :  { %v20042_v13 = vmul.f32 %v19909_v22, %v21732_v45  ;;  %v21734_v7 = vsub.f32 %v19567_v33, %v19775_v58  ;;  %v21735_v29 = vsub.f32 %v19564_v62, %v19775_v58  ;;  %v21736_v60 = vsub.f32 %v19577_v15, %v19775_v58 }
 0xbf2   :  { %v20048_v41 = vmul.f32 %v19909_v22, %v21733_v16  ;;  %v21737_v45 = vsub.f32 %v19574_v26, %v19775_v58  ;;  %v21738_v19 = vsub.f32 %v19587_v42, %v19775_v58  ;;  %v21739_v16 = vsub.f32 %v19584_v51, %v19775_v58  ;;  %10621 = vst [vmem:[#allocation15 + $0x1f0] sm:$0xff] %v10557_v17 }
 0xbf3   :  { %v20054_v40 = vmul.f32 %v19909_v22, %v21734_v7  ;;  %v20060_v21 = vmul.f32 %v19909_v22, %v21735_v29  ;;  %v20066_v38 = vmul.f32 %v19909_v22, %v21736_v60  ;;  %v21740_v7 = vsub.f32 %v19597_v44, %v19775_v58 }
 0xbf4   :  { %v20072_v33 = vmul.f32 %v19909_v22, %v21737_v45  ;;  %v20078_v62 = vmul.f32 %v19909_v22, %v21738_v19  ;;  %v20084_v15 = vmul.f32 %v19909_v22, %v21739_v16  ;;  %v21741_v29 = vsub.f32 %v19594_v32, %v19775_v58 }
 0xbf5   :  { %v20090_v26 = vmul.f32 %v19909_v22, %v21740_v7  ;;  %v21742_v60 = vsub.f32 %v19607_v48, %v19775_v58  ;;  %v21743_v17 = vsub.f32 %v19604_v53, %v19775_v58  ;;  %v21744_v45 = vsub.f32 %v19617_v55, %v19775_v58 }
 0xbf6   :  { %v20096_v42 = vmul.f32 %v19909_v22, %v21741_v29  ;;  %v21745_v19 = vsub.f32 %v19614_v35, %v19775_v58  ;;  %v21746_v16 = vsub.f32 %v19627_v43, %v19775_v58  ;;  %v21747_v7 = vsub.f32 %v19624_v23, %v19775_v58 }
 0xbf7   :  { %v20102_v51 = vmul.f32 %v19909_v22, %v21742_v60  ;;  %v20108_v44 = vmul.f32 %v19909_v22, %v21743_v17  ;;  %v20114_v32 = vmul.f32 %v19909_v22, %v21744_v45  ;;  %v21748_v29 = vsub.f32 %v19637_v47, %v19775_v58 }
 0xbf8   :  { %v20120_v48 = vmul.f32 %v19909_v22, %v21745_v19  ;;  %v20126_v53 = vmul.f32 %v19909_v22, %v21746_v16  ;;  %v20132_v55 = vmul.f32 %v19909_v22, %v21747_v7  ;;  %v21749_v60 = vsub.f32 %v19634_v4, %v19775_v58 }
 0xbf9   :  { %v20138_v35 = vmul.f32 %v19909_v22, %v21748_v29  ;;  %v21750_v17 = vsub.f32 %v19647_v37, %v19775_v58  ;;  %v21751_v45 = vsub.f32 %v19644_v8, %v19775_v58  ;;  %v21752_v19 = vsub.f32 %v19657_v49, %v19775_v58 }
 0xbfa   :  { %v20144_v43 = vmul.f32 %v19909_v22, %v21749_v60  ;;  %v21753_v16 = vsub.f32 %v21688_v20, %v19775_v58  ;;  %v21754_v7 = vsub.f32 %v21689_v46, %v19775_v58  ;;  %v21755_v29 = vsub.f32 %v21690_v54, %v19775_v58 }
 0xbfb   :  { %v20150_v23 = vmul.f32 %v19909_v22, %v21750_v17  ;;  %v20156_v47 = vmul.f32 %v19909_v22, %v21751_v45  ;;  %v20162_v4 = vmul.f32 %v19909_v22, %v21752_v19  ;;  %v21756_v60 = vsub.f32 %v21691_v63, %v19775_v58  ;;  %v21757_v17 = vld [vmem:[#allocation84_spill] sm:$0xff]  ;;  %v21760_v19 = vld [vmem:[#allocation22_spill] sm:$0xff] }
 0xbfc   :  { %v20168_v37 = vmul.f32 %v19909_v22, %v21753_v16  ;;  %v20174_v8 = vmul.f32 %v19909_v22, %v21754_v7  ;;  %v20180_v49 = vmul.f32 %v19909_v22, %v21755_v29  ;;  %v21758_v45 = vsub.f32 %v21757_v17, %v19775_v58  ;;  %v21763_v7 = vld [vmem:[#allocation21_spill] sm:$0xff] }
 0xbfd   :  { %v20186_v20 = vmul.f32 %v19909_v22, %v21756_v60  ;;  %v21761_v16 = vsub.f32 %v21760_v19, %v19775_v58  ;;  %v21764_v29 = vsub.f32 %v21763_v7, %v19775_v58  ;;  %v21766_v60 = vld [vmem:[#allocation24_spill] sm:$0xff] }
 0xbfe   :  { %v20192_v46 = vmul.f32 %v19909_v22, %v21758_v45  ;;  %v21767_v57 = vsub.f32 %v21766_v60, %v19775_v58  ;;  %v21769_v45 = vld [vmem:[#allocation23_spill] sm:$0xff] }
 0xbff   :  { %v20198_v54 = vmul.f32 %v19909_v22, %v21761_v16  ;;  %v20204_v63 = vmul.f32 %v19909_v22, %v21764_v29  ;;  %v21772_v16 = vld [vmem:[#allocation26_spill] sm:$0xff]  ;;  %v21775_v29 = vld [vmem:[#allocation25_spill] sm:$0xff] }
 0xc00   :  { %21759 = vst [vmem:[#allocation92_spill] sm:$0xff] %v20192_v46  ;;  %v20210_v17 = vmul.f32 %v19909_v22, %v21767_v57  ;;  %v21770_v46 = vsub.f32 %v21769_v45, %v19775_v58  ;;  %v21778_v57 = vld [vmem:[#allocation28_spill] sm:$0xff] }
 0xc01   :  { %21762 = vst [vmem:[#allocation93_spill] sm:$0xff] %v20198_v54  ;;  %21765 = vst [vmem:[#allocation94_spill] sm:$0xff] %v20204_v63  ;;  %v21773_v54 = vsub.f32 %v21772_v16, %v19775_v58  ;;  %v21776_v63 = vsub.f32 %v21775_v29, %v19775_v58 }
 0xc02   :  { %21768 = vst [vmem:[#allocation95_spill] sm:$0xff] %v20210_v17  ;;  %v20216_v19 = vmul.f32 %v19909_v22, %v21770_v46  ;;  %v21779_v17 = vsub.f32 %v21778_v57, %v19775_v58  ;;  %v21781_v46 = vld [vmem:[#allocation27_spill] sm:$0xff] }
 0xc03   :  { %v20222_v7 = vmul.f32 %v19909_v22, %v21773_v54  ;;  %v20228_v60 = vmul.f32 %v19909_v22, %v21776_v63  ;;  %v21784_v54 = vld [vmem:[#allocation30_spill] sm:$0xff]  ;;  %v21786_v63 = vld [vmem:[#allocation29_spill] sm:$0xff] }
 0xc04   :  { %21771 = vst [vmem:[#allocation96_spill] sm:$0xff] %v20216_v19  ;;  %v20234_v45 = vmul.f32 %v19909_v22, %v21779_v17  ;;  %v21782_v19 = vsub.f32 %v21781_v46, %v19775_v58  ;;  %v21788_v17 = vld [vmem:[#allocation87_spill] sm:$0xff] }
 0xc05   :  { %21774 = vst [vmem:[#allocation31_spill] sm:$0xff] %v20222_v7  ;;  %21777 = vst [vmem:[#allocation44_spill] sm:$0xff] %v20228_v60  ;;  %v21785_v7 = vsub.f32 %v21784_v54, %v19775_v58  ;;  %v21787_v60 = vsub.f32 %v21786_v63, %v19775_v58 }
 0xc06   :  { %21780 = vst [vmem:[#allocation49_spill] sm:$0xff] %v20234_v45  ;;  %v20240_v16 = vmul.f32 %v19909_v22, %v21782_v19  ;;  %v21789_v45 = vsub.f32 %v21788_v17, %v19775_v58  ;;  %v21790_v19 = vld [vmem:[#allocation86_spill] sm:$0xff] }
 0xc07   :  { %v20246_v29 = vmul.f32 %v19909_v22, %v21785_v7  ;;  %v20252_v57 = vmul.f32 %v19909_v22, %v21787_v60  ;;  %v21792_v7 = vsub.f32 %v21705_v59, %v19775_v58  ;;  %v21793_v60 = vsub.f32 %v21706_v3, %v19775_v58 }
 0xc08   :  { %21783 = vst [vmem:[#allocation48_spill] sm:$0xff] %v20240_v16  ;;  %v20258_v46 = vmul.f32 %v19909_v22, %v21789_v45  ;;  %v21791_v16 = vsub.f32 %v21790_v19, %v19775_v58  ;;  %v21794_v45 = vsub.f32 %v21707_v2, %v19775_v58  ;;  %v20302_v2 = vadd.f32 %v19911_v25, %v19927_v12 }
 0xc09   :  { %v20270_v63 = vmul.f32 %v19909_v22, %v21792_v7  ;;  %v20276_v17 = vmul.f32 %v19909_v22, %v21793_v60  ;;  %v21796_v7 = vsub.f32 %v19764_v11, %v19775_v58  ;;  %v20298_v60 = vadd.f32 %v19911_v25, %v19921_v10 }
 0xc0a   :  { %v20264_v54 = vmul.f32 %v19909_v22, %v21791_v16  ;;  %v20282_v19 = vmul.f32 %v19909_v22, %v21794_v45  ;;  %v21795_v16 = vsub.f32 %v21708_v56, %v19775_v58  ;;  %v20306_v56 = vadd.f32 %v19911_v25, %v19933_v1 }
 0xc0b   :  { %v20294_v3 = vmul.f32 %v19909_v22, %v21796_v7  ;;  %v20310_v45 = vadd.f32 %v19911_v25, %v19939_v27  ;;  %v20314_v11 = vadd.f32 %v19911_v25, %v19945_v39  ;;  %v20318_v58 = vadd.f32 %v19911_v25, %v19951_v50  ;;  %v21809_v7 = vld [vmem:[#allocation95_spill] sm:$0xff] }
 0xc0c   :  { %v20288_v59 = vmul.f32 %v19909_v22, %v21795_v16  ;;  %v20322_v10 = vadd.f32 %v19911_v25, %v19957_v36  ;;  %v20326_v22 = vadd.f32 %v19911_v25, %v19964_v14  ;;  %v20330_v12 = vadd.f32 %v19911_v25, %v19970_v52  ;;  %v21807_v16 = vld [vmem:[#allocation94_spill] sm:$0xff] }
 0xc0d   :  { %v20334_v1 = vadd.f32 %v19911_v25, %v19976_v30  ;;  %v20338_v27 = vadd.f32 %v19911_v25, %v19982_v24  ;;  %v20342_v39 = vadd.f32 %v19911_v25, %v19988_v34  ;;  %v20346_v50 = vadd.f32 %v19911_v25, %v19994_v6 }
 0xc0e   :  { %v20350_v36 = vadd.f32 %v19911_v25, %v20000_v9  ;;  %v20354_v14 = vadd.f32 %v19911_v25, %v20006_v18  ;;  %v20358_v52 = vadd.f32 %v19911_v25, %v20012_v31  ;;  %v20362_v30 = vadd.f32 %v19911_v25, %v20018_v5 }
 0xc0f   :  { %v20366_v24 = vadd.f32 %v19911_v25, %v20024_v61  ;;  %v20370_v34 = vadd.f32 %v19911_v25, %v20030_v0  ;;  %v20374_v6 = vadd.f32 %v19911_v25, %v20036_v28  ;;  %v20378_v9 = vadd.f32 %v19911_v25, %v20042_v13 }
 0xc10   :  { %v20382_v18 = vadd.f32 %v19911_v25, %v20048_v41  ;;  %v20386_v31 = vadd.f32 %v19911_v25, %v20054_v40  ;;  %v20390_v5 = vadd.f32 %v19911_v25, %v20060_v21  ;;  %v20394_v61 = vadd.f32 %v19911_v25, %v20066_v38 }
 0xc11   :  { %v20398_v0 = vadd.f32 %v19911_v25, %v20072_v33  ;;  %v20402_v28 = vadd.f32 %v19911_v25, %v20078_v62  ;;  %v20406_v13 = vadd.f32 %v19911_v25, %v20084_v15  ;;  %v20410_v41 = vadd.f32 %v19911_v25, %v20090_v26 }
 0xc12   :  { %v20414_v40 = vadd.f32 %v19911_v25, %v20096_v42  ;;  %v20418_v21 = vadd.f32 %v19911_v25, %v20102_v51  ;;  %v20422_v38 = vadd.f32 %v19911_v25, %v20108_v44  ;;  %v20426_v33 = vadd.f32 %v19911_v25, %v20114_v32 }
 0xc13   :  { %v20430_v62 = vadd.f32 %v19911_v25, %v20120_v48  ;;  %v20434_v15 = vadd.f32 %v19911_v25, %v20126_v53  ;;  %v20438_v26 = vadd.f32 %v19911_v25, %v20132_v55  ;;  %v20442_v42 = vadd.f32 %v19911_v25, %v20138_v35 }
 0xc14   :  { %v20446_v51 = vadd.f32 %v19911_v25, %v20144_v43  ;;  %v20450_v44 = vadd.f32 %v19911_v25, %v20150_v23  ;;  %v20454_v32 = vadd.f32 %v19911_v25, %v20156_v47  ;;  %v20458_v48 = vadd.f32 %v19911_v25, %v20162_v4  ;;  %v21803_v23 = vld [vmem:[#allocation92_spill] sm:$0xff]  ;;  %v21805_v4 = vld [vmem:[#allocation93_spill] sm:$0xff] }
 0xc15   :  { %21797 = vst [vmem:[#allocation51_spill] sm:$0xff] %v20430_v62  ;;  %21798 = vst [vmem:[#allocation50_spill] sm:$0xff] %v20434_v15  ;;  %v20462_v53 = vadd.f32 %v19911_v25, %v20168_v37  ;;  %v20466_v55 = vadd.f32 %v19911_v25, %v20174_v8  ;;  %v20470_v35 = vadd.f32 %v19911_v25, %v20180_v49 }
 0xc16   :  { %21799 = vst [vmem:[#allocation33_spill] sm:$0xff] %v20438_v26  ;;  %21800 = vst [vmem:[#allocation32_spill] sm:$0xff] %v20442_v42  ;;  %v20474_v43 = vadd.f32 %v19911_v25, %v20186_v20  ;;  %v20478_v47 = vadd.f32 %v19911_v25, %v21803_v23  ;;  %v20482_v37 = vadd.f32 %v19911_v25, %v21805_v4  ;;  %v16010_v42 = vld [vmem:[#allocation3 + $0x39] sm:$0xff] }
 0xc17   :  { %21801 = vst [vmem:[#allocation35_spill] sm:$0xff] %v20470_v35  ;;  %v20486_v8 = vadd.f32 %v19911_v25, %v21807_v16  ;;  %v20490_v49 = vadd.f32 %v19911_v25, %v21809_v7  ;;  %v21811_v35 = vld [vmem:[#allocation96_spill] sm:$0xff] }
 0xc18   :  { %21802 = vst [vmem:[#allocation34_spill] sm:$0xff] %v20474_v43  ;;  %21804 = vst [vmem:[#allocation37_spill] sm:$0xff] %v20478_v47  ;;  %v20494_v20 = vadd.f32 %v19911_v25, %v21811_v35  ;;  %v21813_v43 = vld [vmem:[#allocation31_spill] sm:$0xff]  ;;  %v21815_v47 = vld [vmem:[#allocation44_spill] sm:$0xff]  ;;  %v20514_v35 = vadd.f32 %v19911_v25, %v20246_v29  ;;  %v20534_v29 = vadd.f32 %v19911_v25, %v20276_v17  ;;  %v21837_v17 = vmax.f32 %v20298_v60, 0.0 }
 0xc19   :  { %21806 = vst [vmem:[#allocation36_spill] sm:$0xff] %v20482_v37  ;;  %21808 = vst [vmem:[#allocation39_spill] sm:$0xff] %v20486_v8  ;;  %v20498_v23 = vadd.f32 %v19911_v25, %v21813_v43  ;;  %v20502_v4 = vadd.f32 %v19911_v25, %v21815_v47  ;;  %v21816_v37 = vld [vmem:[#allocation49_spill] sm:$0xff]  ;;  %v21818_v8 = vld [vmem:[#allocation48_spill] sm:$0xff]  ;;  %v20518_v43 = vadd.f32 %v19911_v25, %v20252_v57  ;;  %v21842_v60 = vmax.f32 %v20318_v58, 0.0 }
 0xc1a   :  { %21810 = vst [vmem:[#allocation38_spill] sm:$0xff] %v20490_v49  ;;  %21812 = vst [vmem:[#allocation41_spill] sm:$0xff] %v20494_v20  ;;  %v20506_v16 = vadd.f32 %v19911_v25, %v21816_v37  ;;  %v20510_v7 = vadd.f32 %v19911_v25, %v21818_v8  ;;  %v20522_v47 = vadd.f32 %v19911_v25, %v20258_v46  ;;  %v21834_v49 = vmov %v20534_v29  ;;  %v16011_v20 = vld [vmem:[#allocation3 + $0x49] sm:$0xff] }
 0xc1b   :  { %21814 = vst [vmem:[#allocation40_spill] sm:$0xff] %v20498_v23  ;;  %21819 = vst [vmem:[#allocation42_spill] sm:$0xff] %v20514_v35  ;;  %v20526_v37 = vadd.f32 %v19911_v25, %v20264_v54  ;;  %v20530_v8 = vadd.f32 %v19911_v25, %v20270_v63  ;;  %v20538_v57 = vadd.f32 %v19911_v25, %v20282_v19  ;;  %v16008_v35 = vld [vmem:[#allocation3 + $0x21] sm:$0xff]  ;;  %v21838_v19 = vmax.f32 %v20302_v2, 0.0 }
 0xc1c   :  { %21817 = vst [vmem:[#allocation43_spill] sm:$0xff] %v20506_v16  ;;  %21820 = vst [vmem:[#allocation45_spill] sm:$0xff] %v20522_v47  ;;  %v20542_v46 = vadd.f32 %v19911_v25, %v20288_v59  ;;  %v20546_v54 = vadd.f32 %v19911_v25, %v20294_v3  ;;  %v16007_v16 = vld [vmem:[#allocation3 + $0x19] sm:$0xff]  ;;  %v16009_v47 = vld [vmem:[#allocation3 + $0x31] sm:$0xff]  ;;  %v21839_v59 = vmax.f32 %v20306_v56, 0.0  ;;  %v21840_v25 = vmax.f32 %v20310_v45, 0.0 }
 0xc1d   :  { %21821 = vst [vmem:[#allocation47_spill] sm:$0xff] %v20526_v37  ;;  %21822 = vst [vmem:[#allocation46_spill] sm:$0xff] %v20530_v8  ;;  %v21841_v63 = vmax.f32 %v20314_v11, 0.0  ;;  %v21843_v2 = vmax.f32 %v20322_v10, 0.0  ;;  %v21844_v56 = vmax.f32 %v20326_v22, 0.0  ;;  %v21845_v45 = vmax.f32 %v20330_v12, 0.0 }
 0xc1e   :  { %21823 = vst [vmem:[#allocation53_spill] sm:$0xff] %v20534_v29  ;;  %21824 = vst [vmem:[#allocation54_spill] sm:$0xff] %v20538_v57  ;;  %v21827_v37 = vld [vmem:[#allocation35_spill] sm:$0xff]  ;;  %v21836_v23 = vmov %v20542_v46  ;;  %v10495_v29 = vadd.f32 %v16007_v16, %v21837_v17  ;;  %v10496_v57 = vadd.f32 %v16008_v35, %v21838_v19  ;;  %v10498_v3 = vadd.f32 %v16010_v42, %v21840_v25  ;;  %v16013_v17 = vld [vmem:[#allocation3 + $0x61] sm:$0xff] }
 0xc1f   :  { %21825 = vst [vmem:[#allocation55_spill] sm:$0xff] %v20542_v46  ;;  %21826 = vst [vmem:[#allocation56_spill] sm:$0xff] %v20546_v54  ;;  %v21828_v62 = vld [vmem:[#allocation34_spill] sm:$0xff]  ;;  %v21829_v15 = vld [vmem:[#allocation37_spill] sm:$0xff]  ;;  %v10497_v46 = vadd.f32 %v16009_v47, %v21839_v59  ;;  %v10499_v8 = vadd.f32 %v16011_v20, %v21841_v63  ;;  %v10501_v35 = vadd.f32 %v16013_v17, %v21843_v2  ;;  %v21846_v11 = vmax.f32 %v20334_v1, 0.0 }
 0xc20   :  { %v16012_v54 = vld [vmem:[#allocation3 + $0x51] sm:$0xff]  ;;  %v16014_v19 = vld [vmem:[#allocation3 + $0x69] sm:$0xff]  ;;  %v16015_v59 = vld [vmem:[#allocation3 + $0x79] sm:$0xff]  ;;  %v21847_v58 = vmax.f32 %v20338_v27, 0.0  ;;  %10559 = vst [vmem:[#allocation15] sm:$0xff] %v10495_v29  ;;  %v21849_v2 = vmax.f32 %v20346_v50, 0.0 }
 0xc21   :  { %v10500_v16 = vadd.f32 %v16012_v54, %v21842_v60  ;;  %v10502_v47 = vadd.f32 %v16014_v19, %v21844_v56  ;;  %v10503_v42 = vadd.f32 %v16015_v59, %v21845_v45  ;;  %v16016_v25 = vld [vmem:[#allocation3 + $0x81] sm:$0xff]  ;;  %v16017_v63 = vld [vmem:[#allocation3 + $0x91] sm:$0xff]  ;;  %10560 = vst [vmem:[#allocation15 + $0x8] sm:$0xff] %v10496_v57  ;;  %10561 = vst [vmem:[#allocation15 + $0x10] sm:$0xff] %v10497_v46  ;;  %v21848_v60 = vmax.f32 %v20342_v39, 0.0 }
 0xc22   :  { %v10504_v20 = vadd.f32 %v16016_v25, %v21846_v11  ;;  %v10505_v54 = vadd.f32 %v16017_v63, %v21847_v58  ;;  %v16018_v10 = vld [vmem:[#allocation3 + $0x99] sm:$0xff]  ;;  %v16019_v17 = vld [vmem:[#allocation3 + $0xa9] sm:$0xff]  ;;  %v16020_v19 = vld [vmem:[#allocation3 + $0xb1] sm:$0xff]  ;;  %v21850_v56 = vmax.f32 %v20350_v36, 0.0  ;;  %v21851_v45 = vmax.f32 %v20354_v14, 0.0  ;;  %10562 = vst [vmem:[#allocation15 + $0x18] sm:$0xff] %v10498_v3 }
 0xc23   :  { %v10506_v22 = vadd.f32 %v16018_v10, %v21848_v60  ;;  %v10507_v12 = vadd.f32 %v16019_v17, %v21849_v2  ;;  %v16021_v59 = vld [vmem:[#allocation3 + $0xc1] sm:$0xff]  ;;  %10563 = vst [vmem:[#allocation15 + $0x20] sm:$0xff] %v10499_v8  ;;  %10564 = vst [vmem:[#allocation15 + $0x28] sm:$0xff] %v10500_v16  ;;  %v16022_v29 = vld [vmem:[#allocation3 + $0xc9] sm:$0xff]  ;;  %v21852_v39 = vmax.f32 %v20358_v52, 0.0  ;;  %v21853_v50 = vmax.f32 %v20362_v30, 0.0 }
 0xc24   :  { %v21832_v26 = vld [vmem:[#allocation47_spill] sm:$0xff]  ;;  %v10508_v1 = vadd.f32 %v16020_v19, %v21850_v56  ;;  %v10509_v27 = vadd.f32 %v16021_v59, %v21851_v45  ;;  %10565 = vst [vmem:[#allocation15 + $0x30] sm:$0xff] %v10501_v35  ;;  %v16024_v11 = vld [vmem:[#allocation3 + $0xe1] sm:$0xff]  ;;  %v21854_v36 = vmax.f32 %v20366_v24, 0.0  ;;  %v21855_v14 = vmax.f32 %v20370_v34, 0.0  ;;  %10566 = vst [vmem:[#allocation15 + $0x38] sm:$0xff] %v10502_v47 }
 0xc25   :  { %v10510_v57 = vadd.f32 %v16022_v29, %v21852_v39  ;;  %v16023_v46 = vld [vmem:[#allocation3 + $0xd9] sm:$0xff]  ;;  %v16025_v58 = vld [vmem:[#allocation3 + $0xf1] sm:$0xff]  ;;  %10567 = vst [vmem:[#allocation15 + $0x40] sm:$0xff] %v10503_v42  ;;  %10568 = vst [vmem:[#allocation15 + $0x48] sm:$0xff] %v10504_v20  ;;  %v21856_v52 = vmax.f32 %v20374_v6, 0.0  ;;  %v21857_v30 = vmax.f32 %v20378_v9, 0.0 }
 0xc26   :  { %v10511_v25 = vadd.f32 %v16023_v46, %v21853_v50  ;;  %v10512_v63 = vadd.f32 %v16024_v11, %v21854_v36  ;;  %v10513_v10 = vadd.f32 %v16025_v58, %v21855_v14  ;;  %10569 = vst [vmem:[#allocation15 + $0x50] sm:$0xff] %v10505_v54  ;;  %v16026_v8 = vld [vmem:[#allocation3 + $0xf9] sm:$0xff]  ;;  %v16027_v16 = vld [vmem:[#allocation3 + $0x109] sm:$0xff]  ;;  %v16028_v60 = vld [vmem:[#allocation3 + $0x111] sm:$0xff]  ;;  %v21858_v24 = vmax.f32 %v20382_v18, 0.0 }
 0xc27   :  { %v10514_v3 = vadd.f32 %v16026_v8, %v21856_v52  ;;  %v10515_v35 = vadd.f32 %v16027_v16, %v21857_v30  ;;  %v16029_v2 = vld [vmem:[#allocation3 + $0x121] sm:$0xff]  ;;  %v21859_v34 = vmax.f32 %v20386_v31, 0.0  ;;  %10570 = vst [vmem:[#allocation15 + $0x58] sm:$0xff] %v10506_v22  ;;  %10571 = vst [vmem:[#allocation15 + $0x60] sm:$0xff] %v10507_v12  ;;  %v16030_v47 = vld [vmem:[#allocation3 + $0x129] sm:$0xff]  ;;  %v21860_v6 = vmax.f32 %v20390_v5, 0.0 }
 0xc28   :  { %v10516_v17 = vadd.f32 %v16028_v60, %v21858_v24  ;;  %10572 = vst [vmem:[#allocation15 + $0x68] sm:$0xff] %v10508_v1  ;;  %10573 = vst [vmem:[#allocation15 + $0x70] sm:$0xff] %v10509_v27  ;;  %v16031_v20 = vld [vmem:[#allocation3 + $0x139] sm:$0xff]  ;;  %v21861_v9 = vmax.f32 %v20394_v61, 0.0  ;;  %v16032_v56 = vld [vmem:[#allocation3 + $0x141] sm:$0xff]  ;;  %v21862_v18 = vmax.f32 %v20398_v0, 0.0 }
 0xc29   :  { %v10517_v19 = vadd.f32 %v16029_v2, %v21859_v34  ;;  %v10518_v42 = vadd.f32 %v16030_v47, %v21860_v6  ;;  %v16033_v45 = vld [vmem:[#allocation3 + $0x151] sm:$0xff]  ;;  %v21863_v31 = vmax.f32 %v20402_v28, 0.0  ;;  %10574 = vst [vmem:[#allocation15 + $0x78] sm:$0xff] %v10510_v57  ;;  %10575 = vst [vmem:[#allocation15 + $0x80] sm:$0xff] %v10511_v25  ;;  %v16034_v22 = vld [vmem:[#allocation3 + $0x159] sm:$0xff]  ;;  %v21864_v5 = vmax.f32 %v20406_v13, 0.0 }
 0xc2a   :  { %v10519_v54 = vadd.f32 %v16031_v20, %v21861_v9  ;;  %v10520_v59 = vadd.f32 %v16032_v56, %v21862_v18  ;;  %10576 = vst [vmem:[#allocation15 + $0x88] sm:$0xff] %v10512_v63  ;;  %10577 = vst [vmem:[#allocation15 + $0x90] sm:$0xff] %v10513_v10  ;;  %v16035_v1 = vld [vmem:[#allocation3 + $0x169] sm:$0xff]  ;;  %v21865_v61 = vmax.f32 %v20410_v41, 0.0  ;;  %v16036_v39 = vld [vmem:[#allocation3 + $0x171] sm:$0xff]  ;;  %v21866_v0 = vmax.f32 %v20414_v40, 0.0 }
 0xc2b   :  { %v10521_v29 = vadd.f32 %v16033_v45, %v21863_v31  ;;  %v10522_v12 = vadd.f32 %v16034_v22, %v21864_v5  ;;  %v16037_v50 = vld [vmem:[#allocation3 + $0x181] sm:$0xff]  ;;  %v21867_v28 = vmax.f32 %v20418_v21, 0.0  ;;  %10578 = vst [vmem:[#allocation15 + $0x98] sm:$0xff] %v10514_v3  ;;  %10579 = vst [vmem:[#allocation15 + $0xa0] sm:$0xff] %v10515_v35  ;;  %v16038_v57 = vld [vmem:[#allocation3 + $0x189] sm:$0xff]  ;;  %v21868_v13 = vmax.f32 %v20422_v38, 0.0 }
 0xc2c   :  { %v10523_v27 = vadd.f32 %v16035_v1, %v21865_v61  ;;  %v10524_v46 = vadd.f32 %v16036_v39, %v21866_v0  ;;  %10580 = vst [vmem:[#allocation15 + $0xa8] sm:$0xff] %v10516_v17  ;;  %10581 = vst [vmem:[#allocation15 + $0xb0] sm:$0xff] %v10517_v19  ;;  %v16039_v36 = vld [vmem:[#allocation3 + $0x1c9] sm:$0xff]  ;;  %v21869_v41 = vmax.f32 %v20426_v33, 0.0  ;;  %v16040_v58 = vld [vmem:[#allocation3 + $0x1d1] sm:$0xff]  ;;  %v21878_v34 = vmax.f32 %v20446_v51, 0.0 }
 0xc2d   :  { %v10525_v11 = vadd.f32 %v16037_v50, %v21867_v28  ;;  %v10526_v25 = vadd.f32 %v16038_v57, %v21868_v13  ;;  %v21870_v14 = vld [vmem:[#allocation51_spill] sm:$0xff]  ;;  %v16041_v8 = vld [vmem:[#allocation3 + $0x1e1] sm:$0xff]  ;;  %v21872_v52 = vld [vmem:[#allocation50_spill] sm:$0xff]  ;;  %10582 = vst [vmem:[#allocation15 + $0xb8] sm:$0xff] %v10518_v42  ;;  %v21879_v6 = vmax.f32 %v20450_v44, 0.0  ;;  %v21880_v9 = vmax.f32 %v20454_v32, 0.0 }
 0xc2e   :  { %v10527_v63 = vadd.f32 %v16039_v36, %v21869_v41  ;;  %v21871_v40 = vmax.f32 %v21870_v14, 0.0  ;;  %v21873_v21 = vmax.f32 %v21872_v52, 0.0  ;;  %10583 = vst [vmem:[#allocation15 + $0xc0] sm:$0xff] %v10519_v54  ;;  %10584 = vst [vmem:[#allocation15 + $0xc8] sm:$0xff] %v10520_v59  ;;  %v16042_v3 = vld [vmem:[#allocation3 + $0x1e9] sm:$0xff]  ;;  %v16043_v60 = vld [vmem:[#allocation3 + $0x1f9] sm:$0xff] }
 0xc2f   :  { %10585 = vst [vmem:[#allocation15 + $0xd0] sm:$0xff] %v10521_v29  ;;  %v21874_v30 = vld [vmem:[#allocation33_spill] sm:$0xff]  ;;  %v21876_v24 = vld [vmem:[#allocation32_spill] sm:$0xff]  ;;  %v16045_v47 = vld [vmem:[#allocation3 + $0x211] sm:$0xff]  ;;  %v21881_v18 = vmax.f32 %v20458_v48, 0.0  ;;  %v21882_v51 = vmax.f32 %v20462_v53, 0.0 }
 0xc30   :  { %v10528_v10 = vadd.f32 %v16040_v58, %v21871_v40  ;;  %v10529_v16 = vadd.f32 %v16041_v8, %v21873_v21  ;;  %v21875_v38 = vmax.f32 %v21874_v30, 0.0  ;;  %v21877_v33 = vmax.f32 %v21876_v24, 0.0  ;;  %v16044_v2 = vld [vmem:[#allocation3 + $0x201] sm:$0xff]  ;;  %10586 = vst [vmem:[#allocation15 + $0xd8] sm:$0xff] %v10522_v12  ;;  %10587 = vst [vmem:[#allocation15 + $0xe0] sm:$0xff] %v10523_v27  ;;  %v16046_v42 = vld [vmem:[#allocation3 + $0x219] sm:$0xff] }
 0xc31   :  { %v10532_v19 = vadd.f32 %v16044_v2, %v21878_v34  ;;  %v10533_v20 = vadd.f32 %v16045_v47, %v21879_v6  ;;  %10588 = vst [vmem:[#allocation15 + $0xe8] sm:$0xff] %v10524_v46  ;;  %10589 = vst [vmem:[#allocation15 + $0xf0] sm:$0xff] %v10525_v11  ;;  %v10534_v54 = vadd.f32 %v16046_v42, %v21880_v9  ;;  %v16047_v56 = vld [vmem:[#allocation3 + $0x229] sm:$0xff]  ;;  %v16048_v45 = vld [vmem:[#allocation3 + $0x231] sm:$0xff]  ;;  %v21883_v44 = vmax.f32 %v20466_v55, 0.0 }
 0xc32   :  { %v10530_v35 = vadd.f32 %v16042_v3, %v21875_v38  ;;  %v10531_v17 = vadd.f32 %v16043_v60, %v21877_v33  ;;  %v10535_v59 = vadd.f32 %v16047_v56, %v21881_v18  ;;  %v10536_v31 = vadd.f32 %v16048_v45, %v21882_v51  ;;  %v16049_v29 = vld [vmem:[#allocation3 + $0x241] sm:$0xff]  ;;  %10590 = vst [vmem:[#allocation15 + $0xf8] sm:$0xff] %v10526_v25  ;;  %v16050_v5 = vld [vmem:[#allocation3 + $0x249] sm:$0xff]  ;;  %v16051_v1 = vld [vmem:[#allocation3 + $0x259] sm:$0xff] }
 0xc33   :  { %v10537_v22 = vadd.f32 %v16049_v29, %v21883_v44  ;;  %10591 = vst [vmem:[#allocation15 + $0x100] sm:$0xff] %v10527_v63  ;;  %10592 = vst [vmem:[#allocation15 + $0x108] sm:$0xff] %v10528_v10  ;;  %v21884_v32 = vmax.f32 %v21827_v37, 0.0  ;;  %v21885_v48 = vmax.f32 %v21828_v62, 0.0  ;;  %v16052_v27 = vld [vmem:[#allocation3 + $0x261] sm:$0xff]  ;;  %v21886_v53 = vmax.f32 %v21829_v15, 0.0 }
 0xc34   :  { %10593 = vst [vmem:[#allocation15 + $0x110] sm:$0xff] %v10529_v16  ;;  %v16053_v0 = vld [vmem:[#allocation3 + $0x271] sm:$0xff]  ;;  %v21887_v46 = vld [vmem:[#allocation36_spill] sm:$0xff]  ;;  %10594 = vst [vmem:[#allocation15 + $0x118] sm:$0xff] %v10530_v35  ;;  %v21897_v21 = vmax.f32 %v20502_v4, 0.0  ;;  %v21900_v24 = vmax.f32 %v20510_v7, 0.0 }
 0xc35   :  { %v10538_v12 = vadd.f32 %v16050_v5, %v21884_v32  ;;  %v10539_v61 = vadd.f32 %v16051_v1, %v21885_v48  ;;  %v10540_v39 = vadd.f32 %v16052_v27, %v21886_v53  ;;  %v21888_v55 = vmax.f32 %v21887_v46, 0.0  ;;  %10595 = vst [vmem:[#allocation15 + $0x120] sm:$0xff] %v10531_v17  ;;  %10596 = vst [vmem:[#allocation15 + $0x128] sm:$0xff] %v10532_v19  ;;  %v16054_v28 = vld [vmem:[#allocation3 + $0x279] sm:$0xff]  ;;  %v16055_v13 = vld [vmem:[#allocation3 + $0x289] sm:$0xff] }
 0xc36   :  { %10597 = vst [vmem:[#allocation15 + $0x130] sm:$0xff] %v10533_v20  ;;  %v21889_v11 = vld [vmem:[#allocation39_spill] sm:$0xff]  ;;  %v21891_v25 = vld [vmem:[#allocation38_spill] sm:$0xff]  ;;  %v21893_v63 = vld [vmem:[#allocation41_spill] sm:$0xff]  ;;  %v21903_v4 = vmax.f32 %v20518_v43, 0.0  ;;  %v21906_v7 = vmax.f32 %v21832_v26, 0.0 }
 0xc37   :  { %v10541_v50 = vadd.f32 %v16053_v0, %v21888_v55  ;;  %v21890_v37 = vmax.f32 %v21889_v11, 0.0  ;;  %v21892_v62 = vmax.f32 %v21891_v25, 0.0  ;;  %v16056_v41 = vld [vmem:[#allocation3 + $0x291] sm:$0xff]  ;;  %v21894_v15 = vmax.f32 %v21893_v63, 0.0  ;;  %v16057_v14 = vld [vmem:[#allocation3 + $0x2a1] sm:$0xff]  ;;  %10598 = vst [vmem:[#allocation15 + $0x138] sm:$0xff] %v10534_v54 }
 0xc38   :  { %v21895_v40 = vld [vmem:[#allocation40_spill] sm:$0xff]  ;;  %10599 = vst [vmem:[#allocation15 + $0x140] sm:$0xff] %v10535_v59  ;;  %10600 = vst [vmem:[#allocation15 + $0x148] sm:$0xff] %v10536_v31  ;;  %v16058_v52 = vld [vmem:[#allocation3 + $0x2a9] sm:$0xff]  ;;  %v21909_v43 = vmax.f32 %v21834_v49, 0.0  ;;  %v21912_v26 = vmax.f32 %v21836_v23, 0.0 }
 0xc39   :  { %v10542_v57 = vadd.f32 %v16054_v28, %v21890_v37  ;;  %v10543_v36 = vadd.f32 %v16055_v13, %v21892_v62  ;;  %v10544_v58 = vadd.f32 %v16056_v41, %v21894_v15  ;;  %v21896_v10 = vmax.f32 %v21895_v40, 0.0  ;;  %10601 = vst [vmem:[#allocation15 + $0x150] sm:$0xff] %v10537_v22  ;;  %v16059_v3 = vld [vmem:[#allocation3 + $0x2b9] sm:$0xff]  ;;  %v16060_v60 = vld [vmem:[#allocation3 + $0x2c1] sm:$0xff]  ;;  %v16061_v17 = vld [vmem:[#allocation3 + $0x2d1] sm:$0xff] }
 0xc3a   :  { %v10546_v16 = vadd.f32 %v16058_v52, %v21897_v21  ;;  %v21898_v30 = vld [vmem:[#allocation43_spill] sm:$0xff]  ;;  %v10548_v33 = vadd.f32 %v16060_v60, %v21900_v24  ;;  %v21901_v2 = vld [vmem:[#allocation42_spill] sm:$0xff]  ;;  %10602 = vst [vmem:[#allocation15 + $0x158] sm:$0xff] %v10538_v12  ;;  %10603 = vst [vmem:[#allocation15 + $0x160] sm:$0xff] %v10539_v61 }
 0xc3b   :  { %v10545_v8 = vadd.f32 %v16057_v14, %v21896_v10  ;;  %v21899_v38 = vmax.f32 %v21898_v30, 0.0  ;;  %v21902_v34 = vmax.f32 %v21901_v2, 0.0  ;;  %10604 = vst [vmem:[#allocation15 + $0x168] sm:$0xff] %v10540_v39  ;;  %10605 = vst [vmem:[#allocation15 + $0x170] sm:$0xff] %v10541_v50  ;;  %v16062_v47 = vld [vmem:[#allocation3 + $0x2d9] sm:$0xff]  ;;  %v16063_v20 = vld [vmem:[#allocation3 + $0x2e9] sm:$0xff] }
 0xc3c   :  { %v10550_v6 = vadd.f32 %v16062_v47, %v21903_v4  ;;  %v21904_v42 = vld [vmem:[#allocation45_spill] sm:$0xff]  ;;  %v16064_v56 = vld [vmem:[#allocation3 + $0x2f1] sm:$0xff]  ;;  %10606 = vst [vmem:[#allocation15 + $0x178] sm:$0xff] %v10542_v57  ;;  %10607 = vst [vmem:[#allocation15 + $0x180] sm:$0xff] %v10543_v36 }
 0xc3d   :  { %v10547_v35 = vadd.f32 %v16059_v3, %v21899_v38  ;;  %v10549_v19 = vadd.f32 %v16061_v17, %v21902_v34  ;;  %v21905_v9 = vmax.f32 %v21904_v42, 0.0  ;;  %v10552_v18 = vadd.f32 %v16064_v56, %v21906_v7  ;;  %v16065_v59 = vld [vmem:[#allocation3 + $0x301] sm:$0xff]  ;;  %v21907_v45 = vld [vmem:[#allocation46_spill] sm:$0xff]  ;;  %10608 = vst [vmem:[#allocation15 + $0x188] sm:$0xff] %v10544_v58  ;;  %10609 = vst [vmem:[#allocation15 + $0x190] sm:$0xff] %v10545_v8 }
 0xc3e   :  { %v21908_v51 = vmax.f32 %v21907_v45, 0.0  ;;  %v16066_v29 = vld [vmem:[#allocation3 + $0x309] sm:$0xff]  ;;  %v16067_v22 = vld [vmem:[#allocation3 + $0x319] sm:$0xff]  ;;  %v16068_v1 = vld [vmem:[#allocation3 + $0x321] sm:$0xff]  ;;  %10610 = vst [vmem:[#allocation15 + $0x198] sm:$0xff] %v10546_v16 }
 0xc3f   :  { %v10551_v54 = vadd.f32 %v16063_v20, %v21905_v9  ;;  %v10554_v44 = vadd.f32 %v16066_v29, %v21909_v43  ;;  %v21910_v5 = vld [vmem:[#allocation54_spill] sm:$0xff]  ;;  %v10556_v48 = vadd.f32 %v16068_v1, %v21912_v26  ;;  %v16069_v61 = vld [vmem:[#allocation3 + $0x339] sm:$0xff]  ;;  %10611 = vst [vmem:[#allocation15 + $0x1a0] sm:$0xff] %v10547_v35  ;;  %10612 = vst [vmem:[#allocation15 + $0x1a8] sm:$0xff] %v10548_v33 }
 0xc40   :  { %v10553_v31 = vadd.f32 %v16065_v59, %v21908_v51  ;;  %v21911_v32 = vmax.f32 %v21910_v5, 0.0  ;;  %v21913_v27 = vld [vmem:[#allocation56_spill] sm:$0xff]  ;;  %10613 = vst [vmem:[#allocation15 + $0x1b0] sm:$0xff] %v10549_v19  ;;  %10614 = vst [vmem:[#allocation15 + $0x1b8] sm:$0xff] %v10550_v6 }
 0xc41   :  { %v21914_v53 = vmax.f32 %v21913_v27, 0.0  ;;  %10615 = vst [vmem:[#allocation15 + $0x1c0] sm:$0xff] %v10551_v54  ;;  %10616 = vst [vmem:[#allocation15 + $0x1c8] sm:$0xff] %v10552_v18 }
 0xc42   :  { %v10555_v12 = vadd.f32 %v16067_v22, %v21911_v32  ;;  %10617 = vst [vmem:[#allocation15 + $0x1d0] sm:$0xff] %v10553_v31  ;;  %10618 = vst [vmem:[#allocation15 + $0x1d8] sm:$0xff] %v10554_v44 }
 0xc43   :  { %v10558_v39 = vadd.f32 %v16069_v61, %v21914_v53  ;;  %10620 = vst [vmem:[#allocation15 + $0x1e8] sm:$0xff] %v10556_v48 }
 0xc44   :  { %10619 = vst [vmem:[#allocation15 + $0x1e0] sm:$0xff] %v10555_v12 }
 0xc45   :  { %10622 = vst [vmem:[#allocation15 + $0x1f8] sm:$0xff] %v10558_v39 }
 0xc46   :  { %16235 = shalt.err (!%p16232_p4)
}
 0xc47   :  { %s16236_s20 = scalar_lea.hbm %s20762_s7, 8192 }
 0xc48   :  { %p16237_p5 = scmp.ne.s32.totalorder %s20762_s7, %s16236_s20  ;;  %p16240_p6 = scmp.lt.u32.totalorder %s16236_s20, %s20762_s7 }
 0xc4a   :  { %p16242_p7 = pnand %p16240_p6, %p16237_p5 }
 0xc4c   :  { %16245 = shalt.err (!%p16242_p7)
}
 0xc4d   :  { %10634 = dma.vmem_to_hbm [thread:$0]  %s10629_s0, 8192, %s20762_s7, [#allocation5], %s16258_s13, %s16258_s13, %s16259_s14  }
 0xc4e   :  { %16254 = dma.done.wait [#allocation5], 8192  }
 0xc4f   :  { %16255 = vsyncadd [#allocation5], 4294959104 }
 0xc50   :  { %10638 = vsyncpa [#allocation4], 1 }
 0xc51   :  { %10639 = vsyncpa [#allocation7], 1 }
 0xc52   :  { %10640 = vsyncpa [#allocation10], 1 }
 0xc53   :  { %10641 = vsyncpa [#allocation13], 1 }
 0xc54   :  { %10642 = vsyncpa [#allocation5], 1 }

</bundles_post_ra>
